<compile_context>
chip_gen: v5e
topology: v5e:2x2
jax: 0.10.0
libtpu: 0.0.40
codegen_flags: <defaults>
</compile_context>

<pallas_src>
import functools

import jax
import jax.numpy as jnp
from jax.experimental import pallas as pl
from jax.experimental.pallas import tpu as pltpu


_VMEM_LIMIT = 48 * 1024 * 1024  # safe on v5e/v6e (128 MiB) and v7x (64 MiB)


def _round_up(x, m):
    return ((x + m - 1) // m) * m


def _pick_tm(M, K, Cpad):
    """Pick a row-tile size (multiple of 8) so the working set stays ~<20 MiB."""
    budget = 20 * 1024 * 1024

    def est(t):
        return (2 * t * K * 2          # patches tile, double-buffered, bf16
                + 2 * K * Cpad * 2     # resident weights (counted 2x, safe)
                + 2 * t * Cpad * 4     # output tile, double-buffered, f32
                + 2 * 8 * Cpad * 4)    # stats tile

    tm = 512
    while tm > 16 and est(tm) > budget:
        tm //= 2
    return max(8, min(tm, _round_up(M, 8)))


# -----------------------------------------------------------------------------
# Pallas kernels
# -----------------------------------------------------------------------------
def _conv_kernel(p_ref, w_ref, b_ref, o_ref, stats_ref, *, tm, m_valid, act):
    """One MXU matmul per row tile: (TM, K)bf16 @ (K, Cpad)bf16 -> f32, + bias.

    Also emits a (8, Cpad) stats block per tile: row 0 = masked column sums,
    row 1 = masked column sums of squares (for fused BatchNorm statistics).
    """
    y = jnp.dot(p_ref[...], w_ref[...], preferred_element_type=jnp.float32)
    y = y + b_ref[...]
    if act == "tanh":
        y = jnp.tanh(y)
    elif act == "relu":
        y = jnp.maximum(y, 0.0)
    o_ref[...] = y

    # Partial BN statistics (mask out rows past the real M).
    row = pl.program_id(0) * tm + jax.lax.broadcasted_iota(jnp.int32, (tm, 1), 0)
    ym = jnp.where(row < m_valid, y, 0.0)
    colsum = jnp.sum(ym, axis=0, keepdims=True)          # (1, Cpad)
    colsq = jnp.sum(ym * ym, axis=0, keepdims=True)      # (1, Cpad)
    ridx = jax.lax.broadcasted_iota(jnp.int32, (8, 1), 0)
    stats_ref[...] = jnp.where(ridx == 0, colsum,
                               jnp.where(ridx == 1, colsq, 0.0))


def _make_affine_kernel(act, has_res):
    """Folded-BN affine + optional residual add + activation, tiled over rows."""
    def kernel(*refs):
        if has_res:
            x_ref, s_ref, t_ref, r_ref, o_ref = refs
        else:
            x_ref, s_ref, t_ref, o_ref = refs
        y = x_ref[...] * s_ref[...] + t_ref[...]
        if has_res:
            y = y + r_ref[...]
        if act == "relu":
            y = jnp.maximum(y, 0.0)
        elif act == "tanh":
            y = jnp.tanh(y)
        o_ref[...] = y
    return kernel


# -----------------------------------------------------------------------------
# Conv layer (conv + fused BN stats + fused affine/act/residual epilogue)
# -----------------------------------------------------------------------------
def conv_layer(x, w, b, *, stride=1, pad=0, pad_mode="reflect",
               bn=None, act="relu", residual=None, eps=1e-5):
    """x: (N,H,W,Cin) f32;  w: (KH,KW,Cin,Cout);  b: (Cout,).

    bn = (gamma, beta) enables training-mode BatchNorm (batch stats) folded
    into a scale/shift epilogue; bn=None applies `act` directly in the conv
    kernel (used for the tanh head).  `residual` (NHWC, same shape as the conv
    output) is fused into the epilogue.
    """
    if pad > 0:
        mode = "reflect" if pad_mode == "reflect" else "constant"
        x = jnp.pad(x, ((0, 0), (pad, pad), (pad, pad), (0, 0)), mode=mode)

    N, Hp, Wp, Cin = x.shape
    KH, KW, _, Cout = w.shape
    Hout = (Hp - KH) // stride + 1
    Wout = (Wp - KW) // stride + 1
    M = N * Hout * Wout
    K = KH * KW * Cin
    Cpad = _round_up(Cout, 128)

    # im2col with the taps folded into the contraction dim, cast to bf16.
    # TODO(synk): the im2col slab is still materialized in HBM (KH*KW x the
    # input size); indexing x_pad directly per-tap via Element offsets would
    # remove that traffic for the stride-1 convs.
    cols = []
    for kh in range(KH):
        for kw in range(KW):
            cols.append(x[:, kh:kh + stride * Hout:stride,
                            kw:kw + stride * Wout:stride, :])
    patches = jnp.stack(cols, axis=3).reshape(M, K).astype(jnp.bfloat16)

    TM = _pick_tm(M, K, Cpad)
    Mpad = _round_up(M, TM)
    nmt = Mpad // TM
    if Mpad > M:
        patches = jnp.pad(patches, ((0, Mpad - M), (0, 0)))

    wmat = w.reshape(K, Cout)
    if Cpad > Cout:
        wmat = jnp.pad(wmat, ((0, 0), (0, Cpad - Cout)))
    wmat = wmat.astype(jnp.bfloat16)
    bias = jnp.pad(b.astype(jnp.float32), (0, Cpad - Cout)).reshape(1, Cpad)

    conv_act = act if bn is None else "none"
    conv_out, stats = pl.pallas_call(
        functools.partial(_conv_kernel, tm=TM, m_valid=M, act=conv_act),
        out_shape=(jax.ShapeDtypeStruct((Mpad, Cpad), jnp.float32),
                   jax.ShapeDtypeStruct((nmt * 8, Cpad), jnp.float32)),
        grid_spec=pltpu.PrefetchScalarGridSpec(
            num_scalar_prefetch=0,
            grid=(nmt,),
            in_specs=[
                pl.BlockSpec((TM, K), lambda m: (m, 0)),        # patches tile
                pl.BlockSpec((K, Cpad), lambda m: (0, 0)),      # weights (resident)
                pl.BlockSpec((1, Cpad), lambda m: (0, 0)),      # bias
            ],
            out_specs=(
                pl.BlockSpec((TM, Cpad), lambda m: (m, 0)),
                pl.BlockSpec((8, Cpad), lambda m: (m, 0)),
            ),
        ),
        compiler_params=pltpu.CompilerParams(
            dimension_semantics=("parallel",),
            vmem_limit_bytes=_VMEM_LIMIT),
    )(patches, wmat, bias)

    if bn is None:
        out2d = conv_out
    else:
        gamma, beta = bn
        st = stats.reshape(nmt, 8, Cpad)
        mean = st[:, 0, :].sum(axis=0) / M
        var = jnp.maximum(st[:, 1, :].sum(axis=0) / M - mean * mean, 0.0)
        gpad = jnp.pad(gamma.astype(jnp.float32), (0, Cpad - Cout),
                       constant_values=1.0)
        bpad = jnp.pad(beta.astype(jnp.float32), (0, Cpad - Cout))
        scale = gpad * jax.lax.rsqrt(var + eps)
        shift = bpad - mean * scale

        has_res = residual is not None
        args = [conv_out, scale.reshape(1, Cpad), shift.reshape(1, Cpad)]
        in_specs = [
            pl.BlockSpec((TM, Cpad), lambda m: (m, 0)),
            pl.BlockSpec((1, Cpad), lambda m: (0, 0)),
            pl.BlockSpec((1, Cpad), lambda m: (0, 0)),
        ]
        if has_res:
            r = residual.reshape(M, Cout).astype(jnp.float32)
            if Mpad > M or Cpad > Cout:
                r = jnp.pad(r, ((0, Mpad - M), (0, Cpad - Cout)))
            args.append(r)
            in_specs.append(pl.BlockSpec((TM, Cpad), lambda m: (m, 0)))

        out2d = pl.pallas_call(
            _make_affine_kernel(act, has_res),
            out_shape=jax.ShapeDtypeStruct((Mpad, Cpad), jnp.float32),
            grid_spec=pltpu.PrefetchScalarGridSpec(
                num_scalar_prefetch=0,
                grid=(nmt,),
                in_specs=in_specs,
                out_specs=pl.BlockSpec((TM, Cpad), lambda m: (m, 0)),
            ),
            compiler_params=pltpu.CompilerParams(
                dimension_semantics=("parallel",),
                vmem_limit_bytes=_VMEM_LIMIT),
        )(*args)

    return out2d[:M, :Cout].reshape(N, Hout, Wout, Cout)


def conv_transpose_layer(x, w_eq, b, bn, *, k=3, stride=2, padding=1,
                         output_padding=1, act="relu"):
    """ConvTranspose2d(k=3, s=2, p=1, op=1) lowered to zero-insertion + VALID conv.

    w_eq is the equivalent *forward-conv* weight (KH, KW, Cin, Cout).
    """
    # TODO(synk): a 4-phase (sub-pixel) decomposition would avoid the 75% zero
    # multiplies of the zero-insertion lowering; kept simple and exact here.
    N, H, W, C = x.shape
    up = jnp.zeros((N, (H - 1) * stride + 1, (W - 1) * stride + 1, C), x.dtype)
    up = up.at[:, ::stride, ::stride, :].set(x)
    lo = k - 1 - padding
    hi = k - 1 - padding + output_padding
    up = jnp.pad(up, ((0, 0), (lo, hi), (lo, hi), (0, 0)))
    return conv_layer(up, w_eq, b, stride=1, pad=0, bn=bn, act=act)


# -----------------------------------------------------------------------------
# ResnetGenerator: parameters + forward
# -----------------------------------------------------------------------------
def init_params(key, input_nc, output_nc, ngf, n_blocks):
    keys = iter(jax.random.split(key, 128))

    def w(shape):
        return jax.random.normal(next(keys), shape, jnp.float32) * 0.05

    P = {}
    # stem: ReflectionPad2d(3) + Conv2d(input_nc, ngf, 7, bias=False) + BN + ReLU
    P["stem_w"] = w((7, 7, input_nc, ngf))
    P["stem_b"] = jnp.zeros((ngf,), jnp.float32)          # use_bias=False
    P["stem_g"], P["stem_be"] = jnp.ones((ngf,)), jnp.zeros((ngf,))

    # 2 x downsampling
    for i in range(2):
        cin, cout = ngf * (2 ** i), ngf * (2 ** (i + 1))
        P[f"down{i}_w"] = w((3, 3, cin, cout))
        P[f"down{i}_b"] = jnp.zeros((cout,), jnp.float32)
        P[f"down{i}_g"], P[f"down{i}_be"] = jnp.ones((cout,)), jnp.zeros((cout,))

    # n_blocks x ResnetBlock at ngf*4
    c = ngf * 4
    for i in range(n_blocks):
        P[f"blk{i}_w1"] = w((3, 3, c, c))
        P[f"blk{i}_b1"] = jnp.zeros((c,), jnp.float32)
        P[f"blk{i}_g1"], P[f"blk{i}_be1"] = jnp.ones((c,)), jnp.zeros((c,))
        P[f"blk{i}_w2"] = w((3, 3, c, c))
        P[f"blk{i}_b2"] = jnp.zeros((c,), jnp.float32)
        P[f"blk{i}_g2"], P[f"blk{i}_be2"] = jnp.ones((c,)), jnp.zeros((c,))

    # 2 x upsampling (ConvTranspose2d equivalent-conv weights)
    for i in range(2):
        cin = ngf * (2 ** (2 - i))
        cout = cin // 2
        P[f"up{i}_w"] = w((3, 3, cin, cout))
        P[f"up{i}_b"] = jnp.zeros((cout,), jnp.float32)
        P[f"up{i}_g"], P[f"up{i}_be"] = jnp.ones((cout,)), jnp.zeros((cout,))

    # head: ReflectionPad2d(3) + Conv2d(ngf, output_nc, 7, bias=True) + Tanh
    P["head_w"] = w((7, 7, ngf, output_nc))
    P["head_b"] = jax.random.normal(next(keys), (output_nc,), jnp.float32) * 0.05
    return P


def resnet_generator_forward(x_nchw, params, n_blocks):
    x = jnp.transpose(x_nchw, (0, 2, 3, 1))               # NCHW -> NHWC

    # stem
    y = conv_layer(x, params["stem_w"], params["stem_b"], pad=3,
                   pad_mode="reflect",
                   bn=(params["stem_g"], params["stem_be"]), act="relu")

    # downsampling
    for i in range(2):
        y = conv_layer(y, params[f"down{i}_w"], params[f"down{i}_b"],
                       stride=2, pad=1, pad_mode="zero",
                       bn=(params[f"down{i}_g"], params[f"down{i}_be"]),
                       act="relu")

    # resnet blocks (residual add fused into the second conv's epilogue)
    for i in range(n_blocks):
        r = conv_layer(y, params[f"blk{i}_w1"], params[f"blk{i}_b1"],
                       pad=1, pad_mode="reflect",
                       bn=(params[f"blk{i}_g1"], params[f"blk{i}_be1"]),
                       act="relu")
        y = conv_layer(r, params[f"blk{i}_w2"], params[f"blk{i}_b2"],
                       pad=1, pad_mode="reflect",
                       bn=(params[f"blk{i}_g2"], params[f"blk{i}_be2"]),
                       act="none", residual=y)

    # upsampling
    for i in range(2):
        y = conv_transpose_layer(y, params[f"up{i}_w"], params[f"up{i}_b"],
                                 (params[f"up{i}_g"], params[f"up{i}_be"]))

    # head: conv + tanh fused in the conv kernel (channels lane-padded to 128)
    y = conv_layer(y, params["head_w"], params["head_b"], pad=3,
                   pad_mode="reflect", bn=None, act="tanh")

    return jnp.transpose(y, (0, 3, 1, 2))                  # NHWC -> NCHW


# TODO(synk): use_dropout / dense_fusion paths are off under the module's
# defaults and are not implemented (Dropout(0.5) training-mode randomness,
# DenseFusionBlock).

if __name__ == "__main__":
    # Small but architecture-consistent config.
    input_nc, output_nc, ngf, n_blocks = 3, 3, 8, 2
    N, H, W = 2, 16, 16

    key = jax.random.PRNGKey(0)
    k_x, k_p = jax.random.split(key)
    x = jax.random.normal(k_x, (N, input_nc, H, W), jnp.float32)
    params = init_params(k_p, input_nc, output_nc, ngf, n_blocks)

    fwd = jax.jit(functools.partial(resnet_generator_forward, n_blocks=n_blocks))
    out = fwd(x, params)
    jax.block_until_ready(out)

    assert out.shape == (N, output_nc, H, W), out.shape
    assert bool(jnp.all(jnp.isfinite(out)))
    assert bool(jnp.all(jnp.abs(out) <= 1.0 + 1e-6))       # tanh output range
    print("KERNEL_OK")
</pallas_src>

<mosaic_0001>
module attributes {stable_mosaic.version = 11 : i64} {
  func.func @kernel(%arg0: i32, %arg1: memref<512x128xf32, #tpu.memory_space<vmem>>, %arg2: memref<1x128xf32, #tpu.memory_space<vmem>>, %arg3: memref<1x128xf32, #tpu.memory_space<vmem>>, %arg4: memref<512x128xf32, #tpu.memory_space<vmem>>) attributes {dimension_semantics = [#tpu.dimension_semantics<parallel>], iteration_bounds = array<i64: 1>, scalar_prefetch = 0 : i64, scratch_operands = 0 : i64, tpu.core_type = #tpu.core_type<tc>, window_params = [{transform_indices = @transform_0, window_bounds = array<i64: 512, 128>}, {pipeline_mode = #tpu.pipeline_mode<synchronous>, transform_indices = @transform_1, window_bounds = array<i64: 1, 128>}, {pipeline_mode = #tpu.pipeline_mode<synchronous>, transform_indices = @transform_2, window_bounds = array<i64: 1, 128>}, {transform_indices = @transform_3, window_bounds = array<i64: 512, 128>}]} {
    %c0 = arith.constant 0 : index
    %c0_0 = arith.constant 0 : index
    %0 = vector.load %arg1[%c0, %c0_0] : memref<512x128xf32, #tpu.memory_space<vmem>>, vector<512x128xf32>
    %c0_1 = arith.constant 0 : index
    %c0_2 = arith.constant 0 : index
    %1 = vector.load %arg2[%c0_1, %c0_2] : memref<1x128xf32, #tpu.memory_space<vmem>>, vector<1x128xf32>
    %2 = vector.broadcast %1 : vector<1x128xf32> to vector<512x128xf32>
    %3 = arith.mulf %0, %2 : vector<512x128xf32>
    %c0_3 = arith.constant 0 : index
    %c0_4 = arith.constant 0 : index
    %4 = vector.load %arg3[%c0_3, %c0_4] : memref<1x128xf32, #tpu.memory_space<vmem>>, vector<1x128xf32>
    %5 = vector.broadcast %4 : vector<1x128xf32> to vector<512x128xf32>
    %6 = arith.addf %3, %5 : vector<512x128xf32>
    %cst = arith.constant 0.000000e+00 : f32
    %7 = vector.broadcast %cst : f32 to vector<512x128xf32>
    %8 = arith.maximumf %6, %7 : vector<512x128xf32>
    %c0_5 = arith.constant 0 : index
    %c0_6 = arith.constant 0 : index
    %9 = vector.load %arg4[%c0_5, %c0_6] : memref<512x128xf32, #tpu.memory_space<vmem>>, vector<512x128xf32>
    tpu.vector_store %arg4[%c0_5, %c0_6], %8 {strides = array<i32>} : memref<512x128xf32, #tpu.memory_space<vmem>>, vector<512x128xf32>,
    return
  }
  func.func @transform_0(%arg0: i32) -> (i32, i32) {
    %c0_i32 = arith.constant 0 : i32
    %c0_i32_0 = arith.constant 0 : i32
    return %arg0, %c0_i32 : i32, i32
  }
  func.func @transform_1(%arg0: i32) -> (i32, i32) {
    %c0_i32 = arith.constant 0 : i32
    %c0_i32_0 = arith.constant 0 : i32
    %c0_i32_1 = arith.constant 0 : i32
    return %c0_i32, %c0_i32_0 : i32, i32
  }
  func.func @transform_2(%arg0: i32) -> (i32, i32) {
    %c0_i32 = arith.constant 0 : i32
    %c0_i32_0 = arith.constant 0 : i32
    %c0_i32_1 = arith.constant 0 : i32
    return %c0_i32, %c0_i32_0 : i32, i32
  }
  func.func @transform_3(%arg0: i32) -> (i32, i32) {
    %c0_i32 = arith.constant 0 : i32
    %c0_i32_0 = arith.constant 0 : i32
    return %arg0, %c0_i32 : i32, i32
  }
}

module attributes {stable_mosaic.version = 11 : i64} {
  func.func @_conv_kernel(%arg0: i32, %arg1: memref<512x147xbf16, #tpu.memory_space<vmem>>, %arg2: memref<147x128xbf16, #tpu.memory_space<vmem>>, %arg3: memref<1x128xf32, #tpu.memory_space<vmem>>, %arg4: memref<512x128xf32, #tpu.memory_space<vmem>>, %arg5: memref<8x128xf32, #tpu.memory_space<vmem>>) attributes {dimension_semantics = [#tpu.dimension_semantics<parallel>], iteration_bounds = array<i64: 1>, scalar_prefetch = 0 : i64, scratch_operands = 0 : i64, tpu.core_type = #tpu.core_type<tc>, window_params = [{transform_indices = @transform_0, window_bounds = array<i64: 512, 147>}, {pipeline_mode = #tpu.pipeline_mode<synchronous>, transform_indices = @transform_1, window_bounds = array<i64: 147, 128>}, {pipeline_mode = #tpu.pipeline_mode<synchronous>, transform_indices = @transform_2, window_bounds = array<i64: 1, 128>}, {transform_indices = @transform_3, window_bounds = array<i64: 512, 128>}, {transform_indices = @transform_4, window_bounds = array<i64: 8, 128>}]} {
    %c0 = arith.constant 0 : index
    %c0_0 = arith.constant 0 : index
    %0 = vector.load %arg1[%c0, %c0_0] : memref<512x147xbf16, #tpu.memory_space<vmem>>, vector<512x147xbf16>
    %c0_1 = arith.constant 0 : index
    %c0_2 = arith.constant 0 : index
    %1 = vector.load %arg2[%c0_1, %c0_2] : memref<147x128xbf16, #tpu.memory_space<vmem>>, vector<147x128xbf16>
    %cst = arith.constant dense<0.000000e+00> : vector<512x128xf32>
    %2 = tpu.matmul %0, %1, %cst {dimension_numbers = #tpu.dot_dimension_numbers<[1], [0], [0], [1], [0, 0, 1, 1], [], []>} : vector<512x147xbf16>, vector<147x128xbf16>, vector<512x128xf32> -> vector<512x128xf32>
    %c0_3 = arith.constant 0 : index
    %c0_4 = arith.constant 0 : index
    %3 = vector.load %arg3[%c0_3, %c0_4] : memref<1x128xf32, #tpu.memory_space<vmem>>, vector<1x128xf32>
    %4 = vector.broadcast %3 : vector<1x128xf32> to vector<512x128xf32>
    %5 = arith.addf %2, %4 : vector<512x128xf32>
    %c0_5 = arith.constant 0 : index
    %c0_6 = arith.constant 0 : index
    %6 = vector.load %arg4[%c0_5, %c0_6] : memref<512x128xf32, #tpu.memory_space<vmem>>, vector<512x128xf32>
    tpu.vector_store %arg4[%c0_5, %c0_6], %5 {strides = array<i32>} : memref<512x128xf32, #tpu.memory_space<vmem>>, vector<512x128xf32>,
    %c512_i32 = arith.constant 512 : i32
    %7 = arith.muli %arg0, %c512_i32 : i32
    %8 = tpu.iota {dimensions = array<i32: 0>} : vector<512x1xi32>
    %9 = vector.broadcast %7 : i32 to vector<512x1xi32>
    %10 = arith.addi %9, %8 : vector<512x1xi32>
    %c512_i32_7 = arith.constant 512 : i32
    %11 = vector.broadcast %c512_i32_7 : i32 to vector<512x1xi32>
    %12 = arith.cmpi slt, %10, %11 : vector<512x1xi32>
    %cst_8 = arith.constant 0.000000e+00 : f32
    %13 = vector.shape_cast %12 : vector<512x1xi1> to vector<512x1xi1>
    %14 = vector.broadcast %13 : vector<512x1xi1> to vector<512x128xi1>
    %15 = vector.broadcast %cst_8 : f32 to vector<512x128xf32>
    %16 = arith.select %14, %5, %15 : vector<512x128xi1>, vector<512x128xf32>
    %cst_9 = arith.constant dense<0.000000e+00> : vector<128xf32>
    %17 = vector.multi_reduction <add>, %16, %cst_9 [0] : vector<512x128xf32> to vector<128xf32>
    %18 = vector.shape_cast %17 : vector<128xf32> to vector<1x128xf32>
    %19 = arith.mulf %16, %16 : vector<512x128xf32>
    %cst_10 = arith.constant dense<0.000000e+00> : vector<128xf32>
    %20 = vector.multi_reduction <add>, %19, %cst_10 [0] : vector<512x128xf32> to vector<128xf32>
    %21 = vector.shape_cast %20 : vector<128xf32> to vector<1x128xf32>
    %22 = tpu.iota {dimensions = array<i32: 0>} : vector<8x1xi32>
    %c0_i32 = arith.constant 0 : i32
    %23 = vector.broadcast %c0_i32 : i32 to vector<8x1xi32>
    %24 = arith.cmpi eq, %22, %23 : vector<8x1xi32>
    %c1_i32 = arith.constant 1 : i32
    %25 = vector.broadcast %c1_i32 : i32 to vector<8x1xi32>
    %26 = arith.cmpi eq, %22, %25 : vector<8x1xi32>
    %cst_11 = arith.constant 0.000000e+00 : f32
    %27 = vector.shape_cast %26 : vector<8x1xi1> to vector<8x1xi1>
    %28 = vector.broadcast %27 : vector<8x1xi1> to vector<8x128xi1>
    %29 = vector.shape_cast %21 : vector<1x128xf32> to vector<1x128xf32>
    %30 = vector.broadcast %29 : vector<1x128xf32> to vector<8x128xf32>
    %31 = vector.broadcast %cst_11 : f32 to vector<8x128xf32>
    %32 = arith.select %28, %30, %31 : vector<8x128xi1>, vector<8x128xf32>
    %33 = vector.shape_cast %24 : vector<8x1xi1> to vector<8x1xi1>
    %34 = vector.broadcast %33 : vector<8x1xi1> to vector<8x128xi1>
    %35 = vector.shape_cast %18 : vector<1x128xf32> to vector<1x128xf32>
    %36 = vector.broadcast %35 : vector<1x128xf32> to vector<8x128xf32>
    %37 = arith.select %34, %36, %32 : vector<8x128xi1>, vector<8x128xf32>
    %c0_12 = arith.constant 0 : index
    %c0_13 = arith.constant 0 : index
    %38 = vector.load %arg5[%c0_12, %c0_13] : memref<8x128xf32, #tpu.memory_space<vmem>>, vector<8x128xf32>
    tpu.vector_store %arg5[%c0_12, %c0_13], %37 {strides = array<i32>} : memref<8x128xf32, #tpu.memory_space<vmem>>, vector<8x128xf32>,
    return
  }
  func.func @transform_0(%arg0: i32) -> (i32, i32) {
    %c0_i32 = arith.constant 0 : i32
    %c0_i32_0 = arith.constant 0 : i32
    return %arg0, %c0_i32 : i32, i32
  }
  func.func @transform_1(%arg0: i32) -> (i32, i32) {
    %c0_i32 = arith.constant 0 : i32
    %c0_i32_0 = arith.constant 0 : i32
    %c0_i32_1 = arith.constant 0 : i32
    return %c0_i32, %c0_i32_0 : i32, i32
  }
  func.func @transform_2(%arg0: i32) -> (i32, i32) {
    %c0_i32 = arith.constant 0 : i32
    %c0_i32_0 = arith.constant 0 : i32
    %c0_i32_1 = arith.constant 0 : i32
    return %c0_i32, %c0_i32_0 : i32, i32
  }
  func.func @transform_3(%arg0: i32) -> (i32, i32) {
    %c0_i32 = arith.constant 0 : i32
    %c0_i32_0 = arith.constant 0 : i32
    return %arg0, %c0_i32 : i32, i32
  }
  func.func @transform_4(%arg0: i32) -> (i32, i32) {
    %c0_i32 = arith.constant 0 : i32
    %c0_i32_0 = arith.constant 0 : i32
    return %arg0, %c0_i32 : i32, i32
  }
}

module attributes {stable_mosaic.version = 11 : i64} {
  func.func @_conv_kernel(%arg0: i32, %arg1: memref<128x72xbf16, #tpu.memory_space<vmem>>, %arg2: memref<72x128xbf16, #tpu.memory_space<vmem>>, %arg3: memref<1x128xf32, #tpu.memory_space<vmem>>, %arg4: memref<128x128xf32, #tpu.memory_space<vmem>>, %arg5: memref<8x128xf32, #tpu.memory_space<vmem>>) attributes {dimension_semantics = [#tpu.dimension_semantics<parallel>], iteration_bounds = array<i64: 1>, scalar_prefetch = 0 : i64, scratch_operands = 0 : i64, tpu.core_type = #tpu.core_type<tc>, window_params = [{transform_indices = @transform_0, window_bounds = array<i64: 128, 72>}, {pipeline_mode = #tpu.pipeline_mode<synchronous>, transform_indices = @transform_1, window_bounds = array<i64: 72, 128>}, {pipeline_mode = #tpu.pipeline_mode<synchronous>, transform_indices = @transform_2, window_bounds = array<i64: 1, 128>}, {transform_indices = @transform_3, window_bounds = array<i64: 128, 128>}, {transform_indices = @transform_4, window_bounds = array<i64: 8, 128>}]} {
    %c0 = arith.constant 0 : index
    %c0_0 = arith.constant 0 : index
    %0 = vector.load %arg1[%c0, %c0_0] : memref<128x72xbf16, #tpu.memory_space<vmem>>, vector<128x72xbf16>
    %c0_1 = arith.constant 0 : index
    %c0_2 = arith.constant 0 : index
    %1 = vector.load %arg2[%c0_1, %c0_2] : memref<72x128xbf16, #tpu.memory_space<vmem>>, vector<72x128xbf16>
    %cst = arith.constant dense<0.000000e+00> : vector<128x128xf32>
    %2 = tpu.matmul %0, %1, %cst {dimension_numbers = #tpu.dot_dimension_numbers<[1], [0], [0], [1], [0, 0, 1, 1], [], []>} : vector<128x72xbf16>, vector<72x128xbf16>, vector<128x128xf32> -> vector<128x128xf32>
    %c0_3 = arith.constant 0 : index
    %c0_4 = arith.constant 0 : index
    %3 = vector.load %arg3[%c0_3, %c0_4] : memref<1x128xf32, #tpu.memory_space<vmem>>, vector<1x128xf32>
    %4 = vector.broadcast %3 : vector<1x128xf32> to vector<128x128xf32>
    %5 = arith.addf %2, %4 : vector<128x128xf32>
    %c0_5 = arith.constant 0 : index
    %c0_6 = arith.constant 0 : index
    %6 = vector.load %arg4[%c0_5, %c0_6] : memref<128x128xf32, #tpu.memory_space<vmem>>, vector<128x128xf32>
    tpu.vector_store %arg4[%c0_5, %c0_6], %5 {strides = array<i32>} : memref<128x128xf32, #tpu.memory_space<vmem>>, vector<128x128xf32>,
    %c128_i32 = arith.constant 128 : i32
    %7 = arith.muli %arg0, %c128_i32 : i32
    %8 = tpu.iota {dimensions = array<i32: 0>} : vector<128x1xi32>
    %9 = vector.broadcast %7 : i32 to vector<128x1xi32>
    %10 = arith.addi %9, %8 : vector<128x1xi32>
    %c128_i32_7 = arith.constant 128 : i32
    %11 = vector.broadcast %c128_i32_7 : i32 to vector<128x1xi32>
    %12 = arith.cmpi slt, %10, %11 : vector<128x1xi32>
    %cst_8 = arith.constant 0.000000e+00 : f32
    %13 = vector.shape_cast %12 : vector<128x1xi1> to vector<128x1xi1>
    %14 = vector.broadcast %13 : vector<128x1xi1> to vector<128x128xi1>
    %15 = vector.broadcast %cst_8 : f32 to vector<128x128xf32>
    %16 = arith.select %14, %5, %15 : vector<128x128xi1>, vector<128x128xf32>
    %cst_9 = arith.constant dense<0.000000e+00> : vector<128xf32>
    %17 = vector.multi_reduction <add>, %16, %cst_9 [0] : vector<128x128xf32> to vector<128xf32>
    %18 = vector.shape_cast %17 : vector<128xf32> to vector<1x128xf32>
    %19 = arith.mulf %16, %16 : vector<128x128xf32>
    %cst_10 = arith.constant dense<0.000000e+00> : vector<128xf32>
    %20 = vector.multi_reduction <add>, %19, %cst_10 [0] : vector<128x128xf32> to vector<128xf32>
    %21 = vector.shape_cast %20 : vector<128xf32> to vector<1x128xf32>
    %22 = tpu.iota {dimensions = array<i32: 0>} : vector<8x1xi32>
    %c0_i32 = arith.constant 0 : i32
    %23 = vector.broadcast %c0_i32 : i32 to vector<8x1xi32>
    %24 = arith.cmpi eq, %22, %23 : vector<8x1xi32>
    %c1_i32 = arith.constant 1 : i32
    %25 = vector.broadcast %c1_i32 : i32 to vector<8x1xi32>
    %26 = arith.cmpi eq, %22, %25 : vector<8x1xi32>
    %cst_11 = arith.constant 0.000000e+00 : f32
    %27 = vector.shape_cast %26 : vector<8x1xi1> to vector<8x1xi1>
    %28 = vector.broadcast %27 : vector<8x1xi1> to vector<8x128xi1>
    %29 = vector.shape_cast %21 : vector<1x128xf32> to vector<1x128xf32>
    %30 = vector.broadcast %29 : vector<1x128xf32> to vector<8x128xf32>
    %31 = vector.broadcast %cst_11 : f32 to vector<8x128xf32>
    %32 = arith.select %28, %30, %31 : vector<8x128xi1>, vector<8x128xf32>
    %33 = vector.shape_cast %24 : vector<8x1xi1> to vector<8x1xi1>
    %34 = vector.broadcast %33 : vector<8x1xi1> to vector<8x128xi1>
    %35 = vector.shape_cast %18 : vector<1x128xf32> to vector<1x128xf32>
    %36 = vector.broadcast %35 : vector<1x128xf32> to vector<8x128xf32>
    %37 = arith.select %34, %36, %32 : vector<8x128xi1>, vector<8x128xf32>
    %c0_12 = arith.constant 0 : index
    %c0_13 = arith.constant 0 : index
    %38 = vector.load %arg5[%c0_12, %c0_13] : memref<8x128xf32, #tpu.memory_space<vmem>>, vector<8x128xf32>
    tpu.vector_store %arg5[%c0_12, %c0_13], %37 {strides = array<i32>} : memref<8x128xf32, #tpu.memory_space<vmem>>, vector<8x128xf32>,
    return
  }
  func.func @transform_0(%arg0: i32) -> (i32, i32) {
    %c0_i32 = arith.constant 0 : i32
    %c0_i32_0 = arith.constant 0 : i32
    return %arg0, %c0_i32 : i32, i32
  }
  func.func @transform_1(%arg0: i32) -> (i32, i32) {
    %c0_i32 = arith.constant 0 : i32
    %c0_i32_0 = arith.constant 0 : i32
    %c0_i32_1 = arith.constant 0 : i32
    return %c0_i32, %c0_i32_0 : i32, i32
  }
  func.func @transform_2(%arg0: i32) -> (i32, i32) {
    %c0_i32 = arith.constant 0 : i32
    %c0_i32_0 = arith.constant 0 : i32
    %c0_i32_1 = arith.constant 0 : i32
    return %c0_i32, %c0_i32_0 : i32, i32
  }
  func.func @transform_3(%arg0: i32) -> (i32, i32) {
    %c0_i32 = arith.constant 0 : i32
    %c0_i32_0 = arith.constant 0 : i32
    return %arg0, %c0_i32 : i32, i32
  }
  func.func @transform_4(%arg0: i32) -> (i32, i32) {
    %c0_i32 = arith.constant 0 : i32
    %c0_i32_0 = arith.constant 0 : i32
    return %arg0, %c0_i32 : i32, i32
  }
}

module attributes {stable_mosaic.version = 11 : i64} {
  func.func @kernel(%arg0: i32, %arg1: memref<128x128xf32, #tpu.memory_space<vmem>>, %arg2: memref<1x128xf32, #tpu.memory_space<vmem>>, %arg3: memref<1x128xf32, #tpu.memory_space<vmem>>, %arg4: memref<128x128xf32, #tpu.memory_space<vmem>>) attributes {dimension_semantics = [#tpu.dimension_semantics<parallel>], iteration_bounds = array<i64: 1>, scalar_prefetch = 0 : i64, scratch_operands = 0 : i64, tpu.core_type = #tpu.core_type<tc>, window_params = [{transform_indices = @transform_0, window_bounds = array<i64: 128, 128>}, {pipeline_mode = #tpu.pipeline_mode<synchronous>, transform_indices = @transform_1, window_bounds = array<i64: 1, 128>}, {pipeline_mode = #tpu.pipeline_mode<synchronous>, transform_indices = @transform_2, window_bounds = array<i64: 1, 128>}, {transform_indices = @transform_3, window_bounds = array<i64: 128, 128>}]} {
    %c0 = arith.constant 0 : index
    %c0_0 = arith.constant 0 : index
    %0 = vector.load %arg1[%c0, %c0_0] : memref<128x128xf32, #tpu.memory_space<vmem>>, vector<128x128xf32>
    %c0_1 = arith.constant 0 : index
    %c0_2 = arith.constant 0 : index
    %1 = vector.load %arg2[%c0_1, %c0_2] : memref<1x128xf32, #tpu.memory_space<vmem>>, vector<1x128xf32>
    %2 = vector.broadcast %1 : vector<1x128xf32> to vector<128x128xf32>
    %3 = arith.mulf %0, %2 : vector<128x128xf32>
    %c0_3 = arith.constant 0 : index
    %c0_4 = arith.constant 0 : index
    %4 = vector.load %arg3[%c0_3, %c0_4] : memref<1x128xf32, #tpu.memory_space<vmem>>, vector<1x128xf32>
    %5 = vector.broadcast %4 : vector<1x128xf32> to vector<128x128xf32>
    %6 = arith.addf %3, %5 : vector<128x128xf32>
    %cst = arith.constant 0.000000e+00 : f32
    %7 = vector.broadcast %cst : f32 to vector<128x128xf32>
    %8 = arith.maximumf %6, %7 : vector<128x128xf32>
    %c0_5 = arith.constant 0 : index
    %c0_6 = arith.constant 0 : index
    %9 = vector.load %arg4[%c0_5, %c0_6] : memref<128x128xf32, #tpu.memory_space<vmem>>, vector<128x128xf32>
    tpu.vector_store %arg4[%c0_5, %c0_6], %8 {strides = array<i32>} : memref<128x128xf32, #tpu.memory_space<vmem>>, vector<128x128xf32>,
    return
  }
  func.func @transform_0(%arg0: i32) -> (i32, i32) {
    %c0_i32 = arith.constant 0 : i32
    %c0_i32_0 = arith.constant 0 : i32
    return %arg0, %c0_i32 : i32, i32
  }
  func.func @transform_1(%arg0: i32) -> (i32, i32) {
    %c0_i32 = arith.constant 0 : i32
    %c0_i32_0 = arith.constant 0 : i32
    %c0_i32_1 = arith.constant 0 : i32
    return %c0_i32, %c0_i32_0 : i32, i32
  }
  func.func @transform_2(%arg0: i32) -> (i32, i32) {
    %c0_i32 = arith.constant 0 : i32
    %c0_i32_0 = arith.constant 0 : i32
    %c0_i32_1 = arith.constant 0 : i32
    return %c0_i32, %c0_i32_0 : i32, i32
  }
  func.func @transform_3(%arg0: i32) -> (i32, i32) {
    %c0_i32 = arith.constant 0 : i32
    %c0_i32_0 = arith.constant 0 : i32
    return %arg0, %c0_i32 : i32, i32
  }
}

module attributes {stable_mosaic.version = 11 : i64} {
  func.func @kernel(%arg0: i32, %arg1: memref<32x128xf32, #tpu.memory_space<vmem>>, %arg2: memref<1x128xf32, #tpu.memory_space<vmem>>, %arg3: memref<1x128xf32, #tpu.memory_space<vmem>>, %arg4: memref<32x128xf32, #tpu.memory_space<vmem>>) attributes {dimension_semantics = [#tpu.dimension_semantics<parallel>], iteration_bounds = array<i64: 1>, scalar_prefetch = 0 : i64, scratch_operands = 0 : i64, tpu.core_type = #tpu.core_type<tc>, window_params = [{transform_indices = @transform_0, window_bounds = array<i64: 32, 128>}, {pipeline_mode = #tpu.pipeline_mode<synchronous>, transform_indices = @transform_1, window_bounds = array<i64: 1, 128>}, {pipeline_mode = #tpu.pipeline_mode<synchronous>, transform_indices = @transform_2, window_bounds = array<i64: 1, 128>}, {transform_indices = @transform_3, window_bounds = array<i64: 32, 128>}]} {
    %c0 = arith.constant 0 : index
    %c0_0 = arith.constant 0 : index
    %0 = vector.load %arg1[%c0, %c0_0] : memref<32x128xf32, #tpu.memory_space<vmem>>, vector<32x128xf32>
    %c0_1 = arith.constant 0 : index
    %c0_2 = arith.constant 0 : index
    %1 = vector.load %arg2[%c0_1, %c0_2] : memref<1x128xf32, #tpu.memory_space<vmem>>, vector<1x128xf32>
    %2 = vector.broadcast %1 : vector<1x128xf32> to vector<32x128xf32>
    %3 = arith.mulf %0, %2 : vector<32x128xf32>
    %c0_3 = arith.constant 0 : index
    %c0_4 = arith.constant 0 : index
    %4 = vector.load %arg3[%c0_3, %c0_4] : memref<1x128xf32, #tpu.memory_space<vmem>>, vector<1x128xf32>
    %5 = vector.broadcast %4 : vector<1x128xf32> to vector<32x128xf32>
    %6 = arith.addf %3, %5 : vector<32x128xf32>
    %cst = arith.constant 0.000000e+00 : f32
    %7 = vector.broadcast %cst : f32 to vector<32x128xf32>
    %8 = arith.maximumf %6, %7 : vector<32x128xf32>
    %c0_5 = arith.constant 0 : index
    %c0_6 = arith.constant 0 : index
    %9 = vector.load %arg4[%c0_5, %c0_6] : memref<32x128xf32, #tpu.memory_space<vmem>>, vector<32x128xf32>
    tpu.vector_store %arg4[%c0_5, %c0_6], %8 {strides = array<i32>} : memref<32x128xf32, #tpu.memory_space<vmem>>, vector<32x128xf32>,
    return
  }
  func.func @transform_0(%arg0: i32) -> (i32, i32) {
    %c0_i32 = arith.constant 0 : i32
    %c0_i32_0 = arith.constant 0 : i32
    return %arg0, %c0_i32 : i32, i32
  }
  func.func @transform_1(%arg0: i32) -> (i32, i32) {
    %c0_i32 = arith.constant 0 : i32
    %c0_i32_0 = arith.constant 0 : i32
    %c0_i32_1 = arith.constant 0 : i32
    return %c0_i32, %c0_i32_0 : i32, i32
  }
  func.func @transform_2(%arg0: i32) -> (i32, i32) {
    %c0_i32 = arith.constant 0 : i32
    %c0_i32_0 = arith.constant 0 : i32
    %c0_i32_1 = arith.constant 0 : i32
    return %c0_i32, %c0_i32_0 : i32, i32
  }
  func.func @transform_3(%arg0: i32) -> (i32, i32) {
    %c0_i32 = arith.constant 0 : i32
    %c0_i32_0 = arith.constant 0 : i32
    return %arg0, %c0_i32 : i32, i32
  }
}

module attributes {stable_mosaic.version = 11 : i64} {
  func.func @_conv_kernel(%arg0: i32, %arg1: memref<32x144xbf16, #tpu.memory_space<vmem>>, %arg2: memref<144x128xbf16, #tpu.memory_space<vmem>>, %arg3: memref<1x128xf32, #tpu.memory_space<vmem>>, %arg4: memref<32x128xf32, #tpu.memory_space<vmem>>, %arg5: memref<8x128xf32, #tpu.memory_space<vmem>>) attributes {dimension_semantics = [#tpu.dimension_semantics<parallel>], iteration_bounds = array<i64: 1>, scalar_prefetch = 0 : i64, scratch_operands = 0 : i64, tpu.core_type = #tpu.core_type<tc>, window_params = [{transform_indices = @transform_0, window_bounds = array<i64: 32, 144>}, {pipeline_mode = #tpu.pipeline_mode<synchronous>, transform_indices = @transform_1, window_bounds = array<i64: 144, 128>}, {pipeline_mode = #tpu.pipeline_mode<synchronous>, transform_indices = @transform_2, window_bounds = array<i64: 1, 128>}, {transform_indices = @transform_3, window_bounds = array<i64: 32, 128>}, {transform_indices = @transform_4, window_bounds = array<i64: 8, 128>}]} {
    %c0 = arith.constant 0 : index
    %c0_0 = arith.constant 0 : index
    %0 = vector.load %arg1[%c0, %c0_0] : memref<32x144xbf16, #tpu.memory_space<vmem>>, vector<32x144xbf16>
    %c0_1 = arith.constant 0 : index
    %c0_2 = arith.constant 0 : index
    %1 = vector.load %arg2[%c0_1, %c0_2] : memref<144x128xbf16, #tpu.memory_space<vmem>>, vector<144x128xbf16>
    %cst = arith.constant dense<0.000000e+00> : vector<32x128xf32>
    %2 = tpu.matmul %0, %1, %cst {dimension_numbers = #tpu.dot_dimension_numbers<[1], [0], [0], [1], [0, 0, 1, 1], [], []>} : vector<32x144xbf16>, vector<144x128xbf16>, vector<32x128xf32> -> vector<32x128xf32>
    %c0_3 = arith.constant 0 : index
    %c0_4 = arith.constant 0 : index
    %3 = vector.load %arg3[%c0_3, %c0_4] : memref<1x128xf32, #tpu.memory_space<vmem>>, vector<1x128xf32>
    %4 = vector.broadcast %3 : vector<1x128xf32> to vector<32x128xf32>
    %5 = arith.addf %2, %4 : vector<32x128xf32>
    %c0_5 = arith.constant 0 : index
    %c0_6 = arith.constant 0 : index
    %6 = vector.load %arg4[%c0_5, %c0_6] : memref<32x128xf32, #tpu.memory_space<vmem>>, vector<32x128xf32>
    tpu.vector_store %arg4[%c0_5, %c0_6], %5 {strides = array<i32>} : memref<32x128xf32, #tpu.memory_space<vmem>>, vector<32x128xf32>,
    %c32_i32 = arith.constant 32 : i32
    %7 = arith.muli %arg0, %c32_i32 : i32
    %8 = tpu.iota {dimensions = array<i32: 0>} : vector<32x1xi32>
    %9 = vector.broadcast %7 : i32 to vector<32x1xi32>
    %10 = arith.addi %9, %8 : vector<32x1xi32>
    %c32_i32_7 = arith.constant 32 : i32
    %11 = vector.broadcast %c32_i32_7 : i32 to vector<32x1xi32>
    %12 = arith.cmpi slt, %10, %11 : vector<32x1xi32>
    %cst_8 = arith.constant 0.000000e+00 : f32
    %13 = vector.shape_cast %12 : vector<32x1xi1> to vector<32x1xi1>
    %14 = vector.broadcast %13 : vector<32x1xi1> to vector<32x128xi1>
    %15 = vector.broadcast %cst_8 : f32 to vector<32x128xf32>
    %16 = arith.select %14, %5, %15 : vector<32x128xi1>, vector<32x128xf32>
    %cst_9 = arith.constant dense<0.000000e+00> : vector<128xf32>
    %17 = vector.multi_reduction <add>, %16, %cst_9 [0] : vector<32x128xf32> to vector<128xf32>
    %18 = vector.shape_cast %17 : vector<128xf32> to vector<1x128xf32>
    %19 = arith.mulf %16, %16 : vector<32x128xf32>
    %cst_10 = arith.constant dense<0.000000e+00> : vector<128xf32>
    %20 = vector.multi_reduction <add>, %19, %cst_10 [0] : vector<32x128xf32> to vector<128xf32>
    %21 = vector.shape_cast %20 : vector<128xf32> to vector<1x128xf32>
    %22 = tpu.iota {dimensions = array<i32: 0>} : vector<8x1xi32>
    %c0_i32 = arith.constant 0 : i32
    %23 = vector.broadcast %c0_i32 : i32 to vector<8x1xi32>
    %24 = arith.cmpi eq, %22, %23 : vector<8x1xi32>
    %c1_i32 = arith.constant 1 : i32
    %25 = vector.broadcast %c1_i32 : i32 to vector<8x1xi32>
    %26 = arith.cmpi eq, %22, %25 : vector<8x1xi32>
    %cst_11 = arith.constant 0.000000e+00 : f32
    %27 = vector.shape_cast %26 : vector<8x1xi1> to vector<8x1xi1>
    %28 = vector.broadcast %27 : vector<8x1xi1> to vector<8x128xi1>
    %29 = vector.shape_cast %21 : vector<1x128xf32> to vector<1x128xf32>
    %30 = vector.broadcast %29 : vector<1x128xf32> to vector<8x128xf32>
    %31 = vector.broadcast %cst_11 : f32 to vector<8x128xf32>
    %32 = arith.select %28, %30, %31 : vector<8x128xi1>, vector<8x128xf32>
    %33 = vector.shape_cast %24 : vector<8x1xi1> to vector<8x1xi1>
    %34 = vector.broadcast %33 : vector<8x1xi1> to vector<8x128xi1>
    %35 = vector.shape_cast %18 : vector<1x128xf32> to vector<1x128xf32>
    %36 = vector.broadcast %35 : vector<1x128xf32> to vector<8x128xf32>
    %37 = arith.select %34, %36, %32 : vector<8x128xi1>, vector<8x128xf32>
    %c0_12 = arith.constant 0 : index
    %c0_13 = arith.constant 0 : index
    %38 = vector.load %arg5[%c0_12, %c0_13] : memref<8x128xf32, #tpu.memory_space<vmem>>, vector<8x128xf32>
    tpu.vector_store %arg5[%c0_12, %c0_13], %37 {strides = array<i32>} : memref<8x128xf32, #tpu.memory_space<vmem>>, vector<8x128xf32>,
    return
  }
  func.func @transform_0(%arg0: i32) -> (i32, i32) {
    %c0_i32 = arith.constant 0 : i32
    %c0_i32_0 = arith.constant 0 : i32
    return %arg0, %c0_i32 : i32, i32
  }
  func.func @transform_1(%arg0: i32) -> (i32, i32) {
    %c0_i32 = arith.constant 0 : i32
    %c0_i32_0 = arith.constant 0 : i32
    %c0_i32_1 = arith.constant 0 : i32
    return %c0_i32, %c0_i32_0 : i32, i32
  }
  func.func @transform_2(%arg0: i32) -> (i32, i32) {
    %c0_i32 = arith.constant 0 : i32
    %c0_i32_0 = arith.constant 0 : i32
    %c0_i32_1 = arith.constant 0 : i32
    return %c0_i32, %c0_i32_0 : i32, i32
  }
  func.func @transform_3(%arg0: i32) -> (i32, i32) {
    %c0_i32 = arith.constant 0 : i32
    %c0_i32_0 = arith.constant 0 : i32
    return %arg0, %c0_i32 : i32, i32
  }
  func.func @transform_4(%arg0: i32) -> (i32, i32) {
    %c0_i32 = arith.constant 0 : i32
    %c0_i32_0 = arith.constant 0 : i32
    return %arg0, %c0_i32 : i32, i32
  }
}

module attributes {stable_mosaic.version = 11 : i64} {
  func.func @_conv_kernel(%arg0: i32, %arg1: memref<32x288xbf16, #tpu.memory_space<vmem>>, %arg2: memref<288x128xbf16, #tpu.memory_space<vmem>>, %arg3: memref<1x128xf32, #tpu.memory_space<vmem>>, %arg4: memref<32x128xf32, #tpu.memory_space<vmem>>, %arg5: memref<8x128xf32, #tpu.memory_space<vmem>>) attributes {dimension_semantics = [#tpu.dimension_semantics<parallel>], iteration_bounds = array<i64: 1>, scalar_prefetch = 0 : i64, scratch_operands = 0 : i64, tpu.core_type = #tpu.core_type<tc>, window_params = [{transform_indices = @transform_0, window_bounds = array<i64: 32, 288>}, {pipeline_mode = #tpu.pipeline_mode<synchronous>, transform_indices = @transform_1, window_bounds = array<i64: 288, 128>}, {pipeline_mode = #tpu.pipeline_mode<synchronous>, transform_indices = @transform_2, window_bounds = array<i64: 1, 128>}, {transform_indices = @transform_3, window_bounds = array<i64: 32, 128>}, {transform_indices = @transform_4, window_bounds = array<i64: 8, 128>}]} {
    %c0 = arith.constant 0 : index
    %c0_0 = arith.constant 0 : index
    %0 = vector.load %arg1[%c0, %c0_0] : memref<32x288xbf16, #tpu.memory_space<vmem>>, vector<32x288xbf16>
    %c0_1 = arith.constant 0 : index
    %c0_2 = arith.constant 0 : index
    %1 = vector.load %arg2[%c0_1, %c0_2] : memref<288x128xbf16, #tpu.memory_space<vmem>>, vector<288x128xbf16>
    %cst = arith.constant dense<0.000000e+00> : vector<32x128xf32>
    %2 = tpu.matmul %0, %1, %cst {dimension_numbers = #tpu.dot_dimension_numbers<[1], [0], [0], [1], [0, 0, 1, 1], [], []>} : vector<32x288xbf16>, vector<288x128xbf16>, vector<32x128xf32> -> vector<32x128xf32>
    %c0_3 = arith.constant 0 : index
    %c0_4 = arith.constant 0 : index
    %3 = vector.load %arg3[%c0_3, %c0_4] : memref<1x128xf32, #tpu.memory_space<vmem>>, vector<1x128xf32>
    %4 = vector.broadcast %3 : vector<1x128xf32> to vector<32x128xf32>
    %5 = arith.addf %2, %4 : vector<32x128xf32>
    %c0_5 = arith.constant 0 : index
    %c0_6 = arith.constant 0 : index
    %6 = vector.load %arg4[%c0_5, %c0_6] : memref<32x128xf32, #tpu.memory_space<vmem>>, vector<32x128xf32>
    tpu.vector_store %arg4[%c0_5, %c0_6], %5 {strides = array<i32>} : memref<32x128xf32, #tpu.memory_space<vmem>>, vector<32x128xf32>,
    %c32_i32 = arith.constant 32 : i32
    %7 = arith.muli %arg0, %c32_i32 : i32
    %8 = tpu.iota {dimensions = array<i32: 0>} : vector<32x1xi32>
    %9 = vector.broadcast %7 : i32 to vector<32x1xi32>
    %10 = arith.addi %9, %8 : vector<32x1xi32>
    %c32_i32_7 = arith.constant 32 : i32
    %11 = vector.broadcast %c32_i32_7 : i32 to vector<32x1xi32>
    %12 = arith.cmpi slt, %10, %11 : vector<32x1xi32>
    %cst_8 = arith.constant 0.000000e+00 : f32
    %13 = vector.shape_cast %12 : vector<32x1xi1> to vector<32x1xi1>
    %14 = vector.broadcast %13 : vector<32x1xi1> to vector<32x128xi1>
    %15 = vector.broadcast %cst_8 : f32 to vector<32x128xf32>
    %16 = arith.select %14, %5, %15 : vector<32x128xi1>, vector<32x128xf32>
    %cst_9 = arith.constant dense<0.000000e+00> : vector<128xf32>
    %17 = vector.multi_reduction <add>, %16, %cst_9 [0] : vector<32x128xf32> to vector<128xf32>
    %18 = vector.shape_cast %17 : vector<128xf32> to vector<1x128xf32>
    %19 = arith.mulf %16, %16 : vector<32x128xf32>
    %cst_10 = arith.constant dense<0.000000e+00> : vector<128xf32>
    %20 = vector.multi_reduction <add>, %19, %cst_10 [0] : vector<32x128xf32> to vector<128xf32>
    %21 = vector.shape_cast %20 : vector<128xf32> to vector<1x128xf32>
    %22 = tpu.iota {dimensions = array<i32: 0>} : vector<8x1xi32>
    %c0_i32 = arith.constant 0 : i32
    %23 = vector.broadcast %c0_i32 : i32 to vector<8x1xi32>
    %24 = arith.cmpi eq, %22, %23 : vector<8x1xi32>
    %c1_i32 = arith.constant 1 : i32
    %25 = vector.broadcast %c1_i32 : i32 to vector<8x1xi32>
    %26 = arith.cmpi eq, %22, %25 : vector<8x1xi32>
    %cst_11 = arith.constant 0.000000e+00 : f32
    %27 = vector.shape_cast %26 : vector<8x1xi1> to vector<8x1xi1>
    %28 = vector.broadcast %27 : vector<8x1xi1> to vector<8x128xi1>
    %29 = vector.shape_cast %21 : vector<1x128xf32> to vector<1x128xf32>
    %30 = vector.broadcast %29 : vector<1x128xf32> to vector<8x128xf32>
    %31 = vector.broadcast %cst_11 : f32 to vector<8x128xf32>
    %32 = arith.select %28, %30, %31 : vector<8x128xi1>, vector<8x128xf32>
    %33 = vector.shape_cast %24 : vector<8x1xi1> to vector<8x1xi1>
    %34 = vector.broadcast %33 : vector<8x1xi1> to vector<8x128xi1>
    %35 = vector.shape_cast %18 : vector<1x128xf32> to vector<1x128xf32>
    %36 = vector.broadcast %35 : vector<1x128xf32> to vector<8x128xf32>
    %37 = arith.select %34, %36, %32 : vector<8x128xi1>, vector<8x128xf32>
    %c0_12 = arith.constant 0 : index
    %c0_13 = arith.constant 0 : index
    %38 = vector.load %arg5[%c0_12, %c0_13] : memref<8x128xf32, #tpu.memory_space<vmem>>, vector<8x128xf32>
    tpu.vector_store %arg5[%c0_12, %c0_13], %37 {strides = array<i32>} : memref<8x128xf32, #tpu.memory_space<vmem>>, vector<8x128xf32>,
    return
  }
  func.func @transform_0(%arg0: i32) -> (i32, i32) {
    %c0_i32 = arith.constant 0 : i32
    %c0_i32_0 = arith.constant 0 : i32
    return %arg0, %c0_i32 : i32, i32
  }
  func.func @transform_1(%arg0: i32) -> (i32, i32) {
    %c0_i32 = arith.constant 0 : i32
    %c0_i32_0 = arith.constant 0 : i32
    %c0_i32_1 = arith.constant 0 : i32
    return %c0_i32, %c0_i32_0 : i32, i32
  }
  func.func @transform_2(%arg0: i32) -> (i32, i32) {
    %c0_i32 = arith.constant 0 : i32
    %c0_i32_0 = arith.constant 0 : i32
    %c0_i32_1 = arith.constant 0 : i32
    return %c0_i32, %c0_i32_0 : i32, i32
  }
  func.func @transform_3(%arg0: i32) -> (i32, i32) {
    %c0_i32 = arith.constant 0 : i32
    %c0_i32_0 = arith.constant 0 : i32
    return %arg0, %c0_i32 : i32, i32
  }
  func.func @transform_4(%arg0: i32) -> (i32, i32) {
    %c0_i32 = arith.constant 0 : i32
    %c0_i32_0 = arith.constant 0 : i32
    return %arg0, %c0_i32 : i32, i32
  }
}

module attributes {stable_mosaic.version = 11 : i64} {
  func.func @kernel(%arg0: i32, %arg1: memref<32x128xf32, #tpu.memory_space<vmem>>, %arg2: memref<1x128xf32, #tpu.memory_space<vmem>>, %arg3: memref<1x128xf32, #tpu.memory_space<vmem>>, %arg4: memref<32x128xf32, #tpu.memory_space<vmem>>, %arg5: memref<32x128xf32, #tpu.memory_space<vmem>>) attributes {dimension_semantics = [#tpu.dimension_semantics<parallel>], iteration_bounds = array<i64: 1>, scalar_prefetch = 0 : i64, scratch_operands = 0 : i64, tpu.core_type = #tpu.core_type<tc>, window_params = [{transform_indices = @transform_0, window_bounds = array<i64: 32, 128>}, {pipeline_mode = #tpu.pipeline_mode<synchronous>, transform_indices = @transform_1, window_bounds = array<i64: 1, 128>}, {pipeline_mode = #tpu.pipeline_mode<synchronous>, transform_indices = @transform_2, window_bounds = array<i64: 1, 128>}, {transform_indices = @transform_3, window_bounds = array<i64: 32, 128>}, {transform_indices = @transform_4, window_bounds = array<i64: 32, 128>}]} {
    %c0 = arith.constant 0 : index
    %c0_0 = arith.constant 0 : index
    %0 = vector.load %arg1[%c0, %c0_0] : memref<32x128xf32, #tpu.memory_space<vmem>>, vector<32x128xf32>
    %c0_1 = arith.constant 0 : index
    %c0_2 = arith.constant 0 : index
    %1 = vector.load %arg2[%c0_1, %c0_2] : memref<1x128xf32, #tpu.memory_space<vmem>>, vector<1x128xf32>
    %2 = vector.broadcast %1 : vector<1x128xf32> to vector<32x128xf32>
    %3 = arith.mulf %0, %2 : vector<32x128xf32>
    %c0_3 = arith.constant 0 : index
    %c0_4 = arith.constant 0 : index
    %4 = vector.load %arg3[%c0_3, %c0_4] : memref<1x128xf32, #tpu.memory_space<vmem>>, vector<1x128xf32>
    %5 = vector.broadcast %4 : vector<1x128xf32> to vector<32x128xf32>
    %6 = arith.addf %3, %5 : vector<32x128xf32>
    %c0_5 = arith.constant 0 : index
    %c0_6 = arith.constant 0 : index
    %7 = vector.load %arg4[%c0_5, %c0_6] : memref<32x128xf32, #tpu.memory_space<vmem>>, vector<32x128xf32>
    %8 = arith.addf %6, %7 : vector<32x128xf32>
    %c0_7 = arith.constant 0 : index
    %c0_8 = arith.constant 0 : index
    %9 = vector.load %arg5[%c0_7, %c0_8] : memref<32x128xf32, #tpu.memory_space<vmem>>, vector<32x128xf32>
    tpu.vector_store %arg5[%c0_7, %c0_8], %8 {strides = array<i32>} : memref<32x128xf32, #tpu.memory_space<vmem>>, vector<32x128xf32>,
    return
  }
  func.func @transform_0(%arg0: i32) -> (i32, i32) {
    %c0_i32 = arith.constant 0 : i32
    %c0_i32_0 = arith.constant 0 : i32
    return %arg0, %c0_i32 : i32, i32
  }
  func.func @transform_1(%arg0: i32) -> (i32, i32) {
    %c0_i32 = arith.constant 0 : i32
    %c0_i32_0 = arith.constant 0 : i32
    %c0_i32_1 = arith.constant 0 : i32
    return %c0_i32, %c0_i32_0 : i32, i32
  }
  func.func @transform_2(%arg0: i32) -> (i32, i32) {
    %c0_i32 = arith.constant 0 : i32
    %c0_i32_0 = arith.constant 0 : i32
    %c0_i32_1 = arith.constant 0 : i32
    return %c0_i32, %c0_i32_0 : i32, i32
  }
  func.func @transform_3(%arg0: i32) -> (i32, i32) {
    %c0_i32 = arith.constant 0 : i32
    %c0_i32_0 = arith.constant 0 : i32
    return %arg0, %c0_i32 : i32, i32
  }
  func.func @transform_4(%arg0: i32) -> (i32, i32) {
    %c0_i32 = arith.constant 0 : i32
    %c0_i32_0 = arith.constant 0 : i32
    return %arg0, %c0_i32 : i32, i32
  }
}

module attributes {stable_mosaic.version = 11 : i64} {
  func.func @_conv_kernel(%arg0: i32, %arg1: memref<128x288xbf16, #tpu.memory_space<vmem>>, %arg2: memref<288x128xbf16, #tpu.memory_space<vmem>>, %arg3: memref<1x128xf32, #tpu.memory_space<vmem>>, %arg4: memref<128x128xf32, #tpu.memory_space<vmem>>, %arg5: memref<8x128xf32, #tpu.memory_space<vmem>>) attributes {dimension_semantics = [#tpu.dimension_semantics<parallel>], iteration_bounds = array<i64: 1>, scalar_prefetch = 0 : i64, scratch_operands = 0 : i64, tpu.core_type = #tpu.core_type<tc>, window_params = [{transform_indices = @transform_0, window_bounds = array<i64: 128, 288>}, {pipeline_mode = #tpu.pipeline_mode<synchronous>, transform_indices = @transform_1, window_bounds = array<i64: 288, 128>}, {pipeline_mode = #tpu.pipeline_mode<synchronous>, transform_indices = @transform_2, window_bounds = array<i64: 1, 128>}, {transform_indices = @transform_3, window_bounds = array<i64: 128, 128>}, {transform_indices = @transform_4, window_bounds = array<i64: 8, 128>}]} {
    %c0 = arith.constant 0 : index
    %c0_0 = arith.constant 0 : index
    %0 = vector.load %arg1[%c0, %c0_0] : memref<128x288xbf16, #tpu.memory_space<vmem>>, vector<128x288xbf16>
    %c0_1 = arith.constant 0 : index
    %c0_2 = arith.constant 0 : index
    %1 = vector.load %arg2[%c0_1, %c0_2] : memref<288x128xbf16, #tpu.memory_space<vmem>>, vector<288x128xbf16>
    %cst = arith.constant dense<0.000000e+00> : vector<128x128xf32>
    %2 = tpu.matmul %0, %1, %cst {dimension_numbers = #tpu.dot_dimension_numbers<[1], [0], [0], [1], [0, 0, 1, 1], [], []>} : vector<128x288xbf16>, vector<288x128xbf16>, vector<128x128xf32> -> vector<128x128xf32>
    %c0_3 = arith.constant 0 : index
    %c0_4 = arith.constant 0 : index
    %3 = vector.load %arg3[%c0_3, %c0_4] : memref<1x128xf32, #tpu.memory_space<vmem>>, vector<1x128xf32>
    %4 = vector.broadcast %3 : vector<1x128xf32> to vector<128x128xf32>
    %5 = arith.addf %2, %4 : vector<128x128xf32>
    %c0_5 = arith.constant 0 : index
    %c0_6 = arith.constant 0 : index
    %6 = vector.load %arg4[%c0_5, %c0_6] : memref<128x128xf32, #tpu.memory_space<vmem>>, vector<128x128xf32>
    tpu.vector_store %arg4[%c0_5, %c0_6], %5 {strides = array<i32>} : memref<128x128xf32, #tpu.memory_space<vmem>>, vector<128x128xf32>,
    %c128_i32 = arith.constant 128 : i32
    %7 = arith.muli %arg0, %c128_i32 : i32
    %8 = tpu.iota {dimensions = array<i32: 0>} : vector<128x1xi32>
    %9 = vector.broadcast %7 : i32 to vector<128x1xi32>
    %10 = arith.addi %9, %8 : vector<128x1xi32>
    %c128_i32_7 = arith.constant 128 : i32
    %11 = vector.broadcast %c128_i32_7 : i32 to vector<128x1xi32>
    %12 = arith.cmpi slt, %10, %11 : vector<128x1xi32>
    %cst_8 = arith.constant 0.000000e+00 : f32
    %13 = vector.shape_cast %12 : vector<128x1xi1> to vector<128x1xi1>
    %14 = vector.broadcast %13 : vector<128x1xi1> to vector<128x128xi1>
    %15 = vector.broadcast %cst_8 : f32 to vector<128x128xf32>
    %16 = arith.select %14, %5, %15 : vector<128x128xi1>, vector<128x128xf32>
    %cst_9 = arith.constant dense<0.000000e+00> : vector<128xf32>
    %17 = vector.multi_reduction <add>, %16, %cst_9 [0] : vector<128x128xf32> to vector<128xf32>
    %18 = vector.shape_cast %17 : vector<128xf32> to vector<1x128xf32>
    %19 = arith.mulf %16, %16 : vector<128x128xf32>
    %cst_10 = arith.constant dense<0.000000e+00> : vector<128xf32>
    %20 = vector.multi_reduction <add>, %19, %cst_10 [0] : vector<128x128xf32> to vector<128xf32>
    %21 = vector.shape_cast %20 : vector<128xf32> to vector<1x128xf32>
    %22 = tpu.iota {dimensions = array<i32: 0>} : vector<8x1xi32>
    %c0_i32 = arith.constant 0 : i32
    %23 = vector.broadcast %c0_i32 : i32 to vector<8x1xi32>
    %24 = arith.cmpi eq, %22, %23 : vector<8x1xi32>
    %c1_i32 = arith.constant 1 : i32
    %25 = vector.broadcast %c1_i32 : i32 to vector<8x1xi32>
    %26 = arith.cmpi eq, %22, %25 : vector<8x1xi32>
    %cst_11 = arith.constant 0.000000e+00 : f32
    %27 = vector.shape_cast %26 : vector<8x1xi1> to vector<8x1xi1>
    %28 = vector.broadcast %27 : vector<8x1xi1> to vector<8x128xi1>
    %29 = vector.shape_cast %21 : vector<1x128xf32> to vector<1x128xf32>
    %30 = vector.broadcast %29 : vector<1x128xf32> to vector<8x128xf32>
    %31 = vector.broadcast %cst_11 : f32 to vector<8x128xf32>
    %32 = arith.select %28, %30, %31 : vector<8x128xi1>, vector<8x128xf32>
    %33 = vector.shape_cast %24 : vector<8x1xi1> to vector<8x1xi1>
    %34 = vector.broadcast %33 : vector<8x1xi1> to vector<8x128xi1>
    %35 = vector.shape_cast %18 : vector<1x128xf32> to vector<1x128xf32>
    %36 = vector.broadcast %35 : vector<1x128xf32> to vector<8x128xf32>
    %37 = arith.select %34, %36, %32 : vector<8x128xi1>, vector<8x128xf32>
    %c0_12 = arith.constant 0 : index
    %c0_13 = arith.constant 0 : index
    %38 = vector.load %arg5[%c0_12, %c0_13] : memref<8x128xf32, #tpu.memory_space<vmem>>, vector<8x128xf32>
    tpu.vector_store %arg5[%c0_12, %c0_13], %37 {strides = array<i32>} : memref<8x128xf32, #tpu.memory_space<vmem>>, vector<8x128xf32>,
    return
  }
  func.func @transform_0(%arg0: i32) -> (i32, i32) {
    %c0_i32 = arith.constant 0 : i32
    %c0_i32_0 = arith.constant 0 : i32
    return %arg0, %c0_i32 : i32, i32
  }
  func.func @transform_1(%arg0: i32) -> (i32, i32) {
    %c0_i32 = arith.constant 0 : i32
    %c0_i32_0 = arith.constant 0 : i32
    %c0_i32_1 = arith.constant 0 : i32
    return %c0_i32, %c0_i32_0 : i32, i32
  }
  func.func @transform_2(%arg0: i32) -> (i32, i32) {
    %c0_i32 = arith.constant 0 : i32
    %c0_i32_0 = arith.constant 0 : i32
    %c0_i32_1 = arith.constant 0 : i32
    return %c0_i32, %c0_i32_0 : i32, i32
  }
  func.func @transform_3(%arg0: i32) -> (i32, i32) {
    %c0_i32 = arith.constant 0 : i32
    %c0_i32_0 = arith.constant 0 : i32
    return %arg0, %c0_i32 : i32, i32
  }
  func.func @transform_4(%arg0: i32) -> (i32, i32) {
    %c0_i32 = arith.constant 0 : i32
    %c0_i32_0 = arith.constant 0 : i32
    return %arg0, %c0_i32 : i32, i32
  }
}

module attributes {stable_mosaic.version = 11 : i64} {
  func.func @_conv_kernel(%arg0: i32, %arg1: memref<512x144xbf16, #tpu.memory_space<vmem>>, %arg2: memref<144x128xbf16, #tpu.memory_space<vmem>>, %arg3: memref<1x128xf32, #tpu.memory_space<vmem>>, %arg4: memref<512x128xf32, #tpu.memory_space<vmem>>, %arg5: memref<8x128xf32, #tpu.memory_space<vmem>>) attributes {dimension_semantics = [#tpu.dimension_semantics<parallel>], iteration_bounds = array<i64: 1>, scalar_prefetch = 0 : i64, scratch_operands = 0 : i64, tpu.core_type = #tpu.core_type<tc>, window_params = [{transform_indices = @transform_0, window_bounds = array<i64: 512, 144>}, {pipeline_mode = #tpu.pipeline_mode<synchronous>, transform_indices = @transform_1, window_bounds = array<i64: 144, 128>}, {pipeline_mode = #tpu.pipeline_mode<synchronous>, transform_indices = @transform_2, window_bounds = array<i64: 1, 128>}, {transform_indices = @transform_3, window_bounds = array<i64: 512, 128>}, {transform_indices = @transform_4, window_bounds = array<i64: 8, 128>}]} {
    %c0 = arith.constant 0 : index
    %c0_0 = arith.constant 0 : index
    %0 = vector.load %arg1[%c0, %c0_0] : memref<512x144xbf16, #tpu.memory_space<vmem>>, vector<512x144xbf16>
    %c0_1 = arith.constant 0 : index
    %c0_2 = arith.constant 0 : index
    %1 = vector.load %arg2[%c0_1, %c0_2] : memref<144x128xbf16, #tpu.memory_space<vmem>>, vector<144x128xbf16>
    %cst = arith.constant dense<0.000000e+00> : vector<512x128xf32>
    %2 = tpu.matmul %0, %1, %cst {dimension_numbers = #tpu.dot_dimension_numbers<[1], [0], [0], [1], [0, 0, 1, 1], [], []>} : vector<512x144xbf16>, vector<144x128xbf16>, vector<512x128xf32> -> vector<512x128xf32>
    %c0_3 = arith.constant 0 : index
    %c0_4 = arith.constant 0 : index
    %3 = vector.load %arg3[%c0_3, %c0_4] : memref<1x128xf32, #tpu.memory_space<vmem>>, vector<1x128xf32>
    %4 = vector.broadcast %3 : vector<1x128xf32> to vector<512x128xf32>
    %5 = arith.addf %2, %4 : vector<512x128xf32>
    %c0_5 = arith.constant 0 : index
    %c0_6 = arith.constant 0 : index
    %6 = vector.load %arg4[%c0_5, %c0_6] : memref<512x128xf32, #tpu.memory_space<vmem>>, vector<512x128xf32>
    tpu.vector_store %arg4[%c0_5, %c0_6], %5 {strides = array<i32>} : memref<512x128xf32, #tpu.memory_space<vmem>>, vector<512x128xf32>,
    %c512_i32 = arith.constant 512 : i32
    %7 = arith.muli %arg0, %c512_i32 : i32
    %8 = tpu.iota {dimensions = array<i32: 0>} : vector<512x1xi32>
    %9 = vector.broadcast %7 : i32 to vector<512x1xi32>
    %10 = arith.addi %9, %8 : vector<512x1xi32>
    %c512_i32_7 = arith.constant 512 : i32
    %11 = vector.broadcast %c512_i32_7 : i32 to vector<512x1xi32>
    %12 = arith.cmpi slt, %10, %11 : vector<512x1xi32>
    %cst_8 = arith.constant 0.000000e+00 : f32
    %13 = vector.shape_cast %12 : vector<512x1xi1> to vector<512x1xi1>
    %14 = vector.broadcast %13 : vector<512x1xi1> to vector<512x128xi1>
    %15 = vector.broadcast %cst_8 : f32 to vector<512x128xf32>
    %16 = arith.select %14, %5, %15 : vector<512x128xi1>, vector<512x128xf32>
    %cst_9 = arith.constant dense<0.000000e+00> : vector<128xf32>
    %17 = vector.multi_reduction <add>, %16, %cst_9 [0] : vector<512x128xf32> to vector<128xf32>
    %18 = vector.shape_cast %17 : vector<128xf32> to vector<1x128xf32>
    %19 = arith.mulf %16, %16 : vector<512x128xf32>
    %cst_10 = arith.constant dense<0.000000e+00> : vector<128xf32>
    %20 = vector.multi_reduction <add>, %19, %cst_10 [0] : vector<512x128xf32> to vector<128xf32>
    %21 = vector.shape_cast %20 : vector<128xf32> to vector<1x128xf32>
    %22 = tpu.iota {dimensions = array<i32: 0>} : vector<8x1xi32>
    %c0_i32 = arith.constant 0 : i32
    %23 = vector.broadcast %c0_i32 : i32 to vector<8x1xi32>
    %24 = arith.cmpi eq, %22, %23 : vector<8x1xi32>
    %c1_i32 = arith.constant 1 : i32
    %25 = vector.broadcast %c1_i32 : i32 to vector<8x1xi32>
    %26 = arith.cmpi eq, %22, %25 : vector<8x1xi32>
    %cst_11 = arith.constant 0.000000e+00 : f32
    %27 = vector.shape_cast %26 : vector<8x1xi1> to vector<8x1xi1>
    %28 = vector.broadcast %27 : vector<8x1xi1> to vector<8x128xi1>
    %29 = vector.shape_cast %21 : vector<1x128xf32> to vector<1x128xf32>
    %30 = vector.broadcast %29 : vector<1x128xf32> to vector<8x128xf32>
    %31 = vector.broadcast %cst_11 : f32 to vector<8x128xf32>
    %32 = arith.select %28, %30, %31 : vector<8x128xi1>, vector<8x128xf32>
    %33 = vector.shape_cast %24 : vector<8x1xi1> to vector<8x1xi1>
    %34 = vector.broadcast %33 : vector<8x1xi1> to vector<8x128xi1>
    %35 = vector.shape_cast %18 : vector<1x128xf32> to vector<1x128xf32>
    %36 = vector.broadcast %35 : vector<1x128xf32> to vector<8x128xf32>
    %37 = arith.select %34, %36, %32 : vector<8x128xi1>, vector<8x128xf32>
    %c0_12 = arith.constant 0 : index
    %c0_13 = arith.constant 0 : index
    %38 = vector.load %arg5[%c0_12, %c0_13] : memref<8x128xf32, #tpu.memory_space<vmem>>, vector<8x128xf32>
    tpu.vector_store %arg5[%c0_12, %c0_13], %37 {strides = array<i32>} : memref<8x128xf32, #tpu.memory_space<vmem>>, vector<8x128xf32>,
    return
  }
  func.func @transform_0(%arg0: i32) -> (i32, i32) {
    %c0_i32 = arith.constant 0 : i32
    %c0_i32_0 = arith.constant 0 : i32
    return %arg0, %c0_i32 : i32, i32
  }
  func.func @transform_1(%arg0: i32) -> (i32, i32) {
    %c0_i32 = arith.constant 0 : i32
    %c0_i32_0 = arith.constant 0 : i32
    %c0_i32_1 = arith.constant 0 : i32
    return %c0_i32, %c0_i32_0 : i32, i32
  }
  func.func @transform_2(%arg0: i32) -> (i32, i32) {
    %c0_i32 = arith.constant 0 : i32
    %c0_i32_0 = arith.constant 0 : i32
    %c0_i32_1 = arith.constant 0 : i32
    return %c0_i32, %c0_i32_0 : i32, i32
  }
  func.func @transform_3(%arg0: i32) -> (i32, i32) {
    %c0_i32 = arith.constant 0 : i32
    %c0_i32_0 = arith.constant 0 : i32
    return %arg0, %c0_i32 : i32, i32
  }
  func.func @transform_4(%arg0: i32) -> (i32, i32) {
    %c0_i32 = arith.constant 0 : i32
    %c0_i32_0 = arith.constant 0 : i32
    return %arg0, %c0_i32 : i32, i32
  }
}

module attributes {stable_mosaic.version = 11 : i64} {
  func.func @_conv_kernel(%arg0: i32, %arg1: memref<512x392xbf16, #tpu.memory_space<vmem>>, %arg2: memref<392x128xbf16, #tpu.memory_space<vmem>>, %arg3: memref<1x128xf32, #tpu.memory_space<vmem>>, %arg4: memref<512x128xf32, #tpu.memory_space<vmem>>, %arg5: memref<8x128xf32, #tpu.memory_space<vmem>>) attributes {dimension_semantics = [#tpu.dimension_semantics<parallel>], iteration_bounds = array<i64: 1>, scalar_prefetch = 0 : i64, scratch_operands = 0 : i64, tpu.core_type = #tpu.core_type<tc>, window_params = [{transform_indices = @transform_0, window_bounds = array<i64: 512, 392>}, {pipeline_mode = #tpu.pipeline_mode<synchronous>, transform_indices = @transform_1, window_bounds = array<i64: 392, 128>}, {pipeline_mode = #tpu.pipeline_mode<synchronous>, transform_indices = @transform_2, window_bounds = array<i64: 1, 128>}, {transform_indices = @transform_3, window_bounds = array<i64: 512, 128>}, {transform_indices = @transform_4, window_bounds = array<i64: 8, 128>}]} {
    %c0 = arith.constant 0 : index
    %c0_0 = arith.constant 0 : index
    %0 = vector.load %arg1[%c0, %c0_0] : memref<512x392xbf16, #tpu.memory_space<vmem>>, vector<512x392xbf16>
    %c0_1 = arith.constant 0 : index
    %c0_2 = arith.constant 0 : index
    %1 = vector.load %arg2[%c0_1, %c0_2] : memref<392x128xbf16, #tpu.memory_space<vmem>>, vector<392x128xbf16>
    %cst = arith.constant dense<0.000000e+00> : vector<512x128xf32>
    %2 = tpu.matmul %0, %1, %cst {dimension_numbers = #tpu.dot_dimension_numbers<[1], [0], [0], [1], [0, 0, 1, 1], [], []>} : vector<512x392xbf16>, vector<392x128xbf16>, vector<512x128xf32> -> vector<512x128xf32>
    %c0_3 = arith.constant 0 : index
    %c0_4 = arith.constant 0 : index
    %3 = vector.load %arg3[%c0_3, %c0_4] : memref<1x128xf32, #tpu.memory_space<vmem>>, vector<1x128xf32>
    %4 = vector.broadcast %3 : vector<1x128xf32> to vector<512x128xf32>
    %5 = arith.addf %2, %4 : vector<512x128xf32>
    %6 = math.tanh %5 : vector<512x128xf32>
    %c0_5 = arith.constant 0 : index
    %c0_6 = arith.constant 0 : index
    %7 = vector.load %arg4[%c0_5, %c0_6] : memref<512x128xf32, #tpu.memory_space<vmem>>, vector<512x128xf32>
    tpu.vector_store %arg4[%c0_5, %c0_6], %6 {strides = array<i32>} : memref<512x128xf32, #tpu.memory_space<vmem>>, vector<512x128xf32>,
    %c512_i32 = arith.constant 512 : i32
    %8 = arith.muli %arg0, %c512_i32 : i32
    %9 = tpu.iota {dimensions = array<i32: 0>} : vector<512x1xi32>
    %10 = vector.broadcast %8 : i32 to vector<512x1xi32>
    %11 = arith.addi %10, %9 : vector<512x1xi32>
    %c512_i32_7 = arith.constant 512 : i32
    %12 = vector.broadcast %c512_i32_7 : i32 to vector<512x1xi32>
    %13 = arith.cmpi slt, %11, %12 : vector<512x1xi32>
    %cst_8 = arith.constant 0.000000e+00 : f32
    %14 = vector.shape_cast %13 : vector<512x1xi1> to vector<512x1xi1>
    %15 = vector.broadcast %14 : vector<512x1xi1> to vector<512x128xi1>
    %16 = vector.broadcast %cst_8 : f32 to vector<512x128xf32>
    %17 = arith.select %15, %6, %16 : vector<512x128xi1>, vector<512x128xf32>
    %cst_9 = arith.constant dense<0.000000e+00> : vector<128xf32>
    %18 = vector.multi_reduction <add>, %17, %cst_9 [0] : vector<512x128xf32> to vector<128xf32>
    %19 = vector.shape_cast %18 : vector<128xf32> to vector<1x128xf32>
    %20 = arith.mulf %17, %17 : vector<512x128xf32>
    %cst_10 = arith.constant dense<0.000000e+00> : vector<128xf32>
    %21 = vector.multi_reduction <add>, %20, %cst_10 [0] : vector<512x128xf32> to vector<128xf32>
    %22 = vector.shape_cast %21 : vector<128xf32> to vector<1x128xf32>
    %23 = tpu.iota {dimensions = array<i32: 0>} : vector<8x1xi32>
    %c0_i32 = arith.constant 0 : i32
    %24 = vector.broadcast %c0_i32 : i32 to vector<8x1xi32>
    %25 = arith.cmpi eq, %23, %24 : vector<8x1xi32>
    %c1_i32 = arith.constant 1 : i32
    %26 = vector.broadcast %c1_i32 : i32 to vector<8x1xi32>
    %27 = arith.cmpi eq, %23, %26 : vector<8x1xi32>
    %cst_11 = arith.constant 0.000000e+00 : f32
    %28 = vector.shape_cast %27 : vector<8x1xi1> to vector<8x1xi1>
    %29 = vector.broadcast %28 : vector<8x1xi1> to vector<8x128xi1>
    %30 = vector.shape_cast %22 : vector<1x128xf32> to vector<1x128xf32>
    %31 = vector.broadcast %30 : vector<1x128xf32> to vector<8x128xf32>
    %32 = vector.broadcast %cst_11 : f32 to vector<8x128xf32>
    %33 = arith.select %29, %31, %32 : vector<8x128xi1>, vector<8x128xf32>
    %34 = vector.shape_cast %25 : vector<8x1xi1> to vector<8x1xi1>
    %35 = vector.broadcast %34 : vector<8x1xi1> to vector<8x128xi1>
    %36 = vector.shape_cast %19 : vector<1x128xf32> to vector<1x128xf32>
    %37 = vector.broadcast %36 : vector<1x128xf32> to vector<8x128xf32>
    %38 = arith.select %35, %37, %33 : vector<8x128xi1>, vector<8x128xf32>
    %c0_12 = arith.constant 0 : index
    %c0_13 = arith.constant 0 : index
    %39 = vector.load %arg5[%c0_12, %c0_13] : memref<8x128xf32, #tpu.memory_space<vmem>>, vector<8x128xf32>
    tpu.vector_store %arg5[%c0_12, %c0_13], %38 {strides = array<i32>} : memref<8x128xf32, #tpu.memory_space<vmem>>, vector<8x128xf32>,
    return
  }
  func.func @transform_0(%arg0: i32) -> (i32, i32) {
    %c0_i32 = arith.constant 0 : i32
    %c0_i32_0 = arith.constant 0 : i32
    return %arg0, %c0_i32 : i32, i32
  }
  func.func @transform_1(%arg0: i32) -> (i32, i32) {
    %c0_i32 = arith.constant 0 : i32
    %c0_i32_0 = arith.constant 0 : i32
    %c0_i32_1 = arith.constant 0 : i32
    return %c0_i32, %c0_i32_0 : i32, i32
  }
  func.func @transform_2(%arg0: i32) -> (i32, i32) {
    %c0_i32 = arith.constant 0 : i32
    %c0_i32_0 = arith.constant 0 : i32
    %c0_i32_1 = arith.constant 0 : i32
    return %c0_i32, %c0_i32_0 : i32, i32
  }
  func.func @transform_3(%arg0: i32) -> (i32, i32) {
    %c0_i32 = arith.constant 0 : i32
    %c0_i32_0 = arith.constant 0 : i32
    return %arg0, %c0_i32 : i32, i32
  }
  func.func @transform_4(%arg0: i32) -> (i32, i32) {
    %c0_i32 = arith.constant 0 : i32
    %c0_i32_0 = arith.constant 0 : i32
    return %arg0, %c0_i32 : i32, i32
  }
}

</mosaic_0001>

<bundles_post_ra>
// kernel: resnet_generator_forward.20
= control target key start
LH: loop header
LB: loop body
LE: loop exit
PB: predicated region body
PF: predicated region fallthrough
CT: control target
= control target key end

     0   :  { %s893_s0 = inlined_call_operand.vmem [shape: f32[512,128], index: 0, kind: input, shape index: {}]   ;;  %s894_s1 = inlined_call_operand.vmem [shape: f32[1,128], index: 1, kind: input, shape index: {}]   ;;  %s895_s2 = inlined_call_operand.vmem [shape: f32[1,128], index: 2, kind: input, shape index: {}]   ;;  %s896_s3 = inlined_call_operand.vmem [shape: f32[512,128], index: 3, kind: output, shape index: {}]  }
   0x1   :  { %v14_v0 = vld [vmem:[%s893_s0] sm:$0xff]  ;;  %v15_v3 = vld [vmem:[%s893_s0 + $0x8] sm:$0xff]  ;;  %v16_v6 = vld [vmem:[%s893_s0 + $0x10] sm:$0xff] }
   0x2   :  { %v374_v1 = vld [vmem:[%s894_s1] ss:$0 sm:$0xff]  ;;  %v17_v7 = vld [vmem:[%s893_s0 + $0x18] sm:$0xff]  ;;  %v19_v12 = vld [vmem:[%s893_s0 + $0x28] sm:$0xff] }
   0x3   :  { %v379_v2 = vld [vmem:[%s895_s2] ss:$0 sm:$0xff]  ;;  %v82_v4 = vmul.f32 %v374_v1, %v14_v0  ;;  %v83_v5 = vmul.f32 %v374_v1, %v15_v3  ;;  %v84_v9 = vmul.f32 %v374_v1, %v16_v6  ;;  %v85_v10 = vmul.f32 %v374_v1, %v17_v7  ;;  %v20_v13 = vld [vmem:[%s893_s0 + $0x30] sm:$0xff]  ;;  %v21_v14 = vld [vmem:[%s893_s0 + $0x38] sm:$0xff] }
   0x4   :  { %v18_v8 = vld [vmem:[%s893_s0 + $0x20] sm:$0xff]  ;;  %v87_v17 = vmul.f32 %v374_v1, %v19_v12  ;;  %v88_v18 = vmul.f32 %v374_v1, %v20_v13  ;;  %v89_v22 = vmul.f32 %v374_v1, %v21_v14  ;;  %v23_v24 = vld [vmem:[%s893_s0 + $0x48] sm:$0xff]  ;;  %v24_v29 = vld [vmem:[%s893_s0 + $0x50] sm:$0xff] }
   0x5   :  { %v86_v11 = vmul.f32 %v374_v1, %v18_v8  ;;  %v150_v15 = vadd.f32 %v379_v2, %v82_v4  ;;  %v151_v16 = vadd.f32 %v379_v2, %v83_v5  ;;  %v152_v19 = vadd.f32 %v379_v2, %v84_v9  ;;  %v22_v23 = vld [vmem:[%s893_s0 + $0x40] sm:$0xff]  ;;  %v25_v30 = vld [vmem:[%s893_s0 + $0x58] sm:$0xff]  ;;  %v27_v35 = vld [vmem:[%s893_s0 + $0x68] sm:$0xff] }
   0x6   :  { %v153_v20 = vadd.f32 %v379_v2, %v85_v10  ;;  %v155_v27 = vadd.f32 %v379_v2, %v87_v17  ;;  %v156_v28 = vadd.f32 %v379_v2, %v88_v18  ;;  %v26_v31 = vld [vmem:[%s893_s0 + $0x60] sm:$0xff]  ;;  %v157_v34 = vadd.f32 %v379_v2, %v89_v22  ;;  %v28_v36 = vld [vmem:[%s893_s0 + $0x70] sm:$0xff]  ;;  %v29_v41 = vld [vmem:[%s893_s0 + $0x78] sm:$0xff] }
   0x7   :  { %v154_v21 = vadd.f32 %v379_v2, %v86_v11  ;;  %v214_v25 = vmax.f32 %v150_v15, 0.0  ;;  %v215_v26 = vmax.f32 %v151_v16, 0.0  ;;  %v216_v32 = vmax.f32 %v152_v19, 0.0  ;;  %v30_v54 = vld [vmem:[%s893_s0 + $0x80] sm:$0xff]  ;;  %v31_v55 = vld [vmem:[%s893_s0 + $0x88] sm:$0xff]  ;;  %v32_v58 = vld [vmem:[%s893_s0 + $0x90] sm:$0xff] }
   0x8   :  { %v217_v33 = vmax.f32 %v153_v20, 0.0  ;;  %v219_v38 = vmax.f32 %v155_v27, 0.0  ;;  %v90_v39 = vmul.f32 %v374_v1, %v22_v23  ;;  %v91_v40 = vmul.f32 %v374_v1, %v23_v24  ;;  %v33_v59 = vld [vmem:[%s893_s0 + $0x98] sm:$0xff]  ;;  %v34_v62 = vld [vmem:[%s893_s0 + $0xa0] sm:$0xff]  ;;  %v35_v5 = vld [vmem:[%s893_s0 + $0xa8] sm:$0xff] }
   0x9   :  { %278 = vst [vmem:[%s896_s3] sm:$0xff] %v214_v25  ;;  %v218_v37 = vmax.f32 %v154_v21, 0.0  ;;  %v220_v42 = vmax.f32 %v156_v28, 0.0  ;;  %v92_v43 = vmul.f32 %v374_v1, %v24_v29  ;;  %v93_v44 = vmul.f32 %v374_v1, %v25_v30  ;;  %v36_v10 = vld [vmem:[%s893_s0 + $0xb0] sm:$0xff]  ;;  %v37_v14 = vld [vmem:[%s893_s0 + $0xb8] sm:$0xff]  ;;  %v38_v18 = vld [vmem:[%s893_s0 + $0xc0] sm:$0xff] }
   0xa   :  { %279 = vst [vmem:[%s896_s3 + $0x8] sm:$0xff] %v215_v26  ;;  %v94_v45 = vmul.f32 %v374_v1, %v26_v31  ;;  %v158_v46 = vadd.f32 %v379_v2, %v90_v39  ;;  %v159_v47 = vadd.f32 %v379_v2, %v91_v40  ;;  %v95_v48 = vmul.f32 %v374_v1, %v27_v35  ;;  %v39_v22 = vld [vmem:[%s893_s0 + $0xc8] sm:$0xff]  ;;  %v40_v26 = vld [vmem:[%s893_s0 + $0xd0] sm:$0xff]  ;;  %v41_v30 = vld [vmem:[%s893_s0 + $0xd8] sm:$0xff] }
   0xb   :  { %280 = vst [vmem:[%s896_s3 + $0x10] sm:$0xff] %v216_v32  ;;  %v96_v49 = vmul.f32 %v374_v1, %v28_v36  ;;  %v221_v50 = vmax.f32 %v157_v34, 0.0  ;;  %v160_v51 = vadd.f32 %v379_v2, %v92_v43  ;;  %v161_v52 = vadd.f32 %v379_v2, %v93_v44  ;;  %v42_v34 = vld [vmem:[%s893_s0 + $0xe0] sm:$0xff] }
   0xc   :  { %281 = vst [vmem:[%s896_s3 + $0x18] sm:$0xff] %v217_v33  ;;  %v97_v53 = vmul.f32 %v374_v1, %v29_v41  ;;  %v222_v56 = vmax.f32 %v158_v46, 0.0  ;;  %v162_v57 = vadd.f32 %v379_v2, %v94_v45  ;;  %v223_v60 = vmax.f32 %v159_v47, 0.0  ;;  %v45_v46 = vld [vmem:[%s893_s0 + $0xf8] sm:$0xff] }
   0xd   :  { %282 = vst [vmem:[%s896_s3 + $0x20] sm:$0xff] %v218_v37  ;;  %v163_v61 = vadd.f32 %v379_v2, %v95_v48  ;;  %v224_v63 = vmax.f32 %v160_v51, 0.0  ;;  %v164_v0 = vadd.f32 %v379_v2, %v96_v49  ;;  %v98_v3 = vmul.f32 %v374_v1, %v30_v54  ;;  %v47_v54 = vld [vmem:[%s893_s0 + $0x108] sm:$0xff] }
   0xe   :  { %283 = vst [vmem:[%s896_s3 + $0x28] sm:$0xff] %v219_v38  ;;  %v99_v4 = vmul.f32 %v374_v1, %v31_v55  ;;  %v225_v6 = vmax.f32 %v161_v52, 0.0  ;;  %v165_v7 = vadd.f32 %v379_v2, %v97_v53  ;;  %v100_v8 = vmul.f32 %v374_v1, %v32_v58  ;;  %v43_v38 = vld [vmem:[%s893_s0 + $0xe8] sm:$0xff]  ;;  %v48_v58 = vld [vmem:[%s893_s0 + $0x110] sm:$0xff] }
   0xf   :  { %284 = vst [vmem:[%s896_s3 + $0x30] sm:$0xff] %v220_v42  ;;  %v101_v9 = vmul.f32 %v374_v1, %v33_v59  ;;  %v226_v11 = vmax.f32 %v162_v57, 0.0  ;;  %v166_v12 = vadd.f32 %v379_v2, %v98_v3  ;;  %v102_v13 = vmul.f32 %v374_v1, %v34_v62  ;;  %v44_v42 = vld [vmem:[%s893_s0 + $0xf0] sm:$0xff]  ;;  %v49_v62 = vld [vmem:[%s893_s0 + $0x118] sm:$0xff] }
  0x10   :  { %285 = vst [vmem:[%s896_s3 + $0x38] sm:$0xff] %v221_v50  ;;  %v227_v15 = vmax.f32 %v163_v61, 0.0  ;;  %v167_v16 = vadd.f32 %v379_v2, %v99_v4  ;;  %v103_v17 = vmul.f32 %v374_v1, %v35_v5  ;;  %v228_v19 = vmax.f32 %v164_v0, 0.0  ;;  %v46_v50 = vld [vmem:[%s893_s0 + $0x100] sm:$0xff] }
  0x11   :  { %286 = vst [vmem:[%s896_s3 + $0x40] sm:$0xff] %v222_v56  ;;  %v168_v20 = vadd.f32 %v379_v2, %v100_v8  ;;  %v104_v21 = vmul.f32 %v374_v1, %v36_v10  ;;  %v229_v23 = vmax.f32 %v165_v7, 0.0  ;;  %v169_v24 = vadd.f32 %v379_v2, %v101_v9  ;;  %v50_v4 = vld [vmem:[%s893_s0 + $0x120] sm:$0xff]  ;;  %v51_v8 = vld [vmem:[%s893_s0 + $0x128] sm:$0xff] }
  0x12   :  { %287 = vst [vmem:[%s896_s3 + $0x48] sm:$0xff] %v223_v60  ;;  %v105_v25 = vmul.f32 %v374_v1, %v37_v14  ;;  %v230_v27 = vmax.f32 %v166_v12, 0.0  ;;  %v170_v28 = vadd.f32 %v379_v2, %v102_v13  ;;  %v106_v29 = vmul.f32 %v374_v1, %v38_v18  ;;  %v52_v12 = vld [vmem:[%s893_s0 + $0x130] sm:$0xff] }
  0x13   :  { %288 = vst [vmem:[%s896_s3 + $0x50] sm:$0xff] %v224_v63  ;;  %v231_v31 = vmax.f32 %v167_v16, 0.0  ;;  %v171_v32 = vadd.f32 %v379_v2, %v103_v17  ;;  %v107_v33 = vmul.f32 %v374_v1, %v39_v22  ;;  %v232_v35 = vmax.f32 %v168_v20, 0.0  ;;  %v53_v16 = vld [vmem:[%s893_s0 + $0x138] sm:$0xff]  ;;  %v54_v20 = vld [vmem:[%s893_s0 + $0x140] sm:$0xff] }
  0x14   :  { %289 = vst [vmem:[%s896_s3 + $0x58] sm:$0xff] %v225_v6  ;;  %v172_v36 = vadd.f32 %v379_v2, %v104_v21  ;;  %v108_v37 = vmul.f32 %v374_v1, %v40_v26  ;;  %v233_v39 = vmax.f32 %v169_v24, 0.0  ;;  %v173_v40 = vadd.f32 %v379_v2, %v105_v25  ;;  %v55_v24 = vld [vmem:[%s893_s0 + $0x148] sm:$0xff] }
  0x15   :  { %290 = vst [vmem:[%s896_s3 + $0x60] sm:$0xff] %v226_v11  ;;  %v109_v41 = vmul.f32 %v374_v1, %v41_v30  ;;  %v234_v43 = vmax.f32 %v170_v28, 0.0  ;;  %v174_v44 = vadd.f32 %v379_v2, %v106_v29  ;;  %v110_v45 = vmul.f32 %v374_v1, %v42_v34  ;;  %v56_v28 = vld [vmem:[%s893_s0 + $0x150] sm:$0xff] }
  0x16   :  { %291 = vst [vmem:[%s896_s3 + $0x68] sm:$0xff] %v227_v15  ;;  %v235_v47 = vmax.f32 %v171_v32, 0.0  ;;  %v175_v48 = vadd.f32 %v379_v2, %v107_v33  ;;  %v111_v49 = vmul.f32 %v374_v1, %v43_v38  ;;  %v236_v51 = vmax.f32 %v172_v36, 0.0  ;;  %v57_v32 = vld [vmem:[%s893_s0 + $0x158] sm:$0xff]  ;;  %v58_v36 = vld [vmem:[%s893_s0 + $0x160] sm:$0xff] }
  0x17   :  { %292 = vst [vmem:[%s896_s3 + $0x70] sm:$0xff] %v228_v19  ;;  %v176_v52 = vadd.f32 %v379_v2, %v108_v37  ;;  %v112_v53 = vmul.f32 %v374_v1, %v44_v42  ;;  %v237_v55 = vmax.f32 %v173_v40, 0.0  ;;  %v177_v56 = vadd.f32 %v379_v2, %v109_v41  ;;  %v59_v40 = vld [vmem:[%s893_s0 + $0x168] sm:$0xff] }
  0x18   :  { %293 = vst [vmem:[%s896_s3 + $0x78] sm:$0xff] %v229_v23  ;;  %v113_v57 = vmul.f32 %v374_v1, %v45_v46  ;;  %v238_v59 = vmax.f32 %v174_v44, 0.0  ;;  %v178_v60 = vadd.f32 %v379_v2, %v110_v45  ;;  %v114_v61 = vmul.f32 %v374_v1, %v46_v50  ;;  %v60_v44 = vld [vmem:[%s893_s0 + $0x170] sm:$0xff] }
  0x19   :  { %294 = vst [vmem:[%s896_s3 + $0x80] sm:$0xff] %v230_v27  ;;  %v239_v63 = vmax.f32 %v175_v48, 0.0  ;;  %v179_v0 = vadd.f32 %v379_v2, %v111_v49  ;;  %v115_v3 = vmul.f32 %v374_v1, %v47_v54  ;;  %v240_v5 = vmax.f32 %v176_v52, 0.0  ;;  %v61_v48 = vld [vmem:[%s893_s0 + $0x178] sm:$0xff]  ;;  %v62_v52 = vld [vmem:[%s893_s0 + $0x180] sm:$0xff] }
  0x1a   :  { %295 = vst [vmem:[%s896_s3 + $0x88] sm:$0xff] %v231_v31  ;;  %v180_v6 = vadd.f32 %v379_v2, %v112_v53  ;;  %v116_v7 = vmul.f32 %v374_v1, %v48_v58  ;;  %v241_v9 = vmax.f32 %v177_v56, 0.0  ;;  %v181_v10 = vadd.f32 %v379_v2, %v113_v57  ;;  %v63_v56 = vld [vmem:[%s893_s0 + $0x188] sm:$0xff] }
  0x1b   :  { %296 = vst [vmem:[%s896_s3 + $0x90] sm:$0xff] %v232_v35  ;;  %v117_v11 = vmul.f32 %v374_v1, %v49_v62  ;;  %v242_v13 = vmax.f32 %v178_v60, 0.0  ;;  %v182_v14 = vadd.f32 %v379_v2, %v114_v61  ;;  %v118_v15 = vmul.f32 %v374_v1, %v50_v4  ;;  %v64_v60 = vld [vmem:[%s893_s0 + $0x190] sm:$0xff] }
  0x1c   :  { %297 = vst [vmem:[%s896_s3 + $0x98] sm:$0xff] %v233_v39  ;;  %v243_v17 = vmax.f32 %v179_v0, 0.0  ;;  %v183_v18 = vadd.f32 %v379_v2, %v115_v3  ;;  %v119_v19 = vmul.f32 %v374_v1, %v51_v8  ;;  %v244_v21 = vmax.f32 %v180_v6, 0.0  ;;  %v65_v0 = vld [vmem:[%s893_s0 + $0x198] sm:$0xff] }
  0x1d   :  { %298 = vst [vmem:[%s896_s3 + $0xa0] sm:$0xff] %v234_v43  ;;  %v184_v22 = vadd.f32 %v379_v2, %v116_v7  ;;  %v120_v23 = vmul.f32 %v374_v1, %v52_v12  ;;  %v245_v25 = vmax.f32 %v181_v10, 0.0  ;;  %v185_v26 = vadd.f32 %v379_v2, %v117_v11  ;;  %v77_v3 = vld [vmem:[%s893_s0 + $0x1f8] sm:$0xff]  ;;  %v66_v7 = vld [vmem:[%s893_s0 + $0x1a0] sm:$0xff]  ;;  %v67_v11 = vld [vmem:[%s893_s0 + $0x1a8] sm:$0xff] }
  0x1e   :  { %299 = vst [vmem:[%s896_s3 + $0xa8] sm:$0xff] %v235_v47  ;;  %v121_v27 = vmul.f32 %v374_v1, %v53_v16  ;;  %v246_v29 = vmax.f32 %v182_v14, 0.0  ;;  %v186_v30 = vadd.f32 %v379_v2, %v118_v15  ;;  %v122_v31 = vmul.f32 %v374_v1, %v54_v20  ;;  %v68_v15 = vld [vmem:[%s893_s0 + $0x1b0] sm:$0xff]  ;;  %v69_v20 = vld [vmem:[%s893_s0 + $0x1b8] sm:$0xff] }
  0x1f   :  { %300 = vst [vmem:[%s896_s3 + $0xb0] sm:$0xff] %v236_v51  ;;  %v247_v33 = vmax.f32 %v183_v18, 0.0  ;;  %v187_v34 = vadd.f32 %v379_v2, %v119_v19  ;;  %v123_v35 = vmul.f32 %v374_v1, %v55_v24  ;;  %v248_v37 = vmax.f32 %v184_v22, 0.0  ;;  %v70_v24 = vld [vmem:[%s893_s0 + $0x1c0] sm:$0xff] }
  0x20   :  { %301 = vst [vmem:[%s896_s3 + $0xb8] sm:$0xff] %v237_v55  ;;  %v188_v38 = vadd.f32 %v379_v2, %v120_v23  ;;  %v124_v39 = vmul.f32 %v374_v1, %v56_v28  ;;  %v249_v41 = vmax.f32 %v185_v26, 0.0  ;;  %v189_v42 = vadd.f32 %v379_v2, %v121_v27 }
  0x21   :  { %302 = vst [vmem:[%s896_s3 + $0xc0] sm:$0xff] %v238_v59  ;;  %v125_v43 = vmul.f32 %v374_v1, %v57_v32  ;;  %v250_v45 = vmax.f32 %v186_v30, 0.0  ;;  %v190_v46 = vadd.f32 %v379_v2, %v122_v31  ;;  %v126_v47 = vmul.f32 %v374_v1, %v58_v36 }
  0x22   :  { %303 = vst [vmem:[%s896_s3 + $0xc8] sm:$0xff] %v239_v63  ;;  %v251_v49 = vmax.f32 %v187_v34, 0.0  ;;  %v191_v50 = vadd.f32 %v379_v2, %v123_v35  ;;  %v127_v51 = vmul.f32 %v374_v1, %v59_v40  ;;  %v252_v53 = vmax.f32 %v188_v38, 0.0 }
  0x23   :  { %304 = vst [vmem:[%s896_s3 + $0xd0] sm:$0xff] %v240_v5  ;;  %v192_v54 = vadd.f32 %v379_v2, %v124_v39  ;;  %v128_v55 = vmul.f32 %v374_v1, %v60_v44  ;;  %v253_v57 = vmax.f32 %v189_v42, 0.0  ;;  %v193_v58 = vadd.f32 %v379_v2, %v125_v43 }
  0x24   :  { %305 = vst [vmem:[%s896_s3 + $0xd8] sm:$0xff] %v241_v9  ;;  %v129_v59 = vmul.f32 %v374_v1, %v61_v48  ;;  %v254_v61 = vmax.f32 %v190_v46, 0.0  ;;  %v194_v62 = vadd.f32 %v379_v2, %v126_v47  ;;  %v130_v63 = vmul.f32 %v374_v1, %v62_v52 }
  0x25   :  { %306 = vst [vmem:[%s896_s3 + $0xe0] sm:$0xff] %v242_v13  ;;  %v255_v4 = vmax.f32 %v191_v50, 0.0  ;;  %v195_v5 = vadd.f32 %v379_v2, %v127_v51  ;;  %v131_v6 = vmul.f32 %v374_v1, %v63_v56  ;;  %v256_v8 = vmax.f32 %v192_v54, 0.0 }
  0x26   :  { %307 = vst [vmem:[%s896_s3 + $0xe8] sm:$0xff] %v243_v17  ;;  %v196_v9 = vadd.f32 %v379_v2, %v128_v55  ;;  %v132_v10 = vmul.f32 %v374_v1, %v64_v60  ;;  %v257_v12 = vmax.f32 %v193_v58, 0.0  ;;  %v197_v13 = vadd.f32 %v379_v2, %v129_v59 }
  0x27   :  { %308 = vst [vmem:[%s896_s3 + $0xf0] sm:$0xff] %v244_v21  ;;  %v133_v14 = vmul.f32 %v374_v1, %v65_v0  ;;  %v145_v16 = vmul.f32 %v374_v1, %v77_v3  ;;  %v258_v17 = vmax.f32 %v194_v62, 0.0  ;;  %v198_v18 = vadd.f32 %v379_v2, %v130_v63 }
  0x28   :  { %309 = vst [vmem:[%s896_s3 + $0xf8] sm:$0xff] %v245_v25  ;;  %v134_v19 = vmul.f32 %v374_v1, %v66_v7  ;;  %v259_v21 = vmax.f32 %v195_v5, 0.0  ;;  %v199_v22 = vadd.f32 %v379_v2, %v131_v6  ;;  %v135_v23 = vmul.f32 %v374_v1, %v67_v11 }
  0x29   :  { %310 = vst [vmem:[%s896_s3 + $0x100] sm:$0xff] %v246_v29  ;;  %v784_v25 = vadd.f32 %v379_v2, %v145_v16  ;;  %v260_v26 = vmax.f32 %v196_v9, 0.0  ;;  %v200_v27 = vadd.f32 %v379_v2, %v132_v10  ;;  %v136_v28 = vmul.f32 %v374_v1, %v68_v15  ;;  %v71_v29 = vld [vmem:[%s893_s0 + $0x1c8] sm:$0xff] }
  0x2a   :  { %311 = vst [vmem:[%s896_s3 + $0x108] sm:$0xff] %v247_v33  ;;  %v261_v30 = vmax.f32 %v197_v13, 0.0  ;;  %v201_v31 = vadd.f32 %v379_v2, %v133_v14  ;;  %v137_v32 = vmul.f32 %v374_v1, %v69_v20  ;;  %v72_v33 = vld [vmem:[%s893_s0 + $0x1d0] sm:$0xff]  ;;  %v262_v34 = vmax.f32 %v198_v18, 0.0 }
  0x2b   :  { %312 = vst [vmem:[%s896_s3 + $0x110] sm:$0xff] %v248_v37  ;;  %v202_v35 = vadd.f32 %v379_v2, %v134_v19  ;;  %v138_v36 = vmul.f32 %v374_v1, %v70_v24  ;;  %v73_v37 = vld [vmem:[%s893_s0 + $0x1d8] sm:$0xff]  ;;  %v263_v38 = vmax.f32 %v199_v22, 0.0  ;;  %v203_v39 = vadd.f32 %v379_v2, %v135_v23 }
  0x2c   :  { %313 = vst [vmem:[%s896_s3 + $0x118] sm:$0xff] %v249_v41  ;;  %v139_v40 = vmul.f32 %v374_v1, %v71_v29  ;;  %v74_v41 = vld [vmem:[%s893_s0 + $0x1e0] sm:$0xff]  ;;  %v264_v42 = vmax.f32 %v200_v27, 0.0  ;;  %v204_v43 = vadd.f32 %v379_v2, %v136_v28  ;;  %v140_v44 = vmul.f32 %v374_v1, %v72_v33 }
  0x2d   :  { %314 = vst [vmem:[%s896_s3 + $0x120] sm:$0xff] %v250_v45  ;;  %v75_v45 = vld [vmem:[%s893_s0 + $0x1e8] sm:$0xff]  ;;  %v265_v46 = vmax.f32 %v201_v31, 0.0  ;;  %v205_v47 = vadd.f32 %v379_v2, %v137_v32  ;;  %v141_v48 = vmul.f32 %v374_v1, %v73_v37  ;;  %v266_v50 = vmax.f32 %v202_v35, 0.0 }
  0x2e   :  { %315 = vst [vmem:[%s896_s3 + $0x128] sm:$0xff] %v251_v49  ;;  %v76_v49 = vld [vmem:[%s893_s0 + $0x1f0] sm:$0xff]  ;;  %v206_v51 = vadd.f32 %v379_v2, %v138_v36  ;;  %v142_v52 = vmul.f32 %v374_v1, %v74_v41  ;;  %v207_v54 = vadd.f32 %v379_v2, %v139_v40  ;;  %v143_v55 = vmul.f32 %v374_v1, %v75_v45 }
  0x2f   :  { %316 = vst [vmem:[%s896_s3 + $0x130] sm:$0xff] %v252_v53  ;;  %v267_v53 = vmax.f32 %v203_v39, 0.0  ;;  %v268_v56 = vmax.f32 %v204_v43, 0.0  ;;  %v144_v58 = vmul.f32 %v374_v1, %v76_v49  ;;  %v269_v59 = vmax.f32 %v205_v47, 0.0 }
  0x30   :  { %317 = vst [vmem:[%s896_s3 + $0x138] sm:$0xff] %v253_v57  ;;  %v208_v57 = vadd.f32 %v379_v2, %v140_v44  ;;  %v209_v60 = vadd.f32 %v379_v2, %v141_v48  ;;  %v210_v62 = vadd.f32 %v379_v2, %v142_v52  ;;  %v271_v63 = vmax.f32 %v207_v54, 0.0 }
  0x31   :  { %318 = vst [vmem:[%s896_s3 + $0x140] sm:$0xff] %v254_v61  ;;  %v270_v61 = vmax.f32 %v206_v51, 0.0  ;;  %v211_v1 = vadd.f32 %v379_v2, %v143_v55  ;;  %v212_v3 = vadd.f32 %v379_v2, %v144_v58  ;;  %v277_v7 = vmax.f32 %v784_v25, 0.0 }
  0x32   :  { %319 = vst [vmem:[%s896_s3 + $0x148] sm:$0xff] %v255_v4  ;;  %v272_v0 = vmax.f32 %v208_v57, 0.0  ;;  %v273_v4 = vmax.f32 %v209_v60, 0.0  ;;  %v274_v5 = vmax.f32 %v210_v62, 0.0 }
  0x33   :  { %320 = vst [vmem:[%s896_s3 + $0x150] sm:$0xff] %v256_v8  ;;  %v275_v6 = vmax.f32 %v211_v1, 0.0  ;;  %v276_v2 = vmax.f32 %v212_v3, 0.0 }
  0x34   :  { %321 = vst [vmem:[%s896_s3 + $0x158] sm:$0xff] %v257_v12 }
  0x35   :  { %322 = vst [vmem:[%s896_s3 + $0x160] sm:$0xff] %v258_v17 }
  0x36   :  { %323 = vst [vmem:[%s896_s3 + $0x168] sm:$0xff] %v259_v21 }
  0x37   :  { %324 = vst [vmem:[%s896_s3 + $0x170] sm:$0xff] %v260_v26 }
  0x38   :  { %325 = vst [vmem:[%s896_s3 + $0x178] sm:$0xff] %v261_v30 }
  0x39   :  { %326 = vst [vmem:[%s896_s3 + $0x180] sm:$0xff] %v262_v34 }
  0x3a   :  { %327 = vst [vmem:[%s896_s3 + $0x188] sm:$0xff] %v263_v38 }
  0x3b   :  { %328 = vst [vmem:[%s896_s3 + $0x190] sm:$0xff] %v264_v42 }
  0x3c   :  { %329 = vst [vmem:[%s896_s3 + $0x198] sm:$0xff] %v265_v46 }
  0x3d   :  { %330 = vst [vmem:[%s896_s3 + $0x1a0] sm:$0xff] %v266_v50 }
  0x3e   :  { %331 = vst [vmem:[%s896_s3 + $0x1a8] sm:$0xff] %v267_v53 }
  0x3f   :  { %332 = vst [vmem:[%s896_s3 + $0x1b0] sm:$0xff] %v268_v56 }
  0x40   :  { %333 = vst [vmem:[%s896_s3 + $0x1b8] sm:$0xff] %v269_v59 }
  0x41   :  { %334 = vst [vmem:[%s896_s3 + $0x1c0] sm:$0xff] %v270_v61 }
  0x42   :  { %335 = vst [vmem:[%s896_s3 + $0x1c8] sm:$0xff] %v271_v63 }
  0x43   :  { %336 = vst [vmem:[%s896_s3 + $0x1d0] sm:$0xff] %v272_v0 }
  0x44   :  { %337 = vst [vmem:[%s896_s3 + $0x1d8] sm:$0xff] %v273_v4 }
  0x45   :  { %338 = vst [vmem:[%s896_s3 + $0x1e0] sm:$0xff] %v274_v5 }
  0x46   :  { %339 = vst [vmem:[%s896_s3 + $0x1e8] sm:$0xff] %v275_v6 }
  0x47   :  { %340 = vst [vmem:[%s896_s3 + $0x1f0] sm:$0xff] %v276_v2 }
  0x48   :  { %341 = vst [vmem:[%s896_s3 + $0x1f8] sm:$0xff] %v277_v7 }

// kernel: resnet_generator_forward.19
= control target key start
LH: loop header
LB: loop body
LE: loop exit
PB: predicated region body
PF: predicated region fallthrough
CT: control target
= control target key end

     0   :  { %vm546_vm0 = vcmask 1040384   ;;  %vm547_vm1 = vcmask 1041408   ;;  %v1971_v2 = vmov 65535   ;;  %vm449_vm2 = vcmask 154624   ;;  %s2915_s1 = inlined_call_operand.vmem [shape: bf16[147,128], index: 1, kind: input, shape index: {}]   ;;  %s2916_s0 = inlined_call_operand.vmem [shape: bf16[512,147], index: 0, kind: input, shape index: {}]   ;;  %s2917_s2 = inlined_call_operand.vmem [shape: f32[1,128], index: 2, kind: input, shape index: {}]   ;;  %s2918_s3 = inlined_call_operand.vmem [shape: f32[512,128], index: 3, kind: output, shape index: {0}]   ;;  %s2919_s4 = inlined_call_operand.vmem [shape: f32[8,128], index: 4, kind: output, shape index: {1}]  }
   0x1   :  { %v1956_v0 = vld [vmem:[%s2915_s1 + $0x38] sm:$0xff]  ;;  %v99_v1 = vld [vmem:[%s2915_s1 + $0x48] sm:$0x3]  ;;  %v548_v3 = vsel %vm546_vm0, 4294967295, %v1971_v2  ;;  %v1955_v5 = vld [vmem:[%s2915_s1 + $0x30] sm:$0xff] }
   0x2   :  { %v429_v4 = vunpack.c.l.b16 %v99_v1  ;;  %553 = vmatpush.bf16.msra.mxu0 %v1956_v0  ;;  %v549_v6 = vsel %vm547_vm1, %v548_v3, 0  ;;  %1958 = vmatpush.bf16.msra.mxu2 %v1956_v0  ;;  %v1954_v9 = vld [vmem:[%s2915_s1 + $0x28] sm:$0xff]  ;;  %v1957_v10 = vld [vmem:[%s2915_s1 + $0x40] sm:$0xff]  ;;  %v1952_v15 = vld [vmem:[%s2915_s1 + $0x18] sm:$0xff] }
   0x3   :  { %v1885_v11 = vld [vmem:[%s2916_s0 + $0x4] sm:$0xf]  ;;  %v1565_v12 = vld [vmem:[%s2916_s0 + $0x8] sm:$0xf0]  ;;  %v1951_v16 = vld [vmem:[%s2915_s1 + $0x10] sm:$0xff] }
   0x4   :  { %v439_v7 = vpack.c.b16 %v429_v4, %v429_v4  ;;  %v1568_v13 = vor.u32 %v1885_v11, %v1565_v12  ;;  %v1953_v14 = vld [vmem:[%s2915_s1 + $0x20] sm:$0xff]  ;;  %v1950_v17 = vld [vmem:[%s2915_s1 + $0x8] sm:$0xff]  ;;  %v1887_v18 = vld [vmem:[%s2916_s0 + $0x14] sm:$0xf] }
   0x5   :  { %v1573_v19 = vld [vmem:[%s2916_s0 + $0x18] sm:$0xf0]  ;;  %v1949_v21 = vld [vmem:[%s2915_s1] sm:$0xff]  ;;  %v1886_v23 = vld [vmem:[%s2916_s0 + $0x4] sm:$0xf0] }
   0x6   :  { %v551_v8 = vand.u32 %v549_v6, %v439_v7  ;;  %554 = vmatpush.bf16.msra.mxu0 %v1955_v5  ;;  %1959 = vmatpush.bf16.msra.mxu2 %v1955_v5  ;;  %v1576_v20 = vor.u32 %v1887_v18, %v1573_v19  ;;  %v1563_v22 = vld [vmem:[%s2916_s0] sm:$0xf]  ;;  %v1889_v25 = vld [vmem:[%s2916_s0 + $0x24] sm:$0xf]  ;;  %v1581_v26 = vld [vmem:[%s2916_s0 + $0x28] sm:$0xf0] }
   0x7   :  { %v1564_v24 = vor.u32 %v1886_v23, %v1563_v22  ;;  %v1584_v27 = vor.u32 %v1889_v25, %v1581_v26  ;;  %v1571_v28 = vld [vmem:[%s2916_s0 + $0x10] sm:$0xf]  ;;  %v1888_v29 = vld [vmem:[%s2916_s0 + $0x14] sm:$0xf0]  ;;  %v1691_v31 = vld [vmem:[%s2916_s0 + $0x100] sm:$0xf] }
   0x8   :  { %728 = vmatpush.bf16.msra.mxu1 %v551_v8  ;;  %1966 = vmatpush.bf16.msra.mxu3 %v551_v8  ;;  %v1572_v30 = vor.u32 %v1888_v29, %v1571_v28  ;;  %v1918_v32 = vld [vmem:[%s2916_s0 + $0x104] sm:$0xf0]  ;;  %v1891_v34 = vld [vmem:[%s2916_s0 + $0x34] sm:$0xf]  ;;  %v1589_v35 = vld [vmem:[%s2916_s0 + $0x38] sm:$0xf0] }
   0x9   :  { %v1692_v33 = vor.u32 %v1918_v32, %v1691_v31  ;;  %v1592_v36 = vor.u32 %v1891_v34, %v1589_v35  ;;  %v1579_v37 = vld [vmem:[%s2916_s0 + $0x20] sm:$0xf]  ;;  %v1890_v38 = vld [vmem:[%s2916_s0 + $0x24] sm:$0xf0]  ;;  %v1699_v40 = vld [vmem:[%s2916_s0 + $0x110] sm:$0xf] }
   0xa   :  { %555 = vmatpush.bf16.msra.mxu0 %v1954_v9  ;;  %1960 = vmatpush.bf16.msra.mxu2 %v1954_v9  ;;  %v1580_v39 = vor.u32 %v1890_v38, %v1579_v37  ;;  %v1920_v41 = vld [vmem:[%s2916_s0 + $0x114] sm:$0xf0]  ;;  %v1919_v43 = vld [vmem:[%s2916_s0 + $0x114] sm:$0xf]  ;;  %v1701_v44 = vld [vmem:[%s2916_s0 + $0x118] sm:$0xf0] }
   0xb   :  { %v1700_v42 = vor.u32 %v1920_v41, %v1699_v40  ;;  %v1704_v45 = vor.u32 %v1919_v43, %v1701_v44  ;;  %v1893_v46 = vld [vmem:[%s2916_s0 + $0x44] sm:$0xf]  ;;  %v1597_v47 = vld [vmem:[%s2916_s0 + $0x48] sm:$0xf0]  ;;  %v1587_v49 = vld [vmem:[%s2916_s0 + $0x30] sm:$0xf] }
   0xc   :  { %729 = vmatpush.bf16.msra.mxu1 %v1957_v10  ;;  %1967 = vmatpush.bf16.msra.mxu3 %v1957_v10  ;;  %v1600_v48 = vor.u32 %v1893_v46, %v1597_v47  ;;  %v1892_v50 = vld [vmem:[%s2916_s0 + $0x34] sm:$0xf0]  ;;  %v1707_v52 = vld [vmem:[%s2916_s0 + $0x120] sm:$0xf]  ;;  %v1922_v53 = vld [vmem:[%s2916_s0 + $0x124] sm:$0xf0] }
   0xd   :  { %v1588_v51 = vor.u32 %v1892_v50, %v1587_v49  ;;  %v1708_v54 = vor.u32 %v1922_v53, %v1707_v52  ;;  %v1921_v55 = vld [vmem:[%s2916_s0 + $0x124] sm:$0xf]  ;;  %v1709_v56 = vld [vmem:[%s2916_s0 + $0x128] sm:$0xf0]  ;;  %v1895_v58 = vld [vmem:[%s2916_s0 + $0x54] sm:$0xf] }
   0xe   :  { %556 = vmatpush.bf16.msra.mxu0 %v1953_v14  ;;  %1961 = vmatpush.bf16.msra.mxu2 %v1953_v14  ;;  %v1712_v57 = vor.u32 %v1921_v55, %v1709_v56  ;;  %v1605_v59 = vld [vmem:[%s2916_s0 + $0x58] sm:$0xf0]  ;;  %v1595_v61 = vld [vmem:[%s2916_s0 + $0x40] sm:$0xf]  ;;  %v1894_v62 = vld [vmem:[%s2916_s0 + $0x44] sm:$0xf0] }
   0xf   :  { %1853 = vmatmul.msk.bf16.vlgmr.msra.gmra.mxu1 %vm449_vm2, %v1568_v13  ;;  %1870 = vmatmul.msk.bf16.vlgmr.msra.gmra.mxu3 %vm449_vm2, %v1704_v45  ;;  %v1608_v60 = vor.u32 %v1895_v58, %v1605_v59  ;;  %v1596_v63 = vor.u32 %v1894_v62, %v1595_v61  ;;  %v1715_v0 = vld [vmem:[%s2916_s0 + $0x130] sm:$0xf]  ;;  %v1924_v1 = vld [vmem:[%s2916_s0 + $0x134] sm:$0xf0]  ;;  %v1923_v3 = vld [vmem:[%s2916_s0 + $0x134] sm:$0xf] }
  0x10   :  { %v1716_v2 = vor.u32 %v1924_v1, %v1715_v0  ;;  %v1717_v4 = vld [vmem:[%s2916_s0 + $0x138] sm:$0xf0]  ;;  %v1897_v6 = vld [vmem:[%s2916_s0 + $0x64] sm:$0xf]  ;;  %v1613_v7 = vld [vmem:[%s2916_s0 + $0x68] sm:$0xf0] }
  0x11   :  { %v1720_v5 = vor.u32 %v1923_v3, %v1717_v4  ;;  %v1616_v8 = vor.u32 %v1897_v6, %v1613_v7  ;;  %v1603_v9 = vld [vmem:[%s2916_s0 + $0x50] sm:$0xf]  ;;  %v1896_v10 = vld [vmem:[%s2916_s0 + $0x54] sm:$0xf0]  ;;  %v1723_v12 = vld [vmem:[%s2916_s0 + $0x140] sm:$0xf] }
  0x12   :  { %557 = vmatpush.bf16.msra.mxu0 %v1952_v15  ;;  %1962 = vmatpush.bf16.msra.mxu2 %v1952_v15  ;;  %v1604_v11 = vor.u32 %v1896_v10, %v1603_v9  ;;  %v1926_v13 = vld [vmem:[%s2916_s0 + $0x144] sm:$0xf0]  ;;  %v1925_v15 = vld [vmem:[%s2916_s0 + $0x144] sm:$0xf]  ;;  %v1899_v18 = vld [vmem:[%s2916_s0 + $0x74] sm:$0xf] }
  0x13   :  { %v1724_v14 = vor.u32 %v1926_v13, %v1723_v12  ;;  %v1621_v19 = vld [vmem:[%s2916_s0 + $0x78] sm:$0xf0]  ;;  %v1898_v22 = vld [vmem:[%s2916_s0 + $0x64] sm:$0xf0]  ;;  %v1928_v25 = vld [vmem:[%s2916_s0 + $0x154] sm:$0xf0] }
  0x14   :  { %v1733_v28 = vld [vmem:[%s2916_s0 + $0x158] sm:$0xf0]  ;;  %v1629_v31 = vld [vmem:[%s2916_s0 + $0x88] sm:$0xf0]  ;;  %v1900_v34 = vld [vmem:[%s2916_s0 + $0x74] sm:$0xf0] }
  0x15   :  { %v1739_v37 = vld [vmem:[%s2916_s0 + $0x160] sm:$0xf]  ;;  %v1930_v38 = vld [vmem:[%s2916_s0 + $0x164] sm:$0xf0]  ;;  %v1929_v40 = vld [vmem:[%s2916_s0 + $0x164] sm:$0xf] }
  0x16   :  { %558 = vmatpush.bf16.msra.mxu0 %v1951_v16  ;;  %1963 = vmatpush.bf16.msra.mxu2 %v1951_v16  ;;  %v1725_v16 = vld [vmem:[%s2916_s0 + $0x148] sm:$0xf0]  ;;  %v1903_v44 = vld [vmem:[%s2916_s0 + $0x94] sm:$0xf]  ;;  %v1637_v45 = vld [vmem:[%s2916_s0 + $0x98] sm:$0xf0] }
  0x17   :  { %v1741_v41 = vld [vmem:[%s2916_s0 + $0x168] sm:$0xf0]  ;;  %v1640_v46 = vor.u32 %v1903_v44, %v1637_v45  ;;  %v1627_v47 = vld [vmem:[%s2916_s0 + $0x80] sm:$0xf]  ;;  %v1932_v55 = vld [vmem:[%s2916_s0 + $0x174] sm:$0xf0] }
  0x18   :  { %v1744_v43 = vor.u32 %v1929_v40, %v1741_v41  ;;  %v2237_v50 = vld [vmem:[%s2917_s2] ss:$0 sm:$0xff]  ;;  %v1931_v58 = vld [vmem:[%s2916_s0 + $0x174] sm:$0xf]  ;;  %v1749_v59 = vld [vmem:[%s2916_s0 + $0x178] sm:$0xf0] }
  0x19   :  { %v1752_v61 = vor.u32 %v1931_v58, %v1749_v59  ;;  %v1905_v0 = vld [vmem:[%s2916_s0 + $0xa4] sm:$0xf]  ;;  %v1645_v1 = vld [vmem:[%s2916_s0 + $0xa8] sm:$0xf0]  ;;  %v1635_v4 = vld [vmem:[%s2916_s0 + $0x90] sm:$0xf] }
  0x1a   :  { %559 = vmatpush.bf16.msra.mxu0 %v1950_v17  ;;  %1964 = vmatpush.bf16.msra.mxu2 %v1950_v17  ;;  %v1728_v17 = vor.u32 %v1925_v15, %v1725_v16  ;;  %v1648_v3 = vor.u32 %v1905_v0, %v1645_v1  ;;  %v1934_v15 = vld [vmem:[%s2916_s0 + $0x184] sm:$0xf0]  ;;  %v1661_v58 = vld [vmem:[%s2916_s0 + $0xc8] sm:$0xf0] }
  0x1e   :  { %560 = vmatpush.bf16.msra.mxu0 %v1949_v21  ;;  %1965 = vmatpush.bf16.msra.mxu2 %v1949_v21  ;;  %v1611_v21 = vld [vmem:[%s2916_s0 + $0x60] sm:$0xf] }
  0x1f   :  { %1854 = vmatmul.msk.bf16.gmra.mxu1 %vm449_vm2, %v1576_v20  ;;  %1871 = vmatmul.msk.bf16.gmra.mxu3 %vm449_vm2, %v1712_v57  ;;  %v1624_v20 = vor.u32 %v1899_v18, %v1621_v19  ;;  %v1612_v23 = vor.u32 %v1898_v22, %v1611_v21  ;;  %v1933_v18 = vld [vmem:[%s2916_s0 + $0x184] sm:$0xf]  ;;  %v1757_v19 = vld [vmem:[%s2916_s0 + $0x188] sm:$0xf0] }
  0x21   :  { %561 = vmatmul.bf16.vlgmr.msra.gmra.mxu0 %v1564_v24  ;;  %641 = vmatmul.bf16.vlgmr.msra.gmra.mxu2 %v1692_v33  ;;  %v1731_v24 = vld [vmem:[%s2916_s0 + $0x150] sm:$0xf] }
  0x22   :  { %v1732_v26 = vor.u32 %v1928_v25, %v1731_v24  ;;  %v1619_v33 = vld [vmem:[%s2916_s0 + $0x70] sm:$0xf] }
  0x2f   :  { %1855 = vmatmul.msk.bf16.gmra.mxu1 %vm449_vm2, %v1584_v27  ;;  %1872 = vmatmul.msk.bf16.gmra.mxu3 %vm449_vm2, %v1720_v5  ;;  %v1927_v27 = vld [vmem:[%s2916_s0 + $0x154] sm:$0xf]  ;;  %v1904_v5 = vld [vmem:[%s2916_s0 + $0x94] sm:$0xf0] }
  0x30   :  { %v1736_v29 = vor.u32 %v1927_v27, %v1733_v28  ;;  %v1907_v28 = vld [vmem:[%s2916_s0 + $0xb4] sm:$0xf] }
  0x31   :  { %566 = vmatmul.bf16.gmra.mxu0 %v1572_v30  ;;  %646 = vmatmul.bf16.gmra.mxu2 %v1700_v42  ;;  %v1901_v30 = vld [vmem:[%s2916_s0 + $0x84] sm:$0xf] }
  0x32   :  { %v1632_v32 = vor.u32 %v1901_v30, %v1629_v31 }
  0x3f   :  { %1856 = vmatmul.msk.bf16.gmra.mxu1 %vm449_vm2, %v1592_v36  ;;  %1873 = vmatmul.msk.bf16.gmra.mxu3 %vm449_vm2, %v1728_v17  ;;  %v1620_v36 = vor.u32 %v1900_v34, %v1619_v33  ;;  %v1906_v33 = vld [vmem:[%s2916_s0 + $0xa4] sm:$0xf0] }
  0x41   :  { %571 = vmatmul.bf16.gmra.mxu0 %v1580_v39  ;;  %651 = vmatmul.bf16.gmra.mxu2 %v1708_v54  ;;  %v1740_v39 = vor.u32 %v1930_v38, %v1739_v37  ;;  %v1747_v54 = vld [vmem:[%s2916_s0 + $0x170] sm:$0xf] }
  0x42   :  { %v1748_v57 = vor.u32 %v1932_v55, %v1747_v54 }
  0x4f   :  { %1857 = vmatmul.msk.bf16.gmra.mxu1 %vm449_vm2, %v1600_v48  ;;  %1874 = vmatmul.msk.bf16.gmra.mxu3 %vm449_vm2, %v1736_v29  ;;  %v1902_v48 = vld [vmem:[%s2916_s0 + $0x84] sm:$0xf0]  ;;  %v1653_v29 = vld [vmem:[%s2916_s0 + $0xb8] sm:$0xf0] }
  0x50   :  { %v1656_v31 = vor.u32 %v1907_v28, %v1653_v29  ;;  %v1911_v28 = vld [vmem:[%s2916_s0 + $0xd4] sm:$0xf]  ;;  %v1669_v29 = vld [vmem:[%s2916_s0 + $0xd8] sm:$0xf0] }
  0x51   :  { %576 = vmatmul.bf16.gmra.mxu0 %v1588_v51  ;;  %656 = vmatmul.bf16.gmra.mxu2 %v1716_v2  ;;  %v1628_v51 = vor.u32 %v1902_v48, %v1627_v47  ;;  %v1765_v47 = vld [vmem:[%s2916_s0 + $0x198] sm:$0xf0] }
  0x5f   :  { %1858 = vmatmul.msk.bf16.gmra.mxu1 %vm449_vm2, %v1608_v60  ;;  %1875 = vmatmul.msk.bf16.gmra.mxu3 %vm449_vm2, %v1744_v43  ;;  %v1936_v43 = vld [vmem:[%s2916_s0 + $0x194] sm:$0xf0] }
  0x61   :  { %581 = vmatmul.bf16.gmra.mxu0 %v1596_v63  ;;  %661 = vmatmul.bf16.gmra.mxu2 %v1724_v14  ;;  %v1755_v14 = vld [vmem:[%s2916_s0 + $0x180] sm:$0xf] }
  0x62   :  { %v1756_v17 = vor.u32 %v1934_v15, %v1755_v14 }
  0x6f   :  { %1859 = vmatmul.msk.bf16.gmra.mxu1 %vm449_vm2, %v1616_v8  ;;  %1876 = vmatmul.msk.bf16.gmra.mxu3 %vm449_vm2, %v1752_v61 }
  0x71   :  { %586 = vmatmul.bf16.gmra.mxu0 %v1604_v11  ;;  %666 = vmatmul.bf16.gmra.mxu2 %v1732_v26  ;;  %v1636_v11 = vor.u32 %v1904_v5, %v1635_v4 }
  0x7f   :  { %1860 = vmatmul.msk.bf16.gmra.mxu1 %vm449_vm2, %v1624_v20 }
  0x81   :  { %591 = vmatmul.bf16.gmra.mxu0 %v1612_v23  ;;  %671 = vmatmul.bf16.gmra.mxu2 %v1740_v39  ;;  %v1760_v23 = vor.u32 %v1933_v18, %v1757_v19  ;;  %v1773_v18 = vld [vmem:[%s2916_s0 + $0x1a8] sm:$0xf0] }
  0x83   :  { %1877 = vmatmul.msk.bf16.gmra.mxu3 %vm449_vm2, %v1760_v23 }
  0x8c   :  { %v731_v35 = vpop.f32.mrf.mxu1 }
  0x8f   :  { %1861 = vmatmul.msk.bf16.gmra.mxu1 %vm449_vm2, %v1632_v32  ;;  %v1643_v32 = vld [vmem:[%s2916_s0 + $0xa0] sm:$0xf] }
  0x90   :  { %v1644_v38 = vor.u32 %v1906_v33, %v1643_v32  ;;  %v1672_v32 = vor.u32 %v1911_v28, %v1669_v29  ;;  %v1659_v33 = vld [vmem:[%s2916_s0 + $0xc0] sm:$0xf]  ;;  %v1789_v28 = vld [vmem:[%s2916_s0 + $0x1c8] sm:$0xf0] }
  0x91   :  { %596 = vmatmul.bf16.gmra.mxu0 %v1620_v36  ;;  %676 = vmatmul.bf16.gmra.mxu2 %v1748_v57  ;;  %v1909_v57 = vld [vmem:[%s2916_s0 + $0xc4] sm:$0xf] }
  0x92   :  { %v816_v59 = vpop.f32.mrf.mxu3  ;;  %v1664_v61 = vor.u32 %v1909_v57, %v1661_v58 }
  0x94   :  { %v733_v42 = vpop.f32.mrf.mxu1 }
  0x9c   :  { %v736_v49 = vpop.f32.mrf.mxu1 }
  0x9e   :  { %v562_v52 = vpop.f32.mrf.mxu0 }
  0x9f   :  { %1862 = vmatmul.msk.bf16.gmra.mxu1 %vm449_vm2, %v1640_v46  ;;  %v563_v53 = vadd.f32 %v2237_v50, %v562_v52  ;;  %v1935_v46 = vld [vmem:[%s2916_s0 + $0x194] sm:$0xf] }
  0xa0   :  { %v1768_v52 = vor.u32 %v1935_v46, %v1765_v47 }
  0xa1   :  { %v732_v56 = vadd.f32 %v731_v35, %v563_v53  ;;  %601 = vmatmul.bf16.gmra.mxu0 %v1628_v51  ;;  %681 = vmatmul.bf16.gmra.mxu2 %v1756_v17  ;;  %v1937_v17 = vld [vmem:[%s2916_s0 + $0x1a4] sm:$0xf] }
  0xa2   :  { %1878 = vmatmul.msk.bf16.gmra.mxu3 %vm449_vm2, %v1768_v52 }
  0xa3   :  { %891 = vst [vmem:[%s2918_s3] sm:$0xff] %v732_v56  ;;  %v1411_v6 = vmul.f32 %v732_v56, %v732_v56 }
  0xa4   :  { %v738_v60 = vpop.f32.mrf.mxu1  ;;  %v2291_v26 = vpop.f32.mrf.mxu2 }
  0xa6   :  { %v564_v62 = vpop.f32.mrf.mxu0 }
  0xa7   :  { %v565_v63 = vadd.f32 %v2237_v50, %v564_v62  ;;  %v1651_v62 = vld [vmem:[%s2916_s0 + $0xb0] sm:$0xf] }
  0xa9   :  { %v734_v2 = vadd.f32 %v733_v42, %v565_v63  ;;  %v1763_v42 = vld [vmem:[%s2916_s0 + $0x190] sm:$0xf]  ;;  %v1908_v63 = vld [vmem:[%s2916_s0 + $0xb4] sm:$0xf0] }
  0xaa   :  { %v1764_v45 = vor.u32 %v1936_v43, %v1763_v42  ;;  %v1652_v4 = vor.u32 %v1908_v63, %v1651_v62 }
  0xab   :  { %892 = vst [vmem:[%s2918_s3 + $0x8] sm:$0xff] %v734_v2  ;;  %v1342_v7 = vadd.f32 %v734_v2, %v732_v56  ;;  %v1412_v8 = vmul.f32 %v734_v2, %v734_v2 }
  0xac   :  { %v741_v9 = vpop.f32.mrf.mxu1  ;;  %v2310_v40 = vpop.f32.mrf.mxu2 }
  0xad   :  { %v1475_v10 = vadd.f32 %v1412_v8, %v1411_v6 }
  0xae   :  { %v567_v12 = vpop.f32.mrf.mxu0 }
  0xaf   :  { %1863 = vmatmul.msk.bf16.gmra.mxu1 %vm449_vm2, %v1648_v3  ;;  %v568_v13 = vadd.f32 %v2237_v50, %v567_v12  ;;  %v1771_v12 = vld [vmem:[%s2916_s0 + $0x1a0] sm:$0xf] }
  0xb1   :  { %v737_v16 = vadd.f32 %v736_v49, %v568_v13  ;;  %606 = vmatmul.bf16.gmra.mxu0 %v1636_v11  ;;  %686 = vmatmul.bf16.gmra.mxu2 %v1764_v45  ;;  %v818_v11 = vpop.f32.mrf.mxu3  ;;  %v1938_v13 = vld [vmem:[%s2916_s0 + $0x1a4] sm:$0xf0] }
  0xb3   :  { %893 = vst [vmem:[%s2918_s3 + $0x10] sm:$0xff] %v737_v16  ;;  %v1343_v20 = vadd.f32 %v1342_v7, %v737_v16  ;;  %v1413_v21 = vmul.f32 %v737_v16, %v737_v16  ;;  %v1772_v16 = vor.u32 %v1938_v13, %v1771_v12 }
  0xb4   :  { %v743_v22 = vpop.f32.mrf.mxu1  ;;  %v647_v55 = vpop.f32.mrf.mxu2 }
  0xb5   :  { %v1476_v24 = vadd.f32 %v1475_v10, %v1413_v21  ;;  %v648_v5 = vadd.f32 %v2237_v50, %v647_v55  ;;  %v1781_v55 = vld [vmem:[%s2916_s0 + $0x1b8] sm:$0xf0] }
  0xb6   :  { %v569_v25 = vpop.f32.mrf.mxu0 }
  0xb7   :  { %v570_v27 = vadd.f32 %v2237_v50, %v569_v25 }
  0xb9   :  { %v739_v30 = vadd.f32 %v738_v60, %v570_v27 }
  0xbb   :  { %894 = vst [vmem:[%s2918_s3 + $0x18] sm:$0xff] %v739_v30  ;;  %v1344_v34 = vadd.f32 %v1343_v20, %v739_v30  ;;  %v1414_v35 = vmul.f32 %v739_v30, %v739_v30  ;;  %v821_v30 = vpop.f32.mrf.mxu3 }
  0xbc   :  { %v746_v36 = vpop.f32.mrf.mxu1  ;;  %v649_v7 = vpop.f32.mrf.mxu2 }
  0xbd   :  { %v1477_v37 = vadd.f32 %v1476_v24, %v1414_v35  ;;  %v650_v10 = vadd.f32 %v2237_v50, %v649_v7 }
  0xbe   :  { %v572_v39 = vpop.f32.mrf.mxu0 }
  0xbf   :  { %1864 = vmatmul.msk.bf16.gmra.mxu1 %vm449_vm2, %v1656_v31  ;;  %v573_v41 = vadd.f32 %v2237_v50, %v572_v39  ;;  %v2361_v15 = vadd.f32 %v818_v11, %v650_v10 }
  0xc1   :  { %v742_v44 = vadd.f32 %v741_v9, %v573_v41  ;;  %611 = vmatmul.bf16.gmra.mxu0 %v1644_v38  ;;  %v2348_v9 = vadd.f32 %v816_v59, %v648_v5  ;;  %926 = vst [vmem:[%s2918_s3 + $0x118] sm:$0xff] %v2361_v15  ;;  %691 = vmatmul.bf16.gmra.mxu2 %v1772_v16  ;;  %v1667_v5 = vld [vmem:[%s2916_s0 + $0xd0] sm:$0xf] }
  0xc3   :  { %895 = vst [vmem:[%s2918_s3 + $0x20] sm:$0xff] %v742_v44  ;;  %v1345_v48 = vadd.f32 %v1344_v34, %v742_v44  ;;  %v1415_v49 = vmul.f32 %v742_v44, %v742_v44  ;;  %v1910_v34 = vld [vmem:[%s2916_s0 + $0xc4] sm:$0xf0]  ;;  %v823_v47 = vpop.f32.mrf.mxu3 }
  0xc4   :  { %v748_v51 = vpop.f32.mrf.mxu1  ;;  %925 = vst [vmem:[%s2918_s3 + $0x110] sm:$0xff] %v2348_v9  ;;  %v652_v25 = vpop.f32.mrf.mxu2  ;;  %v1660_v39 = vor.u32 %v1910_v34, %v1659_v33 }
  0xc5   :  { %v1478_v53 = vadd.f32 %v1477_v37, %v1415_v49  ;;  %v653_v41 = vadd.f32 %v2237_v50, %v652_v25  ;;  %v1940_v49 = vld [vmem:[%s2916_s0 + $0x1b4] sm:$0xf0] }
  0xc6   :  { %v574_v54 = vpop.f32.mrf.mxu0 }
  0xc7   :  { %v575_v56 = vadd.f32 %v2237_v50, %v574_v54  ;;  %v2396_v45 = vadd.f32 %v821_v30, %v653_v41  ;;  %v1939_v54 = vld [vmem:[%s2916_s0 + $0x1b4] sm:$0xf] }
  0xc8   :  { %v1784_v59 = vor.u32 %v1939_v54, %v1781_v55 }
  0xc9   :  { %v744_v60 = vadd.f32 %v743_v22, %v575_v56  ;;  %v1776_v22 = vor.u32 %v1937_v17, %v1773_v18  ;;  %927 = vst [vmem:[%s2918_s3 + $0x120] sm:$0xff] %v2396_v45 }
  0xcb   :  { %896 = vst [vmem:[%s2918_s3 + $0x28] sm:$0xff] %v744_v60  ;;  %v1346_v0 = vadd.f32 %v1345_v48, %v744_v60  ;;  %v1416_v1 = vmul.f32 %v744_v60, %v744_v60  ;;  %1879 = vmatmul.msk.bf16.gmra.mxu3 %vm449_vm2, %v1776_v22  ;;  %v1779_v48 = vld [vmem:[%s2916_s0 + $0x1b0] sm:$0xf]  ;;  %v1942_v22 = vld [vmem:[%s2916_s0 + $0x1c4] sm:$0xf0] }
  0xcc   :  { %v751_v2 = vpop.f32.mrf.mxu1  ;;  %v654_v43 = vpop.f32.mrf.mxu2 }
  0xcd   :  { %v1479_v3 = vadd.f32 %v1478_v53, %v1416_v1  ;;  %v655_v46 = vadd.f32 %v2237_v50, %v654_v43  ;;  %v1780_v53 = vor.u32 %v1940_v49, %v1779_v48  ;;  %v1677_v1 = vld [vmem:[%s2916_s0 + $0xe8] sm:$0xf0]  ;;  %v1675_v43 = vld [vmem:[%s2916_s0 + $0xe0] sm:$0xf] }
  0xce   :  { %v577_v6 = vpop.f32.mrf.mxu0 }
  0xcf   :  { %1865 = vmatmul.msk.bf16.gmra.mxu1 %vm449_vm2, %v1664_v61  ;;  %v578_v8 = vadd.f32 %v2237_v50, %v577_v6  ;;  %v2409_v52 = vadd.f32 %v823_v47, %v655_v46  ;;  %v1912_v6 = vld [vmem:[%s2916_s0 + $0xd4] sm:$0xf0] }
  0xd0   :  { %v1668_v12 = vor.u32 %v1912_v6, %v1667_v5 }
  0xd1   :  { %v747_v14 = vadd.f32 %v746_v36, %v578_v8  ;;  %616 = vmatmul.bf16.gmra.mxu0 %v1652_v4  ;;  %928 = vst [vmem:[%s2918_s3 + $0x128] sm:$0xff] %v2409_v52  ;;  %696 = vmatmul.bf16.gmra.mxu2 %v1780_v53 }
  0xd3   :  { %897 = vst [vmem:[%s2918_s3 + $0x30] sm:$0xff] %v747_v14  ;;  %v1347_v19 = vadd.f32 %v1346_v0, %v747_v14  ;;  %v1417_v20 = vmul.f32 %v747_v14, %v747_v14  ;;  %v1913_v0 = vld [vmem:[%s2916_s0 + $0xe4] sm:$0xf] }
  0xd4   :  { %v753_v21 = vpop.f32.mrf.mxu1  ;;  %v657_v62 = vpop.f32.mrf.mxu2  ;;  %v1680_v4 = vor.u32 %v1913_v0, %v1677_v1  ;;  %v1943_v1 = vld [vmem:[%s2916_s0 + $0x1d4] sm:$0xf] }
  0xd5   :  { %v1480_v23 = vadd.f32 %v1479_v3, %v1417_v20  ;;  %v658_v13 = vadd.f32 %v2237_v50, %v657_v62 }
  0xd6   :  { %v579_v24 = vpop.f32.mrf.mxu0 }
  0xd7   :  { %v580_v27 = vadd.f32 %v2237_v50, %v579_v24 }
  0xd9   :  { %v749_v31 = vadd.f32 %v748_v51, %v580_v27  ;;  %v1941_v27 = vld [vmem:[%s2916_s0 + $0x1c4] sm:$0xf] }
  0xdb   :  { %898 = vst [vmem:[%s2918_s3 + $0x38] sm:$0xff] %v749_v31  ;;  %v1348_v35 = vadd.f32 %v1347_v19, %v749_v31  ;;  %v1418_v36 = vmul.f32 %v749_v31, %v749_v31  ;;  %1880 = vmatmul.msk.bf16.gmra.mxu3 %vm449_vm2, %v1784_v59 }
  0xdc   :  { %v756_v37 = vpop.f32.mrf.mxu1  ;;  %v659_v16 = vpop.f32.mrf.mxu2 }
  0xdd   :  { %v1481_v38 = vadd.f32 %v1480_v23, %v1418_v36  ;;  %v660_v19 = vadd.f32 %v2237_v50, %v659_v16 }
  0xde   :  { %v582_v42 = vpop.f32.mrf.mxu0 }
  0xdf   :  { %1866 = vmatmul.msk.bf16.gmra.mxu1 %vm449_vm2, %v1672_v32  ;;  %v583_v44 = vadd.f32 %v2237_v50, %v582_v42  ;;  %v1792_v32 = vor.u32 %v1941_v27, %v1789_v28 }
  0xe1   :  { %v752_v51 = vadd.f32 %v751_v2, %v583_v44  ;;  %621 = vmatmul.bf16.gmra.mxu0 %v1660_v39  ;;  %v826_v2 = vpop.f32.mrf.mxu3  ;;  %v1914_v44 = vld [vmem:[%s2916_s0 + $0xe4] sm:$0xf0] }
  0xe2   :  { %v2444_v18 = vadd.f32 %v826_v2, %v658_v13  ;;  %v1797_v2 = vld [vmem:[%s2916_s0 + $0x1d8] sm:$0xf0]  ;;  %v1693_v13 = vld [vmem:[%s2916_s0 + $0x108] sm:$0xf0] }
  0xe3   :  { %899 = vst [vmem:[%s2918_s3 + $0x40] sm:$0xff] %v752_v51  ;;  %v1349_v56 = vadd.f32 %v1348_v35, %v752_v51  ;;  %v1419_v57 = vmul.f32 %v752_v51, %v752_v51  ;;  %v1676_v51 = vor.u32 %v1914_v44, %v1675_v43  ;;  %v1800_v6 = vor.u32 %v1943_v1, %v1797_v2 }
  0xe4   :  { %v758_v58 = vpop.f32.mrf.mxu1  ;;  %929 = vst [vmem:[%s2918_s3 + $0x130] sm:$0xff] %v2444_v18  ;;  %v662_v35 = vpop.f32.mrf.mxu2 }
  0xe5   :  { %v1482_v60 = vadd.f32 %v1481_v38, %v1419_v57  ;;  %v1685_v38 = vld [vmem:[%s2916_s0 + $0xf8] sm:$0xf0]  ;;  %v663_v53 = vadd.f32 %v2237_v50, %v662_v35  ;;  %v1803_v35 = vld [vmem:[%s2916_s0 + $0x1e0] sm:$0xf] }
  0xe6   :  { %v584_v61 = vpop.f32.mrf.mxu0 }
  0xe7   :  { %v585_v63 = vadd.f32 %v2237_v50, %v584_v61  ;;  %v1944_v61 = vld [vmem:[%s2916_s0 + $0x1d4] sm:$0xf0] }
  0xe9   :  { %v754_v3 = vadd.f32 %v753_v21, %v585_v63  ;;  %v828_v20 = vpop.f32.mrf.mxu3  ;;  %v1787_v21 = vld [vmem:[%s2916_s0 + $0x1c0] sm:$0xf] }
  0xea   :  { %v2457_v24 = vadd.f32 %v828_v20, %v660_v19  ;;  %v1788_v25 = vor.u32 %v1942_v22, %v1787_v21  ;;  %v1683_v19 = vld [vmem:[%s2916_s0 + $0xf0] sm:$0xf]  ;;  %v1916_v20 = vld [vmem:[%s2916_s0 + $0xf4] sm:$0xf0] }
  0xeb   :  { %900 = vst [vmem:[%s2918_s3 + $0x48] sm:$0xff] %v754_v3  ;;  %v1350_v7 = vadd.f32 %v1349_v56, %v754_v3  ;;  %v1420_v8 = vmul.f32 %v754_v3, %v754_v3  ;;  %1881 = vmatmul.msk.bf16.gmra.mxu3 %vm449_vm2, %v1792_v32  ;;  %v1684_v27 = vor.u32 %v1916_v20, %v1683_v19 }
  0xec   :  { %v761_v10 = vpop.f32.mrf.mxu1  ;;  %930 = vst [vmem:[%s2918_s3 + $0x138] sm:$0xff] %v2457_v24  ;;  %701 = vmatmul.bf16.gmra.mxu2 %v1788_v25  ;;  %v664_v55 = vpop.f32.mrf.mxu2 }
  0xed   :  { %v1483_v11 = vadd.f32 %v1482_v60, %v1420_v8  ;;  %v1795_v60 = vld [vmem:[%s2916_s0 + $0x1d0] sm:$0xf] }
  0xee   :  { %v587_v14 = vpop.f32.mrf.mxu0  ;;  %v1796_v0 = vor.u32 %v1944_v61, %v1795_v60 }
  0xef   :  { %1867 = vmatmul.msk.bf16.gmra.mxu1 %vm449_vm2, %v1680_v4  ;;  %v588_v17 = vadd.f32 %v2237_v50, %v587_v14 }
  0xf1   :  { %v757_v23 = vadd.f32 %v756_v37, %v588_v17  ;;  %626 = vmatmul.bf16.gmra.mxu0 %v1668_v12  ;;  %v1915_v37 = vld [vmem:[%s2916_s0 + $0xf4] sm:$0xf]  ;;  %v831_v39 = vpop.f32.mrf.mxu3  ;;  %v1917_v12 = vld [vmem:[%s2916_s0 + $0x104] sm:$0xf] }
  0xf2   :  { %v1688_v42 = vor.u32 %v1915_v37, %v1685_v38  ;;  %v2492_v57 = vadd.f32 %v831_v39, %v663_v53  ;;  %v1696_v17 = vor.u32 %v1917_v12, %v1693_v13  ;;  %v1813_v12 = vld [vmem:[%s2916_s0 + $0x1f8] sm:$0xf0] }
  0xf3   :  { %901 = vst [vmem:[%s2918_s3 + $0x50] sm:$0xff] %v757_v23  ;;  %v1351_v29 = vadd.f32 %v1350_v7, %v757_v23  ;;  %v1421_v30 = vmul.f32 %v757_v23, %v757_v23 }
  0xf4   :  { %v763_v31 = vpop.f32.mrf.mxu1  ;;  %931 = vst [vmem:[%s2918_s3 + $0x140] sm:$0xff] %v2492_v57 }
  0xf5   :  { %v1484_v33 = vadd.f32 %v1483_v11, %v1421_v30 }
  0xf6   :  { %v589_v34 = vpop.f32.mrf.mxu0 }
  0xf7   :  { %v590_v36 = vadd.f32 %v2237_v50, %v589_v34 }
  0xf9   :  { %v759_v41 = vadd.f32 %v758_v58, %v590_v36  ;;  %v665_v58 = vadd.f32 %v2237_v50, %v664_v55  ;;  %v833_v59 = vpop.f32.mrf.mxu3  ;;  %v1946_v36 = vld [vmem:[%s2916_s0 + $0x1e4] sm:$0xf0] }
  0xfa   :  { %v1804_v39 = vor.u32 %v1946_v36, %v1803_v35 }
  0xfb   :  { %902 = vst [vmem:[%s2918_s3 + $0x58] sm:$0xff] %v759_v41  ;;  %v1352_v46 = vadd.f32 %v1351_v29, %v759_v41  ;;  %v1422_v47 = vmul.f32 %v759_v41, %v759_v41  ;;  %v2505_v63 = vadd.f32 %v833_v59, %v665_v58  ;;  %1882 = vmatmul.msk.bf16.gmra.mxu3 %vm449_vm2, %v1800_v6  ;;  %v1945_v41 = vld [vmem:[%s2916_s0 + $0x1e4] sm:$0xf]  ;;  %v1948_v6 = vld [vmem:[%s2916_s0 + $0x1f4] sm:$0xf0] }
  0xfc   :  { %v766_v48 = vpop.f32.mrf.mxu1  ;;  %706 = vmatmul.bf16.gmra.mxu2 %v1796_v0 }
  0xfd   :  { %v1485_v49 = vadd.f32 %v1484_v33, %v1422_v47  ;;  %932 = vst [vmem:[%s2918_s3 + $0x148] sm:$0xff] %v2505_v63 }
  0xfe   :  { %v592_v54 = vpop.f32.mrf.mxu0 }
  0xff   :  { %1868 = vmatmul.msk.bf16.gmra.mxu1 %vm449_vm2, %v1688_v42  ;;  %v593_v56 = vadd.f32 %v2237_v50, %v592_v54  ;;  %v1805_v42 = vld [vmem:[%s2916_s0 + $0x1e8] sm:$0xf0] }
 0x100   :  { %v1808_v47 = vor.u32 %v1945_v41, %v1805_v42 }
 0x101   :  { %v762_v62 = vadd.f32 %v761_v10, %v593_v56  ;;  %631 = vmatmul.bf16.gmra.mxu0 %v1676_v51  ;;  %v667_v10 = vpop.f32.mrf.mxu2  ;;  %v836_v14 = vpop.f32.mrf.mxu3 }
 0x102   :  { %v668_v28 = vadd.f32 %v2237_v50, %v667_v10 }
 0x103   :  { %903 = vst [vmem:[%s2918_s3 + $0x60] sm:$0xff] %v762_v62  ;;  %v1353_v3 = vadd.f32 %v1352_v46, %v762_v62  ;;  %v1423_v4 = vmul.f32 %v762_v62, %v762_v62 }
 0x104   :  { %v768_v5 = vpop.f32.mrf.mxu1  ;;  %v2540_v32 = vadd.f32 %v836_v14, %v668_v28 }
 0x105   :  { %v1486_v7 = vadd.f32 %v1485_v49, %v1423_v4 }
 0x106   :  { %v594_v8 = vpop.f32.mrf.mxu0  ;;  %933 = vst [vmem:[%s2918_s3 + $0x150] sm:$0xff] %v2540_v32 }
 0x107   :  { %v595_v11 = vadd.f32 %v2237_v50, %v594_v8 }
 0x109   :  { %v764_v16 = vadd.f32 %v763_v31, %v595_v11  ;;  %v669_v30 = vpop.f32.mrf.mxu2  ;;  %v838_v34 = vpop.f32.mrf.mxu3  ;;  %v1947_v11 = vld [vmem:[%s2916_s0 + $0x1f4] sm:$0xf] }
 0x10a   :  { %v670_v33 = vadd.f32 %v2237_v50, %v669_v30 }
 0x10b   :  { %904 = vst [vmem:[%s2918_s3 + $0x68] sm:$0xff] %v764_v16  ;;  %v1354_v21 = vadd.f32 %v1353_v3, %v764_v16  ;;  %v1424_v22 = vmul.f32 %v764_v16, %v764_v16  ;;  %1883 = vmatmul.msk.bf16.gmra.mxu3 %vm449_vm2, %v1808_v47 }
 0x10c   :  { %v771_v23 = vpop.f32.mrf.mxu1  ;;  %v2553_v38 = vadd.f32 %v838_v34, %v670_v33  ;;  %711 = vmatmul.bf16.gmra.mxu2 %v1804_v39 }
 0x10d   :  { %v1487_v25 = vadd.f32 %v1486_v7, %v1424_v22 }
 0x10e   :  { %v597_v29 = vpop.f32.mrf.mxu0  ;;  %934 = vst [vmem:[%s2918_s3 + $0x158] sm:$0xff] %v2553_v38 }
 0x10f   :  { %1869 = vmatmul.msk.bf16.gmra.mxu1 %vm449_vm2, %v1696_v17  ;;  %v598_v31 = vadd.f32 %v2237_v50, %v597_v29  ;;  %v1816_v17 = vor.u32 %v1947_v11, %v1813_v12 }
 0x111   :  { %v767_v37 = vadd.f32 %v766_v48, %v598_v31  ;;  %636 = vmatmul.bf16.gmra.mxu0 %v1684_v27  ;;  %v672_v51 = vpop.f32.mrf.mxu2  ;;  %v841_v54 = vpop.f32.mrf.mxu3 }
 0x112   :  { %v673_v61 = vadd.f32 %v2237_v50, %v672_v51 }
 0x113   :  { %905 = vst [vmem:[%s2918_s3 + $0x70] sm:$0xff] %v767_v37  ;;  %v1355_v43 = vadd.f32 %v1354_v21, %v767_v37  ;;  %v1425_v44 = vmul.f32 %v767_v37, %v767_v37 }
 0x114   :  { %v773_v46 = vpop.f32.mrf.mxu1  ;;  %v2575_v2 = vadd.f32 %v841_v54, %v673_v61 }
 0x115   :  { %v1488_v48 = vadd.f32 %v1487_v25, %v1425_v44 }
 0x116   :  { %v599_v49 = vpop.f32.mrf.mxu0  ;;  %935 = vst [vmem:[%s2918_s3 + $0x160] sm:$0xff] %v2575_v2 }
 0x117   :  { %v600_v53 = vadd.f32 %v2237_v50, %v599_v49 }
 0x119   :  { %v769_v55 = vadd.f32 %v768_v5, %v600_v53  ;;  %v674_v0 = vpop.f32.mrf.mxu2  ;;  %v843_v4 = vpop.f32.mrf.mxu3  ;;  %v1811_v5 = vld [vmem:[%s2916_s0 + $0x1f0] sm:$0xf] }
 0x11a   :  { %v675_v3 = vadd.f32 %v2237_v50, %v674_v0  ;;  %v1812_v10 = vor.u32 %v1948_v6, %v1811_v5 }
 0x11b   :  { %906 = vst [vmem:[%s2918_s3 + $0x78] sm:$0xff] %v769_v55  ;;  %v1356_v56 = vadd.f32 %v1355_v43, %v769_v55  ;;  %v1426_v58 = vmul.f32 %v769_v55, %v769_v55  ;;  %1884 = vmatmul.msk.bf16.gmra.mxu3 %vm449_vm2, %v1816_v17 }
 0x11c   :  { %v776_v59 = vpop.f32.mrf.mxu1  ;;  %v2588_v8 = vadd.f32 %v843_v4, %v675_v3  ;;  %716 = vmatmul.bf16.gmra.mxu2 %v1812_v10 }
 0x11d   :  { %v1489_v60 = vadd.f32 %v1488_v48, %v1426_v58 }
 0x11e   :  { %v602_v62 = vpop.f32.mrf.mxu0  ;;  %936 = vst [vmem:[%s2918_s3 + $0x168] sm:$0xff] %v2588_v8 }
 0x11f   :  { %v603_v1 = vadd.f32 %v2237_v50, %v602_v62 }
 0x121   :  { %v772_v7 = vadd.f32 %v771_v23, %v603_v1  ;;  %v677_v21 = vpop.f32.mrf.mxu2  ;;  %v846_v23 = vpop.f32.mrf.mxu3 }
 0x122   :  { %v678_v31 = vadd.f32 %v2237_v50, %v677_v21 }
 0x123   :  { %907 = vst [vmem:[%s2918_s3 + $0x80] sm:$0xff] %v772_v7  ;;  %v1357_v13 = vadd.f32 %v1356_v56, %v772_v7  ;;  %v1427_v14 = vmul.f32 %v772_v7, %v772_v7 }
 0x124   :  { %v778_v16 = vpop.f32.mrf.mxu1  ;;  %v2610_v36 = vadd.f32 %v846_v23, %v678_v31 }
 0x125   :  { %v1490_v19 = vadd.f32 %v1489_v60, %v1427_v14 }
 0x126   :  { %v604_v20 = vpop.f32.mrf.mxu0  ;;  %937 = vst [vmem:[%s2918_s3 + $0x170] sm:$0xff] %v2610_v36 }
 0x127   :  { %v605_v22 = vadd.f32 %v2237_v50, %v604_v20 }
 0x129   :  { %v774_v25 = vadd.f32 %v773_v46, %v605_v22  ;;  %v679_v34 = vpop.f32.mrf.mxu2  ;;  %v848_v39 = vpop.f32.mrf.mxu3 }
 0x12a   :  { %v680_v37 = vadd.f32 %v2237_v50, %v679_v34 }
 0x12b   :  { %908 = vst [vmem:[%s2918_s3 + $0x88] sm:$0xff] %v774_v25  ;;  %v1358_v27 = vadd.f32 %v1357_v13, %v774_v25  ;;  %v1428_v28 = vmul.f32 %v774_v25, %v774_v25 }
 0x12c   :  { %v781_v29 = vpop.f32.mrf.mxu1  ;;  %v2617_v42 = vadd.f32 %v848_v39, %v680_v37 }
 0x12d   :  { %v1491_v30 = vadd.f32 %v1490_v19, %v1428_v28 }
 0x12e   :  { %v607_v33 = vpop.f32.mrf.mxu0  ;;  %938 = vst [vmem:[%s2918_s3 + $0x178] sm:$0xff] %v2617_v42 }
 0x12f   :  { %v608_v35 = vadd.f32 %v2237_v50, %v607_v33 }
 0x131   :  { %v777_v41 = vadd.f32 %v776_v59, %v608_v35  ;;  %v682_v49 = vpop.f32.mrf.mxu2  ;;  %v851_v53 = vpop.f32.mrf.mxu3 }
 0x132   :  { %v683_v60 = vadd.f32 %v2237_v50, %v682_v49 }
 0x133   :  { %909 = vst [vmem:[%s2918_s3 + $0x90] sm:$0xff] %v777_v41  ;;  %v1359_v43 = vadd.f32 %v1358_v27, %v777_v41  ;;  %v1429_v44 = vmul.f32 %v777_v41, %v777_v41 }
 0x134   :  { %v783_v46 = vpop.f32.mrf.mxu1  ;;  %v2632_v1 = vadd.f32 %v851_v53, %v683_v60 }
 0x135   :  { %v1492_v47 = vadd.f32 %v1491_v30, %v1429_v44 }
 0x136   :  { %v609_v48 = vpop.f32.mrf.mxu0  ;;  %939 = vst [vmem:[%s2918_s3 + $0x180] sm:$0xff] %v2632_v1 }
 0x137   :  { %v610_v51 = vadd.f32 %v2237_v50, %v609_v48 }
 0x139   :  { %v779_v54 = vadd.f32 %v778_v16, %v610_v51  ;;  %v684_v62 = vpop.f32.mrf.mxu2  ;;  %v853_v4 = vpop.f32.mrf.mxu3 }
 0x13a   :  { %v685_v3 = vadd.f32 %v2237_v50, %v684_v62 }
 0x13b   :  { %910 = vst [vmem:[%s2918_s3 + $0x98] sm:$0xff] %v779_v54  ;;  %v1360_v55 = vadd.f32 %v1359_v43, %v779_v54  ;;  %v1430_v56 = vmul.f32 %v779_v54, %v779_v54 }
 0x13c   :  { %v786_v58 = vpop.f32.mrf.mxu1  ;;  %v2639_v6 = vadd.f32 %v853_v4, %v685_v3 }
 0x13d   :  { %v1493_v59 = vadd.f32 %v1492_v47, %v1430_v56 }
 0x13e   :  { %v612_v61 = vpop.f32.mrf.mxu0  ;;  %940 = vst [vmem:[%s2918_s3 + $0x188] sm:$0xff] %v2639_v6 }
 0x13f   :  { %v613_v0 = vadd.f32 %v2237_v50, %v612_v61 }
 0x141   :  { %v782_v5 = vadd.f32 %v781_v29, %v613_v0  ;;  %v687_v14 = vpop.f32.mrf.mxu2  ;;  %v856_v17 = vpop.f32.mrf.mxu3 }
 0x142   :  { %v688_v22 = vadd.f32 %v2237_v50, %v687_v14 }
 0x143   :  { %911 = vst [vmem:[%s2918_s3 + $0xa0] sm:$0xff] %v782_v5  ;;  %v1361_v7 = vadd.f32 %v1360_v55, %v782_v5  ;;  %v1431_v10 = vmul.f32 %v782_v5, %v782_v5 }
 0x144   :  { %v788_v11 = vpop.f32.mrf.mxu1  ;;  %v2662_v28 = vadd.f32 %v856_v17, %v688_v22 }
 0x145   :  { %v2648_v12 = vadd.f32 %v1493_v59, %v1431_v10 }
 0x146   :  { %v614_v13 = vpop.f32.mrf.mxu0  ;;  %941 = vst [vmem:[%s2918_s3 + $0x190] sm:$0xff] %v2662_v28 }
 0x147   :  { %v615_v16 = vadd.f32 %v2237_v50, %v614_v13 }
 0x149   :  { %v2651_v19 = vadd.f32 %v783_v46, %v615_v16  ;;  %v689_v25 = vpop.f32.mrf.mxu2  ;;  %v858_v30 = vpop.f32.mrf.mxu3 }
 0x14a   :  { %v690_v29 = vadd.f32 %v2237_v50, %v689_v25 }
 0x14b   :  { %912 = vst [vmem:[%s2918_s3 + $0xa8] sm:$0xff] %v2651_v19  ;;  %v2658_v20 = vadd.f32 %v1361_v7, %v2651_v19 }
 0x14c   :  { %v791_v21 = vpop.f32.mrf.mxu1  ;;  %v2671_v33 = vadd.f32 %v858_v30, %v690_v29 }
 0x14e   :  { %v617_v23 = vpop.f32.mrf.mxu0  ;;  %942 = vst [vmem:[%s2918_s3 + $0x198] sm:$0xff] %v2671_v33 }
 0x14f   :  { %v618_v27 = vadd.f32 %v2237_v50, %v617_v23 }
 0x151   :  { %v2665_v31 = vadd.f32 %v786_v58, %v618_v27  ;;  %v692_v39 = vpop.f32.mrf.mxu2  ;;  %v861_v41 = vpop.f32.mrf.mxu3 }
 0x152   :  { %v693_v46 = vadd.f32 %v2237_v50, %v692_v39 }
 0x153   :  { %913 = vst [vmem:[%s2918_s3 + $0xb0] sm:$0xff] %v2665_v31 }
 0x154   :  { %v793_v34 = vpop.f32.mrf.mxu1  ;;  %v2690_v49 = vadd.f32 %v861_v41, %v693_v46 }
 0x156   :  { %v619_v35 = vpop.f32.mrf.mxu0  ;;  %943 = vst [vmem:[%s2918_s3 + $0x1a0] sm:$0xff] %v2690_v49 }
 0x157   :  { %v620_v37 = vadd.f32 %v2237_v50, %v619_v35 }
 0x159   :  { %v2682_v43 = vadd.f32 %v788_v11, %v620_v37  ;;  %v694_v51 = vpop.f32.mrf.mxu2  ;;  %v863_v54 = vpop.f32.mrf.mxu3 }
 0x15a   :  { %v695_v53 = vadd.f32 %v2237_v50, %v694_v51 }
 0x15b   :  { %914 = vst [vmem:[%s2918_s3 + $0xb8] sm:$0xff] %v2682_v43 }
 0x15c   :  { %v796_v44 = vpop.f32.mrf.mxu1  ;;  %v2699_v56 = vadd.f32 %v863_v54, %v695_v53  ;;  %v1432_v53 = vmul.f32 %v2651_v19, %v2651_v19  ;;  %v1433_v54 = vmul.f32 %v2665_v31, %v2665_v31  ;;  %v1434_v19 = vmul.f32 %v2682_v43, %v2682_v43 }
 0x15e   :  { %v622_v47 = vpop.f32.mrf.mxu0  ;;  %944 = vst [vmem:[%s2918_s3 + $0x1a8] sm:$0xff] %v2699_v56 }
 0x15f   :  { %v623_v48 = vadd.f32 %v2237_v50, %v622_v47 }
 0x161   :  { %v2693_v55 = vadd.f32 %v791_v21, %v623_v48  ;;  %v697_v61 = vpop.f32.mrf.mxu2  ;;  %v866_v62 = vpop.f32.mrf.mxu3 }
 0x162   :  { %v698_v4 = vadd.f32 %v2237_v50, %v697_v61  ;;  %v1495_v61 = vadd.f32 %v2648_v12, %v1432_v53 }
 0x163   :  { %915 = vst [vmem:[%s2918_s3 + $0xc0] sm:$0xff] %v2693_v55 }
 0x164   :  { %v798_v58 = vpop.f32.mrf.mxu1  ;;  %v2715_v10 = vadd.f32 %v866_v62, %v698_v4 }
 0x166   :  { %v624_v59 = vpop.f32.mrf.mxu0  ;;  %945 = vst [vmem:[%s2918_s3 + $0x1b0] sm:$0xff] %v2715_v10 }
 0x167   :  { %v625_v60 = vadd.f32 %v2237_v50, %v624_v59 }
 0x169   :  { %v794_v0 = vadd.f32 %v793_v34, %v625_v60  ;;  %v699_v11 = vpop.f32.mrf.mxu2  ;;  %v868_v14 = vpop.f32.mrf.mxu3 }
 0x16a   :  { %v700_v13 = vadd.f32 %v2237_v50, %v699_v11  ;;  %v1435_v11 = vmul.f32 %v2693_v55, %v2693_v55 }
 0x16b   :  { %916 = vst [vmem:[%s2918_s3 + $0xc8] sm:$0xff] %v794_v0 }
 0x16c   :  { %v801_v3 = vpop.f32.mrf.mxu1  ;;  %v2722_v17 = vadd.f32 %v868_v14, %v700_v13 }
 0x16e   :  { %v627_v5 = vpop.f32.mrf.mxu0  ;;  %946 = vst [vmem:[%s2918_s3 + $0x1b8] sm:$0xff] %v2722_v17 }
 0x16f   :  { %v628_v7 = vadd.f32 %v2237_v50, %v627_v5  ;;  %v643_v5 = vadd.f32 %v2237_v50, %v2291_v26 }
 0x171   :  { %v797_v16 = vadd.f32 %v796_v44, %v628_v7  ;;  %v702_v25 = vpop.f32.mrf.mxu2  ;;  %v871_v27 = vpop.f32.mrf.mxu3  ;;  %v1496_v7 = vadd.f32 %v1495_v61, %v1433_v54  ;;  %v645_v54 = vadd.f32 %v2237_v50, %v2310_v40 }
 0x172   :  { %v703_v37 = vadd.f32 %v2237_v50, %v702_v25 }
 0x173   :  { %917 = vst [vmem:[%s2918_s3 + $0xd0] sm:$0xff] %v797_v16  ;;  %v1497_v14 = vadd.f32 %v1496_v7, %v1434_v19  ;;  %v1437_v25 = vmul.f32 %v797_v16, %v797_v16 }
 0x174   :  { %v803_v21 = vpop.f32.mrf.mxu1  ;;  %v2738_v47 = vadd.f32 %v871_v27, %v703_v37 }
 0x176   :  { %v629_v22 = vpop.f32.mrf.mxu0  ;;  %947 = vst [vmem:[%s2918_s3 + $0x1c0] sm:$0xff] %v2738_v47 }
 0x177   :  { %v630_v23 = vadd.f32 %v2237_v50, %v629_v22  ;;  %v1436_v22 = vmul.f32 %v794_v0, %v794_v0 }
 0x179   :  { %v799_v29 = vadd.f32 %v798_v58, %v630_v23  ;;  %v704_v39 = vpop.f32.mrf.mxu2  ;;  %v873_v44 = vpop.f32.mrf.mxu3 }
 0x17a   :  { %v705_v41 = vadd.f32 %v2237_v50, %v704_v39 }
 0x17b   :  { %918 = vst [vmem:[%s2918_s3 + $0xd8] sm:$0xff] %v799_v29 }
 0x17c   :  { %v806_v30 = vpop.f32.mrf.mxu1  ;;  %v2740_v48 = vadd.f32 %v873_v44, %v705_v41  ;;  %v1438_v44 = vmul.f32 %v799_v29, %v799_v29 }
 0x17e   :  { %v632_v34 = vpop.f32.mrf.mxu0  ;;  %948 = vst [vmem:[%s2918_s3 + $0x1c8] sm:$0xff] %v2740_v48 }
 0x17f   :  { %v633_v35 = vadd.f32 %v2237_v50, %v632_v34 }
 0x181   :  { %v802_v46 = vadd.f32 %v801_v3, %v633_v35  ;;  %v707_v60 = vpop.f32.mrf.mxu2  ;;  %v876_v62 = vpop.f32.mrf.mxu3  ;;  %v1363_v3 = vadd.f32 %v2658_v20, %v2665_v31  ;;  %v1498_v31 = vadd.f32 %v1497_v14, %v1435_v11 }
 0x182   :  { %v708_v27 = vadd.f32 %v2237_v50, %v707_v60 }
 0x183   :  { %919 = vst [vmem:[%s2918_s3 + $0xe0] sm:$0xff] %v802_v46  ;;  %v1364_v13 = vadd.f32 %v1363_v3, %v2682_v43  ;;  %v1499_v35 = vadd.f32 %v1498_v31, %v1436_v22  ;;  %v1439_v61 = vmul.f32 %v802_v46, %v802_v46 }
 0x184   :  { %v808_v51 = vpop.f32.mrf.mxu1  ;;  %v2778_v53 = vadd.f32 %v876_v62, %v708_v27 }
 0x185   :  { %v1365_v20 = vadd.f32 %v1364_v13, %v2693_v55 }
 0x186   :  { %v634_v58 = vpop.f32.mrf.mxu0  ;;  %949 = vst [vmem:[%s2918_s3 + $0x1d0] sm:$0xff] %v2778_v53 }
 0x187   :  { %v635_v59 = vadd.f32 %v2237_v50, %v634_v58 }
 0x189   :  { %v804_v4 = vadd.f32 %v803_v21, %v635_v59  ;;  %v1366_v21 = vadd.f32 %v1365_v20, %v794_v0  ;;  %v709_v34 = vpop.f32.mrf.mxu2  ;;  %v878_v39 = vpop.f32.mrf.mxu3  ;;  %v1500_v0 = vadd.f32 %v1499_v35, %v1437_v25 }
 0x18a   :  { %v710_v37 = vadd.f32 %v2237_v50, %v709_v34 }
 0x18b   :  { %920 = vst [vmem:[%s2918_s3 + $0xe8] sm:$0xff] %v804_v4  ;;  %v1367_v41 = vadd.f32 %v1366_v21, %v797_v16  ;;  %v1501_v16 = vadd.f32 %v1500_v0, %v1438_v44  ;;  %v1440_v62 = vmul.f32 %v804_v4, %v804_v4 }
 0x18c   :  { %v811_v12 = vpop.f32.mrf.mxu1  ;;  %v2782_v58 = vadd.f32 %v878_v39, %v710_v37 }
 0x18d   :  { %v812_v23 = vadd.f32 %v811_v12, %v643_v5  ;;  %v1368_v59 = vadd.f32 %v1367_v41, %v799_v29  ;;  %v1502_v40 = vadd.f32 %v1501_v16, %v1439_v61  ;;  %v1970_v5 = vld [vmem:[%s2917_s2] ss:$0 sm:$0xff] }
 0x18e   :  { %v637_v26 = vpop.f32.mrf.mxu0  ;;  %950 = vst [vmem:[%s2918_s3 + $0x1d8] sm:$0xff] %v2782_v58 }
 0x18f   :  { %923 = vst [vmem:[%s2918_s3 + $0x100] sm:$0xff] %v812_v23  ;;  %v638_v43 = vadd.f32 %v2237_v50, %v637_v26  ;;  %v1503_v13 = vadd.f32 %v1502_v40, %v1440_v62  ;;  %v1443_v26 = vmul.f32 %v812_v23, %v812_v23 }
 0x191   :  { %v807_v55 = vadd.f32 %v806_v30, %v638_v43  ;;  %v1369_v30 = vadd.f32 %v1368_v59, %v802_v46  ;;  %v712_v46 = vpop.f32.mrf.mxu2  ;;  %v881_v11 = vpop.f32.mrf.mxu3 }
 0x192   :  { %v713_v34 = vadd.f32 %v1970_v5, %v712_v46  ;;  %v1451_v46 = vmul.f32 %v2492_v57, %v2492_v57 }
 0x193   :  { %921 = vst [vmem:[%s2918_s3 + $0xf0] sm:$0xff] %v807_v55  ;;  %v1370_v29 = vadd.f32 %v1369_v30, %v804_v4  ;;  %v1441_v3 = vmul.f32 %v807_v55, %v807_v55 }
 0x194   :  { %v813_v60 = vpop.f32.mrf.mxu1 }
 0x195   :  { %v814_v19 = vadd.f32 %v813_v60, %v645_v54  ;;  %v1371_v12 = vadd.f32 %v1370_v29, %v807_v55  ;;  %v1504_v22 = vadd.f32 %v1503_v13, %v1441_v3  ;;  %v2807_v55 = vadd.f32 %v881_v11, %v713_v34 }
 0x196   :  { %v639_v50 = vpop.f32.mrf.mxu0  ;;  %v1450_v3 = vmul.f32 %v2457_v24, %v2457_v24  ;;  %v1452_v13 = vmul.f32 %v2505_v63, %v2505_v63  ;;  %v1456_v34 = vmul.f32 %v2588_v8, %v2588_v8 }
 0x197   :  { %924 = vst [vmem:[%s2918_s3 + $0x108] sm:$0xff] %v814_v19  ;;  %v640_v7 = vadd.f32 %v1970_v5, %v639_v50  ;;  %v1444_v25 = vmul.f32 %v814_v19, %v814_v19  ;;  %v1449_v50 = vmul.f32 %v2444_v18, %v2444_v18 }
 0x198   :  { %951 = vst [vmem:[%s2918_s3 + $0x1e0] sm:$0xff] %v2807_v55 }
 0x199   :  { %v809_v14 = vadd.f32 %v808_v51, %v640_v7  ;;  %v714_v35 = vpop.f32.mrf.mxu2  ;;  %v883_v39 = vpop.f32.mrf.mxu3  ;;  %v1445_v51 = vmul.f32 %v2348_v9, %v2348_v9 }
 0x19a   :  { %v715_v37 = vadd.f32 %v1970_v5, %v714_v35 }
 0x19b   :  { %922 = vst [vmem:[%s2918_s3 + $0xf8] sm:$0xff] %v809_v14  ;;  %v1372_v20 = vadd.f32 %v1371_v12, %v809_v14  ;;  %v1442_v31 = vmul.f32 %v809_v14, %v809_v14 }
 0x19c   :  { %v2809_v54 = vadd.f32 %v883_v39, %v715_v37  ;;  %v1457_v37 = vmul.f32 %v2610_v36, %v2610_v36 }
 0x19d   :  { %v1373_v4 = vadd.f32 %v1372_v20, %v812_v23  ;;  %v1505_v21 = vadd.f32 %v1504_v22, %v1442_v31  ;;  %v1446_v23 = vmul.f32 %v2361_v15, %v2361_v15 }
 0x19e   :  { %952 = vst [vmem:[%s2918_s3 + $0x1e8] sm:$0xff] %v2809_v54 }
 0x19f   :  { %v1374_v43 = vadd.f32 %v1373_v4, %v814_v19  ;;  %v1506_v27 = vadd.f32 %v1505_v21, %v1443_v26 }
 0x1a1   :  { %v1375_v41 = vadd.f32 %v1374_v43, %v2348_v9  ;;  %v1507_v44 = vadd.f32 %v1506_v27, %v1444_v25  ;;  %v1447_v9 = vmul.f32 %v2396_v45, %v2396_v45  ;;  %v717_v30 = vpop.f32.mrf.mxu2  ;;  %v886_v62 = vpop.f32.mrf.mxu3 }
 0x1a3   :  { %v1376_v0 = vadd.f32 %v1375_v41, %v2361_v15  ;;  %v1508_v59 = vadd.f32 %v1507_v44, %v1445_v51  ;;  %v1448_v15 = vmul.f32 %v2409_v52, %v2409_v52  ;;  %v1458_v41 = vmul.f32 %v2617_v42, %v2617_v42 }
 0x1a5   :  { %v1377_v61 = vadd.f32 %v1376_v0, %v2396_v45  ;;  %v1509_v60 = vadd.f32 %v1508_v59, %v1446_v23 }
 0x1a7   :  { %v1378_v19 = vadd.f32 %v1377_v61, %v2409_v52  ;;  %v1510_v16 = vadd.f32 %v1509_v60, %v1447_v9 }
 0x1a9   :  { %v1379_v40 = vadd.f32 %v1378_v19, %v2444_v18  ;;  %v1511_v29 = vadd.f32 %v1510_v16, %v1448_v15  ;;  %v718_v18 = vadd.f32 %v1970_v5, %v717_v30  ;;  %v719_v22 = vpop.f32.mrf.mxu2  ;;  %v888_v31 = vpop.f32.mrf.mxu3 }
 0x1aa   :  { %v720_v20 = vadd.f32 %v1970_v5, %v719_v22  ;;  %v1470_v22 = vmul.f32 %v2782_v58, %v2782_v58 }
 0x1ab   :  { %v1380_v45 = vadd.f32 %v1379_v40, %v2457_v24  ;;  %v1512_v7 = vadd.f32 %v1511_v29, %v1449_v50  ;;  %v1453_v24 = vmul.f32 %v2540_v32, %v2540_v32  ;;  %v887_v21 = vadd.f32 %v886_v62, %v718_v18 }
 0x1ac   :  { %v2843_v25 = vadd.f32 %v888_v31, %v720_v20  ;;  %v1471_v31 = vmul.f32 %v2807_v55, %v2807_v55 }
 0x1ad   :  { %v1381_v52 = vadd.f32 %v1380_v45, %v2492_v57  ;;  %v1513_v11 = vadd.f32 %v1512_v7, %v1450_v3  ;;  %v1454_v57 = vmul.f32 %v2553_v38, %v2553_v38  ;;  %953 = vst [vmem:[%s2918_s3 + $0x1f0] sm:$0xff] %v887_v21 }
 0x1ae   :  { %954 = vst [vmem:[%s2918_s3 + $0x1f8] sm:$0xff] %v2843_v25 }
 0x1af   :  { %v1382_v12 = vadd.f32 %v1381_v52, %v2505_v63  ;;  %v1514_v14 = vadd.f32 %v1513_v11, %v1451_v46  ;;  %v1467_v46 = vmul.f32 %v2738_v47, %v2738_v47 }
 0x1b1   :  { %v1383_v26 = vadd.f32 %v1382_v12, %v2540_v32  ;;  %v1515_v4 = vadd.f32 %v1514_v14, %v1452_v13  ;;  %v1455_v32 = vmul.f32 %v2575_v2, %v2575_v2  ;;  %v1468_v13 = vmul.f32 %v2740_v48, %v2740_v48 }
 0x1b2   :  { %v1469_v14 = vmul.f32 %v2778_v53, %v2778_v53 }
 0x1b3   :  { %v1516_v43 = vadd.f32 %v1515_v4, %v1453_v24  ;;  %v1384_v63 = vadd.f32 %v1383_v26, %v2553_v38  ;;  %v1472_v26 = vmul.f32 %v2809_v54, %v2809_v54 }
 0x1b5   :  { %v1385_v5 = vadd.f32 %v1384_v63, %v2575_v2  ;;  %v1517_v27 = vadd.f32 %v1516_v43, %v1454_v57  ;;  %v1459_v2 = vmul.f32 %v2632_v1, %v2632_v1  ;;  %v1473_v57 = vmul.f32 %v887_v21, %v887_v21 }
 0x1b7   :  { %v1386_v38 = vadd.f32 %v1385_v5, %v2588_v8  ;;  %v1518_v35 = vadd.f32 %v1517_v27, %v1455_v32  ;;  %v1460_v8 = vmul.f32 %v2639_v6, %v2639_v6 }
 0x1b9   :  { %v1387_v39 = vadd.f32 %v1386_v38, %v2610_v36  ;;  %v1519_v51 = vadd.f32 %v1518_v35, %v1456_v34  ;;  %v1461_v36 = vmul.f32 %v2662_v28, %v2662_v28 }
 0x1bb   :  { %v1388_v44 = vadd.f32 %v1387_v39, %v2617_v42  ;;  %v1520_v23 = vadd.f32 %v1519_v51, %v1457_v37  ;;  %v1462_v42 = vmul.f32 %v2671_v33, %v2671_v33 }
 0x1bd   :  { %v1389_v0 = vadd.f32 %v1388_v44, %v2632_v1  ;;  %v1521_v59 = vadd.f32 %v1520_v23, %v1458_v41  ;;  %v1463_v1 = vmul.f32 %v2690_v49, %v2690_v49 }
 0x1bf   :  { %v1390_v9 = vadd.f32 %v1389_v0, %v2639_v6  ;;  %v1522_v61 = vadd.f32 %v1521_v59, %v1459_v2  ;;  %v1464_v6 = vmul.f32 %v2699_v56, %v2699_v56 }
 0x1c1   :  { %v1391_v60 = vadd.f32 %v1390_v9, %v2662_v28  ;;  %v1523_v15 = vadd.f32 %v1522_v61, %v1460_v8  ;;  %v1465_v28 = vmul.f32 %v2715_v10, %v2715_v10 }
 0x1c3   :  { %v1392_v19 = vadd.f32 %v1391_v60, %v2671_v33  ;;  %v1524_v16 = vadd.f32 %v1523_v15, %v1461_v36  ;;  %v1466_v33 = vmul.f32 %v2722_v17, %v2722_v17 }
 0x1c5   :  { %v1393_v30 = vadd.f32 %v1392_v19, %v2690_v49  ;;  %v1525_v62 = vadd.f32 %v1524_v16, %v1462_v42 }
 0x1c7   :  { %v1394_v50 = vadd.f32 %v1393_v30, %v2699_v56  ;;  %v1526_v40 = vadd.f32 %v1525_v62, %v1463_v1 }
 0x1c9   :  { %v1395_v29 = vadd.f32 %v1394_v50, %v2715_v10  ;;  %v1527_v3 = vadd.f32 %v1526_v40, %v1464_v6 }
 0x1cb   :  { %v1396_v45 = vadd.f32 %v1395_v29, %v2722_v17  ;;  %v1528_v7 = vadd.f32 %v1527_v3, %v1465_v28 }
 0x1cd   :  { %v1397_v49 = vadd.f32 %v1396_v45, %v2738_v47  ;;  %v1529_v52 = vadd.f32 %v1528_v7, %v1466_v33 }
 0x1cf   :  { %v1530_v56 = vadd.f32 %v1529_v52, %v1467_v46  ;;  %v1398_v11 = vadd.f32 %v1397_v49, %v2740_v48 }
 0x1d1   :  { %v1531_v10 = vadd.f32 %v1530_v56, %v1468_v13  ;;  %v1399_v12 = vadd.f32 %v1398_v11, %v2778_v53 }
 0x1d3   :  { %v1532_v17 = vadd.f32 %v1531_v10, %v1469_v14  ;;  %v1400_v18 = vadd.f32 %v1399_v12, %v2782_v58  ;;  %v1474_v58 = vmul.f32 %v2843_v25, %v2843_v25 }
 0x1d5   :  { %v1533_v47 = vadd.f32 %v1532_v17, %v1470_v22  ;;  %v1401_v20 = vadd.f32 %v1400_v18, %v2807_v55  ;;  %v956_v55 = vlaneseq }
 0x1d7   :  { %v1534_v24 = vadd.f32 %v1533_v47, %v1471_v31  ;;  %v1402_v48 = vadd.f32 %v1401_v20, %v2809_v54  ;;  %v957_v51 = vshrl.u32 %v956_v55, 7 }
 0x1d9   :  { %v1535_v4 = vadd.f32 %v1534_v24, %v1472_v26  ;;  %v1403_v53 = vadd.f32 %v1402_v48, %v887_v21  ;;  %vm1545_vm3 = vcmp.eq.s32.totalorder %v957_v51, 1  ;;  %vm1544_vm4 = vcmp.eq.s32.totalorder %v957_v51, 0 }
 0x1db   :  { %v1536_v43 = vadd.f32 %v1535_v4, %v1473_v57  ;;  %v1404_v63 = vadd.f32 %v1403_v53, %v2843_v25 }
 0x1dd   :  { %v1405_v32 = vrot.slane %v1404_v63, 4  ;;  %v1537_v5 = vadd.f32 %v1536_v43, %v1474_v58 }
 0x1df   :  { %v1406_v27 = vadd.f32 %v1405_v32, %v1404_v63  ;;  %v1538_v34 = vrot.slane %v1537_v5, 4 }
 0x1e1   :  { %v1407_v38 = vrot.slane %v1406_v27, 2  ;;  %v1539_v35 = vadd.f32 %v1538_v34, %v1537_v5 }
 0x1e3   :  { %v1408_v37 = vadd.f32 %v1407_v38, %v1406_v27  ;;  %v1540_v39 = vrot.slane %v1539_v35, 2 }
 0x1e5   :  { %v1541_v54 = vadd.f32 %v1540_v39, %v1539_v35  ;;  %v1409_v41 = vrot.slane %v1408_v37, 1 }
 0x1e7   :  { %v1542_v44 = vrot.slane %v1541_v54, 1  ;;  %v1410_v23 = vadd.f32 %v1409_v41, %v1408_v37 }
 0x1e9   :  { %v1543_v21 = vadd.f32 %v1542_v44, %v1541_v54 }
 0x1eb   :  { %v1548_v2 = vsel %vm1545_vm3, %v1543_v21, 0.0 }
 0x1ec   :  { %v1551_v0 = vsel %vm1544_vm4, %v1410_v23, %v1548_v2 }
 0x1ed   :  { %1552 = vst [vmem:[%s2919_s4] sm:$0xff] %v1551_v0 }

// kernel: resnet_generator_forward.21
= control target key start
LH: loop header
LB: loop body
LE: loop exit
PB: predicated region body
PF: predicated region fallthrough
CT: control target
= control target key end

     0   :  { %vm138_vm0 = vcmask 1043456   ;;  %vm113_vm1 = vcmask 588800   ;;  %s597_s1 = inlined_call_operand.vmem [shape: bf16[72,128], index: 1, kind: input, shape index: {}]   ;;  %s598_s2 = inlined_call_operand.vmem [shape: f32[1,128], index: 2, kind: input, shape index: {}]   ;;  %s599_s0 = inlined_call_operand.vmem [shape: bf16[128,72], index: 0, kind: input, shape index: {}]   ;;  %s600_s3 = inlined_call_operand.vmem [shape: f32[128,128], index: 3, kind: output, shape index: {0}]   ;;  %s601_s4 = inlined_call_operand.vmem [shape: f32[8,128], index: 4, kind: output, shape index: {1}]  }
   0x1   :  { %v41_v0 = vld [vmem:[%s597_s1 + $0x20] sm:$0xf]  ;;  %v448_v4 = vld [vmem:[%s597_s1 + $0x18] sm:$0xff]  ;;  %v447_v5 = vld [vmem:[%s597_s1 + $0x10] sm:$0xff] }
   0x2   :  { %v103_v1 = vunpack.c.l.b16 %v41_v0  ;;  %v446_v6 = vld [vmem:[%s597_s1 + $0x8] sm:$0xff]  ;;  %v445_v7 = vld [vmem:[%s597_s1] sm:$0xff]  ;;  %v439_v9 = vld [vmem:[%s599_s0 + $0x10] sm:$0xff] }
   0x3   :  { %v437_v8 = vld [vmem:[%s599_s0] sm:$0xff]  ;;  %v443_v11 = vld [vmem:[%s599_s0 + $0x30] sm:$0xff]  ;;  %v438_v12 = vld [vmem:[%s599_s0 + $0x8] sm:$0xff] }
   0x4   :  { %v108_v2 = vpack.c.b16 %v103_v1, %v103_v1  ;;  %v441_v10 = vld [vmem:[%s599_s0 + $0x20] sm:$0xff]  ;;  %v440_v13 = vld [vmem:[%s599_s0 + $0x18] sm:$0xff]  ;;  %v442_v14 = vld [vmem:[%s599_s0 + $0x28] sm:$0xff] }
   0x5   :  { %v444_v15 = vld [vmem:[%s599_s0 + $0x38] sm:$0xff]  ;;  %v464_v16 = vld [vmem:[%s598_s2] ss:$0 sm:$0xff] }
   0x6   :  { %v140_v3 = vsel %vm138_vm0, %v108_v2, 0 }
   0x7   :  { %145 = vmatpush.bf16.msra.mxu0 %v140_v3  ;;  %449 = vmatpush.bf16.msra.mxu1 %v140_v3 }
   0x8   :  { %450 = vmatpush.bf16.msra.mxu2 %v140_v3  ;;  %451 = vmatpush.bf16.msra.mxu3 %v140_v3 }
   0xb   :  { %146 = vmatpush.bf16.msra.mxu0 %v448_v4  ;;  %452 = vmatpush.bf16.msra.mxu1 %v448_v4 }
   0xc   :  { %453 = vmatpush.bf16.msra.mxu2 %v448_v4  ;;  %454 = vmatpush.bf16.msra.mxu3 %v448_v4 }
   0xf   :  { %147 = vmatpush.bf16.msra.mxu0 %v447_v5  ;;  %455 = vmatpush.bf16.msra.mxu1 %v447_v5 }
  0x10   :  { %456 = vmatpush.bf16.msra.mxu2 %v447_v5  ;;  %457 = vmatpush.bf16.msra.mxu3 %v447_v5 }
  0x13   :  { %148 = vmatpush.bf16.msra.mxu0 %v446_v6  ;;  %458 = vmatpush.bf16.msra.mxu1 %v446_v6 }
  0x14   :  { %459 = vmatpush.bf16.msra.mxu2 %v446_v6  ;;  %460 = vmatpush.bf16.msra.mxu3 %v446_v6 }
  0x17   :  { %149 = vmatpush.bf16.msra.mxu0 %v445_v7  ;;  %461 = vmatpush.bf16.msra.mxu1 %v445_v7 }
  0x18   :  { %462 = vmatpush.bf16.msra.mxu2 %v445_v7  ;;  %463 = vmatpush.bf16.msra.mxu3 %v445_v7 }
  0x1a   :  { %429 = vmatmul.msk.bf16.vlgmr.msra.gmra.mxu0 %vm113_vm1, %v437_v8  ;;  %431 = vmatmul.msk.bf16.vlgmr.msra.gmra.mxu1 %vm113_vm1, %v439_v9 }
  0x1b   :  { %433 = vmatmul.msk.bf16.vlgmr.msra.gmra.mxu2 %vm113_vm1, %v441_v10  ;;  %435 = vmatmul.msk.bf16.vlgmr.msra.gmra.mxu3 %vm113_vm1, %v443_v11 }
  0x2a   :  { %430 = vmatmul.msk.bf16.gmra.mxu0 %vm113_vm1, %v438_v12  ;;  %432 = vmatmul.msk.bf16.gmra.mxu1 %vm113_vm1, %v440_v13 }
  0x2b   :  { %434 = vmatmul.msk.bf16.gmra.mxu2 %vm113_vm1, %v442_v14  ;;  %436 = vmatmul.msk.bf16.gmra.mxu3 %vm113_vm1, %v444_v15 }
  0x97   :  { %v151_v17 = vpop.f32.mrf.mxu0  ;;  %v161_v18 = vpop.f32.mrf.mxu1 }
  0x98   :  { %v152_v19 = vadd.f32 %v464_v16, %v151_v17  ;;  %v162_v20 = vadd.f32 %v464_v16, %v161_v18 }
  0x9a   :  { %191 = vst [vmem:[%s600_s3] sm:$0xff] %v152_v19  ;;  %v327_v38 = vmul.f32 %v152_v19, %v152_v19  ;;  %v331_v54 = vmul.f32 %v162_v20, %v162_v20 }
  0x9b   :  { %195 = vst [vmem:[%s600_s3 + $0x20] sm:$0xff] %v162_v20 }
  0x9e   :  { %v171_v21 = vpop.f32.mrf.mxu2  ;;  %v181_v22 = vpop.f32.mrf.mxu3 }
  0x9f   :  { %v153_v23 = vpop.f32.mrf.mxu0  ;;  %v163_v24 = vpop.f32.mrf.mxu1  ;;  %v172_v25 = vadd.f32 %v464_v16, %v171_v21  ;;  %v546_v28 = vadd.f32 %v464_v16, %v181_v22 }
  0xa0   :  { %v154_v26 = vadd.f32 %v464_v16, %v153_v23  ;;  %v164_v27 = vadd.f32 %v464_v16, %v163_v24 }
  0xa1   :  { %199 = vst [vmem:[%s600_s3 + $0x40] sm:$0xff] %v172_v25  ;;  %v335_v6 = vmul.f32 %v172_v25, %v172_v25  ;;  %v339_v18 = vmul.f32 %v546_v28, %v546_v28 }
  0xa2   :  { %192 = vst [vmem:[%s600_s3 + $0x8] sm:$0xff] %v154_v26  ;;  %v328_v37 = vmul.f32 %v154_v26, %v154_v26  ;;  %v306_v39 = vadd.f32 %v154_v26, %v152_v19  ;;  %v332_v57 = vmul.f32 %v164_v27, %v164_v27 }
  0xa3   :  { %196 = vst [vmem:[%s600_s3 + $0x28] sm:$0xff] %v164_v27 }
  0xa4   :  { %203 = vst [vmem:[%s600_s3 + $0x60] sm:$0xff] %v546_v28  ;;  %v343_v43 = vadd.f32 %v328_v37, %v327_v38 }
  0xa6   :  { %v173_v29 = vpop.f32.mrf.mxu2  ;;  %v183_v30 = vpop.f32.mrf.mxu3 }
  0xa7   :  { %v156_v31 = vpop.f32.mrf.mxu0  ;;  %v166_v32 = vpop.f32.mrf.mxu1  ;;  %v174_v33 = vadd.f32 %v464_v16, %v173_v29  ;;  %v184_v36 = vadd.f32 %v464_v16, %v183_v30 }
  0xa8   :  { %v157_v34 = vadd.f32 %v464_v16, %v156_v31  ;;  %v167_v35 = vadd.f32 %v464_v16, %v166_v32 }
  0xa9   :  { %200 = vst [vmem:[%s600_s3 + $0x48] sm:$0xff] %v174_v33  ;;  %v336_v9 = vmul.f32 %v174_v33, %v174_v33  ;;  %v340_v21 = vmul.f32 %v184_v36, %v184_v36 }
  0xaa   :  { %193 = vst [vmem:[%s600_s3 + $0x10] sm:$0xff] %v157_v34  ;;  %v329_v40 = vmul.f32 %v157_v34, %v157_v34  ;;  %v307_v47 = vadd.f32 %v306_v39, %v157_v34  ;;  %v333_v0 = vmul.f32 %v167_v35, %v167_v35 }
  0xab   :  { %197 = vst [vmem:[%s600_s3 + $0x30] sm:$0xff] %v167_v35 }
  0xac   :  { %204 = vst [vmem:[%s600_s3 + $0x68] sm:$0xff] %v184_v36  ;;  %v344_v51 = vadd.f32 %v343_v43, %v329_v40 }
  0xae   :  { %v176_v41 = vpop.f32.mrf.mxu2  ;;  %v186_v42 = vpop.f32.mrf.mxu3 }
  0xaf   :  { %v158_v44 = vpop.f32.mrf.mxu0  ;;  %v168_v45 = vpop.f32.mrf.mxu1  ;;  %v177_v46 = vadd.f32 %v464_v16, %v176_v41  ;;  %v187_v50 = vadd.f32 %v464_v16, %v186_v42 }
  0xb0   :  { %v159_v48 = vadd.f32 %v464_v16, %v158_v44  ;;  %v169_v49 = vadd.f32 %v464_v16, %v168_v45 }
  0xb1   :  { %201 = vst [vmem:[%s600_s3 + $0x50] sm:$0xff] %v177_v46  ;;  %v337_v13 = vmul.f32 %v177_v46, %v177_v46 }
  0xb2   :  { %194 = vst [vmem:[%s600_s3 + $0x18] sm:$0xff] %v159_v48  ;;  %v308_v52 = vadd.f32 %v307_v47, %v159_v48  ;;  %v330_v53 = vmul.f32 %v159_v48, %v159_v48  ;;  %v334_v4 = vmul.f32 %v169_v49, %v169_v49 }
  0xb3   :  { %198 = vst [vmem:[%s600_s3 + $0x38] sm:$0xff] %v169_v49 }
  0xb4   :  { %v309_v55 = vadd.f32 %v308_v52, %v162_v20  ;;  %v345_v56 = vadd.f32 %v344_v51, %v330_v53  ;;  %205 = vst [vmem:[%s600_s3 + $0x70] sm:$0xff] %v187_v50 }
  0xb6   :  { %v346_v58 = vadd.f32 %v345_v56, %v331_v54  ;;  %v310_v59 = vadd.f32 %v309_v55, %v164_v27  ;;  %v178_v60 = vpop.f32.mrf.mxu2  ;;  %v188_v61 = vpop.f32.mrf.mxu3 }
  0xb7   :  { %v179_v62 = vadd.f32 %v464_v16, %v178_v60  ;;  %v189_v63 = vadd.f32 %v464_v16, %v188_v61 }
  0xb8   :  { %v311_v1 = vadd.f32 %v310_v59, %v167_v35  ;;  %v347_v2 = vadd.f32 %v346_v58, %v332_v57  ;;  %v208_v35 = vlaneseq }
  0xb9   :  { %202 = vst [vmem:[%s600_s3 + $0x58] sm:$0xff] %v179_v62  ;;  %v338_v17 = vmul.f32 %v179_v62, %v179_v62  ;;  %v342_v30 = vmul.f32 %v189_v63, %v189_v63 }
  0xba   :  { %v312_v3 = vadd.f32 %v311_v1, %v169_v49  ;;  %v348_v5 = vadd.f32 %v347_v2, %v333_v0  ;;  %206 = vst [vmem:[%s600_s3 + $0x78] sm:$0xff] %v189_v63 }
  0xbc   :  { %v313_v7 = vadd.f32 %v312_v3, %v172_v25  ;;  %v349_v8 = vadd.f32 %v348_v5, %v334_v4  ;;  %v341_v25 = vmul.f32 %v187_v50, %v187_v50 }
  0xbe   :  { %v350_v10 = vadd.f32 %v349_v8, %v335_v6  ;;  %v314_v11 = vadd.f32 %v313_v7, %v174_v33 }
  0xc0   :  { %v315_v12 = vadd.f32 %v314_v11, %v177_v46  ;;  %v351_v14 = vadd.f32 %v350_v10, %v336_v9 }
  0xc2   :  { %v352_v15 = vadd.f32 %v351_v14, %v337_v13  ;;  %v316_v16 = vadd.f32 %v315_v12, %v179_v62 }
  0xc4   :  { %v317_v19 = vadd.f32 %v316_v16, %v546_v28  ;;  %v353_v20 = vadd.f32 %v352_v15, %v338_v17  ;;  %v209_v28 = vshrl.u32 %v208_v35, 7 }
  0xc6   :  { %v354_v22 = vadd.f32 %v353_v20, %v339_v18  ;;  %v318_v23 = vadd.f32 %v317_v19, %v184_v36  ;;  %vm365_vm2 = vcmp.eq.s32.totalorder %v209_v28, 1  ;;  %vm364_vm3 = vcmp.eq.s32.totalorder %v209_v28, 0 }
  0xc8   :  { %v319_v24 = vadd.f32 %v318_v23, %v187_v50  ;;  %v355_v26 = vadd.f32 %v354_v22, %v340_v21 }
  0xca   :  { %v356_v27 = vadd.f32 %v355_v26, %v341_v25  ;;  %v320_v29 = vadd.f32 %v319_v24, %v189_v63 }
  0xcc   :  { %v321_v31 = vrot.slane %v320_v29, 4  ;;  %v357_v32 = vadd.f32 %v356_v27, %v342_v30 }
  0xce   :  { %v322_v33 = vadd.f32 %v321_v31, %v320_v29  ;;  %v358_v34 = vrot.slane %v357_v32, 4 }
  0xd0   :  { %v323_v37 = vrot.slane %v322_v33, 2  ;;  %v359_v38 = vadd.f32 %v358_v34, %v357_v32 }
  0xd2   :  { %v324_v39 = vadd.f32 %v323_v37, %v322_v33  ;;  %v360_v40 = vrot.slane %v359_v38, 2 }
  0xd4   :  { %v361_v41 = vadd.f32 %v360_v40, %v359_v38  ;;  %v325_v42 = vrot.slane %v324_v39, 1 }
  0xd6   :  { %v362_v43 = vrot.slane %v361_v41, 1  ;;  %v326_v44 = vadd.f32 %v325_v42, %v324_v39 }
  0xd8   :  { %v363_v36 = vadd.f32 %v362_v43, %v361_v41 }
  0xda   :  { %v368_v45 = vsel %vm365_vm2, %v363_v36, 0.0 }
  0xdb   :  { %v371_v46 = vsel %vm364_vm3, %v326_v44, %v368_v45 }
  0xdc   :  { %372 = vst [vmem:[%s601_s4] sm:$0xff] %v371_v46 }

// kernel: resnet_generator_forward.22
= control target key start
LH: loop header
LB: loop body
LE: loop exit
PB: predicated region body
PF: predicated region fallthrough
CT: control target
= control target key end

     0   :  { %s248_s0 = inlined_call_operand.vmem [shape: f32[128,128], index: 0, kind: input, shape index: {}]   ;;  %s249_s1 = inlined_call_operand.vmem [shape: f32[1,128], index: 1, kind: input, shape index: {}]   ;;  %s250_s2 = inlined_call_operand.vmem [shape: f32[1,128], index: 2, kind: input, shape index: {}]   ;;  %s251_s3 = inlined_call_operand.vmem [shape: f32[128,128], index: 3, kind: output, shape index: {}]  }
   0x1   :  { %v14_v0 = vld [vmem:[%s248_s0] sm:$0xff]  ;;  %v15_v3 = vld [vmem:[%s248_s0 + $0x8] sm:$0xff]  ;;  %v16_v6 = vld [vmem:[%s248_s0 + $0x10] sm:$0xff] }
   0x2   :  { %v106_v1 = vld [vmem:[%s249_s1] ss:$0 sm:$0xff]  ;;  %v17_v7 = vld [vmem:[%s248_s0 + $0x18] sm:$0xff]  ;;  %v19_v12 = vld [vmem:[%s248_s0 + $0x28] sm:$0xff] }
   0x3   :  { %v137_v2 = vld [vmem:[%s250_s2] ss:$0 sm:$0xff]  ;;  %v34_v4 = vmul.f32 %v106_v1, %v14_v0  ;;  %v35_v5 = vmul.f32 %v106_v1, %v15_v3  ;;  %v36_v9 = vmul.f32 %v106_v1, %v16_v6  ;;  %v37_v10 = vmul.f32 %v106_v1, %v17_v7  ;;  %v20_v13 = vld [vmem:[%s248_s0 + $0x30] sm:$0xff]  ;;  %v21_v14 = vld [vmem:[%s248_s0 + $0x38] sm:$0xff] }
   0x4   :  { %v18_v8 = vld [vmem:[%s248_s0 + $0x20] sm:$0xff]  ;;  %v39_v17 = vmul.f32 %v106_v1, %v19_v12  ;;  %v40_v18 = vmul.f32 %v106_v1, %v20_v13  ;;  %v41_v22 = vmul.f32 %v106_v1, %v21_v14  ;;  %v23_v24 = vld [vmem:[%s248_s0 + $0x48] sm:$0xff]  ;;  %v24_v29 = vld [vmem:[%s248_s0 + $0x50] sm:$0xff] }
   0x5   :  { %v38_v11 = vmul.f32 %v106_v1, %v18_v8  ;;  %v54_v15 = vadd.f32 %v137_v2, %v34_v4  ;;  %v55_v16 = vadd.f32 %v137_v2, %v35_v5  ;;  %v56_v19 = vadd.f32 %v137_v2, %v36_v9  ;;  %v22_v23 = vld [vmem:[%s248_s0 + $0x40] sm:$0xff]  ;;  %v25_v30 = vld [vmem:[%s248_s0 + $0x58] sm:$0xff]  ;;  %v27_v35 = vld [vmem:[%s248_s0 + $0x68] sm:$0xff] }
   0x6   :  { %v57_v20 = vadd.f32 %v137_v2, %v37_v10  ;;  %v59_v27 = vadd.f32 %v137_v2, %v39_v17  ;;  %v60_v28 = vadd.f32 %v137_v2, %v40_v18  ;;  %v26_v31 = vld [vmem:[%s248_s0 + $0x60] sm:$0xff]  ;;  %v61_v34 = vadd.f32 %v137_v2, %v41_v22  ;;  %v28_v36 = vld [vmem:[%s248_s0 + $0x70] sm:$0xff]  ;;  %v29_v41 = vld [vmem:[%s248_s0 + $0x78] sm:$0xff] }
   0x7   :  { %v58_v21 = vadd.f32 %v137_v2, %v38_v11  ;;  %v70_v25 = vmax.f32 %v54_v15, 0.0  ;;  %v71_v26 = vmax.f32 %v55_v16, 0.0  ;;  %v72_v32 = vmax.f32 %v56_v19, 0.0 }
   0x8   :  { %v73_v33 = vmax.f32 %v57_v20, 0.0  ;;  %v75_v38 = vmax.f32 %v59_v27, 0.0  ;;  %v42_v39 = vmul.f32 %v106_v1, %v22_v23  ;;  %v43_v40 = vmul.f32 %v106_v1, %v23_v24 }
   0x9   :  { %86 = vst [vmem:[%s251_s3] sm:$0xff] %v70_v25  ;;  %v74_v37 = vmax.f32 %v58_v21, 0.0  ;;  %v76_v42 = vmax.f32 %v60_v28, 0.0  ;;  %v44_v43 = vmul.f32 %v106_v1, %v24_v29  ;;  %v45_v44 = vmul.f32 %v106_v1, %v25_v30 }
   0xa   :  { %87 = vst [vmem:[%s251_s3 + $0x8] sm:$0xff] %v71_v26  ;;  %v46_v45 = vmul.f32 %v106_v1, %v26_v31  ;;  %v62_v46 = vadd.f32 %v137_v2, %v42_v39  ;;  %v63_v47 = vadd.f32 %v137_v2, %v43_v40  ;;  %v47_v48 = vmul.f32 %v106_v1, %v27_v35 }
   0xb   :  { %88 = vst [vmem:[%s251_s3 + $0x10] sm:$0xff] %v72_v32  ;;  %v48_v49 = vmul.f32 %v106_v1, %v28_v36  ;;  %v77_v50 = vmax.f32 %v61_v34, 0.0  ;;  %v64_v51 = vadd.f32 %v137_v2, %v44_v43  ;;  %v65_v52 = vadd.f32 %v137_v2, %v45_v44 }
   0xc   :  { %89 = vst [vmem:[%s251_s3 + $0x18] sm:$0xff] %v73_v33  ;;  %v49_v53 = vmul.f32 %v106_v1, %v29_v41  ;;  %v78_v54 = vmax.f32 %v62_v46, 0.0  ;;  %v66_v55 = vadd.f32 %v137_v2, %v46_v45  ;;  %v79_v56 = vmax.f32 %v63_v47, 0.0 }
   0xd   :  { %90 = vst [vmem:[%s251_s3 + $0x20] sm:$0xff] %v74_v37  ;;  %v67_v57 = vadd.f32 %v137_v2, %v47_v48  ;;  %v80_v58 = vmax.f32 %v64_v51, 0.0  ;;  %v68_v59 = vadd.f32 %v137_v2, %v48_v49  ;;  %v81_v60 = vmax.f32 %v65_v52, 0.0 }
   0xe   :  { %91 = vst [vmem:[%s251_s3 + $0x28] sm:$0xff] %v75_v38  ;;  %v69_v61 = vadd.f32 %v137_v2, %v49_v53  ;;  %v82_v62 = vmax.f32 %v66_v55, 0.0 }
   0xf   :  { %92 = vst [vmem:[%s251_s3 + $0x30] sm:$0xff] %v76_v42  ;;  %v83_v63 = vmax.f32 %v67_v57, 0.0  ;;  %v84_v0 = vmax.f32 %v68_v59, 0.0 }
  0x10   :  { %93 = vst [vmem:[%s251_s3 + $0x38] sm:$0xff] %v77_v50  ;;  %v85_v1 = vmax.f32 %v69_v61, 0.0 }
  0x11   :  { %94 = vst [vmem:[%s251_s3 + $0x40] sm:$0xff] %v78_v54 }
  0x12   :  { %95 = vst [vmem:[%s251_s3 + $0x48] sm:$0xff] %v79_v56 }
  0x13   :  { %96 = vst [vmem:[%s251_s3 + $0x50] sm:$0xff] %v80_v58 }
  0x14   :  { %97 = vst [vmem:[%s251_s3 + $0x58] sm:$0xff] %v81_v60 }
  0x15   :  { %98 = vst [vmem:[%s251_s3 + $0x60] sm:$0xff] %v82_v62 }
  0x16   :  { %99 = vst [vmem:[%s251_s3 + $0x68] sm:$0xff] %v83_v63 }
  0x17   :  { %100 = vst [vmem:[%s251_s3 + $0x70] sm:$0xff] %v84_v0 }
  0x18   :  { %101 = vst [vmem:[%s251_s3 + $0x78] sm:$0xff] %v85_v1 }

// kernel: resnet_generator_forward.24
= control target key start
LH: loop header
LB: loop body
LE: loop exit
PB: predicated region body
PF: predicated region fallthrough
CT: control target
= control target key end

     0   :  { %s98_s0 = inlined_call_operand.vmem [shape: f32[32,128], index: 0, kind: input, shape index: {}]   ;;  %s99_s1 = inlined_call_operand.vmem [shape: f32[1,128], index: 1, kind: input, shape index: {}]   ;;  %s100_s2 = inlined_call_operand.vmem [shape: f32[1,128], index: 2, kind: input, shape index: {}]   ;;  %s101_s3 = inlined_call_operand.vmem [shape: f32[32,128], index: 3, kind: output, shape index: {}]  }
   0x1   :  { %v14_v0 = vld [vmem:[%s98_s0] sm:$0xff]  ;;  %v15_v3 = vld [vmem:[%s98_s0 + $0x8] sm:$0xff]  ;;  %v16_v6 = vld [vmem:[%s98_s0 + $0x10] sm:$0xff] }
   0x2   :  { %v46_v1 = vld [vmem:[%s99_s1] ss:$0 sm:$0xff]  ;;  %v17_v7 = vld [vmem:[%s98_s0 + $0x18] sm:$0xff] }
   0x3   :  { %v47_v2 = vld [vmem:[%s100_s2] ss:$0 sm:$0xff]  ;;  %v22_v4 = vmul.f32 %v46_v1, %v14_v0  ;;  %v23_v5 = vmul.f32 %v46_v1, %v15_v3  ;;  %v24_v8 = vmul.f32 %v46_v1, %v16_v6  ;;  %v25_v9 = vmul.f32 %v46_v1, %v17_v7 }
   0x5   :  { %v30_v10 = vadd.f32 %v47_v2, %v22_v4  ;;  %v31_v11 = vadd.f32 %v47_v2, %v23_v5  ;;  %v32_v12 = vadd.f32 %v47_v2, %v24_v8  ;;  %v33_v13 = vadd.f32 %v47_v2, %v25_v9 }
   0x7   :  { %v34_v14 = vmax.f32 %v30_v10, 0.0  ;;  %v35_v15 = vmax.f32 %v31_v11, 0.0  ;;  %v36_v16 = vmax.f32 %v32_v12, 0.0  ;;  %v37_v17 = vmax.f32 %v33_v13, 0.0 }
   0x9   :  { %38 = vst [vmem:[%s101_s3] sm:$0xff] %v34_v14 }
   0xa   :  { %39 = vst [vmem:[%s101_s3 + $0x8] sm:$0xff] %v35_v15 }
   0xb   :  { %40 = vst [vmem:[%s101_s3 + $0x10] sm:$0xff] %v36_v16 }
   0xc   :  { %41 = vst [vmem:[%s101_s3 + $0x18] sm:$0xff] %v37_v17 }

// kernel: resnet_generator_forward.23
= control target key start
LH: loop header
LB: loop body
LE: loop exit
PB: predicated region body
PF: predicated region fallthrough
CT: control target
= control target key end

     0   :  { %vm115_vm0 = vcmask 130048   ;;  %v165_v51 = vlaneseq  ;;  %s402_s1 = inlined_call_operand.vmem [shape: bf16[144,128], index: 1, kind: input, shape index: {}]   ;;  %s403_s0 = inlined_call_operand.vmem [shape: bf16[32,144], index: 0, kind: input, shape index: {}]   ;;  %s404_s2 = inlined_call_operand.vmem [shape: f32[1,128], index: 2, kind: input, shape index: {}]   ;;  %s405_s3 = inlined_call_operand.vmem [shape: f32[32,128], index: 3, kind: output, shape index: {0}]   ;;  %s406_s4 = inlined_call_operand.vmem [shape: f32[8,128], index: 4, kind: output, shape index: {1}]  }
   0x1   :  { %v295_v0 = vld [vmem:[%s402_s1 + $0x38] sm:$0xff]  ;;  %v296_v1 = vld [vmem:[%s402_s1 + $0x40] sm:$0xff]  ;;  %v294_v3 = vld [vmem:[%s402_s1 + $0x30] sm:$0xff] }
   0x2   :  { %v284_v2 = vld [vmem:[%s403_s0 + $0x4] sm:$0xf]  ;;  %122 = vmatpush.bf16.msra.mxu0 %v295_v0  ;;  %297 = vmatpush.bf16.msra.mxu2 %v295_v0  ;;  %v234_v4 = vld [vmem:[%s403_s0 + $0x8] sm:$0xf0]  ;;  %v291_v8 = vld [vmem:[%s402_s1 + $0x18] sm:$0xff]  ;;  %v166_v56 = vshrl.u32 %v165_v51, 7 }
   0x3   :  { %148 = vmatpush.bf16.msra.mxu1 %v296_v1  ;;  %v237_v5 = vor.u32 %v284_v2, %v234_v4  ;;  %v293_v6 = vld [vmem:[%s402_s1 + $0x28] sm:$0xff]  ;;  %v292_v7 = vld [vmem:[%s402_s1 + $0x20] sm:$0xff]  ;;  %v286_v9 = vld [vmem:[%s403_s0 + $0x14] sm:$0xf] }
   0x4   :  { %v242_v10 = vld [vmem:[%s403_s0 + $0x18] sm:$0xf0]  ;;  %v290_v11 = vld [vmem:[%s402_s1 + $0x10] sm:$0xff]  ;;  %v289_v13 = vld [vmem:[%s402_s1 + $0x8] sm:$0xff]  ;;  %vm214_vm1 = vcmp.eq.s32.totalorder %v166_v56, 1  ;;  %vm213_vm2 = vcmp.eq.s32.totalorder %v166_v56, 0 }
   0x5   :  { %v245_v12 = vor.u32 %v286_v9, %v242_v10  ;;  %v288_v14 = vld [vmem:[%s402_s1] sm:$0xff]  ;;  %v285_v16 = vld [vmem:[%s403_s0 + $0x4] sm:$0xf0]  ;;  %v240_v17 = vld [vmem:[%s403_s0 + $0x10] sm:$0xf] }
   0x6   :  { %123 = vmatpush.bf16.msra.mxu0 %v294_v3  ;;  %298 = vmatpush.bf16.msra.mxu2 %v294_v3  ;;  %v232_v15 = vld [vmem:[%s403_s0] sm:$0xf]  ;;  %v287_v18 = vld [vmem:[%s403_s0 + $0x14] sm:$0xf0] }
   0x7   :  { %282 = vmatmul.msk.bf16.vlgmr.msra.gmra.mxu1 %vm115_vm0, %v237_v5  ;;  %v233_v19 = vor.u32 %v285_v16, %v232_v15  ;;  %v241_v20 = vor.u32 %v287_v18, %v240_v17  ;;  %v305_v23 = vld [vmem:[%s404_s2] ss:$0 sm:$0xff] }
   0xa   :  { %124 = vmatpush.bf16.msra.mxu0 %v293_v6  ;;  %299 = vmatpush.bf16.msra.mxu2 %v293_v6 }
   0xe   :  { %125 = vmatpush.bf16.msra.mxu0 %v292_v7  ;;  %300 = vmatpush.bf16.msra.mxu2 %v292_v7 }
  0x12   :  { %126 = vmatpush.bf16.msra.mxu0 %v291_v8  ;;  %301 = vmatpush.bf16.msra.mxu2 %v291_v8 }
  0x16   :  { %127 = vmatpush.bf16.msra.mxu0 %v290_v11  ;;  %302 = vmatpush.bf16.msra.mxu2 %v290_v11 }
  0x17   :  { %283 = vmatmul.msk.bf16.gmra.mxu1 %vm115_vm0, %v245_v12 }
  0x1a   :  { %128 = vmatpush.bf16.msra.mxu0 %v289_v13  ;;  %303 = vmatpush.bf16.msra.mxu2 %v289_v13 }
  0x1e   :  { %129 = vmatpush.bf16.msra.mxu0 %v288_v14  ;;  %304 = vmatpush.bf16.msra.mxu2 %v288_v14 }
  0x21   :  { %130 = vmatmul.bf16.vlgmr.msra.gmra.mxu0 %v233_v19  ;;  %135 = vmatmul.bf16.vlgmr.msra.gmra.mxu2 %v241_v20 }
  0x84   :  { %v150_v21 = vpop.f32.mrf.mxu1 }
  0x8c   :  { %v152_v22 = vpop.f32.mrf.mxu1 }
  0x94   :  { %v155_v27 = vpop.f32.mrf.mxu1 }
  0x9c   :  { %v157_v40 = vpop.f32.mrf.mxu1 }
  0x9e   :  { %v131_v24 = vpop.f32.mrf.mxu0 }
  0x9f   :  { %v132_v25 = vadd.f32 %v305_v23, %v131_v24 }
  0xa1   :  { %v151_v26 = vadd.f32 %v150_v21, %v132_v25 }
  0xa3   :  { %160 = vst [vmem:[%s405_s3] sm:$0xff] %v151_v26  ;;  %v200_v34 = vmul.f32 %v151_v26, %v151_v26 }
  0xa4   :  { %v136_v28 = vpop.f32.mrf.mxu2 }
  0xa5   :  { %v137_v29 = vadd.f32 %v305_v23, %v136_v28 }
  0xa6   :  { %v133_v30 = vpop.f32.mrf.mxu0 }
  0xa7   :  { %v156_v31 = vadd.f32 %v155_v27, %v137_v29  ;;  %v134_v32 = vadd.f32 %v305_v23, %v133_v30 }
  0xa9   :  { %162 = vst [vmem:[%s405_s3 + $0x10] sm:$0xff] %v156_v31  ;;  %v153_v33 = vadd.f32 %v152_v22, %v134_v32  ;;  %v202_v41 = vmul.f32 %v156_v31, %v156_v31 }
  0xab   :  { %161 = vst [vmem:[%s405_s3 + $0x8] sm:$0xff] %v153_v33  ;;  %v191_v35 = vadd.f32 %v153_v33, %v151_v26  ;;  %v201_v36 = vmul.f32 %v153_v33, %v153_v33 }
  0xac   :  { %v138_v37 = vpop.f32.mrf.mxu2 }
  0xad   :  { %v204_v38 = vadd.f32 %v201_v36, %v200_v34  ;;  %v139_v39 = vadd.f32 %v305_v23, %v138_v37  ;;  %v192_v43 = vadd.f32 %v191_v35, %v156_v31 }
  0xaf   :  { %v158_v42 = vadd.f32 %v157_v40, %v139_v39  ;;  %v205_v46 = vadd.f32 %v204_v38, %v202_v41 }
  0xb1   :  { %163 = vst [vmem:[%s405_s3 + $0x18] sm:$0xff] %v158_v42  ;;  %v193_v44 = vadd.f32 %v192_v43, %v158_v42  ;;  %v203_v45 = vmul.f32 %v158_v42, %v158_v42 }
  0xb3   :  { %v194_v47 = vrot.slane %v193_v44, 4  ;;  %v206_v48 = vadd.f32 %v205_v46, %v203_v45 }
  0xb5   :  { %v195_v49 = vadd.f32 %v194_v47, %v193_v44  ;;  %v207_v50 = vrot.slane %v206_v48, 4 }
  0xb7   :  { %v196_v52 = vrot.slane %v195_v49, 2  ;;  %v208_v53 = vadd.f32 %v207_v50, %v206_v48 }
  0xb9   :  { %v197_v54 = vadd.f32 %v196_v52, %v195_v49  ;;  %v209_v55 = vrot.slane %v208_v53, 2 }
  0xbb   :  { %v210_v57 = vadd.f32 %v209_v55, %v208_v53  ;;  %v198_v58 = vrot.slane %v197_v54, 1 }
  0xbd   :  { %v211_v59 = vrot.slane %v210_v57, 1  ;;  %v199_v61 = vadd.f32 %v198_v58, %v197_v54 }
  0xbf   :  { %v212_v60 = vadd.f32 %v211_v59, %v210_v57 }
  0xc1   :  { %v217_v62 = vsel %vm214_vm1, %v212_v60, 0.0 }
  0xc2   :  { %v220_v63 = vsel %vm213_vm2, %v199_v61, %v217_v62 }
  0xc3   :  { %221 = vst [vmem:[%s406_s4] sm:$0xff] %v220_v63 }

// kernel: resnet_generator_forward.28
= control target key start
LH: loop header
LB: loop body
LE: loop exit
PB: predicated region body
PF: predicated region fallthrough
CT: control target
= control target key end

     0   :  { %s122_s0 = inlined_call_operand.vmem [shape: f32[32,128], index: 0, kind: input, shape index: {}]   ;;  %s123_s1 = inlined_call_operand.vmem [shape: f32[1,128], index: 1, kind: input, shape index: {}]   ;;  %s124_s2 = inlined_call_operand.vmem [shape: f32[1,128], index: 2, kind: input, shape index: {}]   ;;  %s125_s3 = inlined_call_operand.vmem [shape: f32[32,128], index: 3, kind: input, shape index: {}]   ;;  %s126_s4 = inlined_call_operand.vmem [shape: f32[32,128], index: 4, kind: output, shape index: {}]  }
   0x1   :  { %v17_v0 = vld [vmem:[%s122_s0] sm:$0xff]  ;;  %v18_v4 = vld [vmem:[%s122_s0 + $0x8] sm:$0xff]  ;;  %v19_v5 = vld [vmem:[%s122_s0 + $0x10] sm:$0xff] }
   0x2   :  { %v53_v1 = vld [vmem:[%s123_s1] ss:$0 sm:$0xff]  ;;  %v20_v9 = vld [vmem:[%s122_s0 + $0x18] sm:$0xff]  ;;  %v38_v11 = vld [vmem:[%s125_s3 + $0x8] sm:$0xff] }
   0x3   :  { %v54_v2 = vld [vmem:[%s124_s2] ss:$0 sm:$0xff]  ;;  %v25_v3 = vmul.f32 %v53_v1, %v17_v0  ;;  %v26_v7 = vmul.f32 %v53_v1, %v18_v4  ;;  %v27_v8 = vmul.f32 %v53_v1, %v19_v5  ;;  %v39_v12 = vld [vmem:[%s125_s3 + $0x10] sm:$0xff]  ;;  %v28_v13 = vmul.f32 %v53_v1, %v20_v9  ;;  %v40_v16 = vld [vmem:[%s125_s3 + $0x18] sm:$0xff] }
   0x4   :  { %v37_v6 = vld [vmem:[%s125_s3] sm:$0xff] }
   0x5   :  { %v33_v10 = vadd.f32 %v54_v2, %v25_v3  ;;  %v34_v14 = vadd.f32 %v54_v2, %v26_v7  ;;  %v35_v15 = vadd.f32 %v54_v2, %v27_v8  ;;  %v36_v18 = vadd.f32 %v54_v2, %v28_v13 }
   0x7   :  { %v41_v17 = vadd.f32 %v37_v6, %v33_v10  ;;  %v42_v19 = vadd.f32 %v38_v11, %v34_v14  ;;  %v43_v20 = vadd.f32 %v39_v12, %v35_v15  ;;  %v44_v21 = vadd.f32 %v40_v16, %v36_v18 }
   0x9   :  { %45 = vst [vmem:[%s126_s4] sm:$0xff] %v41_v17 }
   0xa   :  { %46 = vst [vmem:[%s126_s4 + $0x8] sm:$0xff] %v42_v19 }
   0xb   :  { %47 = vst [vmem:[%s126_s4 + $0x10] sm:$0xff] %v43_v20 }
   0xc   :  { %48 = vst [vmem:[%s126_s4 + $0x18] sm:$0xff] %v44_v21 }

// kernel: resnet_generator_forward.25
= control target key start
LH: loop header
LB: loop body
LE: loop exit
PB: predicated region body
PF: predicated region fallthrough
CT: control target
= control target key end

     0   :  { %vm203_vm0 = vcmask 261120   ;;  %s603_s1 = inlined_call_operand.vmem [shape: bf16[288,128], index: 1, kind: input, shape index: {}]   ;;  %s604_s0 = inlined_call_operand.vmem [shape: bf16[32,288], index: 0, kind: input, shape index: {}]   ;;  %s605_s2 = inlined_call_operand.vmem [shape: f32[1,128], index: 2, kind: input, shape index: {}]   ;;  %s606_s3 = inlined_call_operand.vmem [shape: f32[32,128], index: 3, kind: output, shape index: {0}]   ;;  %s607_s4 = inlined_call_operand.vmem [shape: f32[8,128], index: 4, kind: output, shape index: {1}]  }
   0x1   :  { %v448_v0 = vld [vmem:[%s603_s1 + $0x38] sm:$0xff]  ;;  %v447_v2 = vld [vmem:[%s603_s1 + $0x30] sm:$0xff]  ;;  %v458_v3 = vld [vmem:[%s603_s1 + $0x88] sm:$0xff] }
   0x2   :  { %v456_v1 = vld [vmem:[%s603_s1 + $0x78] sm:$0xff]  ;;  %210 = vmatpush.bf16.msra.mxu0 %v448_v0  ;;  %459 = vmatpush.bf16.msra.mxu3 %v448_v0  ;;  %v455_v4 = vld [vmem:[%s603_s1 + $0x70] sm:$0xff]  ;;  %v457_v5 = vld [vmem:[%s603_s1 + $0x80] sm:$0xff] }
   0x3   :  { %229 = vmatpush.bf16.msra.mxu1 %v456_v1  ;;  %254 = vmatpush.bf16.msra.mxu2 %v458_v3  ;;  %v347_v6 = vld [vmem:[%s604_s0 + $0x8] sm:$0xf]  ;;  %v437_v7 = vld [vmem:[%s604_s0 + $0x10] sm:$0xf0]  ;;  %v445_v11 = vld [vmem:[%s603_s1 + $0x20] sm:$0xff] }
   0x4   :  { %v446_v8 = vld [vmem:[%s603_s1 + $0x28] sm:$0xff]  ;;  %v348_v10 = vor.u32 %v437_v7, %v347_v6  ;;  %v453_v12 = vld [vmem:[%s603_s1 + $0x60] sm:$0xff]  ;;  %v444_v13 = vld [vmem:[%s603_s1 + $0x18] sm:$0xff] }
   0x5   :  { %v454_v9 = vld [vmem:[%s603_s1 + $0x68] sm:$0xff]  ;;  %v452_v14 = vld [vmem:[%s603_s1 + $0x58] sm:$0xff]  ;;  %v443_v15 = vld [vmem:[%s603_s1 + $0x10] sm:$0xff] }
   0x6   :  { %211 = vmatpush.bf16.msra.mxu0 %v447_v2  ;;  %460 = vmatpush.bf16.msra.mxu3 %v447_v2  ;;  %v451_v16 = vld [vmem:[%s603_s1 + $0x50] sm:$0xff]  ;;  %v359_v17 = vld [vmem:[%s604_s0 + $0x20] sm:$0xf]  ;;  %v440_v18 = vld [vmem:[%s604_s0 + $0x28] sm:$0xf0] }
   0x7   :  { %230 = vmatpush.bf16.msra.mxu1 %v455_v4  ;;  %255 = vmatpush.bf16.msra.mxu2 %v457_v5  ;;  %v442_v19 = vld [vmem:[%s603_s1 + $0x8] sm:$0xff]  ;;  %v360_v21 = vor.u32 %v440_v18, %v359_v17  ;;  %v441_v22 = vld [vmem:[%s603_s1] sm:$0xff]  ;;  %v351_v25 = vld [vmem:[%s604_s0 + $0x18] sm:$0xf] }
   0x8   :  { %v450_v20 = vld [vmem:[%s603_s1 + $0x48] sm:$0xff]  ;;  %v339_v23 = vld [vmem:[%s604_s0] sm:$0xf]  ;;  %v439_v26 = vld [vmem:[%s604_s0 + $0x20] sm:$0xf0] }
   0x9   :  { %v436_v24 = vld [vmem:[%s604_s0 + $0x8] sm:$0xf0]  ;;  %v449_v27 = vld [vmem:[%s603_s1 + $0x40] sm:$0xff]  ;;  %v341_v29 = vld [vmem:[%s604_s0 + $0xc] sm:$0xf0]  ;;  %v352_v31 = vor.u32 %v439_v26, %v351_v25 }
   0xa   :  { %212 = vmatpush.bf16.msra.mxu0 %v446_v8  ;;  %461 = vmatpush.bf16.msra.mxu3 %v446_v8  ;;  %v435_v28 = vld [vmem:[%s604_s0 + $0x4] sm:$0xf]  ;;  %v340_v30 = vor.u32 %v436_v24, %v339_v23  ;;  %v438_v33 = vld [vmem:[%s604_s0 + $0x1c] sm:$0xf]  ;;  %v353_v34 = vld [vmem:[%s604_s0 + $0x24] sm:$0xf0] }
   0xb   :  { %231 = vmatpush.bf16.msra.mxu1 %v454_v9  ;;  %433 = vmatmul.msk.bf16.vlgmr.msra.gmra.mxu2 %vm203_vm0, %v348_v10  ;;  %v344_v32 = vor.u32 %v435_v28, %v341_v29  ;;  %v356_v35 = vor.u32 %v438_v33, %v353_v34  ;;  %v467_v37 = vld [vmem:[%s605_s2] ss:$0 sm:$0xff]  ;;  %v272_v10 = vlaneseq }
   0xe   :  { %213 = vmatpush.bf16.msra.mxu0 %v445_v11  ;;  %462 = vmatpush.bf16.msra.mxu3 %v445_v11 }
   0xf   :  { %232 = vmatpush.bf16.msra.mxu1 %v453_v12 }
  0x12   :  { %214 = vmatpush.bf16.msra.mxu0 %v444_v13  ;;  %463 = vmatpush.bf16.msra.mxu3 %v444_v13 }
  0x13   :  { %233 = vmatpush.bf16.msra.mxu1 %v452_v14 }
  0x16   :  { %215 = vmatpush.bf16.msra.mxu0 %v443_v15  ;;  %464 = vmatpush.bf16.msra.mxu3 %v443_v15  ;;  %v273_v15 = vshrl.u32 %v272_v10, 7 }
  0x17   :  { %234 = vmatpush.bf16.msra.mxu1 %v451_v16 }
  0x18   :  { %vm321_vm1 = vcmp.eq.s32.totalorder %v273_v15, 1  ;;  %vm320_vm2 = vcmp.eq.s32.totalorder %v273_v15, 0 }
  0x1a   :  { %216 = vmatpush.bf16.msra.mxu0 %v442_v19  ;;  %465 = vmatpush.bf16.msra.mxu3 %v442_v19 }
  0x1b   :  { %235 = vmatpush.bf16.msra.mxu1 %v450_v20  ;;  %434 = vmatmul.msk.bf16.gmra.mxu2 %vm203_vm0, %v360_v21 }
  0x1e   :  { %217 = vmatpush.bf16.msra.mxu0 %v441_v22  ;;  %466 = vmatpush.bf16.msra.mxu3 %v441_v22 }
  0x1f   :  { %236 = vmatpush.bf16.msra.mxu1 %v449_v27 }
  0x21   :  { %218 = vmatmul.bf16.vlgmr.msra.gmra.mxu0 %v340_v30  ;;  %223 = vmatmul.bf16.vlgmr.msra.gmra.mxu3 %v352_v31 }
  0x22   :  { %237 = vmatmul.bf16.vlgmr.msra.gmra.mxu1 %v344_v32 }
  0x32   :  { %242 = vmatmul.bf16.gmra.mxu1 %v356_v35 }
  0x8e   :  { %v257_v36 = vpop.f32.mrf.mxu2 }
  0x96   :  { %v259_v43 = vpop.f32.mrf.mxu2 }
  0x9e   :  { %v219_v38 = vpop.f32.mrf.mxu0  ;;  %v262_v51 = vpop.f32.mrf.mxu2 }
  0x9f   :  { %v220_v39 = vadd.f32 %v467_v37, %v219_v38  ;;  %v238_v40 = vpop.f32.mrf.mxu1 }
  0xa1   :  { %v239_v41 = vadd.f32 %v238_v40, %v220_v39 }
  0xa3   :  { %v258_v42 = vadd.f32 %v257_v36, %v239_v41 }
  0xa4   :  { %v224_v47 = vpop.f32.mrf.mxu3 }
  0xa5   :  { %267 = vst [vmem:[%s606_s3] sm:$0xff] %v258_v42  ;;  %v225_v50 = vadd.f32 %v467_v37, %v224_v47  ;;  %v307_v59 = vmul.f32 %v258_v42, %v258_v42 }
  0xa6   :  { %v221_v44 = vpop.f32.mrf.mxu0  ;;  %v264_v63 = vpop.f32.mrf.mxu2 }
  0xa7   :  { %v222_v45 = vadd.f32 %v467_v37, %v221_v44  ;;  %v240_v46 = vpop.f32.mrf.mxu1 }
  0xa9   :  { %v241_v48 = vadd.f32 %v240_v46, %v222_v45 }
  0xab   :  { %v260_v49 = vadd.f32 %v259_v43, %v241_v48 }
  0xac   :  { %v226_v55 = vpop.f32.mrf.mxu3 }
  0xad   :  { %268 = vst [vmem:[%s606_s3 + $0x8] sm:$0xff] %v260_v49  ;;  %v308_v56 = vmul.f32 %v260_v49, %v260_v49  ;;  %v227_v57 = vadd.f32 %v467_v37, %v226_v55  ;;  %v298_v60 = vadd.f32 %v260_v49, %v258_v42 }
  0xaf   :  { %v243_v52 = vpop.f32.mrf.mxu1  ;;  %v311_v0 = vadd.f32 %v308_v56, %v307_v59 }
  0xb0   :  { %v244_v53 = vadd.f32 %v243_v52, %v225_v50 }
  0xb2   :  { %v263_v54 = vadd.f32 %v262_v51, %v244_v53 }
  0xb4   :  { %269 = vst [vmem:[%s606_s3 + $0x10] sm:$0xff] %v263_v54  ;;  %v309_v61 = vmul.f32 %v263_v54, %v263_v54  ;;  %v299_v1 = vadd.f32 %v298_v60, %v263_v54 }
  0xb6   :  { %v312_v3 = vadd.f32 %v311_v0, %v309_v61 }
  0xb7   :  { %v245_v58 = vpop.f32.mrf.mxu1 }
  0xb8   :  { %v246_v62 = vadd.f32 %v245_v58, %v227_v57 }
  0xba   :  { %v265_v2 = vadd.f32 %v264_v63, %v246_v62 }
  0xbc   :  { %270 = vst [vmem:[%s606_s3 + $0x18] sm:$0xff] %v265_v2  ;;  %v300_v4 = vadd.f32 %v299_v1, %v265_v2  ;;  %v310_v5 = vmul.f32 %v265_v2, %v265_v2 }
  0xbe   :  { %v301_v6 = vrot.slane %v300_v4, 4  ;;  %v313_v7 = vadd.f32 %v312_v3, %v310_v5 }
  0xc0   :  { %v302_v8 = vadd.f32 %v301_v6, %v300_v4  ;;  %v314_v9 = vrot.slane %v313_v7, 4 }
  0xc2   :  { %v303_v11 = vrot.slane %v302_v8, 2  ;;  %v315_v12 = vadd.f32 %v314_v9, %v313_v7 }
  0xc4   :  { %v304_v13 = vadd.f32 %v303_v11, %v302_v8  ;;  %v316_v14 = vrot.slane %v315_v12, 2 }
  0xc6   :  { %v317_v16 = vadd.f32 %v316_v14, %v315_v12  ;;  %v305_v17 = vrot.slane %v304_v13, 1 }
  0xc8   :  { %v318_v18 = vrot.slane %v317_v16, 1  ;;  %v306_v20 = vadd.f32 %v305_v17, %v304_v13 }
  0xca   :  { %v319_v19 = vadd.f32 %v318_v18, %v317_v16 }
  0xcc   :  { %v324_v21 = vsel %vm321_vm1, %v319_v19, 0.0 }
  0xcd   :  { %v327_v22 = vsel %vm320_vm2, %v306_v20, %v324_v21 }
  0xce   :  { %328 = vst [vmem:[%s607_s4] sm:$0xff] %v327_v22 }

// kernel: resnet_generator_forward.33
= control target key start
LH: loop header
LB: loop body
LE: loop exit
PB: predicated region body
PF: predicated region fallthrough
CT: control target
= control target key end

     0   :  { %vm317_vm0 = vcmask 261120   ;;  %s1229_s1 = inlined_call_operand.vmem [shape: bf16[288,128], index: 1, kind: input, shape index: {}]   ;;  %s1230_s0 = inlined_call_operand.vmem [shape: bf16[128,288], index: 0, kind: input, shape index: {}]   ;;  %s1231_s2 = inlined_call_operand.vmem [shape: f32[1,128], index: 2, kind: input, shape index: {}]   ;;  %s1232_s3 = inlined_call_operand.vmem [shape: f32[128,128], index: 3, kind: output, shape index: {0}]   ;;  %s1233_s4 = inlined_call_operand.vmem [shape: f32[8,128], index: 4, kind: output, shape index: {1}]  }
   0x1   :  { %v886_v0 = vld [vmem:[%s1229_s1 + $0x38] sm:$0xff]  ;;  %v896_v2 = vld [vmem:[%s1229_s1 + $0x88] sm:$0xff]  ;;  %v885_v3 = vld [vmem:[%s1229_s1 + $0x30] sm:$0xff] }
   0x2   :  { %v894_v1 = vld [vmem:[%s1229_s1 + $0x78] sm:$0xff]  ;;  %342 = vmatpush.bf16.msra.mxu0 %v886_v0  ;;  %897 = vmatpush.bf16.msra.mxu3 %v886_v0  ;;  %v893_v4 = vld [vmem:[%s1229_s1 + $0x70] sm:$0xff]  ;;  %v895_v5 = vld [vmem:[%s1229_s1 + $0x80] sm:$0xff] }
   0x3   :  { %391 = vmatpush.bf16.msra.mxu1 %v894_v1  ;;  %446 = vmatpush.bf16.msra.mxu2 %v896_v2  ;;  %v689_v6 = vld [vmem:[%s1230_s0 + $0x8] sm:$0xf]  ;;  %v857_v7 = vld [vmem:[%s1230_s0 + $0x10] sm:$0xf0]  ;;  %v883_v11 = vld [vmem:[%s1229_s1 + $0x20] sm:$0xff] }
   0x4   :  { %v690_v8 = vor.u32 %v857_v7, %v689_v6  ;;  %v884_v9 = vld [vmem:[%s1229_s1 + $0x28] sm:$0xff]  ;;  %v891_v12 = vld [vmem:[%s1229_s1 + $0x60] sm:$0xff]  ;;  %v882_v13 = vld [vmem:[%s1229_s1 + $0x18] sm:$0xff] }
   0x5   :  { %v892_v10 = vld [vmem:[%s1229_s1 + $0x68] sm:$0xff]  ;;  %v890_v14 = vld [vmem:[%s1229_s1 + $0x58] sm:$0xff]  ;;  %v881_v15 = vld [vmem:[%s1229_s1 + $0x10] sm:$0xff] }
   0x6   :  { %343 = vmatpush.bf16.msra.mxu0 %v885_v3  ;;  %898 = vmatpush.bf16.msra.mxu3 %v885_v3  ;;  %v889_v16 = vld [vmem:[%s1229_s1 + $0x50] sm:$0xff]  ;;  %v701_v17 = vld [vmem:[%s1230_s0 + $0x20] sm:$0xf]  ;;  %v860_v18 = vld [vmem:[%s1230_s0 + $0x28] sm:$0xf0] }
   0x7   :  { %392 = vmatpush.bf16.msra.mxu1 %v893_v4  ;;  %447 = vmatpush.bf16.msra.mxu2 %v895_v5  ;;  %v702_v19 = vor.u32 %v860_v18, %v701_v17  ;;  %v880_v20 = vld [vmem:[%s1229_s1 + $0x8] sm:$0xff]  ;;  %v879_v22 = vld [vmem:[%s1229_s1] sm:$0xff]  ;;  %v753_v26 = vld [vmem:[%s1230_s0 + $0x90] sm:$0xf] }
   0x8   :  { %v888_v21 = vld [vmem:[%s1229_s1 + $0x48] sm:$0xff]  ;;  %v887_v23 = vld [vmem:[%s1229_s1 + $0x40] sm:$0xff]  ;;  %v874_v27 = vld [vmem:[%s1230_s0 + $0x98] sm:$0xf0] }
   0x9   :  { %v681_v24 = vld [vmem:[%s1230_s0] sm:$0xf]  ;;  %v856_v25 = vld [vmem:[%s1230_s0 + $0x8] sm:$0xf0]  ;;  %v855_v28 = vld [vmem:[%s1230_s0 + $0x4] sm:$0xf]  ;;  %v754_v31 = vor.u32 %v874_v27, %v753_v26 }
   0xa   :  { %847 = vmatmul.msk.bf16.vlgmr.msra.gmra.mxu2 %vm317_vm0, %v690_v8  ;;  %344 = vmatpush.bf16.msra.mxu0 %v884_v9  ;;  %v683_v29 = vld [vmem:[%s1230_s0 + $0xc] sm:$0xf0]  ;;  %v682_v30 = vor.u32 %v856_v25, %v681_v24  ;;  %v713_v33 = vld [vmem:[%s1230_s0 + $0x38] sm:$0xf]  ;;  %v863_v34 = vld [vmem:[%s1230_s0 + $0x40] sm:$0xf0] }
   0xb   :  { %899 = vmatpush.bf16.msra.mxu3 %v884_v9  ;;  %393 = vmatpush.bf16.msra.mxu1 %v892_v10  ;;  %v686_v32 = vor.u32 %v855_v28, %v683_v29  ;;  %v714_v35 = vor.u32 %v863_v34, %v713_v33  ;;  %v693_v36 = vld [vmem:[%s1230_s0 + $0x18] sm:$0xf]  ;;  %v859_v37 = vld [vmem:[%s1230_s0 + $0x20] sm:$0xf0]  ;;  %v765_v38 = vld [vmem:[%s1230_s0 + $0xa8] sm:$0xf] }
   0xc   :  { %v877_v39 = vld [vmem:[%s1230_s0 + $0xb0] sm:$0xf0]  ;;  %v858_v40 = vld [vmem:[%s1230_s0 + $0x1c] sm:$0xf]  ;;  %v695_v41 = vld [vmem:[%s1230_s0 + $0x24] sm:$0xf0]  ;;  %v694_v42 = vor.u32 %v859_v37, %v693_v36 }
   0xd   :  { %v766_v43 = vor.u32 %v877_v39, %v765_v38  ;;  %v698_v44 = vor.u32 %v858_v40, %v695_v41  ;;  %v725_v45 = vld [vmem:[%s1230_s0 + $0x50] sm:$0xf]  ;;  %v866_v46 = vld [vmem:[%s1230_s0 + $0x58] sm:$0xf0]  ;;  %v861_v50 = vld [vmem:[%s1230_s0 + $0x34] sm:$0xf] }
   0xe   :  { %345 = vmatpush.bf16.msra.mxu0 %v883_v11  ;;  %v726_v47 = vor.u32 %v866_v46, %v725_v45  ;;  %v705_v48 = vld [vmem:[%s1230_s0 + $0x30] sm:$0xf]  ;;  %v862_v49 = vld [vmem:[%s1230_s0 + $0x38] sm:$0xf0]  ;;  %v707_v51 = vld [vmem:[%s1230_s0 + $0x3c] sm:$0xf0] }
   0xf   :  { %900 = vmatpush.bf16.msra.mxu3 %v883_v11  ;;  %394 = vmatpush.bf16.msra.mxu1 %v891_v12  ;;  %v873_v52 = vld [vmem:[%s1230_s0 + $0x94] sm:$0xf]  ;;  %v755_v53 = vld [vmem:[%s1230_s0 + $0x9c] sm:$0xf0]  ;;  %v706_v54 = vor.u32 %v862_v49, %v705_v48  ;;  %v710_v55 = vor.u32 %v861_v50, %v707_v51  ;;  %v737_v57 = vld [vmem:[%s1230_s0 + $0x68] sm:$0xf] }
  0x10   :  { %v758_v56 = vor.u32 %v873_v52, %v755_v53  ;;  %v869_v58 = vld [vmem:[%s1230_s0 + $0x70] sm:$0xf0]  ;;  %v717_v60 = vld [vmem:[%s1230_s0 + $0x48] sm:$0xf]  ;;  %v864_v62 = vld [vmem:[%s1230_s0 + $0x4c] sm:$0xf] }
  0x11   :  { %v738_v59 = vor.u32 %v869_v58, %v737_v57  ;;  %v865_v61 = vld [vmem:[%s1230_s0 + $0x50] sm:$0xf0]  ;;  %v719_v63 = vld [vmem:[%s1230_s0 + $0x54] sm:$0xf0]  ;;  %v876_v0 = vld [vmem:[%s1230_s0 + $0xac] sm:$0xf] }
  0x12   :  { %346 = vmatpush.bf16.msra.mxu0 %v882_v13  ;;  %v718_v2 = vor.u32 %v865_v61, %v717_v60  ;;  %v722_v3 = vor.u32 %v864_v62, %v719_v63  ;;  %v749_v5 = vld [vmem:[%s1230_s0 + $0x80] sm:$0xf]  ;;  %v872_v6 = vld [vmem:[%s1230_s0 + $0x88] sm:$0xf0]  ;;  %v731_v11 = vld [vmem:[%s1230_s0 + $0x6c] sm:$0xf0] }
  0x13   :  { %901 = vmatpush.bf16.msra.mxu3 %v882_v13  ;;  %395 = vmatpush.bf16.msra.mxu1 %v890_v14  ;;  %v750_v7 = vor.u32 %v872_v6, %v749_v5  ;;  %v729_v8 = vld [vmem:[%s1230_s0 + $0x60] sm:$0xf]  ;;  %v868_v9 = vld [vmem:[%s1230_s0 + $0x68] sm:$0xf0]  ;;  %v741_v17 = vld [vmem:[%s1230_s0 + $0x78] sm:$0xf] }
  0x14   :  { %v871_v18 = vld [vmem:[%s1230_s0 + $0x80] sm:$0xf0]  ;;  %v878_v24 = vld [vmem:[%s1230_s0 + $0xb8] sm:$0xf0]  ;;  %v1148_v28 = vld [vmem:[%s1231_s2] ss:$0 sm:$0xff] }
  0x16   :  { %347 = vmatpush.bf16.msra.mxu0 %v881_v15 }
  0x17   :  { %902 = vmatpush.bf16.msra.mxu3 %v881_v15  ;;  %396 = vmatpush.bf16.msra.mxu1 %v889_v16  ;;  %v875_v15 = vld [vmem:[%s1230_s0 + $0xa0] sm:$0xf0] }
  0x1a   :  { %848 = vmatmul.msk.bf16.gmra.mxu2 %vm317_vm0, %v702_v19  ;;  %348 = vmatpush.bf16.msra.mxu0 %v880_v20  ;;  %v870_v19 = vld [vmem:[%s1230_s0 + $0x7c] sm:$0xf] }
  0x1b   :  { %903 = vmatpush.bf16.msra.mxu3 %v880_v20  ;;  %397 = vmatpush.bf16.msra.mxu1 %v888_v21  ;;  %v743_v20 = vld [vmem:[%s1230_s0 + $0x84] sm:$0xf0] }
  0x1e   :  { %349 = vmatpush.bf16.msra.mxu0 %v879_v22 }
  0x1f   :  { %904 = vmatpush.bf16.msra.mxu3 %v879_v22  ;;  %398 = vmatpush.bf16.msra.mxu1 %v887_v23  ;;  %v746_v22 = vor.u32 %v870_v19, %v743_v20 }
  0x21   :  { %350 = vmatmul.bf16.vlgmr.msra.gmra.mxu0 %v682_v30 }
  0x22   :  { %380 = vmatmul.bf16.vlgmr.msra.gmra.mxu3 %v754_v31  ;;  %399 = vmatmul.bf16.vlgmr.msra.gmra.mxu1 %v686_v32 }
  0x23   :  { %905 = vmatpush.bf16.msrb.mxu3 %v894_v1  ;;  %v767_v1 = vld [vmem:[%s1230_s0 + $0xb4] sm:$0xf0] }
  0x27   :  { %906 = vmatpush.bf16.msrb.mxu3 %v893_v4  ;;  %v770_v4 = vor.u32 %v876_v0, %v767_v1 }
  0x2a   :  { %849 = vmatmul.msk.bf16.gmra.mxu2 %vm317_vm0, %v714_v35 }
  0x2b   :  { %907 = vmatpush.bf16.msrb.mxu3 %v892_v10  ;;  %v867_v10 = vld [vmem:[%s1230_s0 + $0x64] sm:$0xf] }
  0x2c   :  { %v734_v13 = vor.u32 %v867_v10, %v731_v11 }
  0x2f   :  { %908 = vmatpush.bf16.msrb.mxu3 %v891_v12  ;;  %v730_v12 = vor.u32 %v868_v9, %v729_v8 }
  0x31   :  { %355 = vmatmul.bf16.gmra.mxu0 %v694_v42 }
  0x32   :  { %385 = vmatmul.bf16.gmra.mxu3 %v766_v43  ;;  %404 = vmatmul.bf16.gmra.mxu1 %v698_v44 }
  0x33   :  { %909 = vmatpush.bf16.msrb.mxu3 %v890_v14  ;;  %v761_v14 = vld [vmem:[%s1230_s0 + $0x98] sm:$0xf] }
  0x37   :  { %910 = vmatpush.bf16.msrb.mxu3 %v889_v16  ;;  %v762_v16 = vor.u32 %v875_v15, %v761_v14 }
  0x3a   :  { %850 = vmatmul.msk.bf16.gmra.mxu2 %vm317_vm0, %v726_v47 }
  0x3b   :  { %911 = vmatpush.bf16.msrb.mxu3 %v888_v21  ;;  %v742_v21 = vor.u32 %v871_v18, %v741_v17 }
  0x3f   :  { %912 = vmatpush.bf16.msrb.mxu3 %v887_v23  ;;  %v773_v23 = vld [vmem:[%s1230_s0 + $0xb0] sm:$0xf] }
  0x40   :  { %v774_v25 = vor.u32 %v878_v24, %v773_v23 }
  0x41   :  { %360 = vmatmul.bf16.gmra.mxu0 %v706_v54 }
  0x42   :  { %409 = vmatmul.bf16.gmra.mxu1 %v710_v55  ;;  %429 = vmatmul.bf16.vlgmr.msrb.gmra.mxu3 %v758_v56 }
  0x4a   :  { %851 = vmatmul.msk.bf16.gmra.mxu2 %vm317_vm0, %v738_v59 }
  0x51   :  { %365 = vmatmul.bf16.gmra.mxu0 %v718_v2 }
  0x52   :  { %414 = vmatmul.bf16.gmra.mxu1 %v722_v3  ;;  %434 = vmatmul.bf16.gmra.mxu3 %v770_v4 }
  0x5a   :  { %852 = vmatmul.msk.bf16.gmra.mxu2 %vm317_vm0, %v750_v7 }
  0x61   :  { %370 = vmatmul.bf16.gmra.mxu0 %v730_v12 }
  0x62   :  { %419 = vmatmul.bf16.gmra.mxu1 %v734_v13 }
  0x6a   :  { %853 = vmatmul.msk.bf16.gmra.mxu2 %vm317_vm0, %v762_v16 }
  0x71   :  { %375 = vmatmul.bf16.gmra.mxu0 %v742_v21 }
  0x72   :  { %424 = vmatmul.bf16.gmra.mxu1 %v746_v22 }
  0x7a   :  { %854 = vmatmul.msk.bf16.gmra.mxu2 %vm317_vm0, %v774_v25 }
  0x8d   :  { %v449_v26 = vpop.f32.mrf.mxu2 }
  0x95   :  { %v451_v27 = vpop.f32.mrf.mxu2 }
  0x9d   :  { %v454_v29 = vpop.f32.mrf.mxu2 }
  0x9e   :  { %v351_v30 = vpop.f32.mrf.mxu0 }
  0x9f   :  { %v352_v31 = vadd.f32 %v1148_v28, %v351_v30  ;;  %v400_v32 = vpop.f32.mrf.mxu1 }
  0xa1   :  { %v401_v33 = vadd.f32 %v400_v32, %v352_v31 }
  0xa3   :  { %v450_v34 = vadd.f32 %v449_v26, %v401_v33 }
  0xa5   :  { %489 = vst [vmem:[%s1232_s3] sm:$0xff] %v450_v34  ;;  %v456_v35 = vpop.f32.mrf.mxu2  ;;  %v625_v41 = vmul.f32 %v450_v34, %v450_v34  ;;  %v381_v56 = vpop.f32.mrf.mxu3 }
  0xa6   :  { %v353_v36 = vpop.f32.mrf.mxu0  ;;  %v382_v33 = vadd.f32 %v1148_v28, %v381_v56 }
  0xa7   :  { %v354_v37 = vadd.f32 %v1148_v28, %v353_v36  ;;  %v402_v38 = vpop.f32.mrf.mxu1 }
  0xa9   :  { %v403_v39 = vadd.f32 %v402_v38, %v354_v37 }
  0xab   :  { %v452_v40 = vadd.f32 %v451_v27, %v403_v39 }
  0xad   :  { %490 = vst [vmem:[%s1232_s3 + $0x8] sm:$0xff] %v452_v40  ;;  %v1158_v42 = vadd.f32 %v452_v40, %v450_v34  ;;  %v626_v43 = vmul.f32 %v452_v40, %v452_v40  ;;  %v459_v44 = vpop.f32.mrf.mxu2  ;;  %v383_v0 = vpop.f32.mrf.mxu3 }
  0xae   :  { %v356_v45 = vpop.f32.mrf.mxu0 }
  0xaf   :  { %v1160_v46 = vadd.f32 %v626_v43, %v625_v41  ;;  %v357_v47 = vadd.f32 %v1148_v28, %v356_v45  ;;  %v405_v48 = vpop.f32.mrf.mxu1 }
  0xb1   :  { %v406_v49 = vadd.f32 %v405_v48, %v357_v47 }
  0xb3   :  { %v455_v50 = vadd.f32 %v454_v29, %v406_v49 }
  0xb5   :  { %491 = vst [vmem:[%s1232_s3 + $0x10] sm:$0xff] %v455_v50  ;;  %v461_v51 = vpop.f32.mrf.mxu2  ;;  %v1178_v9 = vpop.f32.mrf.mxu3  ;;  %v627_v34 = vmul.f32 %v455_v50, %v455_v50  ;;  %v605_v36 = vadd.f32 %v1158_v42, %v455_v50 }
  0xb6   :  { %v358_v52 = vpop.f32.mrf.mxu0 }
  0xb7   :  { %v359_v53 = vadd.f32 %v1148_v28, %v358_v52  ;;  %v407_v54 = vpop.f32.mrf.mxu1  ;;  %v642_v40 = vadd.f32 %v1160_v46, %v627_v34 }
  0xb9   :  { %v408_v55 = vadd.f32 %v407_v54, %v359_v53  ;;  %v384_v53 = vadd.f32 %v1148_v28, %v383_v0 }
  0xbb   :  { %v457_v57 = vadd.f32 %v456_v35, %v408_v55 }
  0xbd   :  { %492 = vst [vmem:[%s1232_s3 + $0x18] sm:$0xff] %v457_v57  ;;  %v464_v58 = vpop.f32.mrf.mxu2  ;;  %v1185_v18 = vpop.f32.mrf.mxu3  ;;  %v628_v37 = vmul.f32 %v457_v57, %v457_v57  ;;  %v606_v41 = vadd.f32 %v605_v36, %v457_v57 }
  0xbe   :  { %v361_v59 = vpop.f32.mrf.mxu0 }
  0xbf   :  { %v362_v60 = vadd.f32 %v1148_v28, %v361_v59  ;;  %v410_v61 = vpop.f32.mrf.mxu1  ;;  %v643_v49 = vadd.f32 %v642_v40, %v628_v37 }
  0xc1   :  { %v411_v62 = vadd.f32 %v410_v61, %v362_v60 }
  0xc3   :  { %v460_v63 = vadd.f32 %v459_v44, %v411_v62 }
  0xc5   :  { %493 = vst [vmem:[%s1232_s3 + $0x20] sm:$0xff] %v460_v63  ;;  %v466_v1 = vpop.f32.mrf.mxu2  ;;  %v430_v26 = vpop.f32.mrf.mxu3  ;;  %v629_v43 = vmul.f32 %v460_v63, %v460_v63 }
  0xc6   :  { %v363_v2 = vpop.f32.mrf.mxu0  ;;  %v431_v39 = vadd.f32 %v430_v26, %v382_v33 }
  0xc7   :  { %v364_v3 = vadd.f32 %v1148_v28, %v363_v2  ;;  %v412_v4 = vpop.f32.mrf.mxu1  ;;  %v644_v46 = vadd.f32 %v643_v49, %v629_v43 }
  0xc9   :  { %v413_v5 = vadd.f32 %v412_v4, %v364_v3 }
  0xcb   :  { %v462_v6 = vadd.f32 %v461_v51, %v413_v5  ;;  %v607_v51 = vadd.f32 %v606_v41, %v460_v63 }
  0xcd   :  { %494 = vst [vmem:[%s1232_s3 + $0x28] sm:$0xff] %v462_v6  ;;  %v469_v7 = vpop.f32.mrf.mxu2  ;;  %v432_v44 = vpop.f32.mrf.mxu3  ;;  %v630_v52 = vmul.f32 %v462_v6, %v462_v6  ;;  %v608_v54 = vadd.f32 %v607_v51, %v462_v6 }
  0xce   :  { %v366_v8 = vpop.f32.mrf.mxu0  ;;  %v433_v61 = vadd.f32 %v432_v44, %v384_v53 }
  0xcf   :  { %v367_v10 = vadd.f32 %v1148_v28, %v366_v8  ;;  %v415_v11 = vpop.f32.mrf.mxu1  ;;  %v645_v57 = vadd.f32 %v644_v46, %v630_v52 }
  0xd1   :  { %v416_v12 = vadd.f32 %v415_v11, %v367_v10  ;;  %v387_v10 = vadd.f32 %v1148_v28, %v1178_v9 }
  0xd3   :  { %v465_v13 = vadd.f32 %v464_v58, %v416_v12 }
  0xd5   :  { %495 = vst [vmem:[%s1232_s3 + $0x30] sm:$0xff] %v465_v13  ;;  %v471_v14 = vpop.f32.mrf.mxu2  ;;  %v631_v55 = vmul.f32 %v465_v13, %v465_v13  ;;  %v609_v58 = vadd.f32 %v608_v54, %v465_v13  ;;  %v435_v4 = vpop.f32.mrf.mxu3 }
  0xd6   :  { %v368_v15 = vpop.f32.mrf.mxu0 }
  0xd7   :  { %v369_v16 = vadd.f32 %v1148_v28, %v368_v15  ;;  %v417_v17 = vpop.f32.mrf.mxu1  ;;  %v646_v62 = vadd.f32 %v645_v57, %v631_v55 }
  0xd9   :  { %v418_v19 = vadd.f32 %v417_v17, %v369_v16 }
  0xdb   :  { %v467_v20 = vadd.f32 %v466_v1, %v418_v19 }
  0xdd   :  { %496 = vst [vmem:[%s1232_s3 + $0x38] sm:$0xff] %v467_v20  ;;  %v474_v21 = vpop.f32.mrf.mxu2  ;;  %v632_v59 = vmul.f32 %v467_v20, %v467_v20  ;;  %v610_v63 = vadd.f32 %v609_v58, %v467_v20  ;;  %v436_v20 = vadd.f32 %v435_v4, %v387_v10 }
  0xde   :  { %v371_v22 = vpop.f32.mrf.mxu0 }
  0xdf   :  { %v372_v23 = vadd.f32 %v1148_v28, %v371_v22  ;;  %v420_v24 = vpop.f32.mrf.mxu1  ;;  %v647_v5 = vadd.f32 %v646_v62, %v632_v59 }
  0xe1   :  { %v421_v25 = vadd.f32 %v420_v24, %v372_v23 }
  0xe3   :  { %v470_v27 = vadd.f32 %v469_v7, %v421_v25 }
  0xe5   :  { %497 = vst [vmem:[%s1232_s3 + $0x40] sm:$0xff] %v470_v27  ;;  %v476_v29 = vpop.f32.mrf.mxu2  ;;  %v633_v1 = vmul.f32 %v470_v27, %v470_v27  ;;  %v611_v6 = vadd.f32 %v610_v63, %v470_v27 }
  0xe6   :  { %v373_v30 = vpop.f32.mrf.mxu0 }
  0xe7   :  { %v374_v31 = vadd.f32 %v1148_v28, %v373_v30  ;;  %v422_v32 = vpop.f32.mrf.mxu1  ;;  %v648_v12 = vadd.f32 %v647_v5, %v633_v1  ;;  %v389_v30 = vadd.f32 %v1148_v28, %v1185_v18 }
  0xe9   :  { %v423_v35 = vadd.f32 %v422_v32, %v374_v31 }
  0xeb   :  { %v472_v38 = vadd.f32 %v471_v14, %v423_v35 }
  0xed   :  { %498 = vst [vmem:[%s1232_s3 + $0x48] sm:$0xff] %v472_v38  ;;  %v479_v45 = vpop.f32.mrf.mxu2  ;;  %v634_v7 = vmul.f32 %v472_v38, %v472_v38  ;;  %v612_v13 = vadd.f32 %v611_v6, %v472_v38 }
  0xee   :  { %v480_v47 = vadd.f32 %v479_v45, %v431_v39  ;;  %v376_v48 = vpop.f32.mrf.mxu0 }
  0xef   :  { %v377_v42 = vadd.f32 %v1148_v28, %v376_v48  ;;  %v425_v50 = vpop.f32.mrf.mxu1  ;;  %v649_v16 = vadd.f32 %v648_v12, %v634_v7 }
  0xf0   :  { %501 = vst [vmem:[%s1232_s3 + $0x60] sm:$0xff] %v480_v47  ;;  %v637_v25 = vmul.f32 %v480_v47, %v480_v47 }
  0xf1   :  { %v426_v56 = vadd.f32 %v425_v50, %v377_v42 }
  0xf3   :  { %v475_v60 = vadd.f32 %v474_v21, %v426_v56 }
  0xf5   :  { %499 = vst [vmem:[%s1232_s3 + $0x50] sm:$0xff] %v475_v60  ;;  %v481_v0 = vpop.f32.mrf.mxu2  ;;  %v635_v14 = vmul.f32 %v475_v60, %v475_v60  ;;  %v613_v17 = vadd.f32 %v612_v13, %v475_v60 }
  0xf6   :  { %v482_v2 = vadd.f32 %v481_v0, %v433_v61  ;;  %v378_v3 = vpop.f32.mrf.mxu0 }
  0xf7   :  { %v379_v8 = vadd.f32 %v1148_v28, %v378_v3  ;;  %v427_v11 = vpop.f32.mrf.mxu1  ;;  %v650_v21 = vadd.f32 %v649_v16, %v635_v14 }
  0xf8   :  { %502 = vst [vmem:[%s1232_s3 + $0x68] sm:$0xff] %v482_v2  ;;  %v638_v32 = vmul.f32 %v482_v2, %v482_v2 }
  0xf9   :  { %v428_v15 = vadd.f32 %v427_v11, %v379_v8 }
  0xfb   :  { %v477_v19 = vadd.f32 %v476_v29, %v428_v15  ;;  %v437_v29 = vpop.f32.mrf.mxu3 }
  0xfc   :  { %v438_v34 = vadd.f32 %v437_v29, %v389_v30 }
  0xfd   :  { %500 = vst [vmem:[%s1232_s3 + $0x58] sm:$0xff] %v477_v19  ;;  %v614_v22 = vadd.f32 %v613_v17, %v477_v19  ;;  %v636_v9 = vmul.f32 %v477_v19, %v477_v19  ;;  %v484_v23 = vpop.f32.mrf.mxu2 }
  0xfe   :  { %v485_v24 = vadd.f32 %v484_v23, %v436_v20 }
  0xff   :  { %v651_v26 = vadd.f32 %v650_v21, %v636_v9  ;;  %v615_v27 = vadd.f32 %v614_v22, %v480_v47  ;;  %v506_v47 = vlaneseq }
 0x100   :  { %503 = vst [vmem:[%s1232_s3 + $0x70] sm:$0xff] %v485_v24  ;;  %v639_v38 = vmul.f32 %v485_v24, %v485_v24 }
 0x101   :  { %v652_v31 = vadd.f32 %v651_v26, %v637_v25  ;;  %v616_v33 = vadd.f32 %v615_v27, %v482_v2  ;;  %v507_v42 = vshrl.u32 %v506_v47, 7 }
 0x103   :  { %v653_v35 = vadd.f32 %v652_v31, %v638_v32  ;;  %v617_v37 = vadd.f32 %v616_v33, %v485_v24  ;;  %vm663_vm1 = vcmp.eq.s32.totalorder %v507_v42, 1  ;;  %vm662_vm2 = vcmp.eq.s32.totalorder %v507_v42, 0 }
 0x105   :  { %v486_v36 = vpop.f32.mrf.mxu2  ;;  %v654_v40 = vadd.f32 %v653_v35, %v639_v38 }
 0x106   :  { %v487_v39 = vadd.f32 %v486_v36, %v438_v34 }
 0x108   :  { %504 = vst [vmem:[%s1232_s3 + $0x78] sm:$0xff] %v487_v39  ;;  %v618_v28 = vadd.f32 %v617_v37, %v487_v39  ;;  %v640_v18 = vmul.f32 %v487_v39, %v487_v39 }
 0x10a   :  { %v619_v41 = vrot.slane %v618_v28, 4  ;;  %v655_v43 = vadd.f32 %v654_v40, %v640_v18 }
 0x10c   :  { %v620_v44 = vadd.f32 %v619_v41, %v618_v28  ;;  %v656_v45 = vrot.slane %v655_v43, 4 }
 0x10e   :  { %v621_v48 = vrot.slane %v620_v44, 2  ;;  %v657_v49 = vadd.f32 %v656_v45, %v655_v43 }
 0x110   :  { %v622_v51 = vadd.f32 %v621_v48, %v620_v44  ;;  %v658_v52 = vrot.slane %v657_v49, 2 }
 0x112   :  { %v659_v50 = vadd.f32 %v658_v52, %v657_v49  ;;  %v623_v53 = vrot.slane %v622_v51, 1 }
 0x114   :  { %v660_v46 = vrot.slane %v659_v50, 1  ;;  %v624_v55 = vadd.f32 %v623_v53, %v622_v51 }
 0x116   :  { %v661_v54 = vadd.f32 %v660_v46, %v659_v50 }
 0x118   :  { %v666_v56 = vsel %vm663_vm1, %v661_v54, 0.0 }
 0x119   :  { %v669_v57 = vsel %vm662_vm2, %v624_v55, %v666_v56 }
 0x11a   :  { %670 = vst [vmem:[%s1233_s4] sm:$0xff] %v669_v57 }

// kernel: resnet_generator_forward.35
= control target key start
LH: loop header
LB: loop body
LE: loop exit
PB: predicated region body
PF: predicated region fallthrough
CT: control target
= control target key end

     0   :  { %vm445_vm0 = vcmask 130048   ;;  %s2958_s1 = inlined_call_operand.vmem [shape: bf16[144,128], index: 1, kind: input, shape index: {}]   ;;  %s2959_s0 = inlined_call_operand.vmem [shape: bf16[512,144], index: 0, kind: input, shape index: {}]   ;;  %s2960_s2 = inlined_call_operand.vmem [shape: f32[1,128], index: 2, kind: input, shape index: {}]   ;;  %s2961_s3 = inlined_call_operand.vmem [shape: f32[512,128], index: 3, kind: output, shape index: {0}]   ;;  %s2962_s4 = inlined_call_operand.vmem [shape: f32[8,128], index: 4, kind: output, shape index: {1}]  }
   0x1   :  { %v1945_v0 = vld [vmem:[%s2958_s1 + $0x38] sm:$0xff]  ;;  %v1946_v1 = vld [vmem:[%s2958_s1 + $0x40] sm:$0xff]  ;;  %v1554_v3 = vld [vmem:[%s2959_s0 + $0x8] sm:$0xf0] }
   0x2   :  { %v1874_v2 = vld [vmem:[%s2959_s0 + $0x4] sm:$0xf]  ;;  %542 = vmatpush.bf16.msra.mxu0 %v1945_v0  ;;  %718 = vmatpush.bf16.msra.mxu1 %v1946_v1  ;;  %v1944_v5 = vld [vmem:[%s2958_s1 + $0x30] sm:$0xff]  ;;  %v1943_v6 = vld [vmem:[%s2958_s1 + $0x28] sm:$0xff] }
   0x3   :  { %v1557_v4 = vor.u32 %v1874_v2, %v1554_v3  ;;  %1947 = vmatpush.bf16.msra.mxu2 %v1945_v0  ;;  %1955 = vmatpush.bf16.msra.mxu3 %v1946_v1  ;;  %v1942_v7 = vld [vmem:[%s2958_s1 + $0x20] sm:$0xff]  ;;  %v1941_v8 = vld [vmem:[%s2958_s1 + $0x18] sm:$0xff]  ;;  %v1876_v9 = vld [vmem:[%s2959_s0 + $0x14] sm:$0xf] }
   0x4   :  { %v1562_v10 = vld [vmem:[%s2959_s0 + $0x18] sm:$0xf0]  ;;  %v1940_v12 = vld [vmem:[%s2958_s1 + $0x10] sm:$0xff]  ;;  %v1939_v13 = vld [vmem:[%s2958_s1 + $0x8] sm:$0xff] }
   0x5   :  { %1842 = vmatmul.msk.bf16.vlgmr.msra.gmra.mxu1 %vm445_vm0, %v1557_v4  ;;  %v1565_v11 = vor.u32 %v1876_v9, %v1562_v10  ;;  %v1938_v14 = vld [vmem:[%s2958_s1] sm:$0xff]  ;;  %v1875_v16 = vld [vmem:[%s2959_s0 + $0x4] sm:$0xf0]  ;;  %v1570_v19 = vld [vmem:[%s2959_s0 + $0x28] sm:$0xf0] }
   0x6   :  { %543 = vmatpush.bf16.msra.mxu0 %v1944_v5  ;;  %v1552_v15 = vld [vmem:[%s2959_s0] sm:$0xf]  ;;  %v1878_v18 = vld [vmem:[%s2959_s0 + $0x24] sm:$0xf]  ;;  %v1560_v21 = vld [vmem:[%s2959_s0 + $0x10] sm:$0xf] }
   0x7   :  { %1948 = vmatpush.bf16.msra.mxu2 %v1944_v5  ;;  %v1553_v17 = vor.u32 %v1875_v16, %v1552_v15  ;;  %v1573_v20 = vor.u32 %v1878_v18, %v1570_v19  ;;  %v1877_v22 = vld [vmem:[%s2959_s0 + $0x14] sm:$0xf0]  ;;  %v1880_v24 = vld [vmem:[%s2959_s0 + $0x34] sm:$0xf]  ;;  %v1578_v25 = vld [vmem:[%s2959_s0 + $0x38] sm:$0xf0] }
   0x8   :  { %v1561_v23 = vor.u32 %v1877_v22, %v1560_v21  ;;  %v1680_v26 = vld [vmem:[%s2959_s0 + $0x100] sm:$0xf]  ;;  %v1907_v27 = vld [vmem:[%s2959_s0 + $0x104] sm:$0xf0]  ;;  %v1581_v28 = vor.u32 %v1880_v24, %v1578_v25  ;;  %v1882_v33 = vld [vmem:[%s2959_s0 + $0x44] sm:$0xf] }
   0x9   :  { %v1681_v29 = vor.u32 %v1907_v27, %v1680_v26  ;;  %v1568_v30 = vld [vmem:[%s2959_s0 + $0x20] sm:$0xf]  ;;  %v1879_v31 = vld [vmem:[%s2959_s0 + $0x24] sm:$0xf0]  ;;  %v1586_v34 = vld [vmem:[%s2959_s0 + $0x48] sm:$0xf0] }
   0xa   :  { %544 = vmatpush.bf16.msra.mxu0 %v1943_v6  ;;  %v1569_v32 = vor.u32 %v1879_v31, %v1568_v30  ;;  %v1688_v35 = vld [vmem:[%s2959_s0 + $0x110] sm:$0xf]  ;;  %v1909_v36 = vld [vmem:[%s2959_s0 + $0x114] sm:$0xf0]  ;;  %v1589_v37 = vor.u32 %v1882_v33, %v1586_v34  ;;  %v1908_v39 = vld [vmem:[%s2959_s0 + $0x114] sm:$0xf] }
   0xb   :  { %1949 = vmatpush.bf16.msra.mxu2 %v1943_v6  ;;  %v1689_v38 = vor.u32 %v1909_v36, %v1688_v35  ;;  %v1690_v40 = vld [vmem:[%s2959_s0 + $0x118] sm:$0xf0]  ;;  %v1576_v42 = vld [vmem:[%s2959_s0 + $0x30] sm:$0xf]  ;;  %v1881_v43 = vld [vmem:[%s2959_s0 + $0x34] sm:$0xf0] }
   0xc   :  { %v1693_v41 = vor.u32 %v1908_v39, %v1690_v40  ;;  %v1577_v44 = vor.u32 %v1881_v43, %v1576_v42  ;;  %v1884_v45 = vld [vmem:[%s2959_s0 + $0x54] sm:$0xf]  ;;  %v1594_v46 = vld [vmem:[%s2959_s0 + $0x58] sm:$0xf0]  ;;  %v1696_v47 = vld [vmem:[%s2959_s0 + $0x120] sm:$0xf] }
   0xd   :  { %v1911_v48 = vld [vmem:[%s2959_s0 + $0x124] sm:$0xf0]  ;;  %v1597_v49 = vor.u32 %v1884_v45, %v1594_v46  ;;  %v1910_v51 = vld [vmem:[%s2959_s0 + $0x124] sm:$0xf]  ;;  %v1698_v52 = vld [vmem:[%s2959_s0 + $0x128] sm:$0xf0] }
   0xe   :  { %545 = vmatpush.bf16.msra.mxu0 %v1942_v7  ;;  %1859 = vmatmul.msk.bf16.vlgmr.msra.gmra.mxu3 %vm445_vm0, %v1693_v41  ;;  %v1697_v50 = vor.u32 %v1911_v48, %v1696_v47  ;;  %v1701_v53 = vor.u32 %v1910_v51, %v1698_v52  ;;  %v1584_v54 = vld [vmem:[%s2959_s0 + $0x40] sm:$0xf]  ;;  %v1883_v55 = vld [vmem:[%s2959_s0 + $0x44] sm:$0xf0]  ;;  %v1886_v57 = vld [vmem:[%s2959_s0 + $0x64] sm:$0xf] }
   0xf   :  { %1950 = vmatpush.bf16.msra.mxu2 %v1942_v7  ;;  %v1585_v56 = vor.u32 %v1883_v55, %v1584_v54  ;;  %v1602_v58 = vld [vmem:[%s2959_s0 + $0x68] sm:$0xf0]  ;;  %v1704_v59 = vld [vmem:[%s2959_s0 + $0x130] sm:$0xf]  ;;  %v1913_v60 = vld [vmem:[%s2959_s0 + $0x134] sm:$0xf0] }
  0x10   :  { %v1605_v61 = vor.u32 %v1886_v57, %v1602_v58  ;;  %v1705_v62 = vor.u32 %v1913_v60, %v1704_v59  ;;  %v1912_v63 = vld [vmem:[%s2959_s0 + $0x134] sm:$0xf]  ;;  %v1706_v0 = vld [vmem:[%s2959_s0 + $0x138] sm:$0xf0]  ;;  %v1592_v2 = vld [vmem:[%s2959_s0 + $0x50] sm:$0xf] }
  0x11   :  { %v1709_v1 = vor.u32 %v1912_v63, %v1706_v0  ;;  %v1885_v3 = vld [vmem:[%s2959_s0 + $0x54] sm:$0xf0]  ;;  %v1888_v5 = vld [vmem:[%s2959_s0 + $0x74] sm:$0xf]  ;;  %v1610_v6 = vld [vmem:[%s2959_s0 + $0x78] sm:$0xf0] }
  0x12   :  { %546 = vmatpush.bf16.msra.mxu0 %v1941_v8  ;;  %v1593_v4 = vor.u32 %v1885_v3, %v1592_v2  ;;  %v1712_v7 = vld [vmem:[%s2959_s0 + $0x140] sm:$0xf]  ;;  %v1613_v9 = vor.u32 %v1888_v5, %v1610_v6  ;;  %v1887_v15 = vld [vmem:[%s2959_s0 + $0x64] sm:$0xf0]  ;;  %v1618_v18 = vld [vmem:[%s2959_s0 + $0x88] sm:$0xf0] }
  0x13   :  { %1951 = vmatpush.bf16.msra.mxu2 %v1941_v8  ;;  %v1915_v8 = vld [vmem:[%s2959_s0 + $0x144] sm:$0xf0]  ;;  %v1720_v19 = vld [vmem:[%s2959_s0 + $0x150] sm:$0xf]  ;;  %v1916_v24 = vld [vmem:[%s2959_s0 + $0x154] sm:$0xf] }
  0x14   :  { %v1713_v10 = vor.u32 %v1915_v8, %v1712_v7  ;;  %v1722_v25 = vld [vmem:[%s2959_s0 + $0x158] sm:$0xf0]  ;;  %v1892_v31 = vld [vmem:[%s2959_s0 + $0x94] sm:$0xf]  ;;  %v1728_v33 = vld [vmem:[%s2959_s0 + $0x160] sm:$0xf] }
  0x15   :  { %1843 = vmatmul.msk.bf16.gmra.mxu1 %vm445_vm0, %v1565_v11  ;;  %v1914_v11 = vld [vmem:[%s2959_s0 + $0x144] sm:$0xf]  ;;  %v1725_v26 = vor.u32 %v1916_v24, %v1722_v25  ;;  %v1919_v34 = vld [vmem:[%s2959_s0 + $0x164] sm:$0xf0]  ;;  %v1730_v39 = vld [vmem:[%s2959_s0 + $0x168] sm:$0xf0] }
  0x16   :  { %547 = vmatpush.bf16.msra.mxu0 %v1940_v12  ;;  %v1729_v36 = vor.u32 %v1919_v34, %v1728_v33  ;;  %v1616_v42 = vld [vmem:[%s2959_s0 + $0x80] sm:$0xf]  ;;  %v1891_v43 = vld [vmem:[%s2959_s0 + $0x84] sm:$0xf0]  ;;  %v1894_v47 = vld [vmem:[%s2959_s0 + $0xa4] sm:$0xf] }
  0x17   :  { %1952 = vmatpush.bf16.msra.mxu2 %v1940_v12  ;;  %v1714_v12 = vld [vmem:[%s2959_s0 + $0x148] sm:$0xf0]  ;;  %v1617_v45 = vor.u32 %v1891_v43, %v1616_v42  ;;  %v1921_v51 = vld [vmem:[%s2959_s0 + $0x174] sm:$0xf0]  ;;  %v1738_v57 = vld [vmem:[%s2959_s0 + $0x178] sm:$0xf0] }
  0x18   :  { %v1634_v48 = vld [vmem:[%s2959_s0 + $0xa8] sm:$0xf0]  ;;  %v1624_v63 = vld [vmem:[%s2959_s0 + $0x90] sm:$0xf]  ;;  %v1893_v0 = vld [vmem:[%s2959_s0 + $0x94] sm:$0xf0] }
  0x19   :  { %v1625_v5 = vor.u32 %v1893_v0, %v1624_v63  ;;  %v1896_v7 = vld [vmem:[%s2959_s0 + $0xb4] sm:$0xf]  ;;  %v1642_v8 = vld [vmem:[%s2959_s0 + $0xb8] sm:$0xf0]  ;;  %v1898_v34 = vld [vmem:[%s2959_s0 + $0xc4] sm:$0xf] }
  0x1a   :  { %548 = vmatpush.bf16.msra.mxu0 %v1939_v13 }
  0x1b   :  { %1953 = vmatpush.bf16.msra.mxu2 %v1939_v13  ;;  %v1717_v13 = vor.u32 %v1914_v11, %v1714_v12  ;;  %v1923_v11 = vld [vmem:[%s2959_s0 + $0x184] sm:$0xf0] }
  0x1e   :  { %549 = vmatpush.bf16.msra.mxu0 %v1938_v14  ;;  %1860 = vmatmul.msk.bf16.gmra.mxu3 %vm445_vm0, %v1701_v53  ;;  %v1637_v53 = vor.u32 %v1894_v47, %v1634_v48  ;;  %v1754_v48 = vld [vmem:[%s2959_s0 + $0x198] sm:$0xf0] }
  0x1f   :  { %1954 = vmatpush.bf16.msra.mxu2 %v1938_v14  ;;  %v1600_v14 = vld [vmem:[%s2959_s0 + $0x60] sm:$0xf] }
  0x20   :  { %v1601_v16 = vor.u32 %v1887_v15, %v1600_v14 }
  0x21   :  { %550 = vmatmul.bf16.vlgmr.msra.gmra.mxu0 %v1553_v17  ;;  %v1890_v17 = vld [vmem:[%s2959_s0 + $0x84] sm:$0xf] }
  0x22   :  { %630 = vmatmul.bf16.vlgmr.msra.gmra.mxu2 %v1681_v29  ;;  %v1621_v21 = vor.u32 %v1890_v17, %v1618_v18  ;;  %v1889_v29 = vld [vmem:[%s2959_s0 + $0x74] sm:$0xf0] }
  0x25   :  { %1844 = vmatmul.msk.bf16.gmra.mxu1 %vm445_vm0, %v1573_v20  ;;  %v1917_v20 = vld [vmem:[%s2959_s0 + $0x154] sm:$0xf0] }
  0x26   :  { %v1721_v22 = vor.u32 %v1917_v20, %v1720_v19  ;;  %v1746_v19 = vld [vmem:[%s2959_s0 + $0x188] sm:$0xf0] }
  0x2e   :  { %1861 = vmatmul.msk.bf16.gmra.mxu3 %vm445_vm0, %v1709_v1 }
  0x31   :  { %555 = vmatmul.bf16.gmra.mxu0 %v1561_v23 }
  0x32   :  { %635 = vmatmul.bf16.gmra.mxu2 %v1689_v38  ;;  %v1918_v38 = vld [vmem:[%s2959_s0 + $0x164] sm:$0xf] }
  0x33   :  { %v1733_v40 = vor.u32 %v1918_v38, %v1730_v39  ;;  %v1752_v38 = vld [vmem:[%s2959_s0 + $0x190] sm:$0xf]  ;;  %v1925_v39 = vld [vmem:[%s2959_s0 + $0x194] sm:$0xf0] }
  0x34   :  { %v1753_v42 = vor.u32 %v1925_v39, %v1752_v38  ;;  %v1666_v38 = vld [vmem:[%s2959_s0 + $0xe8] sm:$0xf0] }
  0x35   :  { %1845 = vmatmul.msk.bf16.gmra.mxu1 %vm445_vm0, %v1581_v28  ;;  %v1608_v28 = vld [vmem:[%s2959_s0 + $0x70] sm:$0xf] }
  0x36   :  { %v1609_v30 = vor.u32 %v1889_v29, %v1608_v28  ;;  %v1895_v28 = vld [vmem:[%s2959_s0 + $0xa4] sm:$0xf0] }
  0x3e   :  { %1862 = vmatmul.msk.bf16.gmra.mxu3 %vm445_vm0, %v1717_v13  ;;  %v1645_v13 = vor.u32 %v1896_v7, %v1642_v8  ;;  %v1760_v8 = vld [vmem:[%s2959_s0 + $0x1a0] sm:$0xf] }
  0x41   :  { %560 = vmatmul.bf16.gmra.mxu0 %v1569_v32  ;;  %v1626_v32 = vld [vmem:[%s2959_s0 + $0x98] sm:$0xf0] }
  0x42   :  { %640 = vmatmul.bf16.gmra.mxu2 %v1697_v50  ;;  %v1629_v35 = vor.u32 %v1892_v31, %v1626_v32  ;;  %v1736_v50 = vld [vmem:[%s2959_s0 + $0x170] sm:$0xf] }
  0x43   :  { %v1737_v54 = vor.u32 %v1921_v51, %v1736_v50 }
  0x45   :  { %1846 = vmatmul.msk.bf16.gmra.mxu1 %vm445_vm0, %v1589_v37 }
  0x4e   :  { %1863 = vmatmul.msk.bf16.gmra.mxu3 %vm445_vm0, %v1725_v26 }
  0x51   :  { %565 = vmatmul.bf16.gmra.mxu0 %v1577_v44  ;;  %v2221_v44 = vld [vmem:[%s2960_s2] ss:$0 sm:$0xff] }
  0x52   :  { %645 = vmatmul.bf16.gmra.mxu2 %v1705_v62 }
  0x55   :  { %1847 = vmatmul.msk.bf16.gmra.mxu1 %vm445_vm0, %v1597_v49 }
  0x5e   :  { %1864 = vmatmul.msk.bf16.gmra.mxu3 %vm445_vm0, %v1733_v40 }
  0x61   :  { %570 = vmatmul.bf16.gmra.mxu0 %v1585_v56  ;;  %v1920_v56 = vld [vmem:[%s2959_s0 + $0x174] sm:$0xf] }
  0x62   :  { %650 = vmatmul.bf16.gmra.mxu2 %v1713_v10  ;;  %v1741_v58 = vor.u32 %v1920_v56, %v1738_v57  ;;  %v1744_v10 = vld [vmem:[%s2959_s0 + $0x180] sm:$0xf]  ;;  %v1640_v57 = vld [vmem:[%s2959_s0 + $0xb0] sm:$0xf] }
  0x63   :  { %v1745_v14 = vor.u32 %v1923_v11, %v1744_v10 }
  0x65   :  { %1848 = vmatmul.msk.bf16.gmra.mxu1 %vm445_vm0, %v1605_v61 }
  0x6e   :  { %1865 = vmatmul.msk.bf16.gmra.mxu3 %vm445_vm0, %v1741_v58  ;;  %v1897_v58 = vld [vmem:[%s2959_s0 + $0xb4] sm:$0xf0] }
  0x6f   :  { %v1641_v63 = vor.u32 %v1897_v58, %v1640_v57 }
  0x71   :  { %575 = vmatmul.bf16.gmra.mxu0 %v1593_v4 }
  0x72   :  { %655 = vmatmul.bf16.gmra.mxu2 %v1721_v22 }
  0x75   :  { %1849 = vmatmul.msk.bf16.gmra.mxu1 %vm445_vm0, %v1613_v9 }
  0x81   :  { %580 = vmatmul.bf16.gmra.mxu0 %v1601_v16  ;;  %v1922_v16 = vld [vmem:[%s2959_s0 + $0x184] sm:$0xf] }
  0x82   :  { %v720_v23 = vpop.f32.mrf.mxu1  ;;  %660 = vmatmul.bf16.gmra.mxu2 %v1729_v36  ;;  %v1749_v20 = vor.u32 %v1922_v16, %v1746_v19  ;;  %v1926_v16 = vld [vmem:[%s2959_s0 + $0x1a4] sm:$0xf] }
  0x84   :  { %1866 = vmatmul.msk.bf16.gmra.mxu3 %vm445_vm0, %v1749_v20 }
  0x85   :  { %1850 = vmatmul.msk.bf16.gmra.mxu1 %vm445_vm0, %v1621_v21 }
  0x8a   :  { %v722_v27 = vpop.f32.mrf.mxu1 }
  0x91   :  { %585 = vmatmul.bf16.gmra.mxu0 %v1609_v30 }
  0x92   :  { %v725_v37 = vpop.f32.mrf.mxu1  ;;  %665 = vmatmul.bf16.gmra.mxu2 %v1737_v54  ;;  %v805_v54 = vpop.f32.mrf.mxu3 }
  0x95   :  { %1851 = vmatmul.msk.bf16.gmra.mxu1 %vm445_vm0, %v1629_v35  ;;  %v1650_v35 = vld [vmem:[%s2959_s0 + $0xc8] sm:$0xf0] }
  0x9a   :  { %v727_v41 = vpop.f32.mrf.mxu1  ;;  %v807_v7 = vpop.f32.mrf.mxu3 }
  0x9e   :  { %v551_v46 = vpop.f32.mrf.mxu0 }
  0x9f   :  { %v552_v49 = vadd.f32 %v2221_v44, %v551_v46 }
  0xa1   :  { %v721_v52 = vadd.f32 %v720_v23, %v552_v49  ;;  %590 = vmatmul.bf16.gmra.mxu0 %v1617_v45  ;;  %v1924_v45 = vld [vmem:[%s2959_s0 + $0x194] sm:$0xf] }
  0xa2   :  { %v730_v55 = vpop.f32.mrf.mxu1  ;;  %670 = vmatmul.bf16.gmra.mxu2 %v1745_v14  ;;  %v1757_v49 = vor.u32 %v1924_v45, %v1754_v48 }
  0xa3   :  { %880 = vst [vmem:[%s2961_s3] sm:$0xff] %v721_v52  ;;  %v1400_v1 = vmul.f32 %v721_v52, %v721_v52 }
  0xa4   :  { %1867 = vmatmul.msk.bf16.gmra.mxu3 %vm445_vm0, %v1757_v49 }
  0xa5   :  { %1852 = vmatmul.msk.bf16.gmra.mxu1 %vm445_vm0, %v1637_v53  ;;  %v2285_v23 = vpop.f32.mrf.mxu2 }
  0xa6   :  { %v553_v59 = vpop.f32.mrf.mxu0 }
  0xa7   :  { %v554_v60 = vadd.f32 %v2221_v44, %v553_v59 }
  0xa9   :  { %v723_v61 = vadd.f32 %v722_v27, %v554_v60  ;;  %v1632_v27 = vld [vmem:[%s2959_s0 + $0xa0] sm:$0xf] }
  0xaa   :  { %v2248_v62 = vpop.f32.mrf.mxu1  ;;  %v1633_v32 = vor.u32 %v1895_v28, %v1632_v27 }
  0xab   :  { %881 = vst [vmem:[%s2961_s3 + $0x8] sm:$0xff] %v723_v61  ;;  %v1331_v2 = vadd.f32 %v723_v61, %v721_v52  ;;  %v1401_v3 = vmul.f32 %v723_v61, %v723_v61 }
  0xad   :  { %v1464_v4 = vadd.f32 %v1401_v3, %v1400_v1  ;;  %v2305_v36 = vpop.f32.mrf.mxu2  ;;  %v1900_v1 = vld [vmem:[%s2959_s0 + $0xd4] sm:$0xf] }
  0xae   :  { %v556_v6 = vpop.f32.mrf.mxu0 }
  0xaf   :  { %v557_v9 = vadd.f32 %v2221_v44, %v556_v6 }
  0xb1   :  { %v726_v12 = vadd.f32 %v725_v37, %v557_v9  ;;  %595 = vmatmul.bf16.gmra.mxu0 %v1625_v5  ;;  %v1927_v9 = vld [vmem:[%s2959_s0 + $0x1a4] sm:$0xf0] }
  0xb2   :  { %v2272_v15 = vpop.f32.mrf.mxu1  ;;  %675 = vmatmul.bf16.gmra.mxu2 %v1753_v42  ;;  %v1761_v14 = vor.u32 %v1927_v9, %v1760_v8  ;;  %v1904_v9 = vld [vmem:[%s2959_s0 + $0xf4] sm:$0xf] }
  0xb3   :  { %882 = vst [vmem:[%s2961_s3 + $0x10] sm:$0xff] %v726_v12  ;;  %v1332_v17 = vadd.f32 %v1331_v2, %v726_v12  ;;  %v1402_v18 = vmul.f32 %v726_v12, %v726_v12  ;;  %v1658_v2 = vld [vmem:[%s2959_s0 + $0xd8] sm:$0xf0] }
  0xb4   :  { %v1661_v11 = vor.u32 %v1900_v1, %v1658_v2  ;;  %v1656_v1 = vld [vmem:[%s2959_s0 + $0xd0] sm:$0xf]  ;;  %v1901_v2 = vld [vmem:[%s2959_s0 + $0xd4] sm:$0xf0] }
  0xb5   :  { %v1465_v21 = vadd.f32 %v1464_v4, %v1402_v18  ;;  %1853 = vmatmul.msk.bf16.gmra.mxu1 %vm445_vm0, %v1645_v13  ;;  %v636_v52 = vpop.f32.mrf.mxu2  ;;  %v1762_v18 = vld [vmem:[%s2959_s0 + $0x1a8] sm:$0xf0] }
  0xb6   :  { %v558_v22 = vpop.f32.mrf.mxu0  ;;  %v1765_v19 = vor.u32 %v1926_v16, %v1762_v18  ;;  %v1931_v18 = vld [vmem:[%s2959_s0 + $0x1c4] sm:$0xf0] }
  0xb7   :  { %v559_v24 = vadd.f32 %v2221_v44, %v558_v22 }
  0xb8   :  { %1868 = vmatmul.msk.bf16.gmra.mxu3 %vm445_vm0, %v1765_v19 }
  0xb9   :  { %v728_v25 = vadd.f32 %v727_v41, %v559_v24  ;;  %v1653_v41 = vor.u32 %v1898_v34, %v1650_v35 }
  0xba   :  { %v2288_v26 = vpop.f32.mrf.mxu1 }
  0xbb   :  { %883 = vst [vmem:[%s2961_s3 + $0x18] sm:$0xff] %v728_v25  ;;  %v1333_v29 = vadd.f32 %v1332_v17, %v728_v25  ;;  %v1403_v30 = vmul.f32 %v728_v25, %v728_v25  ;;  %v810_v25 = vpop.f32.mrf.mxu3 }
  0xbd   :  { %v1466_v31 = vadd.f32 %v1465_v21, %v1403_v30  ;;  %v638_v3 = vpop.f32.mrf.mxu2  ;;  %v1899_v30 = vld [vmem:[%s2959_s0 + $0xc4] sm:$0xf0] }
  0xbe   :  { %v561_v33 = vpop.f32.mrf.mxu0  ;;  %v639_v6 = vadd.f32 %v2221_v44, %v638_v3 }
  0xbf   :  { %v562_v37 = vadd.f32 %v2221_v44, %v561_v33 }
  0xc0   :  { %v2362_v12 = vadd.f32 %v807_v7, %v639_v6  ;;  %v1657_v7 = vor.u32 %v1901_v2, %v1656_v1  ;;  %v1932_v2 = vld [vmem:[%s2959_s0 + $0x1d4] sm:$0xf] }
  0xc1   :  { %v731_v40 = vadd.f32 %v730_v55, %v562_v37  ;;  %600 = vmatmul.bf16.gmra.mxu0 %v1633_v32  ;;  %v1902_v37 = vld [vmem:[%s2959_s0 + $0xe4] sm:$0xf] }
  0xc2   :  { %v2314_v43 = vpop.f32.mrf.mxu1  ;;  %915 = vst [vmem:[%s2961_s3 + $0x118] sm:$0xff] %v2362_v12  ;;  %680 = vmatmul.bf16.gmra.mxu2 %v1761_v14  ;;  %v1669_v49 = vor.u32 %v1902_v37, %v1666_v38 }
  0xc3   :  { %884 = vst [vmem:[%s2961_s3 + $0x20] sm:$0xff] %v731_v40  ;;  %v1334_v46 = vadd.f32 %v1333_v29, %v731_v40  ;;  %v1404_v47 = vmul.f32 %v731_v40, %v731_v40  ;;  %v1648_v29 = vld [vmem:[%s2959_s0 + $0xc0] sm:$0xf]  ;;  %v812_v45 = vpop.f32.mrf.mxu3 }
  0xc4   :  { %v1649_v34 = vor.u32 %v1899_v30, %v1648_v29 }
  0xc5   :  { %v1467_v50 = vadd.f32 %v1466_v31, %v1404_v47  ;;  %1854 = vmatmul.msk.bf16.gmra.mxu1 %vm445_vm0, %v1653_v41  ;;  %v641_v22 = vpop.f32.mrf.mxu2  ;;  %v1929_v47 = vld [vmem:[%s2959_s0 + $0x1b4] sm:$0xf0] }
  0xc6   :  { %v563_v51 = vpop.f32.mrf.mxu0 }
  0xc7   :  { %v564_v53 = vadd.f32 %v2221_v44, %v563_v51 }
  0xc9   :  { %v733_v55 = vadd.f32 %v2248_v62, %v564_v53  ;;  %v637_v62 = vadd.f32 %v2221_v44, %v636_v52  ;;  %v1928_v53 = vld [vmem:[%s2959_s0 + $0x1b4] sm:$0xf] }
  0xca   :  { %v2329_v56 = vpop.f32.mrf.mxu1 }
  0xcb   :  { %885 = vst [vmem:[%s2961_s3 + $0x28] sm:$0xff] %v733_v55  ;;  %v1335_v59 = vadd.f32 %v1334_v46, %v733_v55  ;;  %v1405_v60 = vmul.f32 %v733_v55, %v733_v55  ;;  %v2348_v5 = vadd.f32 %v805_v54, %v637_v62  ;;  %v1768_v46 = vld [vmem:[%s2959_s0 + $0x1b0] sm:$0xf]  ;;  %v1770_v55 = vld [vmem:[%s2959_s0 + $0x1b8] sm:$0xf0]  ;;  %v815_v62 = vpop.f32.mrf.mxu3 }
  0xcc   :  { %v1769_v52 = vor.u32 %v1929_v47, %v1768_v46  ;;  %v1773_v57 = vor.u32 %v1928_v53, %v1770_v55 }
  0xcd   :  { %v1468_v61 = vadd.f32 %v1467_v50, %v1405_v60  ;;  %914 = vst [vmem:[%s2961_s3 + $0x110] sm:$0xff] %v2348_v5  ;;  %v643_v39 = vpop.f32.mrf.mxu2 }
  0xce   :  { %v566_v0 = vpop.f32.mrf.mxu0  ;;  %v644_v42 = vadd.f32 %v2221_v44, %v643_v39  ;;  %1869 = vmatmul.msk.bf16.gmra.mxu3 %vm445_vm0, %v1773_v57  ;;  %v1664_v39 = vld [vmem:[%s2959_s0 + $0xe0] sm:$0xf]  ;;  %v1784_v57 = vld [vmem:[%s2959_s0 + $0x1d0] sm:$0xf] }
  0xcf   :  { %v567_v4 = vadd.f32 %v2221_v44, %v566_v0 }
  0xd0   :  { %v2416_v50 = vadd.f32 %v812_v45, %v644_v42 }
  0xd1   :  { %v736_v10 = vadd.f32 %v2272_v15, %v567_v4  ;;  %605 = vmatmul.bf16.gmra.mxu0 %v1641_v63 }
  0xd2   :  { %v2364_v13 = vpop.f32.mrf.mxu1  ;;  %917 = vst [vmem:[%s2961_s3 + $0x128] sm:$0xff] %v2416_v50  ;;  %685 = vmatmul.bf16.gmra.mxu2 %v1769_v52  ;;  %v1682_v52 = vld [vmem:[%s2959_s0 + $0x108] sm:$0xf0] }
  0xd3   :  { %886 = vst [vmem:[%s2961_s3 + $0x30] sm:$0xff] %v736_v10  ;;  %v1336_v15 = vadd.f32 %v1335_v59, %v736_v10  ;;  %v1406_v17 = vmul.f32 %v736_v10, %v736_v10  ;;  %v1674_v10 = vld [vmem:[%s2959_s0 + $0xf8] sm:$0xf0] }
  0xd5   :  { %v1469_v20 = vadd.f32 %v1468_v61, %v1406_v17  ;;  %1855 = vmatmul.msk.bf16.gmra.mxu1 %vm445_vm0, %v1661_v11  ;;  %v646_v60 = vpop.f32.mrf.mxu2  ;;  %v1776_v17 = vld [vmem:[%s2959_s0 + $0x1c0] sm:$0xf] }
  0xd6   :  { %v568_v21 = vpop.f32.mrf.mxu0 }
  0xd7   :  { %v569_v24 = vadd.f32 %v2221_v44, %v568_v21  ;;  %v817_v21 = vpop.f32.mrf.mxu3 }
  0xd9   :  { %v738_v27 = vadd.f32 %v2288_v26, %v569_v24  ;;  %v642_v26 = vadd.f32 %v2221_v44, %v641_v22  ;;  %v1777_v22 = vor.u32 %v1931_v18, %v1776_v17  ;;  %v1905_v17 = vld [vmem:[%s2959_s0 + $0xf4] sm:$0xf0] }
  0xda   :  { %v2383_v28 = vpop.f32.mrf.mxu1 }
  0xdb   :  { %887 = vst [vmem:[%s2961_s3 + $0x38] sm:$0xff] %v738_v27  ;;  %v1337_v31 = vadd.f32 %v1336_v15, %v738_v27  ;;  %v1407_v32 = vmul.f32 %v738_v27, %v738_v27  ;;  %v2402_v41 = vadd.f32 %v810_v25, %v642_v26  ;;  %v1930_v27 = vld [vmem:[%s2959_s0 + $0x1c4] sm:$0xf] }
  0xdd   :  { %v1470_v33 = vadd.f32 %v1469_v20, %v1407_v32  ;;  %916 = vst [vmem:[%s2961_s3 + $0x120] sm:$0xff] %v2402_v41  ;;  %v648_v11 = vpop.f32.mrf.mxu2  ;;  %v1677_v20 = vor.u32 %v1904_v9, %v1674_v10 }
  0xde   :  { %v571_v35 = vpop.f32.mrf.mxu0  ;;  %v649_v15 = vadd.f32 %v2221_v44, %v648_v11 }
  0xdf   :  { %v572_v40 = vadd.f32 %v2221_v44, %v571_v35  ;;  %v820_v37 = vpop.f32.mrf.mxu3 }
  0xe0   :  { %v2472_v25 = vadd.f32 %v817_v21, %v649_v15  ;;  %v1672_v15 = vld [vmem:[%s2959_s0 + $0xf0] sm:$0xf] }
  0xe1   :  { %v741_v48 = vadd.f32 %v2314_v43, %v572_v40  ;;  %610 = vmatmul.bf16.gmra.mxu0 %v1649_v34  ;;  %v1903_v40 = vld [vmem:[%s2959_s0 + $0xe4] sm:$0xf0]  ;;  %v1673_v21 = vor.u32 %v1905_v17, %v1672_v15 }
  0xe2   :  { %v2418_v51 = vpop.f32.mrf.mxu1  ;;  %919 = vst [vmem:[%s2961_s3 + $0x138] sm:$0xff] %v2472_v25  ;;  %690 = vmatmul.bf16.gmra.mxu2 %v1777_v22  ;;  %v1665_v47 = vor.u32 %v1903_v40, %v1664_v39  ;;  %v1934_v39 = vld [vmem:[%s2959_s0 + $0x1e4] sm:$0xf]  ;;  %v1794_v40 = vld [vmem:[%s2959_s0 + $0x1e8] sm:$0xf0] }
  0xe3   :  { %888 = vst [vmem:[%s2961_s3 + $0x40] sm:$0xff] %v741_v48  ;;  %v1338_v43 = vadd.f32 %v1337_v31, %v741_v48  ;;  %v1408_v54 = vmul.f32 %v741_v48, %v741_v48 }
  0xe5   :  { %v1471_v58 = vadd.f32 %v1470_v33, %v1408_v54  ;;  %1856 = vmatmul.msk.bf16.gmra.mxu1 %vm445_vm0, %v1669_v49  ;;  %v651_v34 = vpop.f32.mrf.mxu2  ;;  %v1906_v49 = vld [vmem:[%s2959_s0 + $0x104] sm:$0xf] }
  0xe6   :  { %v573_v59 = vpop.f32.mrf.mxu0 }
  0xe7   :  { %v574_v61 = vadd.f32 %v2221_v44, %v573_v59 }
  0xe9   :  { %v743_v63 = vadd.f32 %v2329_v56, %v574_v61  ;;  %v647_v56 = vadd.f32 %v2221_v44, %v646_v60  ;;  %v1685_v60 = vor.u32 %v1906_v49, %v1682_v52  ;;  %v822_v61 = vpop.f32.mrf.mxu3 }
  0xea   :  { %v2437_v0 = vpop.f32.mrf.mxu1 }
  0xeb   :  { %889 = vst [vmem:[%s2961_s3 + $0x48] sm:$0xff] %v743_v63  ;;  %v1339_v3 = vadd.f32 %v1338_v43, %v743_v63  ;;  %v1409_v4 = vmul.f32 %v743_v63, %v743_v63  ;;  %v2456_v16 = vadd.f32 %v815_v62, %v647_v56 }
  0xed   :  { %v1472_v6 = vadd.f32 %v1471_v58, %v1409_v4  ;;  %918 = vst [vmem:[%s2961_s3 + $0x130] sm:$0xff] %v2456_v16  ;;  %v653_v53 = vpop.f32.mrf.mxu2  ;;  %v1933_v58 = vld [vmem:[%s2959_s0 + $0x1d4] sm:$0xf0] }
  0xee   :  { %v576_v8 = vpop.f32.mrf.mxu0  ;;  %v654_v55 = vadd.f32 %v2221_v44, %v653_v53  ;;  %v1785_v63 = vor.u32 %v1933_v58, %v1784_v57 }
  0xef   :  { %v577_v14 = vadd.f32 %v2221_v44, %v576_v8 }
  0xf0   :  { %v2526_v1 = vadd.f32 %v822_v61, %v654_v55 }
  0xf1   :  { %v746_v19 = vadd.f32 %v2364_v13, %v577_v14  ;;  %615 = vmatmul.bf16.gmra.mxu0 %v1657_v7  ;;  %v1778_v13 = vld [vmem:[%s2959_s0 + $0x1c8] sm:$0xf0]  ;;  %v825_v11 = vpop.f32.mrf.mxu3 }
  0xf2   :  { %v2470_v24 = vpop.f32.mrf.mxu1  ;;  %v1781_v31 = vor.u32 %v1930_v27, %v1778_v13  ;;  %921 = vst [vmem:[%s2961_s3 + $0x148] sm:$0xff] %v2526_v1  ;;  %695 = vmatmul.bf16.gmra.mxu2 %v1785_v63 }
  0xf3   :  { %890 = vst [vmem:[%s2961_s3 + $0x50] sm:$0xff] %v746_v19  ;;  %v1340_v29 = vadd.f32 %v1339_v3, %v746_v19  ;;  %v1410_v30 = vmul.f32 %v746_v19, %v746_v19 }
  0xf4   :  { %1870 = vmatmul.msk.bf16.gmra.mxu3 %vm445_vm0, %v1781_v31  ;;  %v1792_v31 = vld [vmem:[%s2959_s0 + $0x1e0] sm:$0xf] }
  0xf5   :  { %v1473_v32 = vadd.f32 %v1472_v6, %v1410_v30  ;;  %1857 = vmatmul.msk.bf16.gmra.mxu1 %vm445_vm0, %v1677_v20  ;;  %v656_v8 = vpop.f32.mrf.mxu2 }
  0xf6   :  { %v578_v33 = vpop.f32.mrf.mxu0 }
  0xf7   :  { %v579_v26 = vadd.f32 %v2221_v44, %v578_v33 }
  0xf9   :  { %v748_v35 = vadd.f32 %v2383_v28, %v579_v26  ;;  %v652_v28 = vadd.f32 %v2221_v44, %v651_v34  ;;  %v827_v34 = vpop.f32.mrf.mxu3 }
  0xfa   :  { %v2491_v38 = vpop.f32.mrf.mxu1 }
  0xfb   :  { %891 = vst [vmem:[%s2961_s3 + $0x58] sm:$0xff] %v748_v35  ;;  %v1341_v42 = vadd.f32 %v1340_v29, %v748_v35  ;;  %v1411_v45 = vmul.f32 %v748_v35, %v748_v35  ;;  %v2510_v54 = vadd.f32 %v820_v37, %v652_v28 }
  0xfd   :  { %v1474_v46 = vadd.f32 %v1473_v32, %v1411_v45  ;;  %920 = vst [vmem:[%s2961_s3 + $0x140] sm:$0xff] %v2510_v54  ;;  %v658_v27 = vpop.f32.mrf.mxu2  ;;  %v1935_v32 = vld [vmem:[%s2959_s0 + $0x1e4] sm:$0xf0]  ;;  %v1797_v45 = vor.u32 %v1934_v39, %v1794_v40 }
  0xfe   :  { %v581_v48 = vpop.f32.mrf.mxu0  ;;  %v659_v30 = vadd.f32 %v2221_v44, %v658_v27  ;;  %v1793_v26 = vor.u32 %v1935_v32, %v1792_v31 }
  0xff   :  { %v582_v43 = vadd.f32 %v2221_v44, %v581_v48 }
 0x100   :  { %v2572_v37 = vadd.f32 %v827_v34, %v659_v30 }
 0x101   :  { %v751_v59 = vadd.f32 %v2418_v51, %v582_v43  ;;  %620 = vmatmul.bf16.gmra.mxu0 %v1665_v47  ;;  %v1786_v51 = vld [vmem:[%s2959_s0 + $0x1d8] sm:$0xf0]  ;;  %v830_v52 = vpop.f32.mrf.mxu3 }
 0x102   :  { %v2524_v62 = vpop.f32.mrf.mxu1  ;;  %v1789_v6 = vor.u32 %v1932_v2, %v1786_v51  ;;  %923 = vst [vmem:[%s2961_s3 + $0x158] sm:$0xff] %v2572_v37  ;;  %700 = vmatmul.bf16.gmra.mxu2 %v1793_v26  ;;  %v1937_v51 = vld [vmem:[%s2959_s0 + $0x1f4] sm:$0xf0] }
 0x103   :  { %892 = vst [vmem:[%s2961_s3 + $0x60] sm:$0xff] %v751_v59  ;;  %v1342_v3 = vadd.f32 %v1341_v42, %v751_v59  ;;  %v1412_v4 = vmul.f32 %v751_v59, %v751_v59 }
 0x104   :  { %1871 = vmatmul.msk.bf16.gmra.mxu3 %vm445_vm0, %v1789_v6 }
 0x105   :  { %v1475_v7 = vadd.f32 %v1474_v46, %v1412_v4  ;;  %1858 = vmatmul.msk.bf16.gmra.mxu1 %vm445_vm0, %v1685_v60  ;;  %v661_v28 = vpop.f32.mrf.mxu2 }
 0x106   :  { %v583_v56 = vpop.f32.mrf.mxu0  ;;  %v662_v58 = vadd.f32 %v2221_v44, %v661_v28 }
 0x107   :  { %v584_v9 = vadd.f32 %v2221_v44, %v583_v56 }
 0x108   :  { %v2595_v63 = vadd.f32 %v830_v52, %v662_v58 }
 0x109   :  { %v753_v10 = vadd.f32 %v2437_v0, %v584_v9  ;;  %v657_v0 = vadd.f32 %v2221_v44, %v656_v8  ;;  %v832_v4 = vpop.f32.mrf.mxu3  ;;  %v1936_v8 = vld [vmem:[%s2959_s0 + $0x1f4] sm:$0xf]  ;;  %v1802_v9 = vld [vmem:[%s2959_s0 + $0x1f8] sm:$0xf0] }
 0x10a   :  { %v2545_v14 = vpop.f32.mrf.mxu1  ;;  %924 = vst [vmem:[%s2961_s3 + $0x160] sm:$0xff] %v2595_v63 }
 0x10b   :  { %893 = vst [vmem:[%s2961_s3 + $0x68] sm:$0xff] %v753_v10  ;;  %v1343_v18 = vadd.f32 %v1342_v3, %v753_v10  ;;  %v1413_v19 = vmul.f32 %v753_v10, %v753_v10  ;;  %v2558_v29 = vadd.f32 %v825_v11, %v657_v0  ;;  %v1805_v11 = vor.u32 %v1936_v8, %v1802_v9 }
 0x10d   :  { %v1476_v20 = vadd.f32 %v1475_v7, %v1413_v19  ;;  %922 = vst [vmem:[%s2961_s3 + $0x150] sm:$0xff] %v2558_v29  ;;  %v663_v60 = vpop.f32.mrf.mxu2 }
 0x10e   :  { %v586_v22 = vpop.f32.mrf.mxu0  ;;  %v664_v2 = vadd.f32 %v2221_v44, %v663_v60 }
 0x10f   :  { %v587_v13 = vadd.f32 %v2221_v44, %v586_v22 }
 0x110   :  { %v2609_v56 = vadd.f32 %v832_v4, %v664_v2 }
 0x111   :  { %v756_v33 = vadd.f32 %v2470_v24, %v587_v13  ;;  %625 = vmatmul.bf16.gmra.mxu0 %v1673_v21  ;;  %v835_v21 = vpop.f32.mrf.mxu3 }
 0x112   :  { %v765_v35 = vpop.f32.mrf.mxu1  ;;  %925 = vst [vmem:[%s2961_s3 + $0x168] sm:$0xff] %v2609_v56 }
 0x113   :  { %894 = vst [vmem:[%s2961_s3 + $0x70] sm:$0xff] %v756_v33  ;;  %v1344_v24 = vadd.f32 %v1343_v18, %v756_v33  ;;  %v1414_v42 = vmul.f32 %v756_v33, %v756_v33 }
 0x114   :  { %1872 = vmatmul.msk.bf16.gmra.mxu3 %vm445_vm0, %v1797_v45 }
 0x115   :  { %v1477_v46 = vadd.f32 %v1476_v20, %v1414_v42  ;;  %v666_v18 = vpop.f32.mrf.mxu2 }
 0x116   :  { %v588_v47 = vpop.f32.mrf.mxu0  ;;  %v667_v30 = vadd.f32 %v2221_v44, %v666_v18 }
 0x117   :  { %v589_v48 = vadd.f32 %v2221_v44, %v588_v47 }
 0x118   :  { %v2632_v34 = vadd.f32 %v835_v21, %v667_v30 }
 0x119   :  { %v758_v49 = vadd.f32 %v2491_v38, %v589_v48  ;;  %v1800_v38 = vld [vmem:[%s2959_s0 + $0x1f0] sm:$0xf]  ;;  %v837_v39 = vpop.f32.mrf.mxu3 }
 0x11a   :  { %v767_v53 = vpop.f32.mrf.mxu1  ;;  %v1801_v6 = vor.u32 %v1937_v51, %v1800_v38  ;;  %926 = vst [vmem:[%s2961_s3 + $0x170] sm:$0xff] %v2632_v34 }
 0x11b   :  { %895 = vst [vmem:[%s2961_s3 + $0x78] sm:$0xff] %v758_v49  ;;  %v1345_v43 = vadd.f32 %v1344_v24, %v758_v49  ;;  %v1415_v55 = vmul.f32 %v758_v49, %v758_v49 }
 0x11c   :  { %705 = vmatmul.bf16.gmra.mxu2 %v1801_v6 }
 0x11d   :  { %v1478_v57 = vadd.f32 %v1477_v46, %v1415_v55  ;;  %v668_v32 = vpop.f32.mrf.mxu2 }
 0x11e   :  { %v591_v59 = vpop.f32.mrf.mxu0  ;;  %v669_v26 = vadd.f32 %v2221_v44, %v668_v32 }
 0x11f   :  { %v592_v61 = vadd.f32 %v2221_v44, %v591_v59 }
 0x120   :  { %v2639_v24 = vadd.f32 %v837_v39, %v669_v26 }
 0x121   :  { %v761_v3 = vadd.f32 %v2524_v62, %v592_v61  ;;  %v840_v49 = vpop.f32.mrf.mxu3 }
 0x122   :  { %v770_v7 = vpop.f32.mrf.mxu1  ;;  %927 = vst [vmem:[%s2961_s3 + $0x178] sm:$0xff] %v2639_v24 }
 0x123   :  { %896 = vst [vmem:[%s2961_s3 + $0x80] sm:$0xff] %v761_v3  ;;  %v1346_v62 = vadd.f32 %v1345_v43, %v761_v3  ;;  %v1416_v10 = vmul.f32 %v761_v3, %v761_v3 }
 0x124   :  { %1873 = vmatmul.msk.bf16.gmra.mxu3 %vm445_vm0, %v1805_v11 }
 0x125   :  { %v1479_v15 = vadd.f32 %v1478_v57, %v1416_v10  ;;  %v671_v47 = vpop.f32.mrf.mxu2 }
 0x126   :  { %v593_v17 = vpop.f32.mrf.mxu0  ;;  %v672_v58 = vadd.f32 %v2221_v44, %v671_v47 }
 0x127   :  { %v594_v19 = vadd.f32 %v2221_v44, %v593_v17 }
 0x128   :  { %v2654_v2 = vadd.f32 %v840_v49, %v672_v58 }
 0x129   :  { %v763_v20 = vadd.f32 %v2545_v14, %v594_v19  ;;  %v842_v51 = vpop.f32.mrf.mxu3 }
 0x12a   :  { %v772_v0 = vpop.f32.mrf.mxu1  ;;  %928 = vst [vmem:[%s2961_s3 + $0x180] sm:$0xff] %v2654_v2 }
 0x12b   :  { %897 = vst [vmem:[%s2961_s3 + $0x88] sm:$0xff] %v763_v20  ;;  %v1347_v22 = vadd.f32 %v1346_v62, %v763_v20  ;;  %v1417_v27 = vmul.f32 %v763_v20, %v763_v20 }
 0x12d   :  { %v1480_v13 = vadd.f32 %v1479_v15, %v1417_v27  ;;  %v673_v60 = vpop.f32.mrf.mxu2 }
 0x12e   :  { %v596_v31 = vpop.f32.mrf.mxu0  ;;  %v674_v38 = vadd.f32 %v2221_v44, %v673_v60 }
 0x12f   :  { %v597_v33 = vadd.f32 %v2221_v44, %v596_v31 }
 0x130   :  { %v2661_v4 = vadd.f32 %v842_v51, %v674_v38 }
 0x131   :  { %v766_v14 = vadd.f32 %v765_v35, %v597_v33  ;;  %v845_v15 = vpop.f32.mrf.mxu3 }
 0x132   :  { %v775_v40 = vpop.f32.mrf.mxu1  ;;  %929 = vst [vmem:[%s2961_s3 + $0x188] sm:$0xff] %v2661_v4 }
 0x133   :  { %898 = vst [vmem:[%s2961_s3 + $0x90] sm:$0xff] %v766_v14  ;;  %v1348_v42 = vadd.f32 %v1347_v22, %v766_v14  ;;  %v1418_v45 = vmul.f32 %v766_v14, %v766_v14 }
 0x135   :  { %v1481_v35 = vadd.f32 %v1480_v13, %v1418_v45  ;;  %v676_v62 = vpop.f32.mrf.mxu2 }
 0x136   :  { %v598_v46 = vpop.f32.mrf.mxu0  ;;  %v677_v19 = vadd.f32 %v2221_v44, %v676_v62 }
 0x137   :  { %v599_v28 = vadd.f32 %v2221_v44, %v598_v46 }
 0x138   :  { %v2684_v27 = vadd.f32 %v845_v15, %v677_v19 }
 0x139   :  { %v768_v48 = vadd.f32 %v767_v53, %v599_v28  ;;  %v847_v30 = vpop.f32.mrf.mxu3 }
 0x13a   :  { %v777_v52 = vpop.f32.mrf.mxu1  ;;  %930 = vst [vmem:[%s2961_s3 + $0x190] sm:$0xff] %v2684_v27 }
 0x13b   :  { %899 = vst [vmem:[%s2961_s3 + $0x98] sm:$0xff] %v768_v48  ;;  %v1349_v43 = vadd.f32 %v1348_v42, %v768_v48  ;;  %v1419_v55 = vmul.f32 %v768_v48, %v768_v48 }
 0x13d   :  { %v1482_v57 = vadd.f32 %v1481_v35, %v1419_v55  ;;  %v678_v21 = vpop.f32.mrf.mxu2 }
 0x13e   :  { %v601_v59 = vpop.f32.mrf.mxu0 }
 0x13f   :  { %v602_v61 = vadd.f32 %v2221_v44, %v601_v59 }
 0x141   :  { %v771_v53 = vadd.f32 %v770_v7, %v602_v61 }
 0x142   :  { %v780_v3 = vpop.f32.mrf.mxu1 }
 0x143   :  { %900 = vst [vmem:[%s2961_s3 + $0xa0] sm:$0xff] %v771_v53  ;;  %v1350_v6 = vadd.f32 %v1349_v43, %v771_v53  ;;  %v1420_v8 = vmul.f32 %v771_v53, %v771_v53 }
 0x145   :  { %v2670_v7 = vadd.f32 %v1482_v57, %v1420_v8  ;;  %v681_v14 = vpop.f32.mrf.mxu2 }
 0x146   :  { %v603_v9 = vpop.f32.mrf.mxu0  ;;  %v682_v45 = vadd.f32 %v2221_v44, %v681_v14 }
 0x147   :  { %v604_v10 = vadd.f32 %v2221_v44, %v603_v9 }
 0x149   :  { %v2673_v11 = vadd.f32 %v772_v0, %v604_v10  ;;  %v679_v0 = vadd.f32 %v2221_v44, %v678_v21 }
 0x14a   :  { %v782_v17 = vpop.f32.mrf.mxu1 }
 0x14b   :  { %901 = vst [vmem:[%s2961_s3 + $0xa8] sm:$0xff] %v2673_v11  ;;  %v2680_v18 = vadd.f32 %v1350_v6, %v2673_v11  ;;  %v2693_v32 = vadd.f32 %v847_v30, %v679_v0 }
 0x14d   :  { %931 = vst [vmem:[%s2961_s3 + $0x198] sm:$0xff] %v2693_v32  ;;  %v683_v28 = vpop.f32.mrf.mxu2 }
 0x14e   :  { %v606_v20 = vpop.f32.mrf.mxu0  ;;  %v684_v48 = vadd.f32 %v2221_v44, %v683_v28 }
 0x14f   :  { %v607_v22 = vadd.f32 %v2221_v44, %v606_v20 }
 0x151   :  { %v2687_v13 = vadd.f32 %v775_v40, %v607_v22  ;;  %v850_v40 = vpop.f32.mrf.mxu3 }
 0x152   :  { %v785_v31 = vpop.f32.mrf.mxu1  ;;  %v2712_v47 = vadd.f32 %v850_v40, %v682_v45  ;;  %v632_v45 = vadd.f32 %v2221_v44, %v2285_v23 }
 0x153   :  { %902 = vst [vmem:[%s2961_s3 + $0xb0] sm:$0xff] %v2687_v13  ;;  %v1422_v23 = vmul.f32 %v2687_v13, %v2687_v13 }
 0x154   :  { %932 = vst [vmem:[%s2961_s3 + $0x1a0] sm:$0xff] %v2712_v47 }
 0x155   :  { %v686_v59 = vpop.f32.mrf.mxu2 }
 0x156   :  { %v608_v33 = vpop.f32.mrf.mxu0  ;;  %v687_v53 = vadd.f32 %v2221_v44, %v686_v59 }
 0x157   :  { %v609_v26 = vadd.f32 %v2221_v44, %v608_v33 }
 0x159   :  { %v2704_v39 = vadd.f32 %v777_v52, %v609_v26  ;;  %v852_v52 = vpop.f32.mrf.mxu3 }
 0x15a   :  { %v787_v42 = vpop.f32.mrf.mxu1  ;;  %v2721_v55 = vadd.f32 %v852_v52, %v684_v48 }
 0x15b   :  { %903 = vst [vmem:[%s2961_s3 + $0xb8] sm:$0xff] %v2704_v39 }
 0x15c   :  { %933 = vst [vmem:[%s2961_s3 + $0x1a8] sm:$0xff] %v2721_v55 }
 0x15d   :  { %v688_v8 = vpop.f32.mrf.mxu2 }
 0x15e   :  { %v611_v35 = vpop.f32.mrf.mxu0  ;;  %v689_v9 = vadd.f32 %v2221_v44, %v688_v8 }
 0x15f   :  { %v612_v46 = vadd.f32 %v2221_v44, %v611_v35 }
 0x161   :  { %v2715_v49 = vadd.f32 %v780_v3, %v612_v46  ;;  %v855_v61 = vpop.f32.mrf.mxu3 }
 0x162   :  { %v790_v43 = vpop.f32.mrf.mxu1  ;;  %v2740_v6 = vadd.f32 %v855_v61, %v687_v53  ;;  %v1423_v61 = vmul.f32 %v2704_v39, %v2704_v39  ;;  %v634_v53 = vadd.f32 %v2221_v44, %v2305_v36 }
 0x163   :  { %904 = vst [vmem:[%s2961_s3 + $0xc0] sm:$0xff] %v2715_v49 }
 0x164   :  { %934 = vst [vmem:[%s2961_s3 + $0x1b0] sm:$0xff] %v2740_v6 }
 0x165   :  { %v691_v21 = vpop.f32.mrf.mxu2 }
 0x166   :  { %v613_v57 = vpop.f32.mrf.mxu0  ;;  %v692_v26 = vadd.f32 %v2221_v44, %v691_v21 }
 0x167   :  { %v614_v58 = vadd.f32 %v2221_v44, %v613_v57  ;;  %v1421_v57 = vmul.f32 %v2673_v11, %v2673_v11 }
 0x169   :  { %v2732_v60 = vadd.f32 %v782_v17, %v614_v58  ;;  %v857_v10 = vpop.f32.mrf.mxu3  ;;  %v1484_v59 = vadd.f32 %v2670_v7, %v1421_v57 }
 0x16a   :  { %v792_v38 = vpop.f32.mrf.mxu1  ;;  %v2747_v17 = vadd.f32 %v857_v10, %v689_v9  ;;  %v1424_v10 = vmul.f32 %v2715_v49, %v2715_v49 }
 0x16b   :  { %905 = vst [vmem:[%s2961_s3 + $0xc8] sm:$0xff] %v2732_v60  ;;  %v1485_v9 = vadd.f32 %v1484_v59, %v1422_v23  ;;  %v1425_v36 = vmul.f32 %v2732_v60, %v2732_v60 }
 0x16c   :  { %935 = vst [vmem:[%s2961_s3 + $0x1b8] sm:$0xff] %v2747_v17 }
 0x16d   :  { %v693_v14 = vpop.f32.mrf.mxu2  ;;  %v1486_v21 = vadd.f32 %v1485_v9, %v1423_v61 }
 0x16e   :  { %v616_v51 = vpop.f32.mrf.mxu0  ;;  %v694_v40 = vadd.f32 %v2221_v44, %v693_v14 }
 0x16f   :  { %v617_v3 = vadd.f32 %v2221_v44, %v616_v51  ;;  %v1352_v51 = vadd.f32 %v2680_v18, %v2687_v13  ;;  %v1487_v13 = vadd.f32 %v1486_v21, %v1424_v10 }
 0x171   :  { %v786_v62 = vadd.f32 %v785_v31, %v617_v3  ;;  %v1488_v14 = vadd.f32 %v1487_v13, %v1425_v36 }
 0x172   :  { %v795_v15 = vpop.f32.mrf.mxu1 }
 0x173   :  { %906 = vst [vmem:[%s2961_s3 + $0xd0] sm:$0xff] %v786_v62 }
 0x175   :  { %v696_v58 = vpop.f32.mrf.mxu2 }
 0x176   :  { %v618_v19 = vpop.f32.mrf.mxu0 }
 0x177   :  { %v619_v20 = vadd.f32 %v2221_v44, %v618_v19  ;;  %v860_v0 = vpop.f32.mrf.mxu3 }
 0x179   :  { %v788_v22 = vadd.f32 %v787_v42, %v619_v20  ;;  %v2767_v42 = vadd.f32 %v860_v0, %v692_v26  ;;  %v1353_v20 = vadd.f32 %v1352_v51, %v2704_v39  ;;  %v1426_v39 = vmul.f32 %v786_v62, %v786_v62 }
 0x17a   :  { %v2757_v30 = vpop.f32.mrf.mxu1 }
 0x17b   :  { %907 = vst [vmem:[%s2961_s3 + $0xd8] sm:$0xff] %v788_v22  ;;  %v1354_v18 = vadd.f32 %v1353_v20, %v2715_v49 }
 0x17c   :  { %936 = vst [vmem:[%s2961_s3 + $0x1c0] sm:$0xff] %v2767_v42 }
 0x17d   :  { %v1355_v0 = vadd.f32 %v1354_v18, %v2732_v60  ;;  %v698_v26 = vpop.f32.mrf.mxu2 }
 0x17e   :  { %v621_v31 = vpop.f32.mrf.mxu0 }
 0x17f   :  { %v622_v33 = vadd.f32 %v2221_v44, %v621_v31  ;;  %v862_v46 = vpop.f32.mrf.mxu3 }
 0x180   :  { %v2769_v48 = vadd.f32 %v862_v46, %v694_v40  ;;  %v699_v40 = vadd.f32 %v2221_v44, %v698_v26  ;;  %v1427_v46 = vmul.f32 %v788_v22, %v788_v22  ;;  %v1434_v26 = vmul.f32 %v2348_v5, %v2348_v5 }
 0x181   :  { %v791_v35 = vadd.f32 %v790_v43, %v622_v33  ;;  %v697_v33 = vadd.f32 %v2221_v44, %v696_v58 }
 0x182   :  { %v800_v28 = vpop.f32.mrf.mxu1  ;;  %937 = vst [vmem:[%s2961_s3 + $0x1c8] sm:$0xff] %v2769_v48 }
 0x183   :  { %908 = vst [vmem:[%s2961_s3 + $0xe0] sm:$0xff] %v791_v35  ;;  %v2774_v52 = vadd.f32 %v800_v28, %v632_v45  ;;  %v1356_v45 = vadd.f32 %v1355_v0, %v786_v62  ;;  %v1428_v60 = vmul.f32 %v791_v35, %v791_v35 }
 0x185   :  { %912 = vst [vmem:[%s2961_s3 + $0x100] sm:$0xff] %v2774_v52 }
 0x186   :  { %v623_v43 = vpop.f32.mrf.mxu0 }
 0x187   :  { %v624_v11 = vadd.f32 %v2221_v44, %v623_v43  ;;  %v865_v8 = vpop.f32.mrf.mxu3  ;;  %v1489_v43 = vadd.f32 %v1488_v14, %v1426_v39 }
 0x188   :  { %v2816_v28 = vadd.f32 %v865_v8, %v697_v33  ;;  %v701_v8 = vpop.f32.mrf.mxu2 }
 0x189   :  { %v793_v3 = vadd.f32 %v792_v38, %v624_v11  ;;  %v1357_v11 = vadd.f32 %v1356_v45, %v788_v22 }
 0x18a   :  { %v802_v19 = vpop.f32.mrf.mxu1  ;;  %938 = vst [vmem:[%s2961_s3 + $0x1d0] sm:$0xff] %v2816_v28 }
 0x18b   :  { %909 = vst [vmem:[%s2961_s3 + $0xe8] sm:$0xff] %v793_v3  ;;  %v803_v7 = vadd.f32 %v802_v19, %v634_v53  ;;  %v1358_v62 = vadd.f32 %v1357_v11, %v791_v35  ;;  %v1957_v53 = vld [vmem:[%s2960_s2] ss:$0 sm:$0xff] }
 0x18d   :  { %913 = vst [vmem:[%s2961_s3 + $0x108] sm:$0xff] %v803_v7  ;;  %v1359_v59 = vadd.f32 %v1358_v62, %v793_v3 }
 0x18e   :  { %v626_v38 = vpop.f32.mrf.mxu0 }
 0x18f   :  { %v627_v31 = vadd.f32 %v2221_v44, %v626_v38  ;;  %v867_v57 = vpop.f32.mrf.mxu3  ;;  %v1490_v44 = vadd.f32 %v1489_v43, %v1427_v46  ;;  %v1433_v38 = vmul.f32 %v803_v7, %v803_v7 }
 0x190   :  { %v2818_v23 = vadd.f32 %v867_v57, %v699_v40  ;;  %v703_v33 = vpop.f32.mrf.mxu2 }
 0x191   :  { %v796_v49 = vadd.f32 %v795_v15, %v627_v31  ;;  %v1429_v15 = vmul.f32 %v793_v3, %v793_v3  ;;  %v1491_v22 = vadd.f32 %v1490_v44, %v1428_v60  ;;  %v1432_v3 = vmul.f32 %v2774_v52, %v2774_v52 }
 0x192   :  { %939 = vst [vmem:[%s2961_s3 + $0x1d8] sm:$0xff] %v2818_v23  ;;  %v702_v31 = vadd.f32 %v1957_v53, %v701_v8  ;;  %v1440_v8 = vmul.f32 %v2510_v54, %v2510_v54 }
 0x193   :  { %910 = vst [vmem:[%s2961_s3 + $0xf0] sm:$0xff] %v796_v49  ;;  %v1430_v61 = vmul.f32 %v796_v49, %v796_v49  ;;  %v1492_v9 = vadd.f32 %v1491_v22, %v1429_v15  ;;  %v1360_v10 = vadd.f32 %v1359_v59, %v796_v49  ;;  %v1438_v15 = vmul.f32 %v2456_v16, %v2456_v16 }
 0x195   :  { %v1493_v20 = vadd.f32 %v1492_v9, %v1430_v61  ;;  %v1439_v61 = vmul.f32 %v2472_v25, %v2472_v25 }
 0x196   :  { %v628_v58 = vpop.f32.mrf.mxu0 }
 0x197   :  { %v629_v51 = vadd.f32 %v1957_v53, %v628_v58  ;;  %v870_v19 = vpop.f32.mrf.mxu3 }
 0x198   :  { %v2844_v45 = vadd.f32 %v870_v19, %v702_v31  ;;  %v1445_v31 = vmul.f32 %v2609_v56, %v2609_v56 }
 0x199   :  { %v798_v35 = vadd.f32 %v2757_v30, %v629_v51  ;;  %v704_v30 = vadd.f32 %v1957_v53, %v703_v33 }
 0x19a   :  { %940 = vst [vmem:[%s2961_s3 + $0x1e0] sm:$0xff] %v2844_v45 }
 0x19b   :  { %911 = vst [vmem:[%s2961_s3 + $0xf8] sm:$0xff] %v798_v35  ;;  %v1361_v21 = vadd.f32 %v1360_v10, %v798_v35  ;;  %v1431_v36 = vmul.f32 %v798_v35, %v798_v35  ;;  %v1441_v10 = vmul.f32 %v2526_v1, %v2526_v1 }
 0x19d   :  { %v1362_v18 = vadd.f32 %v1361_v21, %v2774_v52  ;;  %v1494_v13 = vadd.f32 %v1493_v20, %v1431_v36  ;;  %v1435_v52 = vmul.f32 %v2362_v12, %v2362_v12  ;;  %v1442_v36 = vmul.f32 %v2558_v29, %v2558_v29 }
 0x19f   :  { %v1363_v0 = vadd.f32 %v1362_v18, %v803_v7  ;;  %v1495_v39 = vadd.f32 %v1494_v13, %v1432_v3  ;;  %v872_v46 = vpop.f32.mrf.mxu3  ;;  %v706_v62 = vpop.f32.mrf.mxu2 }
 0x1a0   :  { %v2846_v49 = vadd.f32 %v872_v46, %v704_v30  ;;  %v707_v19 = vadd.f32 %v1957_v53, %v706_v62  ;;  %v1446_v30 = vmul.f32 %v2632_v34, %v2632_v34 }
 0x1a1   :  { %v1364_v14 = vadd.f32 %v1363_v0, %v2348_v5  ;;  %v1496_v40 = vadd.f32 %v1495_v39, %v1433_v38  ;;  %v1436_v5 = vmul.f32 %v2402_v41, %v2402_v41  ;;  %v1443_v38 = vmul.f32 %v2572_v37, %v2572_v37 }
 0x1a2   :  { %941 = vst [vmem:[%s2961_s3 + $0x1e8] sm:$0xff] %v2846_v49 }
 0x1a3   :  { %v1365_v7 = vadd.f32 %v1364_v14, %v2362_v12  ;;  %v1497_v57 = vadd.f32 %v1496_v40, %v1434_v26  ;;  %v1437_v12 = vmul.f32 %v2416_v50, %v2416_v50  ;;  %v1447_v40 = vmul.f32 %v2639_v24, %v2639_v24 }
 0x1a5   :  { %v1366_v43 = vadd.f32 %v1365_v7, %v2402_v41  ;;  %v1498_v11 = vadd.f32 %v1497_v57, %v1435_v52 }
 0x1a7   :  { %v1367_v60 = vadd.f32 %v1366_v43, %v2416_v50  ;;  %v1499_v44 = vadd.f32 %v1498_v11, %v1436_v5  ;;  %v875_v59 = vpop.f32.mrf.mxu3  ;;  %v708_v20 = vpop.f32.mrf.mxu2 }
 0x1a8   :  { %v709_v21 = vadd.f32 %v1957_v53, %v708_v20  ;;  %v2880_v18 = vadd.f32 %v875_v59, %v707_v19  ;;  %v1459_v20 = vmul.f32 %v2818_v23, %v2818_v23 }
 0x1a9   :  { %v1368_v58 = vadd.f32 %v1367_v60, %v2456_v16  ;;  %v1500_v22 = vadd.f32 %v1499_v44, %v1437_v12 }
 0x1aa   :  { %942 = vst [vmem:[%s2961_s3 + $0x1f0] sm:$0xff] %v2880_v18 }
 0x1ab   :  { %v1369_v41 = vadd.f32 %v1368_v58, %v2472_v25  ;;  %v1501_v51 = vadd.f32 %v1500_v22, %v1438_v15 }
 0x1ad   :  { %v1370_v50 = vadd.f32 %v1369_v41, %v2510_v54  ;;  %v1502_v9 = vadd.f32 %v1501_v51, %v1439_v61 }
 0x1af   :  { %v1371_v35 = vadd.f32 %v1370_v50, %v2526_v1  ;;  %v1503_v16 = vadd.f32 %v1502_v9, %v1440_v8  ;;  %v877_v13 = vpop.f32.mrf.mxu3  ;;  %v1456_v8 = vmul.f32 %v2767_v42, %v2767_v42 }
 0x1b0   :  { %v2882_v54 = vadd.f32 %v877_v13, %v709_v21 }
 0x1b1   :  { %v1372_v25 = vadd.f32 %v1371_v35, %v2558_v29  ;;  %v1504_v3 = vadd.f32 %v1503_v16, %v1441_v10  ;;  %v1444_v29 = vmul.f32 %v2595_v63, %v2595_v63  ;;  %v1457_v10 = vmul.f32 %v2769_v48, %v2769_v48 }
 0x1b2   :  { %943 = vst [vmem:[%s2961_s3 + $0x1f8] sm:$0xff] %v2882_v54  ;;  %v1458_v16 = vmul.f32 %v2816_v28, %v2816_v28 }
 0x1b3   :  { %v1505_v0 = vadd.f32 %v1504_v3, %v1442_v36  ;;  %v1373_v1 = vadd.f32 %v1372_v25, %v2572_v37  ;;  %v1460_v36 = vmul.f32 %v2844_v45, %v2844_v45  ;;  %v1461_v3 = vmul.f32 %v2846_v49, %v2846_v49 }
 0x1b5   :  { %v1374_v53 = vadd.f32 %v1373_v1, %v2595_v63  ;;  %v1506_v39 = vadd.f32 %v1505_v0, %v1443_v38  ;;  %v1448_v63 = vmul.f32 %v2654_v2, %v2654_v2  ;;  %v1462_v38 = vmul.f32 %v2880_v18, %v2880_v18 }
 0x1b6   :  { %v1463_v1 = vmul.f32 %v2882_v54, %v2882_v54 }
 0x1b7   :  { %v1375_v37 = vadd.f32 %v1374_v53, %v2609_v56  ;;  %v1507_v33 = vadd.f32 %v1506_v39, %v1444_v29  ;;  %v1449_v56 = vmul.f32 %v2661_v4, %v2661_v4 }
 0x1b9   :  { %v1376_v26 = vadd.f32 %v1375_v37, %v2632_v34  ;;  %v1508_v14 = vadd.f32 %v1507_v33, %v1445_v31  ;;  %v1450_v34 = vmul.f32 %v2684_v27, %v2684_v27  ;;  %v945_v31 = vlaneseq }
 0x1bb   :  { %v1377_v46 = vadd.f32 %v1376_v26, %v2639_v24  ;;  %v1509_v52 = vadd.f32 %v1508_v14, %v1446_v30  ;;  %v1451_v24 = vmul.f32 %v2693_v32, %v2693_v32  ;;  %v946_v26 = vshrl.u32 %v945_v31, 7 }
 0x1bd   :  { %v1378_v7 = vadd.f32 %v1377_v46, %v2654_v2  ;;  %v1510_v57 = vadd.f32 %v1509_v52, %v1447_v40  ;;  %v1452_v2 = vmul.f32 %v2712_v47, %v2712_v47  ;;  %vm1534_vm1 = vcmp.eq.s32.totalorder %v946_v26, 1 }
 0x1be   :  { %vm1533_vm2 = vcmp.eq.s32.totalorder %v946_v26, 0 }
 0x1bf   :  { %v1379_v5 = vadd.f32 %v1378_v7, %v2661_v4  ;;  %v1511_v43 = vadd.f32 %v1510_v57, %v1448_v63  ;;  %v1453_v4 = vmul.f32 %v2721_v55, %v2721_v55 }
 0x1c1   :  { %v1380_v11 = vadd.f32 %v1379_v5, %v2684_v27  ;;  %v1512_v12 = vadd.f32 %v1511_v43, %v1449_v56  ;;  %v1454_v27 = vmul.f32 %v2740_v6, %v2740_v6 }
 0x1c3   :  { %v1381_v60 = vadd.f32 %v1380_v11, %v2693_v32  ;;  %v1513_v44 = vadd.f32 %v1512_v12, %v1450_v34  ;;  %v1455_v32 = vmul.f32 %v2747_v17, %v2747_v17 }
 0x1c5   :  { %v1382_v62 = vadd.f32 %v1381_v60, %v2712_v47  ;;  %v1514_v15 = vadd.f32 %v1513_v44, %v1451_v24 }
 0x1c7   :  { %v1383_v58 = vadd.f32 %v1382_v62, %v2721_v55  ;;  %v1515_v22 = vadd.f32 %v1514_v15, %v1452_v2 }
 0x1c9   :  { %v1384_v59 = vadd.f32 %v1383_v58, %v2740_v6  ;;  %v1516_v61 = vadd.f32 %v1515_v22, %v1453_v4 }
 0x1cb   :  { %v1385_v41 = vadd.f32 %v1384_v59, %v2747_v17  ;;  %v1517_v51 = vadd.f32 %v1516_v61, %v1454_v27 }
 0x1cd   :  { %v1386_v47 = vadd.f32 %v1385_v41, %v2767_v42  ;;  %v1518_v50 = vadd.f32 %v1517_v51, %v1455_v32 }
 0x1cf   :  { %v1519_v55 = vadd.f32 %v1518_v50, %v1456_v8  ;;  %v1387_v9 = vadd.f32 %v1386_v47, %v2769_v48 }
 0x1d1   :  { %v1520_v6 = vadd.f32 %v1519_v55, %v1457_v10  ;;  %v1388_v35 = vadd.f32 %v1387_v9, %v2816_v28 }
 0x1d3   :  { %v1521_v17 = vadd.f32 %v1520_v6, %v1458_v16  ;;  %v1389_v19 = vadd.f32 %v1388_v35, %v2818_v23 }
 0x1d5   :  { %v1522_v42 = vadd.f32 %v1521_v17, %v1459_v20  ;;  %v1390_v21 = vadd.f32 %v1389_v19, %v2844_v45 }
 0x1d7   :  { %v1523_v25 = vadd.f32 %v1522_v42, %v1460_v36  ;;  %v1391_v48 = vadd.f32 %v1390_v21, %v2846_v49 }
 0x1d9   :  { %v1524_v13 = vadd.f32 %v1523_v25, %v1461_v3  ;;  %v1392_v28 = vadd.f32 %v1391_v48, %v2880_v18 }
 0x1db   :  { %v1525_v0 = vadd.f32 %v1524_v13, %v1462_v38  ;;  %v1393_v23 = vadd.f32 %v1392_v28, %v2882_v54 }
 0x1dd   :  { %v1394_v29 = vrot.slane %v1393_v23, 4  ;;  %v1526_v45 = vadd.f32 %v1525_v0, %v1463_v1 }
 0x1df   :  { %v1395_v53 = vadd.f32 %v1394_v29, %v1393_v23  ;;  %v1527_v39 = vrot.slane %v1526_v45, 4 }
 0x1e1   :  { %v1396_v37 = vrot.slane %v1395_v53, 2  ;;  %v1528_v33 = vadd.f32 %v1527_v39, %v1526_v45 }
 0x1e3   :  { %v1397_v49 = vadd.f32 %v1396_v37, %v1395_v53  ;;  %v1529_v30 = vrot.slane %v1528_v33, 2 }
 0x1e5   :  { %v1530_v14 = vadd.f32 %v1529_v30, %v1528_v33  ;;  %v1398_v40 = vrot.slane %v1397_v49, 1 }
 0x1e7   :  { %v1531_v46 = vrot.slane %v1530_v14, 1  ;;  %v1399_v52 = vadd.f32 %v1398_v40, %v1397_v49 }
 0x1e9   :  { %v1532_v18 = vadd.f32 %v1531_v46, %v1530_v14 }
 0x1eb   :  { %v1537_v63 = vsel %vm1534_vm1, %v1532_v18, 0.0 }
 0x1ec   :  { %v1540_v7 = vsel %vm1533_vm2, %v1399_v52, %v1537_v63 }
 0x1ed   :  { %1541 = vst [vmem:[%s2962_s4] sm:$0xff] %v1540_v7 }

// kernel: resnet_generator_forward.37
= control target key start
LH: loop header
LB: loop body
LE: loop exit
PB: predicated region body
PF: predicated region fallthrough
CT: control target
= control target key end

     0   :  { %vm1051_vm0 = vcmask 1043456   ;;  %vm954_vm1 = vcmask 64512   ;;  %s4626_s0 = inlined_call_operand.vmem [shape: bf16[512,392], index: 0, kind: input, shape index: {}]   ;;  %s4627_s1 = inlined_call_operand.vmem [shape: bf16[392,128], index: 1, kind: input, shape index: {}]   ;;  %s4628_s2 = inlined_call_operand.vmem [shape: f32[1,128], index: 2, kind: input, shape index: {}]   ;;  %s4629_s3 = inlined_call_operand.vmem [shape: f32[512,128], index: 3, kind: output, shape index: {0}]   ;;  %s4630_s4 = inlined_call_operand.hbm [shape: f32[8,128], index: 4, kind: output, shape index: {1}]  }
   0x1   :  { %v3252_v0 = vld [vmem:[%s4627_s1 + $0x38] sm:$0xff]  ;;  %v3251_v3 = vld [vmem:[%s4627_s1 + $0x30] sm:$0xff]  ;;  %v3250_v6 = vld [vmem:[%s4627_s1 + $0x28] sm:$0xff] }
   0x2   :  { %v3260_v1 = vld [vmem:[%s4627_s1 + $0x78] sm:$0xff]  ;;  %1055 = vmatpush.bf16.msra.mxu0 %v3252_v0  ;;  %v3259_v4 = vld [vmem:[%s4627_s1 + $0x70] sm:$0xff]  ;;  %v3258_v7 = vld [vmem:[%s4627_s1 + $0x68] sm:$0xff] }
   0x3   :  { %v3268_v2 = vld [vmem:[%s4627_s1 + $0xb8] sm:$0xff]  ;;  %1224 = vmatpush.bf16.msra.mxu1 %v3260_v1  ;;  %v3267_v5 = vld [vmem:[%s4627_s1 + $0xb0] sm:$0xff]  ;;  %v194_v8 = vld [vmem:[%s4627_s1 + $0xc0] sm:$0xf] }
   0x4   :  { %1393 = vmatpush.bf16.msra.mxu2 %v3268_v2  ;;  %v3266_v9 = vld [vmem:[%s4627_s1 + $0xa8] sm:$0xff]  ;;  %v904_v10 = vunpack.c.l.b16 %v194_v8  ;;  %v2489_v12 = vld [vmem:[%s4626_s0 + $0x18] sm:$0xf0]  ;;  %v3249_v14 = vld [vmem:[%s4627_s1 + $0x20] sm:$0xff] }
   0x5   :  { %v3118_v11 = vld [vmem:[%s4626_s0 + $0xc] sm:$0xf]  ;;  %v3257_v15 = vld [vmem:[%s4627_s1 + $0x60] sm:$0xff] }
   0x6   :  { %1056 = vmatpush.bf16.msra.mxu0 %v3251_v3  ;;  %v929_v13 = vpack.c.b16 %v904_v10, %v904_v10  ;;  %v3265_v16 = vld [vmem:[%s4627_s1 + $0xa0] sm:$0xff]  ;;  %v2492_v18 = vor.u32 %v3118_v11, %v2489_v12 }
   0x7   :  { %1225 = vmatpush.bf16.msra.mxu1 %v3259_v4 }
   0x8   :  { %1394 = vmatpush.bf16.msra.mxu2 %v3267_v5  ;;  %v1053_v17 = vsel %vm1051_vm0, %v929_v13, 0 }
   0x9   :  { %1569 = vmatpush.bf16.msra.mxu3 %v1053_v17 }
   0xa   :  { %1057 = vmatpush.bf16.msra.mxu0 %v3250_v6 }
   0xb   :  { %1226 = vmatpush.bf16.msra.mxu1 %v3258_v7 }
   0xc   :  { %1395 = vmatpush.bf16.msra.mxu2 %v3266_v9 }
   0xd   :  { %10 = vsyncpa [#allocation3], 0  ;;  %v3248_v19 = vld [vmem:[%s4627_s1 + $0x18] sm:$0xff]  ;;  %3085 = vmatmul.msk.bf16.vlgmr.msra.gmra.mxu3 %vm954_vm1, %v2492_v18  ;;  %v3247_v22 = vld [vmem:[%s4627_s1 + $0x10] sm:$0xff]  ;;  %s3427_s7 = smov [#allocation2]   ;;  %s2466_s10 = sshll.u32 %s4630_s4, 4  ;;  %s2467_s10 = int_to_ptr.hbm [resolvable:$true] %s2466_s10 }
   0xe   :  { %1058 = vmatpush.bf16.msra.mxu0 %v3249_v14  ;;  %v3256_v20 = vld [vmem:[%s4627_s1 + $0x58] sm:$0xff]  ;;  %v3255_v23 = vld [vmem:[%s4627_s1 + $0x50] sm:$0xff]  ;;  %v3246_v25 = vld [vmem:[%s4627_s1 + $0x8] sm:$0xff]  ;;  %s2464_s8 = sshll.u32 %s3427_s7, 4  ;;  %s2465_s8 = int_to_ptr.vmem [resolvable:$true] %s2464_s8 }
   0xf   :  { %1227 = vmatpush.bf16.msra.mxu1 %v3257_v15  ;;  %v3264_v21 = vld [vmem:[%s4627_s1 + $0x98] sm:$0xff]  ;;  %v3263_v24 = vld [vmem:[%s4627_s1 + $0x90] sm:$0xff]  ;;  %v3254_v26 = vld [vmem:[%s4627_s1 + $0x48] sm:$0xff] }
  0x10   :  { %1396 = vmatpush.bf16.msra.mxu2 %v3265_v16  ;;  %v3262_v27 = vld [vmem:[%s4627_s1 + $0x88] sm:$0xff]  ;;  %v2505_v29 = vld [vmem:[%s4626_s0 + $0x38] sm:$0xf0]  ;;  %v3245_v30 = vld [vmem:[%s4627_s1] sm:$0xff] }
  0x11   :  { %v3122_v28 = vld [vmem:[%s4626_s0 + $0x2c] sm:$0xf]  ;;  %v3253_v31 = vld [vmem:[%s4627_s1 + $0x40] sm:$0xff]  ;;  %v3119_v33 = vld [vmem:[%s4626_s0 + $0xc] sm:$0xf0] }
  0x12   :  { %1059 = vmatpush.bf16.msra.mxu0 %v3248_v19  ;;  %v2479_v32 = vld [vmem:[%s4626_s0] sm:$0xf]  ;;  %v3117_v34 = vld [vmem:[%s4626_s0 + $0x4] sm:$0xf]  ;;  %v2481_v35 = vld [vmem:[%s4626_s0 + $0x10] sm:$0xf0]  ;;  %v2508_v39 = vor.u32 %v3122_v28, %v2505_v29 }
  0x13   :  { %1228 = vmatpush.bf16.msra.mxu1 %v3256_v20  ;;  %v3261_v36 = vld [vmem:[%s4627_s1 + $0x80] sm:$0xff]  ;;  %v2487_v37 = vld [vmem:[%s4626_s0 + $0x8] sm:$0xf]  ;;  %v3120_v38 = vld [vmem:[%s4626_s0 + $0x14] sm:$0xf0]  ;;  %v2480_v40 = vor.u32 %v3119_v33, %v2479_v32  ;;  %v2484_v41 = vor.u32 %v3117_v34, %v2481_v35 }
  0x14   :  { %1397 = vmatpush.bf16.msra.mxu2 %v3264_v21  ;;  %v2488_v42 = vor.u32 %v3120_v38, %v2487_v37  ;;  %v3126_v43 = vld [vmem:[%s4626_s0 + $0x4c] sm:$0xf]  ;;  %v2521_v44 = vld [vmem:[%s4626_s0 + $0x58] sm:$0xf0]  ;;  %v2495_v45 = vld [vmem:[%s4626_s0 + $0x20] sm:$0xf] }
  0x15   :  { %v3123_v46 = vld [vmem:[%s4626_s0 + $0x2c] sm:$0xf0]  ;;  %v3121_v47 = vld [vmem:[%s4626_s0 + $0x24] sm:$0xf]  ;;  %v2497_v48 = vld [vmem:[%s4626_s0 + $0x30] sm:$0xf0]  ;;  %v2524_v51 = vor.u32 %v3126_v43, %v2521_v44 }
  0x16   :  { %1060 = vmatpush.bf16.msra.mxu0 %v3247_v22  ;;  %v2503_v49 = vld [vmem:[%s4626_s0 + $0x28] sm:$0xf]  ;;  %v3124_v50 = vld [vmem:[%s4626_s0 + $0x34] sm:$0xf0]  ;;  %v2496_v52 = vor.u32 %v3123_v46, %v2495_v45  ;;  %v2500_v53 = vor.u32 %v3121_v47, %v2497_v48  ;;  %v3130_v55 = vld [vmem:[%s4626_s0 + $0x6c] sm:$0xf] }
  0x17   :  { %1229 = vmatpush.bf16.msra.mxu1 %v3255_v23  ;;  %v2504_v54 = vor.u32 %v3124_v50, %v2503_v49  ;;  %v2537_v56 = vld [vmem:[%s4626_s0 + $0x78] sm:$0xf0]  ;;  %v2511_v57 = vld [vmem:[%s4626_s0 + $0x40] sm:$0xf]  ;;  %v3127_v58 = vld [vmem:[%s4626_s0 + $0x4c] sm:$0xf0] }
  0x18   :  { %1398 = vmatpush.bf16.msra.mxu2 %v3263_v24  ;;  %v3125_v59 = vld [vmem:[%s4626_s0 + $0x44] sm:$0xf]  ;;  %v2513_v60 = vld [vmem:[%s4626_s0 + $0x50] sm:$0xf0]  ;;  %v2519_v61 = vld [vmem:[%s4626_s0 + $0x48] sm:$0xf]  ;;  %v2540_v63 = vor.u32 %v3130_v55, %v2537_v56  ;;  %v2512_v0 = vor.u32 %v3127_v58, %v2511_v57 }
  0x19   :  { %v3128_v62 = vld [vmem:[%s4626_s0 + $0x54] sm:$0xf0]  ;;  %v2516_v1 = vor.u32 %v3125_v59, %v2513_v60  ;;  %v3134_v3 = vld [vmem:[%s4626_s0 + $0x8c] sm:$0xf]  ;;  %v2553_v4 = vld [vmem:[%s4626_s0 + $0x98] sm:$0xf0] }
  0x1a   :  { %1061 = vmatpush.bf16.msra.mxu0 %v3246_v25  ;;  %v2520_v2 = vor.u32 %v3128_v62, %v2519_v61  ;;  %v2527_v5 = vld [vmem:[%s4626_s0 + $0x60] sm:$0xf]  ;;  %v3131_v6 = vld [vmem:[%s4626_s0 + $0x6c] sm:$0xf0]  ;;  %v3129_v7 = vld [vmem:[%s4626_s0 + $0x64] sm:$0xf]  ;;  %v2556_v11 = vor.u32 %v3134_v3, %v2553_v4 }
  0x1b   :  { %1230 = vmatpush.bf16.msra.mxu1 %v3254_v26  ;;  %v2529_v8 = vld [vmem:[%s4626_s0 + $0x70] sm:$0xf0]  ;;  %v2535_v9 = vld [vmem:[%s4626_s0 + $0x68] sm:$0xf]  ;;  %v3132_v10 = vld [vmem:[%s4626_s0 + $0x74] sm:$0xf0]  ;;  %v2528_v12 = vor.u32 %v3131_v6, %v2527_v5 }
  0x1c   :  { %1399 = vmatpush.bf16.msra.mxu2 %v3262_v27  ;;  %v2532_v13 = vor.u32 %v3129_v7, %v2529_v8  ;;  %v2536_v14 = vor.u32 %v3132_v10, %v2535_v9  ;;  %v3138_v15 = vld [vmem:[%s4626_s0 + $0xac] sm:$0xf]  ;;  %v2569_v16 = vld [vmem:[%s4626_s0 + $0xb8] sm:$0xf0]  ;;  %v2543_v17 = vld [vmem:[%s4626_s0 + $0x80] sm:$0xf] }
  0x1d   :  { %3086 = vmatmul.msk.bf16.gmra.mxu3 %vm954_vm1, %v2508_v39  ;;  %v3135_v18 = vld [vmem:[%s4626_s0 + $0x8c] sm:$0xf0]  ;;  %v3133_v19 = vld [vmem:[%s4626_s0 + $0x84] sm:$0xf]  ;;  %v2545_v20 = vld [vmem:[%s4626_s0 + $0x90] sm:$0xf0]  ;;  %v2572_v23 = vor.u32 %v3138_v15, %v2569_v16 }
  0x1e   :  { %1062 = vmatpush.bf16.msra.mxu0 %v3245_v30  ;;  %v2551_v21 = vld [vmem:[%s4626_s0 + $0x88] sm:$0xf]  ;;  %v3136_v22 = vld [vmem:[%s4626_s0 + $0x94] sm:$0xf0]  ;;  %v2544_v24 = vor.u32 %v3135_v18, %v2543_v17  ;;  %v2548_v25 = vor.u32 %v3133_v19, %v2545_v20  ;;  %v3142_v27 = vld [vmem:[%s4626_s0 + $0xcc] sm:$0xf] }
  0x1f   :  { %1231 = vmatpush.bf16.msra.mxu1 %v3253_v31  ;;  %v2552_v26 = vor.u32 %v3136_v22, %v2551_v21  ;;  %v2585_v28 = vld [vmem:[%s4626_s0 + $0xd8] sm:$0xf0]  ;;  %v2559_v29 = vld [vmem:[%s4626_s0 + $0xa0] sm:$0xf]  ;;  %v3139_v30 = vld [vmem:[%s4626_s0 + $0xac] sm:$0xf0] }
  0x20   :  { %1400 = vmatpush.bf16.msra.mxu2 %v3261_v36  ;;  %v3137_v31 = vld [vmem:[%s4626_s0 + $0xa4] sm:$0xf]  ;;  %v2561_v32 = vld [vmem:[%s4626_s0 + $0xb0] sm:$0xf0]  ;;  %v2567_v33 = vld [vmem:[%s4626_s0 + $0xa8] sm:$0xf]  ;;  %v2588_v35 = vor.u32 %v3142_v27, %v2585_v28  ;;  %v2560_v36 = vor.u32 %v3139_v30, %v2559_v29 }
  0x21   :  { %1063 = vmatmul.bf16.vlgmr.msra.gmra.mxu0 %v2480_v40  ;;  %v3140_v34 = vld [vmem:[%s4626_s0 + $0xb4] sm:$0xf0]  ;;  %v2564_v37 = vor.u32 %v3137_v31, %v2561_v32  ;;  %v3146_v39 = vld [vmem:[%s4626_s0 + $0xec] sm:$0xf]  ;;  %v2601_v40 = vld [vmem:[%s4626_s0 + $0xf8] sm:$0xf0] }
  0x22   :  { %1232 = vmatmul.bf16.vlgmr.msra.gmra.mxu1 %v2484_v41  ;;  %v2568_v38 = vor.u32 %v3140_v34, %v2567_v33  ;;  %v2575_v41 = vld [vmem:[%s4626_s0 + $0xc0] sm:$0xf]  ;;  %v3141_v43 = vld [vmem:[%s4626_s0 + $0xc4] sm:$0xf]  ;;  %v2577_v44 = vld [vmem:[%s4626_s0 + $0xd0] sm:$0xf0]  ;;  %v2604_v47 = vor.u32 %v3146_v39, %v2601_v40 }
  0x23   :  { %1401 = vmatmul.bf16.vlgmr.msra.gmra.mxu2 %v2488_v42  ;;  %v3143_v42 = vld [vmem:[%s4626_s0 + $0xcc] sm:$0xf0]  ;;  %v2583_v45 = vld [vmem:[%s4626_s0 + $0xc8] sm:$0xf]  ;;  %v3144_v46 = vld [vmem:[%s4626_s0 + $0xd4] sm:$0xf0]  ;;  %v2580_v49 = vor.u32 %v3141_v43, %v2577_v44 }
  0x24   :  { %v2576_v48 = vor.u32 %v3143_v42, %v2575_v41  ;;  %v2584_v50 = vor.u32 %v3144_v46, %v2583_v45  ;;  %v3145_v55 = vld [vmem:[%s4626_s0 + $0xe4] sm:$0xf]  ;;  %v2593_v56 = vld [vmem:[%s4626_s0 + $0xf0] sm:$0xf0]  ;;  %v2599_v57 = vld [vmem:[%s4626_s0 + $0xe8] sm:$0xf] }
  0x25   :  { %v3148_v58 = vld [vmem:[%s4626_s0 + $0xf4] sm:$0xf0]  ;;  %v2596_v61 = vor.u32 %v3145_v55, %v2593_v56  ;;  %v3151_v3 = vld [vmem:[%s4626_s0 + $0x10c] sm:$0xf0]  ;;  %v3149_v4 = vld [vmem:[%s4626_s0 + $0x104] sm:$0xf] }
  0x26   :  { %v2600_v62 = vor.u32 %v3148_v58, %v2599_v57  ;;  %v2609_v5 = vld [vmem:[%s4626_s0 + $0x110] sm:$0xf0]  ;;  %v3756_v7 = vld [vmem:[%s4628_s2] ss:$0 sm:$0xff]  ;;  %v2615_v8 = vld [vmem:[%s4626_s0 + $0x108] sm:$0xf] }
  0x27   :  { %v3152_v9 = vld [vmem:[%s4626_s0 + $0x114] sm:$0xf0]  ;;  %v2623_v27 = vld [vmem:[%s4626_s0 + $0x120] sm:$0xf]  ;;  %v3155_v28 = vld [vmem:[%s4626_s0 + $0x12c] sm:$0xf0] }
  0x28   :  { %v2616_v15 = vor.u32 %v3152_v9, %v2615_v8  ;;  %v3153_v29 = vld [vmem:[%s4626_s0 + $0x124] sm:$0xf]  ;;  %v2625_v30 = vld [vmem:[%s4626_s0 + $0x130] sm:$0xf0]  ;;  %v2631_v32 = vld [vmem:[%s4626_s0 + $0x128] sm:$0xf] }
  0x29   :  { %v3156_v33 = vld [vmem:[%s4626_s0 + $0x134] sm:$0xf0]  ;;  %v3162_v55 = vld [vmem:[%s4626_s0 + $0x16c] sm:$0xf]  ;;  %v2665_v56 = vld [vmem:[%s4626_s0 + $0x178] sm:$0xf0] }
  0x2a   :  { %v2632_v42 = vor.u32 %v3156_v33, %v2631_v32  ;;  %v2655_v33 = vld [vmem:[%s4626_s0 + $0x160] sm:$0xf] }
  0x2d   :  { %3087 = vmatmul.msk.bf16.gmra.mxu3 %vm954_vm1, %v2524_v51  ;;  %v3150_v51 = vld [vmem:[%s4626_s0 + $0x10c] sm:$0xf] }
  0x31   :  { %1068 = vmatmul.bf16.gmra.mxu0 %v2496_v52  ;;  %v2617_v52 = vld [vmem:[%s4626_s0 + $0x118] sm:$0xf0] }
  0x32   :  { %1237 = vmatmul.bf16.gmra.mxu1 %v2500_v53  ;;  %v2591_v53 = vld [vmem:[%s4626_s0 + $0xe0] sm:$0xf]  ;;  %v2620_v59 = vor.u32 %v3150_v51, %v2617_v52 }
  0x33   :  { %1406 = vmatmul.bf16.gmra.mxu2 %v2504_v54  ;;  %v3147_v54 = vld [vmem:[%s4626_s0 + $0xec] sm:$0xf0] }
  0x34   :  { %v2592_v60 = vor.u32 %v3147_v54, %v2591_v53 }
  0x3d   :  { %3088 = vmatmul.msk.bf16.gmra.mxu3 %vm954_vm1, %v2540_v63 }
  0x41   :  { %1073 = vmatmul.bf16.gmra.mxu0 %v2512_v0  ;;  %v3154_v0 = vld [vmem:[%s4626_s0 + $0x12c] sm:$0xf] }
  0x42   :  { %1242 = vmatmul.bf16.gmra.mxu1 %v2516_v1  ;;  %v2633_v1 = vld [vmem:[%s4626_s0 + $0x138] sm:$0xf0] }
  0x43   :  { %1411 = vmatmul.bf16.gmra.mxu2 %v2520_v2  ;;  %v2607_v2 = vld [vmem:[%s4626_s0 + $0x100] sm:$0xf]  ;;  %v2636_v10 = vor.u32 %v3154_v0, %v2633_v1 }
  0x4d   :  { %3089 = vmatmul.msk.bf16.gmra.mxu3 %vm954_vm1, %v2556_v11  ;;  %v2608_v11 = vor.u32 %v3151_v3, %v2607_v2  ;;  %v2647_v2 = vld [vmem:[%s4626_s0 + $0x148] sm:$0xf]  ;;  %v3160_v3 = vld [vmem:[%s4626_s0 + $0x154] sm:$0xf0] }
  0x51   :  { %1078 = vmatmul.bf16.gmra.mxu0 %v2528_v12  ;;  %v2612_v12 = vor.u32 %v3149_v4, %v2609_v5  ;;  %v2668_v4 = vor.u32 %v3162_v55, %v2665_v56 }
  0x52   :  { %1247 = vmatmul.bf16.gmra.mxu1 %v2532_v13 }
  0x53   :  { %1416 = vmatmul.bf16.gmra.mxu2 %v2536_v14 }
  0x5d   :  { %3090 = vmatmul.msk.bf16.gmra.mxu3 %vm954_vm1, %v2572_v23 }
  0x61   :  { %1083 = vmatmul.bf16.gmra.mxu0 %v2544_v24 }
  0x62   :  { %1252 = vmatmul.bf16.gmra.mxu1 %v2548_v25  ;;  %v3158_v25 = vld [vmem:[%s4626_s0 + $0x14c] sm:$0xf] }
  0x63   :  { %1421 = vmatmul.bf16.gmra.mxu2 %v2552_v26  ;;  %v2649_v26 = vld [vmem:[%s4626_s0 + $0x158] sm:$0xf0] }
  0x64   :  { %v2652_v34 = vor.u32 %v3158_v25, %v2649_v26 }
  0x6d   :  { %3091 = vmatmul.msk.bf16.gmra.mxu3 %vm954_vm1, %v2588_v35 }
  0x71   :  { %1088 = vmatmul.bf16.gmra.mxu0 %v2560_v36 }
  0x72   :  { %1257 = vmatmul.bf16.gmra.mxu1 %v2564_v37  ;;  %v2624_v37 = vor.u32 %v3155_v28, %v2623_v27 }
  0x73   :  { %1426 = vmatmul.bf16.gmra.mxu2 %v2568_v38  ;;  %v2628_v38 = vor.u32 %v3153_v29, %v2625_v30  ;;  %v3166_v29 = vld [vmem:[%s4626_s0 + $0x18c] sm:$0xf]  ;;  %v2681_v30 = vld [vmem:[%s4626_s0 + $0x198] sm:$0xf0] }
  0x7d   :  { %3092 = vmatmul.msk.bf16.gmra.mxu3 %vm954_vm1, %v2604_v47 }
  0x81   :  { %1093 = vmatmul.bf16.gmra.mxu0 %v2576_v48 }
  0x82   :  { %1262 = vmatmul.bf16.gmra.mxu1 %v2580_v49 }
  0x83   :  { %1431 = vmatmul.bf16.gmra.mxu2 %v2584_v50 }
  0x8d   :  { %3093 = vmatmul.msk.bf16.gmra.mxu3 %vm954_vm1, %v2620_v59 }
  0x90   :  { %v1571_v63 = vpop.f32.mrf.mxu3 }
  0x91   :  { %1098 = vmatmul.bf16.gmra.mxu0 %v2592_v60  ;;  %v2639_v60 = vld [vmem:[%s4626_s0 + $0x140] sm:$0xf] }
  0x92   :  { %1267 = vmatmul.bf16.gmra.mxu1 %v2596_v61  ;;  %v3159_v61 = vld [vmem:[%s4626_s0 + $0x14c] sm:$0xf0] }
  0x93   :  { %1436 = vmatmul.bf16.gmra.mxu2 %v2600_v62  ;;  %v3157_v62 = vld [vmem:[%s4626_s0 + $0x144] sm:$0xf]  ;;  %v2640_v8 = vor.u32 %v3159_v61, %v2639_v60 }
  0x98   :  { %v1573_v6 = vpop.f32.mrf.mxu3 }
  0x9d   :  { %3094 = vmatmul.msk.bf16.gmra.mxu3 %vm954_vm1, %v2636_v10 }
  0x9e   :  { %v1064_v13 = vpop.f32.mrf.mxu0 }
  0x9f   :  { %v1233_v14 = vpop.f32.mrf.mxu1  ;;  %v1065_v16 = vadd.f32 %v3756_v7, %v1064_v13  ;;  %v2648_v13 = vor.u32 %v3160_v3, %v2647_v2  ;;  %v2697_v2 = vld [vmem:[%s4626_s0 + $0x1b8] sm:$0xf0] }
  0xa0   :  { %v1576_v18 = vpop.f32.mrf.mxu3 }
  0xa1   :  { %1103 = vmatmul.bf16.gmra.mxu0 %v2608_v11  ;;  %v1234_v17 = vadd.f32 %v1233_v14, %v1065_v16 }
  0xa2   :  { %1272 = vmatmul.bf16.gmra.mxu1 %v2612_v12 }
  0xa3   :  { %1441 = vmatmul.bf16.gmra.mxu2 %v2616_v15 }
  0xa6   :  { %v1402_v19 = vpop.f32.mrf.mxu2  ;;  %v1066_v21 = vpop.f32.mrf.mxu0 }
  0xa7   :  { %v1403_v20 = vadd.f32 %v1402_v19, %v1234_v17  ;;  %v1235_v22 = vpop.f32.mrf.mxu1  ;;  %v1067_v24 = vadd.f32 %v3756_v7, %v1066_v21 }
  0xa8   :  { %v1578_v31 = vpop.f32.mrf.mxu3 }
  0xa9   :  { %v1572_v23 = vadd.f32 %v1571_v63, %v1403_v20  ;;  %v1236_v35 = vadd.f32 %v1235_v22, %v1067_v24  ;;  %v2641_v63 = vld [vmem:[%s4626_s0 + $0x150] sm:$0xf0] }
  0xaa   :  { %v2644_v9 = vor.u32 %v3157_v62, %v2641_v63 }
  0xab   :  { %3271 = vtanh.f32 %v1572_v23 }
  0xad   :  { %3095 = vmatmul.msk.bf16.gmra.mxu3 %vm954_vm1, %v2652_v34  ;;  %v3163_v34 = vld [vmem:[%s4626_s0 + $0x16c] sm:$0xf0] }
  0xae   :  { %v1404_v36 = vpop.f32.mrf.mxu2  ;;  %v1069_v40 = vpop.f32.mrf.mxu0 }
  0xaf   :  { %v1405_v39 = vadd.f32 %v1404_v36, %v1236_v35  ;;  %v1238_v41 = vpop.f32.mrf.mxu1  ;;  %v1070_v43 = vadd.f32 %v3756_v7, %v1069_v40  ;;  %v3161_v35 = vld [vmem:[%s4626_s0 + $0x164] sm:$0xf]  ;;  %v2657_v36 = vld [vmem:[%s4626_s0 + $0x170] sm:$0xf0]  ;;  %v3164_v40 = vld [vmem:[%s4626_s0 + $0x174] sm:$0xf0] }
  0xb0   :  { %v1581_v47 = vpop.f32.mrf.mxu3 }
  0xb1   :  { %v3272_v44 = vpop.eup %3271  ;;  %v1574_v45 = vadd.f32 %v1573_v6, %v1405_v39  ;;  %1108 = vmatmul.bf16.gmra.mxu0 %v2624_v37  ;;  %v1239_v46 = vadd.f32 %v1238_v41, %v1070_v43  ;;  %v2663_v39 = vld [vmem:[%s4626_s0 + $0x168] sm:$0xf]  ;;  %v2684_v41 = vor.u32 %v3166_v29, %v2681_v30 }
  0xb2   :  { %1795 = vst [vmem:[%s4629_s3] sm:$0xff] %v3272_v44  ;;  %1277 = vmatmul.bf16.gmra.mxu1 %v2628_v38  ;;  %v2315_v57 = vmul.f32 %v3272_v44, %v3272_v44 }
  0xb3   :  { %3273 = vtanh.f32 %v1574_v45  ;;  %1446 = vmatmul.bf16.gmra.mxu2 %v2632_v42  ;;  %v2660_v45 = vor.u32 %v3161_v35, %v2657_v36 }
  0xb6   :  { %v1407_v48 = vpop.f32.mrf.mxu2  ;;  %v1071_v50 = vpop.f32.mrf.mxu0 }
  0xb7   :  { %v1408_v49 = vadd.f32 %v1407_v48, %v1239_v46  ;;  %v1240_v51 = vpop.f32.mrf.mxu1  ;;  %v1072_v54 = vadd.f32 %v3756_v7, %v1071_v50 }
  0xb8   :  { %v1583_v0 = vpop.f32.mrf.mxu3 }
  0xb9   :  { %v3274_v52 = vpop.eup %3273  ;;  %v1577_v53 = vadd.f32 %v1576_v18, %v1408_v49  ;;  %v1241_v5 = vadd.f32 %v1240_v51, %v1072_v54  ;;  %v2664_v49 = vor.u32 %v3164_v40, %v2663_v39  ;;  %v2713_v39 = vld [vmem:[%s4626_s0 + $0x1d8] sm:$0xf0] }
  0xba   :  { %1796 = vst [vmem:[%s4629_s3 + $0x8] sm:$0xff] %v3274_v52  ;;  %v2246_v58 = vadd.f32 %v3274_v52, %v3272_v44  ;;  %v2316_v59 = vmul.f32 %v3274_v52, %v3274_v52  ;;  %v2656_v44 = vor.u32 %v3163_v34, %v2655_v33 }
  0xbb   :  { %3275 = vtanh.f32 %v1577_v53 }
  0xbc   :  { %v2379_v1 = vadd.f32 %v2316_v59, %v2315_v57 }
  0xbd   :  { %3096 = vmatmul.msk.bf16.gmra.mxu3 %vm954_vm1, %v2668_v4 }
  0xbe   :  { %v1409_v6 = vpop.f32.mrf.mxu2  ;;  %v1074_v11 = vpop.f32.mrf.mxu0 }
  0xbf   :  { %v1410_v10 = vadd.f32 %v1409_v6, %v1241_v5  ;;  %v1243_v12 = vpop.f32.mrf.mxu1  ;;  %v1075_v14 = vadd.f32 %v3756_v7, %v1074_v11  ;;  %v2671_v5 = vld [vmem:[%s4626_s0 + $0x180] sm:$0xf]  ;;  %v3167_v6 = vld [vmem:[%s4626_s0 + $0x18c] sm:$0xf0] }
  0xc0   :  { %v1586_v20 = vpop.f32.mrf.mxu3 }
  0xc1   :  { %v3276_v15 = vpop.eup %3275  ;;  %v1579_v16 = vadd.f32 %v1578_v31, %v1410_v10  ;;  %1113 = vmatmul.bf16.gmra.mxu0 %v2640_v8  ;;  %v1244_v19 = vadd.f32 %v1243_v12, %v1075_v14  ;;  %v3165_v8 = vld [vmem:[%s4626_s0 + $0x184] sm:$0xf]  ;;  %v2679_v12 = vld [vmem:[%s4626_s0 + $0x188] sm:$0xf] }
  0xc2   :  { %1797 = vst [vmem:[%s4629_s3 + $0x10] sm:$0xff] %v3276_v15  ;;  %v2247_v17 = vadd.f32 %v3276_v15, %v2246_v58  ;;  %v2317_v18 = vmul.f32 %v3276_v15, %v3276_v15  ;;  %1282 = vmatmul.bf16.gmra.mxu1 %v2644_v9  ;;  %v2673_v9 = vld [vmem:[%s4626_s0 + $0x190] sm:$0xf0] }
  0xc3   :  { %3277 = vtanh.f32 %v1579_v16  ;;  %1451 = vmatmul.bf16.gmra.mxu2 %v2648_v13  ;;  %v3168_v13 = vld [vmem:[%s4626_s0 + $0x194] sm:$0xf0] }
  0xc4   :  { %v2380_v21 = vadd.f32 %v2379_v1, %v2317_v18  ;;  %v3170_v1 = vld [vmem:[%s4626_s0 + $0x1ac] sm:$0xf]  ;;  %v2676_v18 = vor.u32 %v3165_v8, %v2673_v9 }
  0xc5   :  { %v2700_v14 = vor.u32 %v3170_v1, %v2697_v2 }
  0xc6   :  { %v1412_v22 = vpop.f32.mrf.mxu2  ;;  %v1076_v24 = vpop.f32.mrf.mxu0 }
  0xc7   :  { %v1413_v23 = vadd.f32 %v1412_v22, %v1244_v19  ;;  %v1245_v25 = vpop.f32.mrf.mxu1  ;;  %v1077_v28 = vadd.f32 %v3756_v7, %v1076_v24  ;;  %v2680_v22 = vor.u32 %v3168_v13, %v2679_v12  ;;  %v2729_v12 = vld [vmem:[%s4626_s0 + $0x1f8] sm:$0xf0] }
  0xc8   :  { %v1588_v37 = vpop.f32.mrf.mxu3 }
  0xc9   :  { %v3278_v26 = vpop.eup %3277  ;;  %v1582_v27 = vadd.f32 %v1581_v47, %v1413_v23  ;;  %v1246_v42 = vadd.f32 %v1245_v25, %v1077_v28 }
  0xca   :  { %1798 = vst [vmem:[%s4629_s3 + $0x18] sm:$0xff] %v3278_v26  ;;  %v2248_v31 = vadd.f32 %v3278_v26, %v2247_v17  ;;  %v2318_v32 = vmul.f32 %v3278_v26, %v3278_v26  ;;  %v2672_v17 = vor.u32 %v3167_v6, %v2671_v5 }
  0xcb   :  { %3279 = vtanh.f32 %v1582_v27 }
  0xcc   :  { %v2381_v38 = vadd.f32 %v2380_v21, %v2318_v32 }
  0xcd   :  { %3097 = vmatmul.msk.bf16.gmra.mxu3 %vm954_vm1, %v2684_v41 }
  0xce   :  { %v1414_v43 = vpop.f32.mrf.mxu2  ;;  %v1079_v47 = vpop.f32.mrf.mxu0 }
  0xcf   :  { %v1415_v46 = vadd.f32 %v1414_v43, %v1246_v42  ;;  %v1248_v48 = vpop.f32.mrf.mxu1  ;;  %v1080_v50 = vadd.f32 %v3756_v7, %v1079_v47  ;;  %v2687_v42 = vld [vmem:[%s4626_s0 + $0x1a0] sm:$0xf]  ;;  %v3171_v43 = vld [vmem:[%s4626_s0 + $0x1ac] sm:$0xf0] }
  0xd0   :  { %v1591_v56 = vpop.f32.mrf.mxu3 }
  0xd1   :  { %v3280_v51 = vpop.eup %3279  ;;  %v1584_v52 = vadd.f32 %v1583_v0, %v1415_v46  ;;  %1118 = vmatmul.bf16.gmra.mxu0 %v2656_v44  ;;  %v1249_v55 = vadd.f32 %v1248_v48, %v1080_v50  ;;  %v3169_v44 = vld [vmem:[%s4626_s0 + $0x1a4] sm:$0xf]  ;;  %v2695_v48 = vld [vmem:[%s4626_s0 + $0x1a8] sm:$0xf] }
  0xd2   :  { %1799 = vst [vmem:[%s4629_s3 + $0x20] sm:$0xff] %v3280_v51  ;;  %v2249_v53 = vadd.f32 %v3280_v51, %v2248_v31  ;;  %v2319_v54 = vmul.f32 %v3280_v51, %v3280_v51  ;;  %1287 = vmatmul.bf16.gmra.mxu1 %v2660_v45  ;;  %v2689_v45 = vld [vmem:[%s4626_s0 + $0x1b0] sm:$0xf0] }
  0xd3   :  { %3281 = vtanh.f32 %v1584_v52  ;;  %1456 = vmatmul.bf16.gmra.mxu2 %v2664_v49  ;;  %v3172_v49 = vld [vmem:[%s4626_s0 + $0x1b4] sm:$0xf0] }
  0xd4   :  { %v2382_v57 = vadd.f32 %v2381_v38, %v2319_v54  ;;  %v3174_v38 = vld [vmem:[%s4626_s0 + $0x1cc] sm:$0xf]  ;;  %v2692_v54 = vor.u32 %v3169_v44, %v2689_v45 }
  0xd5   :  { %v2716_v50 = vor.u32 %v3174_v38, %v2713_v39 }
  0xd6   :  { %v1417_v58 = vpop.f32.mrf.mxu2  ;;  %v1081_v60 = vpop.f32.mrf.mxu0 }
  0xd7   :  { %v1418_v59 = vadd.f32 %v1417_v58, %v1249_v55  ;;  %v1250_v61 = vpop.f32.mrf.mxu1  ;;  %v1082_v0 = vadd.f32 %v3756_v7, %v1081_v60  ;;  %v2696_v58 = vor.u32 %v3172_v49, %v2695_v48  ;;  %v2745_v48 = vld [vmem:[%s4626_s0 + $0x218] sm:$0xf0] }
  0xd8   :  { %v1593_v10 = vpop.f32.mrf.mxu3 }
  0xd9   :  { %v3282_v62 = vpop.eup %3281  ;;  %v1587_v63 = vadd.f32 %v1586_v20, %v1418_v59  ;;  %v1251_v15 = vadd.f32 %v1250_v61, %v1082_v0 }
  0xda   :  { %1800 = vst [vmem:[%s4629_s3 + $0x28] sm:$0xff] %v3282_v62  ;;  %v2250_v3 = vadd.f32 %v3282_v62, %v2249_v53  ;;  %v2320_v4 = vmul.f32 %v3282_v62, %v3282_v62  ;;  %v2688_v53 = vor.u32 %v3171_v43, %v2687_v42 }
  0xdb   :  { %3283 = vtanh.f32 %v1587_v63 }
  0xdc   :  { %v2383_v11 = vadd.f32 %v2382_v57, %v2320_v4 }
  0xdd   :  { %3098 = vmatmul.msk.bf16.gmra.mxu3 %vm954_vm1, %v2700_v14 }
  0xde   :  { %v1419_v16 = vpop.f32.mrf.mxu2  ;;  %v1084_v20 = vpop.f32.mrf.mxu0 }
  0xdf   :  { %v1420_v19 = vadd.f32 %v1419_v16, %v1251_v15  ;;  %v1253_v21 = vpop.f32.mrf.mxu1  ;;  %v1085_v23 = vadd.f32 %v3756_v7, %v1084_v20  ;;  %v2703_v15 = vld [vmem:[%s4626_s0 + $0x1c0] sm:$0xf]  ;;  %v3175_v16 = vld [vmem:[%s4626_s0 + $0x1cc] sm:$0xf0] }
  0xe0   :  { %v1596_v29 = vpop.f32.mrf.mxu3 }
  0xe1   :  { %v3284_v24 = vpop.eup %3283  ;;  %v1589_v25 = vadd.f32 %v1588_v37, %v1420_v19  ;;  %1123 = vmatmul.bf16.gmra.mxu0 %v2672_v17  ;;  %v1254_v28 = vadd.f32 %v1253_v21, %v1085_v23  ;;  %v3173_v17 = vld [vmem:[%s4626_s0 + $0x1c4] sm:$0xf]  ;;  %v2711_v21 = vld [vmem:[%s4626_s0 + $0x1c8] sm:$0xf] }
  0xe2   :  { %1801 = vst [vmem:[%s4629_s3 + $0x30] sm:$0xff] %v3284_v24  ;;  %v2251_v26 = vadd.f32 %v3284_v24, %v2250_v3  ;;  %v2321_v27 = vmul.f32 %v3284_v24, %v3284_v24  ;;  %1292 = vmatmul.bf16.gmra.mxu1 %v2676_v18  ;;  %v2705_v18 = vld [vmem:[%s4626_s0 + $0x1d0] sm:$0xf0] }
  0xe3   :  { %3285 = vtanh.f32 %v1589_v25  ;;  %1461 = vmatmul.bf16.gmra.mxu2 %v2680_v22  ;;  %v3176_v22 = vld [vmem:[%s4626_s0 + $0x1d4] sm:$0xf0] }
  0xe4   :  { %v2384_v30 = vadd.f32 %v2383_v11, %v2321_v27  ;;  %v3178_v11 = vld [vmem:[%s4626_s0 + $0x1ec] sm:$0xf]  ;;  %v2708_v27 = vor.u32 %v3173_v17, %v2705_v18 }
  0xe5   :  { %v2732_v23 = vor.u32 %v3178_v11, %v2729_v12 }
  0xe6   :  { %v1422_v31 = vpop.f32.mrf.mxu2  ;;  %v1086_v33 = vpop.f32.mrf.mxu0 }
  0xe7   :  { %v1423_v32 = vadd.f32 %v1422_v31, %v1254_v28  ;;  %v1255_v34 = vpop.f32.mrf.mxu1  ;;  %v1087_v37 = vadd.f32 %v3756_v7, %v1086_v33  ;;  %v2712_v31 = vor.u32 %v3176_v22, %v2711_v21  ;;  %v2761_v21 = vld [vmem:[%s4626_s0 + $0x238] sm:$0xf0] }
  0xe8   :  { %v1598_v46 = vpop.f32.mrf.mxu3 }
  0xe9   :  { %v3286_v35 = vpop.eup %3285  ;;  %v1592_v36 = vadd.f32 %v1591_v56, %v1423_v32  ;;  %v1256_v51 = vadd.f32 %v1255_v34, %v1087_v37 }
  0xea   :  { %1802 = vst [vmem:[%s4629_s3 + $0x38] sm:$0xff] %v3286_v35  ;;  %v2252_v40 = vadd.f32 %v3286_v35, %v2251_v26  ;;  %v2322_v41 = vmul.f32 %v3286_v35, %v3286_v35  ;;  %v2704_v26 = vor.u32 %v3175_v16, %v2703_v15 }
  0xeb   :  { %3287 = vtanh.f32 %v1592_v36 }
  0xec   :  { %v2385_v47 = vadd.f32 %v2384_v30, %v2322_v41 }
  0xed   :  { %3099 = vmatmul.msk.bf16.gmra.mxu3 %vm954_vm1, %v2716_v50 }
  0xee   :  { %v1424_v52 = vpop.f32.mrf.mxu2  ;;  %v1089_v56 = vpop.f32.mrf.mxu0 }
  0xef   :  { %v1425_v55 = vadd.f32 %v1424_v52, %v1256_v51  ;;  %v1258_v57 = vpop.f32.mrf.mxu1  ;;  %v1090_v59 = vadd.f32 %v3756_v7, %v1089_v56  ;;  %v2719_v51 = vld [vmem:[%s4626_s0 + $0x1e0] sm:$0xf]  ;;  %v3179_v52 = vld [vmem:[%s4626_s0 + $0x1ec] sm:$0xf0] }
  0xf0   :  { %v1601_v1 = vpop.f32.mrf.mxu3 }
  0xf1   :  { %v3288_v60 = vpop.eup %3287  ;;  %v1594_v61 = vadd.f32 %v1593_v10, %v1425_v55  ;;  %1128 = vmatmul.bf16.gmra.mxu0 %v2688_v53  ;;  %v1259_v0 = vadd.f32 %v1258_v57, %v1090_v59  ;;  %v3177_v53 = vld [vmem:[%s4626_s0 + $0x1e4] sm:$0xf]  ;;  %v2727_v57 = vld [vmem:[%s4626_s0 + $0x1e8] sm:$0xf] }
  0xf2   :  { %1803 = vst [vmem:[%s4629_s3 + $0x40] sm:$0xff] %v3288_v60  ;;  %v2253_v62 = vadd.f32 %v3288_v60, %v2252_v40  ;;  %v2323_v63 = vmul.f32 %v3288_v60, %v3288_v60  ;;  %1297 = vmatmul.bf16.gmra.mxu1 %v2692_v54  ;;  %v2721_v54 = vld [vmem:[%s4626_s0 + $0x1f0] sm:$0xf0] }
  0xf3   :  { %3289 = vtanh.f32 %v1594_v61  ;;  %1466 = vmatmul.bf16.gmra.mxu2 %v2696_v58  ;;  %v3180_v58 = vld [vmem:[%s4626_s0 + $0x1f4] sm:$0xf0] }
  0xf4   :  { %v2386_v2 = vadd.f32 %v2385_v47, %v2323_v63  ;;  %v3182_v47 = vld [vmem:[%s4626_s0 + $0x20c] sm:$0xf]  ;;  %v2724_v63 = vor.u32 %v3177_v53, %v2721_v54 }
  0xf5   :  { %v2748_v59 = vor.u32 %v3182_v47, %v2745_v48 }
  0xf6   :  { %v1427_v3 = vpop.f32.mrf.mxu2  ;;  %v1091_v5 = vpop.f32.mrf.mxu0 }
  0xf7   :  { %v1428_v4 = vadd.f32 %v1427_v3, %v1259_v0  ;;  %v1260_v6 = vpop.f32.mrf.mxu1  ;;  %v1092_v10 = vadd.f32 %v3756_v7, %v1091_v5  ;;  %v2728_v3 = vor.u32 %v3180_v58, %v2727_v57  ;;  %v2777_v57 = vld [vmem:[%s4626_s0 + $0x258] sm:$0xf0] }
  0xf8   :  { %v1603_v19 = vpop.f32.mrf.mxu3 }
  0xf9   :  { %v3290_v8 = vpop.eup %3289  ;;  %v1597_v9 = vadd.f32 %v1596_v29, %v1428_v4  ;;  %v1261_v24 = vadd.f32 %v1260_v6, %v1092_v10 }
  0xfa   :  { %1804 = vst [vmem:[%s4629_s3 + $0x48] sm:$0xff] %v3290_v8  ;;  %v2254_v13 = vadd.f32 %v3290_v8, %v2253_v62  ;;  %v2324_v14 = vmul.f32 %v3290_v8, %v3290_v8  ;;  %v2720_v62 = vor.u32 %v3179_v52, %v2719_v51 }
  0xfb   :  { %3291 = vtanh.f32 %v1597_v9 }
  0xfc   :  { %v2387_v20 = vadd.f32 %v2386_v2, %v2324_v14 }
  0xfd   :  { %3100 = vmatmul.msk.bf16.gmra.mxu3 %vm954_vm1, %v2732_v23 }
  0xfe   :  { %v1429_v25 = vpop.f32.mrf.mxu2  ;;  %v1094_v29 = vpop.f32.mrf.mxu0 }
  0xff   :  { %v1430_v28 = vadd.f32 %v1429_v25, %v1261_v24  ;;  %v1263_v30 = vpop.f32.mrf.mxu1  ;;  %v1095_v32 = vadd.f32 %v3756_v7, %v1094_v29  ;;  %v2735_v24 = vld [vmem:[%s4626_s0 + $0x200] sm:$0xf]  ;;  %v3183_v25 = vld [vmem:[%s4626_s0 + $0x20c] sm:$0xf0] }
 0x100   :  { %v1606_v38 = vpop.f32.mrf.mxu3 }
 0x101   :  { %v3292_v33 = vpop.eup %3291  ;;  %v1599_v34 = vadd.f32 %v1598_v46, %v1430_v28  ;;  %1133 = vmatmul.bf16.gmra.mxu0 %v2704_v26  ;;  %v1264_v37 = vadd.f32 %v1263_v30, %v1095_v32  ;;  %v3181_v26 = vld [vmem:[%s4626_s0 + $0x204] sm:$0xf]  ;;  %v2743_v30 = vld [vmem:[%s4626_s0 + $0x208] sm:$0xf] }
 0x102   :  { %1805 = vst [vmem:[%s4629_s3 + $0x50] sm:$0xff] %v3292_v33  ;;  %v2255_v35 = vadd.f32 %v3292_v33, %v2254_v13  ;;  %v2325_v36 = vmul.f32 %v3292_v33, %v3292_v33  ;;  %1302 = vmatmul.bf16.gmra.mxu1 %v2708_v27  ;;  %v2737_v27 = vld [vmem:[%s4626_s0 + $0x210] sm:$0xf0] }
 0x103   :  { %3293 = vtanh.f32 %v1599_v34  ;;  %1471 = vmatmul.bf16.gmra.mxu2 %v2712_v31  ;;  %v3184_v31 = vld [vmem:[%s4626_s0 + $0x214] sm:$0xf0] }
 0x104   :  { %v2388_v39 = vadd.f32 %v2387_v20, %v2325_v36  ;;  %v3186_v20 = vld [vmem:[%s4626_s0 + $0x22c] sm:$0xf]  ;;  %v2740_v36 = vor.u32 %v3181_v26, %v2737_v27 }
 0x105   :  { %v2764_v32 = vor.u32 %v3186_v20, %v2761_v21 }
 0x106   :  { %v1432_v40 = vpop.f32.mrf.mxu2  ;;  %v1096_v42 = vpop.f32.mrf.mxu0 }
 0x107   :  { %v1433_v41 = vadd.f32 %v1432_v40, %v1264_v37  ;;  %v1265_v43 = vpop.f32.mrf.mxu1  ;;  %v1097_v46 = vadd.f32 %v3756_v7, %v1096_v42  ;;  %v2744_v40 = vor.u32 %v3184_v31, %v2743_v30  ;;  %v2793_v30 = vld [vmem:[%s4626_s0 + $0x278] sm:$0xf0] }
 0x108   :  { %v1608_v55 = vpop.f32.mrf.mxu3 }
 0x109   :  { %v3294_v44 = vpop.eup %3293  ;;  %v1602_v45 = vadd.f32 %v1601_v1, %v1433_v41  ;;  %v1266_v60 = vadd.f32 %v1265_v43, %v1097_v46 }
 0x10a   :  { %1806 = vst [vmem:[%s4629_s3 + $0x58] sm:$0xff] %v3294_v44  ;;  %v2256_v49 = vadd.f32 %v3294_v44, %v2255_v35  ;;  %v2326_v50 = vmul.f32 %v3294_v44, %v3294_v44  ;;  %v2736_v35 = vor.u32 %v3183_v25, %v2735_v24 }
 0x10b   :  { %3295 = vtanh.f32 %v1602_v45 }
 0x10c   :  { %v2389_v56 = vadd.f32 %v2388_v39, %v2326_v50 }
 0x10d   :  { %3101 = vmatmul.msk.bf16.gmra.mxu3 %vm954_vm1, %v2748_v59 }
 0x10e   :  { %v1434_v61 = vpop.f32.mrf.mxu2  ;;  %v1099_v1 = vpop.f32.mrf.mxu0 }
 0x10f   :  { %v1435_v0 = vadd.f32 %v1434_v61, %v1266_v60  ;;  %v1268_v2 = vpop.f32.mrf.mxu1  ;;  %v1100_v4 = vadd.f32 %v3756_v7, %v1099_v1  ;;  %v2751_v60 = vld [vmem:[%s4626_s0 + $0x220] sm:$0xf]  ;;  %v3187_v61 = vld [vmem:[%s4626_s0 + $0x22c] sm:$0xf0] }
 0x110   :  { %v1611_v11 = vpop.f32.mrf.mxu3 }
 0x111   :  { %v3296_v5 = vpop.eup %3295  ;;  %v1604_v6 = vadd.f32 %v1603_v19, %v1435_v0  ;;  %1138 = vmatmul.bf16.gmra.mxu0 %v2720_v62  ;;  %v1269_v10 = vadd.f32 %v1268_v2, %v1100_v4  ;;  %v3185_v62 = vld [vmem:[%s4626_s0 + $0x224] sm:$0xf]  ;;  %v2759_v2 = vld [vmem:[%s4626_s0 + $0x228] sm:$0xf] }
 0x112   :  { %1807 = vst [vmem:[%s4629_s3 + $0x60] sm:$0xff] %v3296_v5  ;;  %v2257_v8 = vadd.f32 %v3296_v5, %v2256_v49  ;;  %v2327_v9 = vmul.f32 %v3296_v5, %v3296_v5  ;;  %1307 = vmatmul.bf16.gmra.mxu1 %v2724_v63  ;;  %v2753_v63 = vld [vmem:[%s4626_s0 + $0x230] sm:$0xf0] }
 0x113   :  { %3297 = vtanh.f32 %v1604_v6  ;;  %1476 = vmatmul.bf16.gmra.mxu2 %v2728_v3  ;;  %v3188_v3 = vld [vmem:[%s4626_s0 + $0x234] sm:$0xf0] }
 0x114   :  { %v2390_v12 = vadd.f32 %v2389_v56, %v2327_v9  ;;  %v3190_v56 = vld [vmem:[%s4626_s0 + $0x24c] sm:$0xf]  ;;  %v2756_v9 = vor.u32 %v3185_v62, %v2753_v63 }
 0x115   :  { %v2780_v4 = vor.u32 %v3190_v56, %v2777_v57 }
 0x116   :  { %v1437_v13 = vpop.f32.mrf.mxu2  ;;  %v1101_v15 = vpop.f32.mrf.mxu0 }
 0x117   :  { %v1438_v14 = vadd.f32 %v1437_v13, %v1269_v10  ;;  %v1270_v16 = vpop.f32.mrf.mxu1  ;;  %v1102_v19 = vadd.f32 %v3756_v7, %v1101_v15  ;;  %v2760_v13 = vor.u32 %v3188_v3, %v2759_v2  ;;  %v2809_v2 = vld [vmem:[%s4626_s0 + $0x298] sm:$0xf0] }
 0x118   :  { %v1613_v28 = vpop.f32.mrf.mxu3 }
 0x119   :  { %v3298_v17 = vpop.eup %3297  ;;  %v1607_v18 = vadd.f32 %v1606_v38, %v1438_v14  ;;  %v1271_v33 = vadd.f32 %v1270_v16, %v1102_v19 }
 0x11a   :  { %1808 = vst [vmem:[%s4629_s3 + $0x68] sm:$0xff] %v3298_v17  ;;  %v2258_v22 = vadd.f32 %v3298_v17, %v2257_v8  ;;  %v2328_v23 = vmul.f32 %v3298_v17, %v3298_v17  ;;  %v2752_v8 = vor.u32 %v3187_v61, %v2751_v60 }
 0x11b   :  { %3299 = vtanh.f32 %v1607_v18 }
 0x11c   :  { %v2391_v29 = vadd.f32 %v2390_v12, %v2328_v23 }
 0x11d   :  { %3102 = vmatmul.msk.bf16.gmra.mxu3 %vm954_vm1, %v2764_v32 }
 0x11e   :  { %v1439_v34 = vpop.f32.mrf.mxu2  ;;  %v1104_v38 = vpop.f32.mrf.mxu0 }
 0x11f   :  { %v1440_v37 = vadd.f32 %v1439_v34, %v1271_v33  ;;  %v1273_v39 = vpop.f32.mrf.mxu1  ;;  %v1105_v41 = vadd.f32 %v3756_v7, %v1104_v38  ;;  %v2767_v33 = vld [vmem:[%s4626_s0 + $0x240] sm:$0xf]  ;;  %v3191_v34 = vld [vmem:[%s4626_s0 + $0x24c] sm:$0xf0] }
 0x120   :  { %v1616_v47 = vpop.f32.mrf.mxu3 }
 0x121   :  { %v3300_v42 = vpop.eup %3299  ;;  %v1609_v43 = vadd.f32 %v1608_v55, %v1440_v37  ;;  %1143 = vmatmul.bf16.gmra.mxu0 %v2736_v35  ;;  %v1274_v46 = vadd.f32 %v1273_v39, %v1105_v41  ;;  %v3189_v35 = vld [vmem:[%s4626_s0 + $0x244] sm:$0xf]  ;;  %v2775_v39 = vld [vmem:[%s4626_s0 + $0x248] sm:$0xf] }
 0x122   :  { %1809 = vst [vmem:[%s4629_s3 + $0x70] sm:$0xff] %v3300_v42  ;;  %v2259_v44 = vadd.f32 %v3300_v42, %v2258_v22  ;;  %v2329_v45 = vmul.f32 %v3300_v42, %v3300_v42  ;;  %1312 = vmatmul.bf16.gmra.mxu1 %v2740_v36  ;;  %v2769_v36 = vld [vmem:[%s4626_s0 + $0x250] sm:$0xf0] }
 0x123   :  { %3301 = vtanh.f32 %v1609_v43  ;;  %1481 = vmatmul.bf16.gmra.mxu2 %v2744_v40  ;;  %v3192_v40 = vld [vmem:[%s4626_s0 + $0x254] sm:$0xf0] }
 0x124   :  { %v2392_v48 = vadd.f32 %v2391_v29, %v2329_v45  ;;  %v3194_v29 = vld [vmem:[%s4626_s0 + $0x26c] sm:$0xf]  ;;  %v2772_v45 = vor.u32 %v3189_v35, %v2769_v36 }
 0x125   :  { %v2796_v41 = vor.u32 %v3194_v29, %v2793_v30 }
 0x126   :  { %v1442_v49 = vpop.f32.mrf.mxu2  ;;  %v1106_v51 = vpop.f32.mrf.mxu0 }
 0x127   :  { %v1443_v50 = vadd.f32 %v1442_v49, %v1274_v46  ;;  %v1275_v52 = vpop.f32.mrf.mxu1  ;;  %v1107_v55 = vadd.f32 %v3756_v7, %v1106_v51  ;;  %v2776_v49 = vor.u32 %v3192_v40, %v2775_v39  ;;  %v2825_v39 = vld [vmem:[%s4626_s0 + $0x2b8] sm:$0xf0] }
 0x128   :  { %v1618_v0 = vpop.f32.mrf.mxu3 }
 0x129   :  { %v3302_v53 = vpop.eup %3301  ;;  %v1612_v54 = vadd.f32 %v1611_v11, %v1443_v50  ;;  %v1276_v5 = vadd.f32 %v1275_v52, %v1107_v55 }
 0x12a   :  { %1810 = vst [vmem:[%s4629_s3 + $0x78] sm:$0xff] %v3302_v53  ;;  %v2260_v58 = vadd.f32 %v3302_v53, %v2259_v44  ;;  %v2330_v59 = vmul.f32 %v3302_v53, %v3302_v53  ;;  %v2768_v44 = vor.u32 %v3191_v34, %v2767_v33 }
 0x12b   :  { %3303 = vtanh.f32 %v1612_v54 }
 0x12c   :  { %v2393_v1 = vadd.f32 %v2392_v48, %v2330_v59 }
 0x12d   :  { %3103 = vmatmul.msk.bf16.gmra.mxu3 %vm954_vm1, %v2780_v4 }
 0x12e   :  { %v1444_v6 = vpop.f32.mrf.mxu2  ;;  %v1109_v11 = vpop.f32.mrf.mxu0 }
 0x12f   :  { %v1445_v10 = vadd.f32 %v1444_v6, %v1276_v5  ;;  %v1278_v12 = vpop.f32.mrf.mxu1  ;;  %v1110_v14 = vadd.f32 %v3756_v7, %v1109_v11  ;;  %v2783_v5 = vld [vmem:[%s4626_s0 + $0x260] sm:$0xf]  ;;  %v3195_v6 = vld [vmem:[%s4626_s0 + $0x26c] sm:$0xf0] }
 0x130   :  { %v1621_v20 = vpop.f32.mrf.mxu3 }
 0x131   :  { %v3304_v15 = vpop.eup %3303  ;;  %v1614_v16 = vadd.f32 %v1613_v28, %v1445_v10  ;;  %1148 = vmatmul.bf16.gmra.mxu0 %v2752_v8  ;;  %v1279_v19 = vadd.f32 %v1278_v12, %v1110_v14  ;;  %v3193_v8 = vld [vmem:[%s4626_s0 + $0x264] sm:$0xf]  ;;  %v2791_v12 = vld [vmem:[%s4626_s0 + $0x268] sm:$0xf] }
 0x132   :  { %1811 = vst [vmem:[%s4629_s3 + $0x80] sm:$0xff] %v3304_v15  ;;  %v2261_v17 = vadd.f32 %v3304_v15, %v2260_v58  ;;  %v2331_v18 = vmul.f32 %v3304_v15, %v3304_v15  ;;  %1317 = vmatmul.bf16.gmra.mxu1 %v2756_v9  ;;  %v2785_v9 = vld [vmem:[%s4626_s0 + $0x270] sm:$0xf0] }
 0x133   :  { %3305 = vtanh.f32 %v1614_v16  ;;  %1486 = vmatmul.bf16.gmra.mxu2 %v2760_v13  ;;  %v3196_v13 = vld [vmem:[%s4626_s0 + $0x274] sm:$0xf0] }
 0x134   :  { %v2394_v21 = vadd.f32 %v2393_v1, %v2331_v18  ;;  %v3198_v1 = vld [vmem:[%s4626_s0 + $0x28c] sm:$0xf]  ;;  %v2788_v18 = vor.u32 %v3193_v8, %v2785_v9 }
 0x135   :  { %v2812_v14 = vor.u32 %v3198_v1, %v2809_v2 }
 0x136   :  { %v1447_v22 = vpop.f32.mrf.mxu2  ;;  %v1111_v24 = vpop.f32.mrf.mxu0 }
 0x137   :  { %v1448_v23 = vadd.f32 %v1447_v22, %v1279_v19  ;;  %v1280_v25 = vpop.f32.mrf.mxu1  ;;  %v1112_v28 = vadd.f32 %v3756_v7, %v1111_v24  ;;  %v2792_v22 = vor.u32 %v3196_v13, %v2791_v12  ;;  %v2841_v12 = vld [vmem:[%s4626_s0 + $0x2d8] sm:$0xf0] }
 0x138   :  { %v1623_v37 = vpop.f32.mrf.mxu3 }
 0x139   :  { %v3306_v26 = vpop.eup %3305  ;;  %v1617_v27 = vadd.f32 %v1616_v47, %v1448_v23  ;;  %v1281_v42 = vadd.f32 %v1280_v25, %v1112_v28 }
 0x13a   :  { %1812 = vst [vmem:[%s4629_s3 + $0x88] sm:$0xff] %v3306_v26  ;;  %v2262_v31 = vadd.f32 %v3306_v26, %v2261_v17  ;;  %v2332_v32 = vmul.f32 %v3306_v26, %v3306_v26  ;;  %v2784_v17 = vor.u32 %v3195_v6, %v2783_v5 }
 0x13b   :  { %3307 = vtanh.f32 %v1617_v27 }
 0x13c   :  { %v2395_v38 = vadd.f32 %v2394_v21, %v2332_v32 }
 0x13d   :  { %3104 = vmatmul.msk.bf16.gmra.mxu3 %vm954_vm1, %v2796_v41 }
 0x13e   :  { %v1449_v43 = vpop.f32.mrf.mxu2  ;;  %v1114_v47 = vpop.f32.mrf.mxu0 }
 0x13f   :  { %v1450_v46 = vadd.f32 %v1449_v43, %v1281_v42  ;;  %v1283_v48 = vpop.f32.mrf.mxu1  ;;  %v1115_v50 = vadd.f32 %v3756_v7, %v1114_v47  ;;  %v2799_v42 = vld [vmem:[%s4626_s0 + $0x280] sm:$0xf]  ;;  %v3197_v43 = vld [vmem:[%s4626_s0 + $0x284] sm:$0xf]  ;;  %v2807_v47 = vld [vmem:[%s4626_s0 + $0x288] sm:$0xf] }
 0x140   :  { %v1626_v56 = vpop.f32.mrf.mxu3 }
 0x141   :  { %v3308_v51 = vpop.eup %3307  ;;  %v1619_v52 = vadd.f32 %v1618_v0, %v1450_v46  ;;  %1153 = vmatmul.bf16.gmra.mxu0 %v2768_v44  ;;  %v1284_v55 = vadd.f32 %v1283_v48, %v1115_v50  ;;  %v2801_v44 = vld [vmem:[%s4626_s0 + $0x290] sm:$0xf0]  ;;  %v3200_v48 = vld [vmem:[%s4626_s0 + $0x294] sm:$0xf0] }
 0x142   :  { %1813 = vst [vmem:[%s4629_s3 + $0x90] sm:$0xff] %v3308_v51  ;;  %v2263_v53 = vadd.f32 %v3308_v51, %v2262_v31  ;;  %v2333_v54 = vmul.f32 %v3308_v51, %v3308_v51  ;;  %1322 = vmatmul.bf16.gmra.mxu1 %v2772_v45 }
 0x143   :  { %3309 = vtanh.f32 %v1619_v52  ;;  %1491 = vmatmul.bf16.gmra.mxu2 %v2776_v49 }
 0x144   :  { %v2396_v57 = vadd.f32 %v2395_v38, %v2333_v54  ;;  %v3202_v38 = vld [vmem:[%s4626_s0 + $0x2ac] sm:$0xf] }
 0x145   :  { %v2828_v49 = vor.u32 %v3202_v38, %v2825_v39 }
 0x146   :  { %v1452_v58 = vpop.f32.mrf.mxu2  ;;  %v1116_v60 = vpop.f32.mrf.mxu0 }
 0x147   :  { %v1453_v59 = vadd.f32 %v1452_v58, %v1284_v55  ;;  %v1285_v61 = vpop.f32.mrf.mxu1  ;;  %v1117_v0 = vadd.f32 %v3756_v7, %v1116_v60  ;;  %v4157_v58 = vld [vmem:[%s4628_s2] ss:$0 sm:$0xff] }
 0x148   :  { %v1628_v10 = vpop.f32.mrf.mxu3 }
 0x149   :  { %v3310_v62 = vpop.eup %3309  ;;  %v1622_v63 = vadd.f32 %v1621_v20, %v1453_v59  ;;  %v1286_v15 = vadd.f32 %v1285_v61, %v1117_v0 }
 0x14a   :  { %1814 = vst [vmem:[%s4629_s3 + $0x98] sm:$0xff] %v3310_v62  ;;  %v2264_v3 = vadd.f32 %v3310_v62, %v2263_v53  ;;  %v2334_v4 = vmul.f32 %v3310_v62, %v3310_v62  ;;  %v2804_v53 = vor.u32 %v3197_v43, %v2801_v44 }
 0x14b   :  { %3311 = vtanh.f32 %v1622_v63 }
 0x14c   :  { %v2397_v11 = vadd.f32 %v2396_v57, %v2334_v4  ;;  %v2808_v57 = vor.u32 %v3200_v48, %v2807_v47  ;;  %v2857_v47 = vld [vmem:[%s4626_s0 + $0x2f8] sm:$0xf0] }
 0x14d   :  { %3105 = vmatmul.msk.bf16.gmra.mxu3 %vm954_vm1, %v2812_v14 }
 0x14e   :  { %v1454_v16 = vpop.f32.mrf.mxu2  ;;  %v1119_v20 = vpop.f32.mrf.mxu0 }
 0x14f   :  { %v1455_v19 = vadd.f32 %v1454_v16, %v1286_v15  ;;  %v1288_v21 = vpop.f32.mrf.mxu1  ;;  %v1120_v23 = vadd.f32 %v3756_v7, %v1119_v20  ;;  %v2815_v15 = vld [vmem:[%s4626_s0 + $0x2a0] sm:$0xf]  ;;  %v3203_v16 = vld [vmem:[%s4626_s0 + $0x2ac] sm:$0xf0] }
 0x150   :  { %v1631_v29 = vpop.f32.mrf.mxu3 }
 0x151   :  { %v3312_v24 = vpop.eup %3311  ;;  %v1624_v25 = vadd.f32 %v1623_v37, %v1455_v19  ;;  %1158 = vmatmul.bf16.gmra.mxu0 %v2784_v17  ;;  %v1289_v28 = vadd.f32 %v1288_v21, %v1120_v23  ;;  %v3201_v17 = vld [vmem:[%s4626_s0 + $0x2a4] sm:$0xf]  ;;  %v2823_v21 = vld [vmem:[%s4626_s0 + $0x2a8] sm:$0xf] }
 0x152   :  { %1815 = vst [vmem:[%s4629_s3 + $0xa0] sm:$0xff] %v3312_v24  ;;  %v2265_v26 = vadd.f32 %v3312_v24, %v2264_v3  ;;  %v2335_v27 = vmul.f32 %v3312_v24, %v3312_v24  ;;  %1327 = vmatmul.bf16.gmra.mxu1 %v2788_v18  ;;  %v2817_v18 = vld [vmem:[%s4626_s0 + $0x2b0] sm:$0xf0] }
 0x153   :  { %3313 = vtanh.f32 %v1624_v25  ;;  %1496 = vmatmul.bf16.gmra.mxu2 %v2792_v22  ;;  %v3204_v22 = vld [vmem:[%s4626_s0 + $0x2b4] sm:$0xf0] }
 0x154   :  { %v2398_v30 = vadd.f32 %v2397_v11, %v2335_v27  ;;  %v3206_v11 = vld [vmem:[%s4626_s0 + $0x2cc] sm:$0xf]  ;;  %v2820_v27 = vor.u32 %v3201_v17, %v2817_v18 }
 0x155   :  { %v2844_v23 = vor.u32 %v3206_v11, %v2841_v12 }
 0x156   :  { %v1457_v31 = vpop.f32.mrf.mxu2  ;;  %v1121_v33 = vpop.f32.mrf.mxu0 }
 0x157   :  { %v1458_v32 = vadd.f32 %v1457_v31, %v1289_v28  ;;  %v1290_v34 = vpop.f32.mrf.mxu1  ;;  %v1122_v37 = vadd.f32 %v3756_v7, %v1121_v33  ;;  %v3199_v7 = vld [vmem:[%s4626_s0 + $0x28c] sm:$0xf0]  ;;  %v2824_v31 = vor.u32 %v3204_v22, %v2823_v21  ;;  %v2873_v21 = vld [vmem:[%s4626_s0 + $0x318] sm:$0xf0] }
 0x158   :  { %v1633_v45 = vpop.f32.mrf.mxu3  ;;  %v2800_v52 = vor.u32 %v3199_v7, %v2799_v42 }
 0x159   :  { %v3314_v35 = vpop.eup %3313  ;;  %v1627_v36 = vadd.f32 %v1626_v56, %v1458_v32  ;;  %v1291_v50 = vadd.f32 %v1290_v34, %v1122_v37 }
 0x15a   :  { %1816 = vst [vmem:[%s4629_s3 + $0xa8] sm:$0xff] %v3314_v35  ;;  %v2266_v40 = vadd.f32 %v3314_v35, %v2265_v26  ;;  %v2336_v41 = vmul.f32 %v3314_v35, %v3314_v35  ;;  %v2816_v26 = vor.u32 %v3203_v16, %v2815_v15 }
 0x15b   :  { %3315 = vtanh.f32 %v1627_v36 }
 0x15c   :  { %v2399_v46 = vadd.f32 %v2398_v30, %v2336_v41 }
 0x15d   :  { %3106 = vmatmul.msk.bf16.gmra.mxu3 %vm954_vm1, %v2828_v49 }
 0x15e   :  { %v1459_v51 = vpop.f32.mrf.mxu2  ;;  %v1124_v55 = vpop.f32.mrf.mxu0 }
 0x15f   :  { %v1460_v54 = vadd.f32 %v1459_v51, %v1291_v50  ;;  %v1293_v56 = vpop.f32.mrf.mxu1  ;;  %v1125_v59 = vadd.f32 %v4157_v58, %v1124_v55  ;;  %v2831_v50 = vld [vmem:[%s4626_s0 + $0x2c0] sm:$0xf]  ;;  %v3207_v51 = vld [vmem:[%s4626_s0 + $0x2cc] sm:$0xf0] }
 0x160   :  { %v1636_v1 = vpop.f32.mrf.mxu3 }
 0x161   :  { %v3316_v60 = vpop.eup %3315  ;;  %v1629_v61 = vadd.f32 %v1628_v10, %v1460_v54  ;;  %1163 = vmatmul.bf16.gmra.mxu0 %v2800_v52  ;;  %v1294_v0 = vadd.f32 %v1293_v56, %v1125_v59  ;;  %v3205_v52 = vld [vmem:[%s4626_s0 + $0x2c4] sm:$0xf]  ;;  %v2839_v56 = vld [vmem:[%s4626_s0 + $0x2c8] sm:$0xf] }
 0x162   :  { %1817 = vst [vmem:[%s4629_s3 + $0xb0] sm:$0xff] %v3316_v60  ;;  %v2267_v62 = vadd.f32 %v3316_v60, %v2266_v40  ;;  %v2337_v63 = vmul.f32 %v3316_v60, %v3316_v60  ;;  %1332 = vmatmul.bf16.gmra.mxu1 %v2804_v53  ;;  %v2833_v53 = vld [vmem:[%s4626_s0 + $0x2d0] sm:$0xf0] }
 0x163   :  { %3317 = vtanh.f32 %v1629_v61  ;;  %1501 = vmatmul.bf16.gmra.mxu2 %v2808_v57  ;;  %v3208_v57 = vld [vmem:[%s4626_s0 + $0x2d4] sm:$0xf0] }
 0x164   :  { %v2400_v2 = vadd.f32 %v2399_v46, %v2337_v63  ;;  %v3210_v46 = vld [vmem:[%s4626_s0 + $0x2ec] sm:$0xf]  ;;  %v2836_v63 = vor.u32 %v3205_v52, %v2833_v53 }
 0x165   :  { %v2860_v59 = vor.u32 %v3210_v46, %v2857_v47 }
 0x166   :  { %v1462_v3 = vpop.f32.mrf.mxu2  ;;  %v1126_v5 = vpop.f32.mrf.mxu0 }
 0x167   :  { %v1463_v4 = vadd.f32 %v1462_v3, %v1294_v0  ;;  %v1295_v6 = vpop.f32.mrf.mxu1  ;;  %v1127_v10 = vadd.f32 %v4157_v58, %v1126_v5  ;;  %v2840_v3 = vor.u32 %v3208_v57, %v2839_v56  ;;  %v2889_v56 = vld [vmem:[%s4626_s0 + $0x338] sm:$0xf0] }
 0x168   :  { %v1638_v19 = vpop.f32.mrf.mxu3 }
 0x169   :  { %v3318_v8 = vpop.eup %3317  ;;  %v1632_v9 = vadd.f32 %v1631_v29, %v1463_v4  ;;  %v1296_v24 = vadd.f32 %v1295_v6, %v1127_v10 }
 0x16a   :  { %1818 = vst [vmem:[%s4629_s3 + $0xb8] sm:$0xff] %v3318_v8  ;;  %v2268_v13 = vadd.f32 %v3318_v8, %v2267_v62  ;;  %v2338_v14 = vmul.f32 %v3318_v8, %v3318_v8  ;;  %v2832_v62 = vor.u32 %v3207_v51, %v2831_v50 }
 0x16b   :  { %3319 = vtanh.f32 %v1632_v9 }
 0x16c   :  { %v2401_v20 = vadd.f32 %v2400_v2, %v2338_v14 }
 0x16d   :  { %3107 = vmatmul.msk.bf16.gmra.mxu3 %vm954_vm1, %v2844_v23 }
 0x16e   :  { %v1464_v25 = vpop.f32.mrf.mxu2  ;;  %v1129_v29 = vpop.f32.mrf.mxu0 }
 0x16f   :  { %v1465_v28 = vadd.f32 %v1464_v25, %v1296_v24  ;;  %v1298_v30 = vpop.f32.mrf.mxu1  ;;  %v1130_v32 = vadd.f32 %v4157_v58, %v1129_v29  ;;  %v2847_v24 = vld [vmem:[%s4626_s0 + $0x2e0] sm:$0xf]  ;;  %v3211_v25 = vld [vmem:[%s4626_s0 + $0x2ec] sm:$0xf0] }
 0x170   :  { %v1641_v38 = vpop.f32.mrf.mxu3 }
 0x171   :  { %v3320_v33 = vpop.eup %3319  ;;  %v1634_v34 = vadd.f32 %v1633_v45, %v1465_v28  ;;  %1168 = vmatmul.bf16.gmra.mxu0 %v2816_v26  ;;  %v1299_v37 = vadd.f32 %v1298_v30, %v1130_v32  ;;  %v3209_v26 = vld [vmem:[%s4626_s0 + $0x2e4] sm:$0xf]  ;;  %v2855_v30 = vld [vmem:[%s4626_s0 + $0x2e8] sm:$0xf] }
 0x172   :  { %1819 = vst [vmem:[%s4629_s3 + $0xc0] sm:$0xff] %v3320_v33  ;;  %v2269_v35 = vadd.f32 %v3320_v33, %v2268_v13  ;;  %v2339_v36 = vmul.f32 %v3320_v33, %v3320_v33  ;;  %1337 = vmatmul.bf16.gmra.mxu1 %v2820_v27  ;;  %v2849_v27 = vld [vmem:[%s4626_s0 + $0x2f0] sm:$0xf0] }
 0x173   :  { %3321 = vtanh.f32 %v1634_v34  ;;  %1506 = vmatmul.bf16.gmra.mxu2 %v2824_v31  ;;  %v3212_v31 = vld [vmem:[%s4626_s0 + $0x2f4] sm:$0xf0] }
 0x174   :  { %v2402_v39 = vadd.f32 %v2401_v20, %v2339_v36  ;;  %v3214_v20 = vld [vmem:[%s4626_s0 + $0x30c] sm:$0xf]  ;;  %v2852_v36 = vor.u32 %v3209_v26, %v2849_v27 }
 0x175   :  { %v2876_v32 = vor.u32 %v3214_v20, %v2873_v21 }
 0x176   :  { %v1467_v40 = vpop.f32.mrf.mxu2  ;;  %v1131_v42 = vpop.f32.mrf.mxu0 }
 0x177   :  { %v1468_v41 = vadd.f32 %v1467_v40, %v1299_v37  ;;  %v1300_v7 = vpop.f32.mrf.mxu1  ;;  %v1132_v45 = vadd.f32 %v4157_v58, %v1131_v42  ;;  %v2856_v40 = vor.u32 %v3212_v31, %v2855_v30  ;;  %v2905_v30 = vld [vmem:[%s4626_s0 + $0x358] sm:$0xf0] }
 0x178   :  { %v1643_v54 = vpop.f32.mrf.mxu3 }
 0x179   :  { %v3322_v43 = vpop.eup %3321  ;;  %v1637_v44 = vadd.f32 %v1636_v1, %v1468_v41  ;;  %v1301_v60 = vadd.f32 %v1300_v7, %v1132_v45 }
 0x17a   :  { %1820 = vst [vmem:[%s4629_s3 + $0xc8] sm:$0xff] %v3322_v43  ;;  %v2270_v48 = vadd.f32 %v3322_v43, %v2269_v35  ;;  %v2340_v49 = vmul.f32 %v3322_v43, %v3322_v43  ;;  %v2848_v35 = vor.u32 %v3211_v25, %v2847_v24 }
 0x17b   :  { %3323 = vtanh.f32 %v1637_v44 }
 0x17c   :  { %v2403_v55 = vadd.f32 %v2402_v39, %v2340_v49 }
 0x17d   :  { %3108 = vmatmul.msk.bf16.gmra.mxu3 %vm954_vm1, %v2860_v59 }
 0x17e   :  { %v1469_v61 = vpop.f32.mrf.mxu2  ;;  %v1134_v1 = vpop.f32.mrf.mxu0 }
 0x17f   :  { %v1470_v0 = vadd.f32 %v1469_v61, %v1301_v60  ;;  %v1303_v2 = vpop.f32.mrf.mxu1  ;;  %v1135_v4 = vadd.f32 %v4157_v58, %v1134_v1  ;;  %v2863_v60 = vld [vmem:[%s4626_s0 + $0x300] sm:$0xf]  ;;  %v3215_v61 = vld [vmem:[%s4626_s0 + $0x30c] sm:$0xf0] }
 0x180   :  { %v1646_v11 = vpop.f32.mrf.mxu3 }
 0x181   :  { %v3324_v5 = vpop.eup %3323  ;;  %v1639_v6 = vadd.f32 %v1638_v19, %v1470_v0  ;;  %1173 = vmatmul.bf16.gmra.mxu0 %v2832_v62  ;;  %v1304_v10 = vadd.f32 %v1303_v2, %v1135_v4  ;;  %v3213_v62 = vld [vmem:[%s4626_s0 + $0x304] sm:$0xf]  ;;  %v2871_v2 = vld [vmem:[%s4626_s0 + $0x308] sm:$0xf] }
 0x182   :  { %1821 = vst [vmem:[%s4629_s3 + $0xd0] sm:$0xff] %v3324_v5  ;;  %v2271_v8 = vadd.f32 %v3324_v5, %v2270_v48  ;;  %v2341_v9 = vmul.f32 %v3324_v5, %v3324_v5  ;;  %1342 = vmatmul.bf16.gmra.mxu1 %v2836_v63  ;;  %v2865_v63 = vld [vmem:[%s4626_s0 + $0x310] sm:$0xf0] }
 0x183   :  { %3325 = vtanh.f32 %v1639_v6  ;;  %1511 = vmatmul.bf16.gmra.mxu2 %v2840_v3  ;;  %v3216_v3 = vld [vmem:[%s4626_s0 + $0x314] sm:$0xf0] }
 0x184   :  { %v2404_v12 = vadd.f32 %v2403_v55, %v2341_v9  ;;  %v3218_v55 = vld [vmem:[%s4626_s0 + $0x32c] sm:$0xf]  ;;  %v2868_v9 = vor.u32 %v3213_v62, %v2865_v63 }
 0x185   :  { %v2892_v4 = vor.u32 %v3218_v55, %v2889_v56 }
 0x186   :  { %v1472_v13 = vpop.f32.mrf.mxu2  ;;  %v1136_v15 = vpop.f32.mrf.mxu0 }
 0x187   :  { %v1473_v14 = vadd.f32 %v1472_v13, %v1304_v10  ;;  %v1305_v16 = vpop.f32.mrf.mxu1  ;;  %v1137_v19 = vadd.f32 %v4157_v58, %v1136_v15  ;;  %v2872_v13 = vor.u32 %v3216_v3, %v2871_v2  ;;  %v2921_v2 = vld [vmem:[%s4626_s0 + $0x378] sm:$0xf0] }
 0x188   :  { %v1648_v28 = vpop.f32.mrf.mxu3 }
 0x189   :  { %v3326_v17 = vpop.eup %3325  ;;  %v1642_v18 = vadd.f32 %v1641_v38, %v1473_v14  ;;  %v1306_v33 = vadd.f32 %v1305_v16, %v1137_v19 }
 0x18a   :  { %1822 = vst [vmem:[%s4629_s3 + $0xd8] sm:$0xff] %v3326_v17  ;;  %v2272_v22 = vadd.f32 %v3326_v17, %v2271_v8  ;;  %v2342_v23 = vmul.f32 %v3326_v17, %v3326_v17  ;;  %v2864_v8 = vor.u32 %v3215_v61, %v2863_v60 }
 0x18b   :  { %3327 = vtanh.f32 %v1642_v18 }
 0x18c   :  { %v2405_v29 = vadd.f32 %v2404_v12, %v2342_v23 }
 0x18d   :  { %3109 = vmatmul.msk.bf16.gmra.mxu3 %vm954_vm1, %v2876_v32 }
 0x18e   :  { %v1474_v34 = vpop.f32.mrf.mxu2  ;;  %v1139_v38 = vpop.f32.mrf.mxu0 }
 0x18f   :  { %v1475_v37 = vadd.f32 %v1474_v34, %v1306_v33  ;;  %v1308_v39 = vpop.f32.mrf.mxu1  ;;  %v1140_v41 = vadd.f32 %v4157_v58, %v1139_v38  ;;  %v2879_v33 = vld [vmem:[%s4626_s0 + $0x320] sm:$0xf]  ;;  %v3219_v34 = vld [vmem:[%s4626_s0 + $0x32c] sm:$0xf0] }
 0x190   :  { %v1651_v46 = vpop.f32.mrf.mxu3 }
 0x191   :  { %v3328_v42 = vpop.eup %3327  ;;  %v1644_v7 = vadd.f32 %v1643_v54, %v1475_v37  ;;  %1178 = vmatmul.bf16.gmra.mxu0 %v2848_v35  ;;  %v1309_v45 = vadd.f32 %v1308_v39, %v1140_v41  ;;  %v3217_v35 = vld [vmem:[%s4626_s0 + $0x324] sm:$0xf]  ;;  %v2887_v39 = vld [vmem:[%s4626_s0 + $0x328] sm:$0xf] }
 0x192   :  { %1823 = vst [vmem:[%s4629_s3 + $0xe0] sm:$0xff] %v3328_v42  ;;  %v2273_v43 = vadd.f32 %v3328_v42, %v2272_v22  ;;  %v2343_v44 = vmul.f32 %v3328_v42, %v3328_v42  ;;  %1347 = vmatmul.bf16.gmra.mxu1 %v2852_v36  ;;  %v2881_v36 = vld [vmem:[%s4626_s0 + $0x330] sm:$0xf0] }
 0x193   :  { %3329 = vtanh.f32 %v1644_v7  ;;  %1516 = vmatmul.bf16.gmra.mxu2 %v2856_v40  ;;  %v3220_v40 = vld [vmem:[%s4626_s0 + $0x334] sm:$0xf0] }
 0x194   :  { %v2406_v47 = vadd.f32 %v2405_v29, %v2343_v44  ;;  %v3222_v29 = vld [vmem:[%s4626_s0 + $0x34c] sm:$0xf]  ;;  %v2884_v44 = vor.u32 %v3217_v35, %v2881_v36 }
 0x195   :  { %v2908_v41 = vor.u32 %v3222_v29, %v2905_v30 }
 0x196   :  { %v1477_v48 = vpop.f32.mrf.mxu2  ;;  %v1141_v50 = vpop.f32.mrf.mxu0 }
 0x197   :  { %v1478_v49 = vadd.f32 %v1477_v48, %v1309_v45  ;;  %v1310_v51 = vpop.f32.mrf.mxu1  ;;  %v1142_v54 = vadd.f32 %v4157_v58, %v1141_v50  ;;  %v2888_v48 = vor.u32 %v3220_v40, %v2887_v39  ;;  %v2937_v39 = vld [vmem:[%s4626_s0 + $0x398] sm:$0xf0] }
 0x198   :  { %v1653_v0 = vpop.f32.mrf.mxu3 }
 0x199   :  { %v3330_v52 = vpop.eup %3329  ;;  %v1647_v53 = vadd.f32 %v1646_v11, %v1478_v49  ;;  %v1311_v5 = vadd.f32 %v1310_v51, %v1142_v54 }
 0x19a   :  { %1824 = vst [vmem:[%s4629_s3 + $0xe8] sm:$0xff] %v3330_v52  ;;  %v2274_v57 = vadd.f32 %v3330_v52, %v2273_v43  ;;  %v2344_v59 = vmul.f32 %v3330_v52, %v3330_v52  ;;  %v2880_v43 = vor.u32 %v3219_v34, %v2879_v33 }
 0x19b   :  { %3331 = vtanh.f32 %v1647_v53 }
 0x19c   :  { %v2407_v1 = vadd.f32 %v2406_v47, %v2344_v59 }
 0x19d   :  { %3110 = vmatmul.msk.bf16.gmra.mxu3 %vm954_vm1, %v2892_v4 }
 0x19e   :  { %v1479_v6 = vpop.f32.mrf.mxu2  ;;  %v1144_v11 = vpop.f32.mrf.mxu0 }
 0x19f   :  { %v1480_v10 = vadd.f32 %v1479_v6, %v1311_v5  ;;  %v1313_v12 = vpop.f32.mrf.mxu1  ;;  %v1145_v14 = vadd.f32 %v4157_v58, %v1144_v11  ;;  %v2895_v5 = vld [vmem:[%s4626_s0 + $0x340] sm:$0xf]  ;;  %v3223_v6 = vld [vmem:[%s4626_s0 + $0x34c] sm:$0xf0] }
 0x1a0   :  { %v1656_v20 = vpop.f32.mrf.mxu3 }
 0x1a1   :  { %v3332_v15 = vpop.eup %3331  ;;  %v1649_v16 = vadd.f32 %v1648_v28, %v1480_v10  ;;  %1183 = vmatmul.bf16.gmra.mxu0 %v2864_v8  ;;  %v1314_v19 = vadd.f32 %v1313_v12, %v1145_v14  ;;  %v3221_v8 = vld [vmem:[%s4626_s0 + $0x344] sm:$0xf]  ;;  %v2903_v12 = vld [vmem:[%s4626_s0 + $0x348] sm:$0xf] }
 0x1a2   :  { %1825 = vst [vmem:[%s4629_s3 + $0xf0] sm:$0xff] %v3332_v15  ;;  %v2275_v17 = vadd.f32 %v3332_v15, %v2274_v57  ;;  %v2345_v18 = vmul.f32 %v3332_v15, %v3332_v15  ;;  %1352 = vmatmul.bf16.gmra.mxu1 %v2868_v9  ;;  %v2897_v9 = vld [vmem:[%s4626_s0 + $0x350] sm:$0xf0] }
 0x1a3   :  { %3333 = vtanh.f32 %v1649_v16  ;;  %1521 = vmatmul.bf16.gmra.mxu2 %v2872_v13  ;;  %v3224_v13 = vld [vmem:[%s4626_s0 + $0x354] sm:$0xf0] }
 0x1a4   :  { %v2408_v21 = vadd.f32 %v2407_v1, %v2345_v18  ;;  %v3226_v1 = vld [vmem:[%s4626_s0 + $0x36c] sm:$0xf]  ;;  %v2900_v18 = vor.u32 %v3221_v8, %v2897_v9 }
 0x1a5   :  { %v2924_v14 = vor.u32 %v3226_v1, %v2921_v2 }
 0x1a6   :  { %v1482_v22 = vpop.f32.mrf.mxu2  ;;  %v1146_v24 = vpop.f32.mrf.mxu0 }
 0x1a7   :  { %v1483_v23 = vadd.f32 %v1482_v22, %v1314_v19  ;;  %v1315_v25 = vpop.f32.mrf.mxu1  ;;  %v1147_v28 = vadd.f32 %v4157_v58, %v1146_v24  ;;  %v2904_v22 = vor.u32 %v3224_v13, %v2903_v12  ;;  %v2953_v12 = vld [vmem:[%s4626_s0 + $0x3b8] sm:$0xf0] }
 0x1a8   :  { %v1658_v37 = vpop.f32.mrf.mxu3 }
 0x1a9   :  { %v3334_v26 = vpop.eup %3333  ;;  %v1652_v27 = vadd.f32 %v1651_v46, %v1483_v23  ;;  %v1316_v42 = vadd.f32 %v1315_v25, %v1147_v28 }
 0x1aa   :  { %1826 = vst [vmem:[%s4629_s3 + $0xf8] sm:$0xff] %v3334_v26  ;;  %v2276_v31 = vadd.f32 %v3334_v26, %v2275_v17  ;;  %v2346_v32 = vmul.f32 %v3334_v26, %v3334_v26  ;;  %v2896_v17 = vor.u32 %v3223_v6, %v2895_v5 }
 0x1ab   :  { %3335 = vtanh.f32 %v1652_v27 }
 0x1ac   :  { %v2409_v38 = vadd.f32 %v2408_v21, %v2346_v32 }
 0x1ad   :  { %3111 = vmatmul.msk.bf16.gmra.mxu3 %vm954_vm1, %v2908_v41 }
 0x1ae   :  { %v1484_v7 = vpop.f32.mrf.mxu2  ;;  %v1149_v46 = vpop.f32.mrf.mxu0 }
 0x1af   :  { %v1485_v45 = vadd.f32 %v1484_v7, %v1316_v42  ;;  %v1318_v47 = vpop.f32.mrf.mxu1  ;;  %v1150_v49 = vadd.f32 %v4157_v58, %v1149_v46  ;;  %v2911_v42 = vld [vmem:[%s4626_s0 + $0x360] sm:$0xf]  ;;  %v3227_v7 = vld [vmem:[%s4626_s0 + $0x36c] sm:$0xf0] }
 0x1b0   :  { %v1661_v55 = vpop.f32.mrf.mxu3 }
 0x1b1   :  { %v3336_v50 = vpop.eup %3335  ;;  %v1654_v51 = vadd.f32 %v1653_v0, %v1485_v45  ;;  %1188 = vmatmul.bf16.gmra.mxu0 %v2880_v43  ;;  %v1319_v54 = vadd.f32 %v1318_v47, %v1150_v49  ;;  %v3225_v43 = vld [vmem:[%s4626_s0 + $0x364] sm:$0xf]  ;;  %v2919_v47 = vld [vmem:[%s4626_s0 + $0x368] sm:$0xf] }
 0x1b2   :  { %1827 = vst [vmem:[%s4629_s3 + $0x100] sm:$0xff] %v3336_v50  ;;  %v2277_v52 = vadd.f32 %v3336_v50, %v2276_v31  ;;  %v2347_v53 = vmul.f32 %v3336_v50, %v3336_v50  ;;  %1357 = vmatmul.bf16.gmra.mxu1 %v2884_v44  ;;  %v2913_v44 = vld [vmem:[%s4626_s0 + $0x370] sm:$0xf0] }
 0x1b3   :  { %3337 = vtanh.f32 %v1654_v51  ;;  %1526 = vmatmul.bf16.gmra.mxu2 %v2888_v48  ;;  %v3228_v48 = vld [vmem:[%s4626_s0 + $0x374] sm:$0xf0] }
 0x1b4   :  { %v2410_v56 = vadd.f32 %v2409_v38, %v2347_v53  ;;  %v3230_v38 = vld [vmem:[%s4626_s0 + $0x38c] sm:$0xf]  ;;  %v2916_v53 = vor.u32 %v3225_v43, %v2913_v44 }
 0x1b5   :  { %v2940_v49 = vor.u32 %v3230_v38, %v2937_v39 }
 0x1b6   :  { %v1487_v57 = vpop.f32.mrf.mxu2  ;;  %v1151_v60 = vpop.f32.mrf.mxu0 }
 0x1b7   :  { %v1488_v59 = vadd.f32 %v1487_v57, %v1319_v54  ;;  %v1320_v61 = vpop.f32.mrf.mxu1  ;;  %v1152_v0 = vadd.f32 %v4157_v58, %v1151_v60  ;;  %v2920_v57 = vor.u32 %v3228_v48, %v2919_v47  ;;  %v2969_v47 = vld [vmem:[%s4626_s0 + $0x3d8] sm:$0xf0] }
 0x1b8   :  { %v1663_v10 = vpop.f32.mrf.mxu3 }
 0x1b9   :  { %v3338_v62 = vpop.eup %3337  ;;  %v1657_v63 = vadd.f32 %v1656_v20, %v1488_v59  ;;  %v1321_v15 = vadd.f32 %v1320_v61, %v1152_v0 }
 0x1ba   :  { %1828 = vst [vmem:[%s4629_s3 + $0x108] sm:$0xff] %v3338_v62  ;;  %v2278_v3 = vadd.f32 %v3338_v62, %v2277_v52  ;;  %v2348_v4 = vmul.f32 %v3338_v62, %v3338_v62  ;;  %v2912_v52 = vor.u32 %v3227_v7, %v2911_v42 }
 0x1bb   :  { %3339 = vtanh.f32 %v1657_v63 }
 0x1bc   :  { %v2411_v11 = vadd.f32 %v2410_v56, %v2348_v4 }
 0x1bd   :  { %3112 = vmatmul.msk.bf16.gmra.mxu3 %vm954_vm1, %v2924_v14 }
 0x1be   :  { %v1489_v16 = vpop.f32.mrf.mxu2  ;;  %v1154_v20 = vpop.f32.mrf.mxu0 }
 0x1bf   :  { %v1490_v19 = vadd.f32 %v1489_v16, %v1321_v15  ;;  %v1323_v21 = vpop.f32.mrf.mxu1  ;;  %v1155_v23 = vadd.f32 %v4157_v58, %v1154_v20  ;;  %v2927_v15 = vld [vmem:[%s4626_s0 + $0x380] sm:$0xf]  ;;  %v3231_v16 = vld [vmem:[%s4626_s0 + $0x38c] sm:$0xf0] }
 0x1c0   :  { %v1666_v29 = vpop.f32.mrf.mxu3 }
 0x1c1   :  { %v3340_v24 = vpop.eup %3339  ;;  %v1659_v25 = vadd.f32 %v1658_v37, %v1490_v19  ;;  %1193 = vmatmul.bf16.gmra.mxu0 %v2896_v17  ;;  %v1324_v28 = vadd.f32 %v1323_v21, %v1155_v23  ;;  %v3229_v17 = vld [vmem:[%s4626_s0 + $0x384] sm:$0xf]  ;;  %v2935_v21 = vld [vmem:[%s4626_s0 + $0x388] sm:$0xf] }
 0x1c2   :  { %1829 = vst [vmem:[%s4629_s3 + $0x110] sm:$0xff] %v3340_v24  ;;  %v2279_v26 = vadd.f32 %v3340_v24, %v2278_v3  ;;  %v2349_v27 = vmul.f32 %v3340_v24, %v3340_v24  ;;  %1362 = vmatmul.bf16.gmra.mxu1 %v2900_v18  ;;  %v2929_v18 = vld [vmem:[%s4626_s0 + $0x390] sm:$0xf0] }
 0x1c3   :  { %3341 = vtanh.f32 %v1659_v25  ;;  %1531 = vmatmul.bf16.gmra.mxu2 %v2904_v22  ;;  %v3232_v22 = vld [vmem:[%s4626_s0 + $0x394] sm:$0xf0] }
 0x1c4   :  { %v2412_v30 = vadd.f32 %v2411_v11, %v2349_v27  ;;  %v3234_v11 = vld [vmem:[%s4626_s0 + $0x3ac] sm:$0xf]  ;;  %v2932_v27 = vor.u32 %v3229_v17, %v2929_v18 }
 0x1c5   :  { %v2956_v23 = vor.u32 %v3234_v11, %v2953_v12 }
 0x1c6   :  { %v1492_v31 = vpop.f32.mrf.mxu2  ;;  %v1156_v33 = vpop.f32.mrf.mxu0 }
 0x1c7   :  { %v1493_v32 = vadd.f32 %v1492_v31, %v1324_v28  ;;  %v1325_v34 = vpop.f32.mrf.mxu1  ;;  %v1157_v37 = vadd.f32 %v4157_v58, %v1156_v33  ;;  %v2936_v31 = vor.u32 %v3232_v22, %v2935_v21  ;;  %v2985_v21 = vld [vmem:[%s4626_s0 + $0x3f8] sm:$0xf0] }
 0x1c8   :  { %v1668_v45 = vpop.f32.mrf.mxu3 }
 0x1c9   :  { %v3342_v35 = vpop.eup %3341  ;;  %v1662_v36 = vadd.f32 %v1661_v55, %v1493_v32  ;;  %v1326_v50 = vadd.f32 %v1325_v34, %v1157_v37 }
 0x1ca   :  { %1830 = vst [vmem:[%s4629_s3 + $0x118] sm:$0xff] %v3342_v35  ;;  %v2280_v40 = vadd.f32 %v3342_v35, %v2279_v26  ;;  %v2350_v41 = vmul.f32 %v3342_v35, %v3342_v35  ;;  %v2928_v26 = vor.u32 %v3231_v16, %v2927_v15 }
 0x1cb   :  { %3343 = vtanh.f32 %v1662_v36 }
 0x1cc   :  { %v2413_v46 = vadd.f32 %v2412_v30, %v2350_v41 }
 0x1cd   :  { %3113 = vmatmul.msk.bf16.gmra.mxu3 %vm954_vm1, %v2940_v49 }
 0x1ce   :  { %v1494_v51 = vpop.f32.mrf.mxu2  ;;  %v1159_v55 = vpop.f32.mrf.mxu0 }
 0x1cf   :  { %v1495_v54 = vadd.f32 %v1494_v51, %v1326_v50  ;;  %v1328_v56 = vpop.f32.mrf.mxu1  ;;  %v1160_v59 = vadd.f32 %v4157_v58, %v1159_v55  ;;  %v2943_v50 = vld [vmem:[%s4626_s0 + $0x3a0] sm:$0xf]  ;;  %v3235_v51 = vld [vmem:[%s4626_s0 + $0x3ac] sm:$0xf0] }
 0x1d0   :  { %v1671_v1 = vpop.f32.mrf.mxu3 }
 0x1d1   :  { %v3344_v60 = vpop.eup %3343  ;;  %v1664_v61 = vadd.f32 %v1663_v10, %v1495_v54  ;;  %1198 = vmatmul.bf16.gmra.mxu0 %v2912_v52  ;;  %v1329_v0 = vadd.f32 %v1328_v56, %v1160_v59  ;;  %v3233_v52 = vld [vmem:[%s4626_s0 + $0x3a4] sm:$0xf]  ;;  %v2951_v56 = vld [vmem:[%s4626_s0 + $0x3a8] sm:$0xf] }
 0x1d2   :  { %1831 = vst [vmem:[%s4629_s3 + $0x120] sm:$0xff] %v3344_v60  ;;  %v2281_v62 = vadd.f32 %v3344_v60, %v2280_v40  ;;  %v2351_v63 = vmul.f32 %v3344_v60, %v3344_v60  ;;  %1367 = vmatmul.bf16.gmra.mxu1 %v2916_v53  ;;  %v2945_v53 = vld [vmem:[%s4626_s0 + $0x3b0] sm:$0xf0] }
 0x1d3   :  { %3345 = vtanh.f32 %v1664_v61  ;;  %1536 = vmatmul.bf16.gmra.mxu2 %v2920_v57  ;;  %v3236_v57 = vld [vmem:[%s4626_s0 + $0x3b4] sm:$0xf0] }
 0x1d4   :  { %v2414_v2 = vadd.f32 %v2413_v46, %v2351_v63  ;;  %v3238_v46 = vld [vmem:[%s4626_s0 + $0x3cc] sm:$0xf]  ;;  %v2948_v63 = vor.u32 %v3233_v52, %v2945_v53 }
 0x1d5   :  { %v2972_v59 = vor.u32 %v3238_v46, %v2969_v47 }
 0x1d6   :  { %v1497_v3 = vpop.f32.mrf.mxu2  ;;  %v1161_v5 = vpop.f32.mrf.mxu0 }
 0x1d7   :  { %v1498_v4 = vadd.f32 %v1497_v3, %v1329_v0  ;;  %v1330_v6 = vpop.f32.mrf.mxu1  ;;  %v1162_v10 = vadd.f32 %v4157_v58, %v1161_v5  ;;  %v2952_v3 = vor.u32 %v3236_v57, %v2951_v56  ;;  %v2975_v57 = vld [vmem:[%s4626_s0 + $0x3e0] sm:$0xf] }
 0x1d8   :  { %v1673_v19 = vpop.f32.mrf.mxu3 }
 0x1d9   :  { %v3346_v8 = vpop.eup %3345  ;;  %v1667_v9 = vadd.f32 %v1666_v29, %v1498_v4  ;;  %v1331_v24 = vadd.f32 %v1330_v6, %v1162_v10 }
 0x1da   :  { %1832 = vst [vmem:[%s4629_s3 + $0x128] sm:$0xff] %v3346_v8  ;;  %v2282_v13 = vadd.f32 %v3346_v8, %v2281_v62  ;;  %v2352_v14 = vmul.f32 %v3346_v8, %v3346_v8  ;;  %v2944_v62 = vor.u32 %v3235_v51, %v2943_v50 }
 0x1db   :  { %3347 = vtanh.f32 %v1667_v9 }
 0x1dc   :  { %v2415_v20 = vadd.f32 %v2414_v2, %v2352_v14 }
 0x1dd   :  { %3114 = vmatmul.msk.bf16.gmra.mxu3 %vm954_vm1, %v2956_v23 }
 0x1de   :  { %v1499_v25 = vpop.f32.mrf.mxu2  ;;  %v1164_v29 = vpop.f32.mrf.mxu0 }
 0x1df   :  { %v1500_v28 = vadd.f32 %v1499_v25, %v1331_v24  ;;  %v1333_v30 = vpop.f32.mrf.mxu1  ;;  %v1165_v32 = vadd.f32 %v4157_v58, %v1164_v29  ;;  %v2959_v24 = vld [vmem:[%s4626_s0 + $0x3c0] sm:$0xf]  ;;  %v3239_v25 = vld [vmem:[%s4626_s0 + $0x3cc] sm:$0xf0] }
 0x1e0   :  { %v1676_v38 = vpop.f32.mrf.mxu3 }
 0x1e1   :  { %v3348_v33 = vpop.eup %3347  ;;  %v1669_v34 = vadd.f32 %v1668_v45, %v1500_v28  ;;  %1203 = vmatmul.bf16.gmra.mxu0 %v2928_v26  ;;  %v1334_v37 = vadd.f32 %v1333_v30, %v1165_v32  ;;  %v3237_v26 = vld [vmem:[%s4626_s0 + $0x3c4] sm:$0xf]  ;;  %v2967_v30 = vld [vmem:[%s4626_s0 + $0x3c8] sm:$0xf] }
 0x1e2   :  { %1833 = vst [vmem:[%s4629_s3 + $0x130] sm:$0xff] %v3348_v33  ;;  %v2283_v35 = vadd.f32 %v3348_v33, %v2282_v13  ;;  %v2353_v36 = vmul.f32 %v3348_v33, %v3348_v33  ;;  %1372 = vmatmul.bf16.gmra.mxu1 %v2932_v27  ;;  %v2961_v27 = vld [vmem:[%s4626_s0 + $0x3d0] sm:$0xf0] }
 0x1e3   :  { %3349 = vtanh.f32 %v1669_v34  ;;  %1541 = vmatmul.bf16.gmra.mxu2 %v2936_v31  ;;  %v3240_v31 = vld [vmem:[%s4626_s0 + $0x3d4] sm:$0xf0] }
 0x1e4   :  { %v2416_v39 = vadd.f32 %v2415_v20, %v2353_v36  ;;  %v3242_v20 = vld [vmem:[%s4626_s0 + $0x3ec] sm:$0xf]  ;;  %v2964_v36 = vor.u32 %v3237_v26, %v2961_v27 }
 0x1e5   :  { %v2988_v32 = vor.u32 %v3242_v20, %v2985_v21 }
 0x1e6   :  { %v1502_v40 = vpop.f32.mrf.mxu2  ;;  %v1166_v42 = vpop.f32.mrf.mxu0 }
 0x1e7   :  { %v1503_v41 = vadd.f32 %v1502_v40, %v1334_v37  ;;  %v1335_v7 = vpop.f32.mrf.mxu1  ;;  %v1167_v45 = vadd.f32 %v4157_v58, %v1166_v42  ;;  %v2968_v40 = vor.u32 %v3240_v31, %v2967_v30 }
 0x1e8   :  { %v1678_v54 = vpop.f32.mrf.mxu3 }
 0x1e9   :  { %v3350_v43 = vpop.eup %3349  ;;  %v1672_v44 = vadd.f32 %v1671_v1, %v1503_v41  ;;  %v1336_v60 = vadd.f32 %v1335_v7, %v1167_v45 }
 0x1ea   :  { %1834 = vst [vmem:[%s4629_s3 + $0x138] sm:$0xff] %v3350_v43  ;;  %v2284_v48 = vadd.f32 %v3350_v43, %v2283_v35  ;;  %v2354_v49 = vmul.f32 %v3350_v43, %v3350_v43  ;;  %v2960_v35 = vor.u32 %v3239_v25, %v2959_v24 }
 0x1eb   :  { %3351 = vtanh.f32 %v1672_v44 }
 0x1ec   :  { %v2417_v55 = vadd.f32 %v2416_v39, %v2354_v49 }
 0x1ed   :  { %3115 = vmatmul.msk.bf16.gmra.mxu3 %vm954_vm1, %v2972_v59  ;;  %v3243_v59 = vld [vmem:[%s4626_s0 + $0x3ec] sm:$0xf0] }
 0x1ee   :  { %v1504_v61 = vpop.f32.mrf.mxu2  ;;  %v1169_v1 = vpop.f32.mrf.mxu0 }
 0x1ef   :  { %v1505_v0 = vadd.f32 %v1504_v61, %v1336_v60  ;;  %v1338_v2 = vpop.f32.mrf.mxu1  ;;  %v1170_v4 = vadd.f32 %v4157_v58, %v1169_v1  ;;  %v3241_v60 = vld [vmem:[%s4626_s0 + $0x3e4] sm:$0xf]  ;;  %v2977_v61 = vld [vmem:[%s4626_s0 + $0x3f0] sm:$0xf0]  ;;  %v3244_v1 = vld [vmem:[%s4626_s0 + $0x3f4] sm:$0xf0] }
 0x1f0   :  { %v1681_v11 = vpop.f32.mrf.mxu3 }
 0x1f1   :  { %v3352_v5 = vpop.eup %3351  ;;  %v1674_v6 = vadd.f32 %v1673_v19, %v1505_v0  ;;  %1208 = vmatmul.bf16.gmra.mxu0 %v2944_v62  ;;  %v1339_v10 = vadd.f32 %v1338_v2, %v1170_v4  ;;  %v2983_v0 = vld [vmem:[%s4626_s0 + $0x3e8] sm:$0xf]  ;;  %v2976_v4 = vor.u32 %v3243_v59, %v2975_v57 }
 0x1f2   :  { %1835 = vst [vmem:[%s4629_s3 + $0x140] sm:$0xff] %v3352_v5  ;;  %v2285_v8 = vadd.f32 %v3352_v5, %v2284_v48  ;;  %v2355_v9 = vmul.f32 %v3352_v5, %v3352_v5  ;;  %1377 = vmatmul.bf16.gmra.mxu1 %v2948_v63  ;;  %v2980_v5 = vor.u32 %v3241_v60, %v2977_v61 }
 0x1f3   :  { %3353 = vtanh.f32 %v1674_v6  ;;  %1546 = vmatmul.bf16.gmra.mxu2 %v2952_v3 }
 0x1f4   :  { %v2418_v12 = vadd.f32 %v2417_v55, %v2355_v9 }
 0x1f6   :  { %v1507_v13 = vpop.f32.mrf.mxu2  ;;  %v1171_v15 = vpop.f32.mrf.mxu0 }
 0x1f7   :  { %v1508_v14 = vadd.f32 %v1507_v13, %v1339_v10  ;;  %v1340_v16 = vpop.f32.mrf.mxu1  ;;  %v1172_v19 = vadd.f32 %v4157_v58, %v1171_v15  ;;  %v2984_v10 = vor.u32 %v3244_v1, %v2983_v0 }
 0x1f8   :  { %v1683_v28 = vpop.f32.mrf.mxu3 }
 0x1f9   :  { %v3354_v17 = vpop.eup %3353  ;;  %v1677_v18 = vadd.f32 %v1676_v38, %v1508_v14  ;;  %v1341_v33 = vadd.f32 %v1340_v16, %v1172_v19 }
 0x1fa   :  { %1836 = vst [vmem:[%s4629_s3 + $0x148] sm:$0xff] %v3354_v17  ;;  %v2286_v22 = vadd.f32 %v3354_v17, %v2285_v8  ;;  %v2356_v23 = vmul.f32 %v3354_v17, %v3354_v17 }
 0x1fb   :  { %3355 = vtanh.f32 %v1677_v18 }
 0x1fc   :  { %v2419_v29 = vadd.f32 %v2418_v12, %v2356_v23 }
 0x1fd   :  { %3116 = vmatmul.msk.bf16.gmra.mxu3 %vm954_vm1, %v2988_v32 }
 0x1fe   :  { %v1509_v34 = vpop.f32.mrf.mxu2  ;;  %v1174_v38 = vpop.f32.mrf.mxu0 }
 0x1ff   :  { %v1510_v37 = vadd.f32 %v1509_v34, %v1341_v33  ;;  %v1343_v39 = vpop.f32.mrf.mxu1  ;;  %v1175_v41 = vadd.f32 %v4157_v58, %v1174_v38 }
 0x200   :  { %v1686_v46 = vpop.f32.mrf.mxu3 }
 0x201   :  { %v3356_v42 = vpop.eup %3355  ;;  %v1679_v7 = vadd.f32 %v1678_v54, %v1510_v37  ;;  %1213 = vmatmul.bf16.gmra.mxu0 %v2960_v35  ;;  %v1344_v45 = vadd.f32 %v1343_v39, %v1175_v41  ;;  %v4527_v35 = vld [vmem:[%s4628_s2] ss:$0 sm:$0xff] }
 0x202   :  { %1837 = vst [vmem:[%s4629_s3 + $0x150] sm:$0xff] %v3356_v42  ;;  %v2287_v43 = vadd.f32 %v3356_v42, %v2286_v22  ;;  %v2357_v44 = vmul.f32 %v3356_v42, %v3356_v42  ;;  %1382 = vmatmul.bf16.gmra.mxu1 %v2964_v36 }
 0x203   :  { %3357 = vtanh.f32 %v1679_v7  ;;  %1551 = vmatmul.bf16.gmra.mxu2 %v2968_v40 }
 0x204   :  { %v2420_v47 = vadd.f32 %v2419_v29, %v2357_v44 }
 0x206   :  { %v1512_v48 = vpop.f32.mrf.mxu2  ;;  %v1176_v50 = vpop.f32.mrf.mxu0 }
 0x207   :  { %v1513_v49 = vadd.f32 %v1512_v48, %v1344_v45  ;;  %v1345_v51 = vpop.f32.mrf.mxu1  ;;  %v1177_v54 = vadd.f32 %v4157_v58, %v1176_v50 }
 0x208   :  { %v1688_v62 = vpop.f32.mrf.mxu3 }
 0x209   :  { %v3358_v52 = vpop.eup %3357  ;;  %v1682_v53 = vadd.f32 %v1681_v11, %v1513_v49  ;;  %v1346_v2 = vadd.f32 %v1345_v51, %v1177_v54 }
 0x20a   :  { %1838 = vst [vmem:[%s4629_s3 + $0x158] sm:$0xff] %v3358_v52  ;;  %v2288_v55 = vadd.f32 %v3358_v52, %v2287_v43  ;;  %v2358_v56 = vmul.f32 %v3358_v52, %v3358_v52 }
 0x20b   :  { %3359 = vtanh.f32 %v1682_v53 }
 0x20c   :  { %v2421_v63 = vadd.f32 %v2420_v47, %v2358_v56 }
 0x20e   :  { %v1514_v3 = vpop.f32.mrf.mxu2  ;;  %v1179_v8 = vpop.f32.mrf.mxu0 }
 0x20f   :  { %v1515_v6 = vadd.f32 %v1514_v3, %v1346_v2  ;;  %v1348_v9 = vpop.f32.mrf.mxu1  ;;  %v1180_v11 = vadd.f32 %v4157_v58, %v1179_v8 }
 0x210   :  { %v1691_v17 = vpop.f32.mrf.mxu3 }
 0x211   :  { %v3360_v12 = vpop.eup %3359  ;;  %v1684_v13 = vadd.f32 %v1683_v28, %v1515_v6  ;;  %1218 = vmatmul.bf16.gmra.mxu0 %v2976_v4  ;;  %v1349_v16 = vadd.f32 %v1348_v9, %v1180_v11 }
 0x212   :  { %1839 = vst [vmem:[%s4629_s3 + $0x160] sm:$0xff] %v3360_v12  ;;  %v2289_v14 = vadd.f32 %v3360_v12, %v2288_v55  ;;  %v2359_v15 = vmul.f32 %v3360_v12, %v3360_v12  ;;  %1387 = vmatmul.bf16.gmra.mxu1 %v2980_v5 }
 0x213   :  { %3361 = vtanh.f32 %v1684_v13  ;;  %1556 = vmatmul.bf16.gmra.mxu2 %v2984_v10 }
 0x214   :  { %v2422_v18 = vadd.f32 %v2421_v63, %v2359_v15 }
 0x216   :  { %v1517_v19 = vpop.f32.mrf.mxu2  ;;  %v1181_v21 = vpop.f32.mrf.mxu0 }
 0x217   :  { %v1518_v20 = vadd.f32 %v1517_v19, %v1349_v16  ;;  %v1350_v22 = vpop.f32.mrf.mxu1  ;;  %v1182_v25 = vadd.f32 %v4157_v58, %v1181_v21 }
 0x218   :  { %v1693_v28 = vpop.f32.mrf.mxu3 }
 0x219   :  { %v3362_v23 = vpop.eup %3361  ;;  %v1687_v24 = vadd.f32 %v1686_v46, %v1518_v20  ;;  %v1351_v30 = vadd.f32 %v1350_v22, %v1182_v25 }
 0x21a   :  { %1840 = vst [vmem:[%s4629_s3 + $0x168] sm:$0xff] %v3362_v23  ;;  %v2290_v26 = vadd.f32 %v3362_v23, %v2289_v14  ;;  %v2360_v27 = vmul.f32 %v3362_v23, %v3362_v23 }
 0x21b   :  { %3363 = vtanh.f32 %v1687_v24 }
 0x21c   :  { %v2423_v29 = vadd.f32 %v2422_v18, %v2360_v27 }
 0x21e   :  { %v1519_v31 = vpop.f32.mrf.mxu2  ;;  %v1184_v33 = vpop.f32.mrf.mxu0 }
 0x21f   :  { %v1520_v32 = vadd.f32 %v1519_v31, %v1351_v30  ;;  %v1353_v34 = vpop.f32.mrf.mxu1  ;;  %v1185_v58 = vadd.f32 %v4527_v35, %v1184_v33 }
 0x220   :  { %v1696_v41 = vpop.f32.mrf.mxu3 }
 0x221   :  { %v3364_v36 = vpop.eup %3363  ;;  %v1689_v37 = vadd.f32 %v1688_v62, %v1520_v32  ;;  %v1354_v40 = vadd.f32 %v1353_v34, %v1185_v58 }
 0x222   :  { %1841 = vst [vmem:[%s4629_s3 + $0x170] sm:$0xff] %v3364_v36  ;;  %v2291_v38 = vadd.f32 %v3364_v36, %v2290_v26  ;;  %v2361_v39 = vmul.f32 %v3364_v36, %v3364_v36 }
 0x223   :  { %3365 = vtanh.f32 %v1689_v37 }
 0x224   :  { %v2424_v42 = vadd.f32 %v2423_v29, %v2361_v39 }
 0x226   :  { %v1522_v7 = vpop.f32.mrf.mxu2  ;;  %v1186_v44 = vpop.f32.mrf.mxu0 }
 0x227   :  { %v1523_v43 = vadd.f32 %v1522_v7, %v1354_v40  ;;  %v1355_v45 = vpop.f32.mrf.mxu1  ;;  %v1187_v48 = vadd.f32 %v4527_v35, %v1186_v44 }
 0x228   :  { %v1698_v51 = vpop.f32.mrf.mxu3 }
 0x229   :  { %v3366_v46 = vpop.eup %3365  ;;  %v1692_v47 = vadd.f32 %v1691_v17, %v1523_v43  ;;  %v1356_v53 = vadd.f32 %v1355_v45, %v1187_v48 }
 0x22a   :  { %1842 = vst [vmem:[%s4629_s3 + $0x178] sm:$0xff] %v3366_v46  ;;  %v2292_v49 = vadd.f32 %v3366_v46, %v2291_v38  ;;  %v2362_v50 = vmul.f32 %v3366_v46, %v3366_v46 }
 0x22b   :  { %3367 = vtanh.f32 %v1692_v47 }
 0x22c   :  { %v2425_v52 = vadd.f32 %v2424_v42, %v2362_v50 }
 0x22e   :  { %v1524_v54 = vpop.f32.mrf.mxu2  ;;  %v1189_v56 = vpop.f32.mrf.mxu0 }
 0x22f   :  { %v1525_v55 = vadd.f32 %v1524_v54, %v1356_v53  ;;  %v1358_v57 = vpop.f32.mrf.mxu1  ;;  %v1190_v59 = vadd.f32 %v4527_v35, %v1189_v56 }
 0x230   :  { %v1701_v1 = vpop.f32.mrf.mxu3 }
 0x231   :  { %v3368_v60 = vpop.eup %3367  ;;  %v1694_v61 = vadd.f32 %v1693_v28, %v1525_v55  ;;  %v1359_v0 = vadd.f32 %v1358_v57, %v1190_v59 }
 0x232   :  { %1843 = vst [vmem:[%s4629_s3 + $0x180] sm:$0xff] %v3368_v60  ;;  %v2293_v62 = vadd.f32 %v3368_v60, %v2292_v49  ;;  %v2363_v63 = vmul.f32 %v3368_v60, %v3368_v60 }
 0x233   :  { %3369 = vtanh.f32 %v1694_v61 }
 0x234   :  { %v2426_v2 = vadd.f32 %v2425_v52, %v2363_v63 }
 0x236   :  { %v1527_v3 = vpop.f32.mrf.mxu2  ;;  %v1191_v5 = vpop.f32.mrf.mxu0 }
 0x237   :  { %v1528_v4 = vadd.f32 %v1527_v3, %v1359_v0  ;;  %v1360_v6 = vpop.f32.mrf.mxu1  ;;  %v1192_v10 = vadd.f32 %v4527_v35, %v1191_v5 }
 0x238   :  { %v1703_v14 = vpop.f32.mrf.mxu3 }
 0x239   :  { %v3370_v8 = vpop.eup %3369  ;;  %v1697_v9 = vadd.f32 %v1696_v41, %v1528_v4  ;;  %v1361_v15 = vadd.f32 %v1360_v6, %v1192_v10 }
 0x23a   :  { %1844 = vst [vmem:[%s4629_s3 + $0x188] sm:$0xff] %v3370_v8  ;;  %v2294_v11 = vadd.f32 %v3370_v8, %v2293_v62  ;;  %v2364_v12 = vmul.f32 %v3370_v8, %v3370_v8 }
 0x23b   :  { %3371 = vtanh.f32 %v1697_v9 }
 0x23c   :  { %v2427_v13 = vadd.f32 %v2426_v2, %v2364_v12 }
 0x23e   :  { %v1529_v16 = vpop.f32.mrf.mxu2  ;;  %v1194_v18 = vpop.f32.mrf.mxu0 }
 0x23f   :  { %v1530_v17 = vadd.f32 %v1529_v16, %v1361_v15  ;;  %v1363_v19 = vpop.f32.mrf.mxu1  ;;  %v1195_v20 = vadd.f32 %v4527_v35, %v1194_v18 }
 0x240   :  { %v1706_v28 = vpop.f32.mrf.mxu3 }
 0x241   :  { %v3372_v21 = vpop.eup %3371  ;;  %v1699_v22 = vadd.f32 %v1698_v51, %v1530_v17  ;;  %v1364_v25 = vadd.f32 %v1363_v19, %v1195_v20 }
 0x242   :  { %1845 = vst [vmem:[%s4629_s3 + $0x190] sm:$0xff] %v3372_v21  ;;  %v2295_v23 = vadd.f32 %v3372_v21, %v2294_v11  ;;  %v2365_v24 = vmul.f32 %v3372_v21, %v3372_v21 }
 0x243   :  { %3373 = vtanh.f32 %v1699_v22 }
 0x244   :  { %v2428_v26 = vadd.f32 %v2427_v13, %v2365_v24 }
 0x246   :  { %v1532_v27 = vpop.f32.mrf.mxu2  ;;  %v1196_v30 = vpop.f32.mrf.mxu0 }
 0x247   :  { %v1533_v29 = vadd.f32 %v1532_v27, %v1364_v25  ;;  %v1365_v31 = vpop.f32.mrf.mxu1  ;;  %v1197_v34 = vadd.f32 %v4527_v35, %v1196_v30 }
 0x248   :  { %v1708_v43 = vpop.f32.mrf.mxu3 }
 0x249   :  { %v3374_v32 = vpop.eup %3373  ;;  %v1702_v33 = vadd.f32 %v1701_v1, %v1533_v29  ;;  %v1366_v38 = vadd.f32 %v1365_v31, %v1197_v34 }
 0x24a   :  { %1846 = vst [vmem:[%s4629_s3 + $0x198] sm:$0xff] %v3374_v32  ;;  %v2296_v58 = vadd.f32 %v3374_v32, %v2295_v23  ;;  %v2366_v36 = vmul.f32 %v3374_v32, %v3374_v32 }
 0x24b   :  { %3375 = vtanh.f32 %v1702_v33 }
 0x24c   :  { %v2429_v37 = vadd.f32 %v2428_v26, %v2366_v36 }
 0x24e   :  { %v1534_v39 = vpop.f32.mrf.mxu2  ;;  %v1199_v41 = vpop.f32.mrf.mxu0 }
 0x24f   :  { %v1535_v40 = vadd.f32 %v1534_v39, %v1366_v38  ;;  %v1368_v42 = vpop.f32.mrf.mxu1  ;;  %v1200_v7 = vadd.f32 %v4527_v35, %v1199_v41 }
 0x250   :  { %v1711_v60 = vpop.f32.mrf.mxu3 }
 0x251   :  { %v3376_v44 = vpop.eup %3375  ;;  %v1704_v45 = vadd.f32 %v1703_v14, %v1535_v40  ;;  %v1369_v48 = vadd.f32 %v1368_v42, %v1200_v7 }
 0x252   :  { %1847 = vst [vmem:[%s4629_s3 + $0x1a0] sm:$0xff] %v3376_v44  ;;  %v2297_v46 = vadd.f32 %v3376_v44, %v2296_v58  ;;  %v2367_v47 = vmul.f32 %v3376_v44, %v3376_v44 }
 0x253   :  { %3377 = vtanh.f32 %v1704_v45 }
 0x254   :  { %v2430_v49 = vadd.f32 %v2429_v37, %v2367_v47 }
 0x256   :  { %v1537_v50 = vpop.f32.mrf.mxu2  ;;  %v1201_v52 = vpop.f32.mrf.mxu0 }
 0x257   :  { %v1538_v51 = vadd.f32 %v1537_v50, %v1369_v48  ;;  %v1370_v53 = vpop.f32.mrf.mxu1  ;;  %v1202_v56 = vadd.f32 %v4527_v35, %v1201_v52 }
 0x258   :  { %v1713_v8 = vpop.f32.mrf.mxu3 }
 0x259   :  { %v3378_v54 = vpop.eup %3377  ;;  %v1707_v55 = vadd.f32 %v1706_v28, %v1538_v51  ;;  %v1371_v62 = vadd.f32 %v1370_v53, %v1202_v56 }
 0x25a   :  { %1848 = vst [vmem:[%s4629_s3 + $0x1a8] sm:$0xff] %v3378_v54  ;;  %v4561_v57 = vadd.f32 %v3378_v54, %v2297_v46  ;;  %v2368_v59 = vmul.f32 %v3378_v54, %v3378_v54 }
 0x25b   :  { %3379 = vtanh.f32 %v1707_v55 }
 0x25c   :  { %v4563_v61 = vadd.f32 %v2430_v49, %v2368_v59 }
 0x25e   :  { %v1539_v63 = vpop.f32.mrf.mxu2  ;;  %v1204_v1 = vpop.f32.mrf.mxu0 }
 0x25f   :  { %v1540_v0 = vadd.f32 %v1539_v63, %v1371_v62  ;;  %v1373_v2 = vpop.f32.mrf.mxu1  ;;  %v1205_v3 = vadd.f32 %v4527_v35, %v1204_v1 }
 0x260   :  { %v1716_v18 = vpop.f32.mrf.mxu3 }
 0x261   :  { %v4566_v4 = vpop.eup %3379  ;;  %v1709_v5 = vadd.f32 %v1708_v43, %v1540_v0  ;;  %v1374_v6 = vadd.f32 %v1373_v2, %v1205_v3 }
 0x262   :  { %1849 = vst [vmem:[%s4629_s3 + $0x1b0] sm:$0xff] %v4566_v4  ;;  %v2369_v63 = vmul.f32 %v4566_v4, %v4566_v4 }
 0x263   :  { %3381 = vtanh.f32 %v1709_v5  ;;  %v2299_v5 = vadd.f32 %v4566_v4, %v4561_v57 }
 0x266   :  { %v1542_v9 = vpop.f32.mrf.mxu2  ;;  %v1206_v11 = vpop.f32.mrf.mxu0 }
 0x267   :  { %v1543_v10 = vadd.f32 %v1542_v9, %v1374_v6  ;;  %v1375_v12 = vpop.f32.mrf.mxu1  ;;  %v1207_v15 = vadd.f32 %v4527_v35, %v1206_v11  ;;  %v2432_v11 = vadd.f32 %v4563_v61, %v2369_v63 }
 0x268   :  { %v1718_v30 = vpop.f32.mrf.mxu3 }
 0x269   :  { %v4572_v13 = vpop.eup %3381  ;;  %v1712_v14 = vadd.f32 %v1711_v60, %v1543_v10  ;;  %v1376_v16 = vadd.f32 %v1375_v12, %v1207_v15 }
 0x26a   :  { %1850 = vst [vmem:[%s4629_s3 + $0x1b8] sm:$0xff] %v4572_v13  ;;  %v2370_v6 = vmul.f32 %v4572_v13, %v4572_v13  ;;  %v2300_v12 = vadd.f32 %v4572_v13, %v2299_v5 }
 0x26b   :  { %3383 = vtanh.f32 %v1712_v14 }
 0x26c   :  { %v2433_v57 = vadd.f32 %v2432_v11, %v2370_v6 }
 0x26e   :  { %v1544_v17 = vpop.f32.mrf.mxu2  ;;  %v1209_v20 = vpop.f32.mrf.mxu0 }
 0x26f   :  { %v1545_v19 = vadd.f32 %v1544_v17, %v1376_v16  ;;  %v1378_v21 = vpop.f32.mrf.mxu1  ;;  %v1210_v22 = vadd.f32 %v4527_v35, %v1209_v20 }
 0x270   :  { %v1721_v42 = vpop.f32.mrf.mxu3 }
 0x271   :  { %v4580_v23 = vpop.eup %3383  ;;  %v1714_v24 = vadd.f32 %v1713_v8, %v1545_v19  ;;  %v1379_v25 = vadd.f32 %v1378_v21, %v1210_v22 }
 0x272   :  { %1851 = vst [vmem:[%s4629_s3 + $0x1c0] sm:$0xff] %v4580_v23  ;;  %v2371_v14 = vmul.f32 %v4580_v23, %v4580_v23  ;;  %v2301_v4 = vadd.f32 %v4580_v23, %v2300_v12 }
 0x273   :  { %3385 = vtanh.f32 %v1714_v24 }
 0x276   :  { %v1547_v26 = vpop.f32.mrf.mxu2  ;;  %v1211_v28 = vpop.f32.mrf.mxu0 }
 0x277   :  { %v1548_v27 = vadd.f32 %v1547_v26, %v1379_v25  ;;  %v1380_v29 = vpop.f32.mrf.mxu1  ;;  %v1212_v33 = vadd.f32 %v4527_v35, %v1211_v28 }
 0x278   :  { %v1723_v50 = vpop.f32.mrf.mxu3 }
 0x279   :  { %v3386_v31 = vpop.eup %3385  ;;  %v1717_v32 = vadd.f32 %v1716_v18, %v1548_v27  ;;  %v1381_v34 = vadd.f32 %v1380_v29, %v1212_v33  ;;  %v2434_v18 = vadd.f32 %v2433_v57, %v2371_v14 }
 0x27a   :  { %1852 = vst [vmem:[%s4629_s3 + $0x1c8] sm:$0xff] %v3386_v31  ;;  %v2372_v15 = vmul.f32 %v3386_v31, %v3386_v31 }
 0x27b   :  { %3387 = vtanh.f32 %v1717_v32 }
 0x27c   :  { %v2435_v13 = vadd.f32 %v2434_v18, %v2372_v15 }
 0x27e   :  { %v1549_v58 = vpop.f32.mrf.mxu2  ;;  %v1214_v37 = vpop.f32.mrf.mxu0 }
 0x27f   :  { %v1550_v36 = vadd.f32 %v1549_v58, %v1381_v34  ;;  %v1383_v38 = vpop.f32.mrf.mxu1  ;;  %v1215_v39 = vadd.f32 %v4527_v35, %v1214_v37 }
 0x280   :  { %v1726_v0 = vpop.f32.mrf.mxu3 }
 0x281   :  { %v3388_v40 = vpop.eup %3387  ;;  %v1719_v41 = vadd.f32 %v1718_v30, %v1550_v36  ;;  %v1384_v7 = vadd.f32 %v1383_v38, %v1215_v39 }
 0x282   :  { %1853 = vst [vmem:[%s4629_s3 + $0x1d0] sm:$0xff] %v3388_v40  ;;  %v2373_v19 = vmul.f32 %v3388_v40, %v3388_v40 }
 0x283   :  { %3389 = vtanh.f32 %v1719_v41 }
 0x284   :  { %v2436_v27 = vadd.f32 %v2435_v13, %v2373_v19 }
 0x286   :  { %v1552_v43 = vpop.f32.mrf.mxu2  ;;  %v1216_v45 = vpop.f32.mrf.mxu0 }
 0x287   :  { %v1553_v44 = vadd.f32 %v1552_v43, %v1384_v7  ;;  %v1385_v46 = vpop.f32.mrf.mxu1  ;;  %v1217_v49 = vadd.f32 %v4527_v35, %v1216_v45 }
 0x288   :  { %v1728_v24 = vpop.f32.mrf.mxu3 }
 0x289   :  { %v3390_v47 = vpop.eup %3389  ;;  %v1722_v48 = vadd.f32 %v1721_v42, %v1553_v44  ;;  %v1386_v51 = vadd.f32 %v1385_v46, %v1217_v49  ;;  %v1860_v44 = vlaneseq }
 0x28a   :  { %1854 = vst [vmem:[%s4629_s3 + $0x1d8] sm:$0xff] %v3390_v47  ;;  %v2374_v22 = vmul.f32 %v3390_v47, %v3390_v47 }
 0x28b   :  { %3391 = vtanh.f32 %v1722_v48  ;;  %v1861_v49 = vshrl.u32 %v1860_v44, 7 }
 0x28c   :  { %v2437_v23 = vadd.f32 %v2436_v27, %v2374_v22 }
 0x28d   :  { %vm2449_vm2 = vcmp.eq.s32.totalorder %v1861_v49, 1  ;;  %vm2448_vm3 = vcmp.eq.s32.totalorder %v1861_v49, 0 }
 0x28e   :  { %v1554_v52 = vpop.f32.mrf.mxu2  ;;  %v1219_v54 = vpop.f32.mrf.mxu0 }
 0x28f   :  { %v1555_v53 = vadd.f32 %v1554_v52, %v1386_v51  ;;  %v1220_v55 = vadd.f32 %v4527_v35, %v1219_v54  ;;  %v1388_v60 = vpop.f32.mrf.mxu1 }
 0x291   :  { %v3392_v56 = vpop.eup %3391  ;;  %v1724_v59 = vadd.f32 %v1723_v50, %v1555_v53  ;;  %v1389_v62 = vadd.f32 %v1388_v60, %v1220_v55 }
 0x292   :  { %1855 = vst [vmem:[%s4629_s3 + $0x1e0] sm:$0xff] %v3392_v56  ;;  %v2375_v29 = vmul.f32 %v3392_v56, %v3392_v56 }
 0x293   :  { %3393 = vtanh.f32 %v1724_v59 }
 0x294   :  { %v2438_v34 = vadd.f32 %v2437_v23, %v2375_v29 }
 0x296   :  { %v1557_v1 = vpop.f32.mrf.mxu2  ;;  %v1221_v3 = vpop.f32.mrf.mxu0 }
 0x297   :  { %v1558_v2 = vadd.f32 %v1557_v1, %v1389_v62  ;;  %v1222_v10 = vadd.f32 %v4527_v35, %v1221_v3  ;;  %v1390_v16 = vpop.f32.mrf.mxu1  ;;  %v2302_v35 = vadd.f32 %v3386_v31, %v2301_v4 }
 0x299   :  { %v3394_v8 = vpop.eup %3393  ;;  %v1727_v9 = vadd.f32 %v1726_v0, %v1558_v2  ;;  %v1391_v17 = vadd.f32 %v1390_v16, %v1222_v10  ;;  %v2303_v21 = vadd.f32 %v3388_v40, %v2302_v35 }
 0x29a   :  { %1856 = vst [vmem:[%s4629_s3 + $0x1e8] sm:$0xff] %v3394_v8  ;;  %v2376_v31 = vmul.f32 %v3394_v8, %v3394_v8 }
 0x29b   :  { %3395 = vtanh.f32 %v1727_v9  ;;  %v2304_v28 = vadd.f32 %v3390_v47, %v2303_v21 }
 0x29c   :  { %v2439_v36 = vadd.f32 %v2438_v34, %v2376_v31 }
 0x29d   :  { %v2305_v30 = vadd.f32 %v3392_v56, %v2304_v28 }
 0x29e   :  { %v1559_v61 = vpop.f32.mrf.mxu2 }
 0x29f   :  { %v1560_v20 = vadd.f32 %v1559_v61, %v1391_v17  ;;  %v2306_v32 = vadd.f32 %v3394_v8, %v2305_v30 }
 0x2a1   :  { %v3396_v25 = vpop.eup %3395  ;;  %v1729_v26 = vadd.f32 %v1728_v24, %v1560_v20 }
 0x2a2   :  { %1857 = vst [vmem:[%s4629_s3 + $0x1f0] sm:$0xff] %v3396_v25  ;;  %v2377_v33 = vmul.f32 %v3396_v25, %v3396_v25  ;;  %v2307_v58 = vadd.f32 %v3396_v25, %v2306_v32 }
 0x2a3   :  { %3397 = vtanh.f32 %v1729_v26 }
 0x2a4   :  { %v2440_v40 = vadd.f32 %v2439_v36, %v2377_v33 }
 0x2a9   :  { %v3398_v37 = vpop.eup %3397 }
 0x2aa   :  { %1858 = vst [vmem:[%s4629_s3 + $0x1f8] sm:$0xff] %v3398_v37  ;;  %v2308_v38 = vadd.f32 %v3398_v37, %v2307_v58  ;;  %v2378_v39 = vmul.f32 %v3398_v37, %v3398_v37 }
 0x2ac   :  { %v2309_v41 = vrot.slane %v2308_v38, 4  ;;  %v2441_v42 = vadd.f32 %v2440_v40, %v2378_v39 }
 0x2ae   :  { %v2310_v7 = vadd.f32 %v2309_v41, %v2308_v38  ;;  %v2442_v43 = vrot.slane %v2441_v42, 4 }
 0x2b0   :  { %v2311_v45 = vrot.slane %v2310_v7, 2  ;;  %v2443_v46 = vadd.f32 %v2442_v43, %v2441_v42 }
 0x2b2   :  { %v2312_v47 = vadd.f32 %v2311_v45, %v2310_v7  ;;  %v2444_v48 = vrot.slane %v2443_v46, 2 }
 0x2b4   :  { %v2445_v50 = vadd.f32 %v2444_v48, %v2443_v46  ;;  %v2313_v51 = vrot.slane %v2312_v47, 1 }
 0x2b6   :  { %v2446_v52 = vrot.slane %v2445_v50, 1  ;;  %v2314_v54 = vadd.f32 %v2313_v51, %v2312_v47 }
 0x2b8   :  { %v2447_v53 = vadd.f32 %v2446_v52, %v2445_v50 }
 0x2ba   :  { %v2452_v55 = vsel %vm2449_vm2, %v2447_v53, 0.0 }
 0x2bb   :  { %v2455_v56 = vsel %vm2448_vm3, %v2314_v54, %v2452_v55 }
 0x2bc   :  { %2456 = vst [vmem:[#allocation2] sm:$0xff] %v2455_v56 }
 0x2bd   :  { %2469 = dma.vmem_to_hbm [thread:$0]  %s2465_s8, 128, %s2467_s10, [#allocation3]  }
 0x2be   :  { %3425 = dma.done.wait [#allocation3], 128  }
 0x2bf   :  { %3426 = vsyncadd [#allocation3], 4294967168 }
 0x2c0   :  { %2476 = vsyncpa [#allocation3], 1 }

</bundles_post_ra>
